<compile_context>
chip_gen: v7x
topology: tpu7x:2x2x1
jax: 0.10.0
libtpu: 0.0.40
codegen_flags: <defaults>
</compile_context>

<pallas_src>
import functools

import jax
import jax.numpy as jnp
from jax import lax
from jax.experimental import pallas as pl
from jax.experimental.pallas import tpu as pltpu


# ----------------------------------------------------------------------------
# Fused encoder kernel: embedding + 2-layer bidirectional GRU, one invocation.
# ----------------------------------------------------------------------------
def encoder_kernel(tok_ref, emb_ref,
                   w_ih0_ref, w_hh0_ref, b_ih0_ref, b_hh0_ref,
                   w_ih1_ref, w_hh1_ref, b_ih1_ref, b_hh1_ref,
                   h0_ref,
                   out_ref, hN_ref,
                   gi_f_scr, gi_b_scr, l0f_scr, l0b_scr,
                   *, seq_len, batch, hidden):
    T, B, H = seq_len, batch, hidden
    TB = T * B
    VPAD = emb_ref.shape[0]

    # ---- embedding lookup as one-hot matmul (vocab padded to 128 lanes) ----
    tok = tok_ref[...]                                            # (T*B, 1) i32
    vocab_iota = lax.broadcasted_iota(jnp.int32, (TB, VPAD), 1)
    onehot = jnp.where(tok == vocab_iota, 1.0, 0.0)               # (T*B, VPAD)
    emb = jnp.dot(onehot, emb_ref[...],
                  preferred_element_type=jnp.float32)             # (T*B, E)

    # ---- layer 0: hoisted, gate-fused input projections (b_ih folded in) ----
    gi_f_scr[...] = jnp.dot(emb, w_ih0_ref[0],
                            preferred_element_type=jnp.float32) + b_ih0_ref[0]
    gi_b_scr[...] = jnp.dot(emb, w_ih0_ref[1],
                            preferred_element_type=jnp.float32) + b_ih0_ref[1]

    def run_direction(gi_scr, w_hh, b_hh, h0, write_out, reverse):
        """Serial GRU recurrence; only h @ W_hh remains inside the loop."""
        h = h0                                   # (B, H) f32
        for t in range(T):                       # static full unroll (T small)
            time = (T - 1 - t) if reverse else t
            r0 = time * B                        # static, multiple of 8
            gi = gi_scr[r0:r0 + B, :]            # (B, 3H) precomputed
            gh = jnp.dot(h, w_hh, preferred_element_type=jnp.float32) + b_hh
            r = jax.nn.sigmoid(gi[:, 0:H] + gh[:, 0:H])
            z = jax.nn.sigmoid(gi[:, H:2 * H] + gh[:, H:2 * H])
            n = jnp.tanh(gi[:, 2 * H:3 * H] + r * gh[:, 2 * H:3 * H])
            h = (1.0 - z) * n + z * h
            write_out(r0, h)
        return h

    def write_l0f(r0, h):
        l0f_scr[r0:r0 + B, :] = h

    def write_l0b(r0, h):
        l0b_scr[r0:r0 + B, :] = h

    def write_out_f(r0, h):
        out_ref[r0:r0 + B, 0:H] = h

    def write_out_b(r0, h):
        out_ref[r0:r0 + B, H:2 * H] = h

    # layer 0: forward / backward (final hidden written once per direction)
    hN_ref[0] = run_direction(gi_f_scr, w_hh0_ref[0], b_hh0_ref[0], h0_ref[0],
                              write_l0f, reverse=False)
    hN_ref[1] = run_direction(gi_b_scr, w_hh0_ref[1], b_hh0_ref[1], h0_ref[1],
                              write_l0b, reverse=True)

    # ---- layer 1: input = lane-concat of layer-0 fwd/bwd outputs (in VMEM) ---
    x1 = jnp.concatenate([l0f_scr[...], l0b_scr[...]], axis=-1)   # (T*B, 2H)
    gi_f_scr[...] = jnp.dot(x1, w_ih1_ref[0],
                            preferred_element_type=jnp.float32) + b_ih1_ref[0]
    gi_b_scr[...] = jnp.dot(x1, w_ih1_ref[1],
                            preferred_element_type=jnp.float32) + b_ih1_ref[1]

    # layer 1: forward / backward -> write straight into the (T*B, 2H) output
    hN_ref[2] = run_direction(gi_f_scr, w_hh1_ref[0], b_hh1_ref[0], h0_ref[2],
                              write_out_f, reverse=False)
    hN_ref[3] = run_direction(gi_b_scr, w_hh1_ref[1], b_hh1_ref[1], h0_ref[3],
                              write_out_b, reverse=True)


# ----------------------------------------------------------------------------
# Wrapper: mirrors Encoder.forward (gru, bidirectional, 2 layers, dropout=0).
# ----------------------------------------------------------------------------
def encoder_forward(params, tokens, hidden0):
    """tokens: (T, B) int32; hidden0: (layers*directions, B, H).

    Returns (output (T, B, 2H), hidden (layers*directions, B, H), cell=None).
    """
    T, B = tokens.shape
    emb_tab = params["embedding"]                 # (V, E)
    V, E = emb_tab.shape
    VPAD = ((V + 127) // 128) * 128
    emb_pad = jnp.zeros((VPAD, E), emb_tab.dtype).at[:V, :].set(emb_tab)
    p0, p1 = params["gru"]
    H = p0["w_hh"].shape[-1] // 3

    tok2d = tokens.reshape(T * B, 1).astype(jnp.int32)

    kernel = functools.partial(encoder_kernel, seq_len=T, batch=B, hidden=H)
    out2d, h_n = pl.pallas_call(
        kernel,
        out_shape=(jax.ShapeDtypeStruct((T * B, 2 * H), jnp.float32),
                   jax.ShapeDtypeStruct((4, B, H), jnp.float32)),
        scratch_shapes=[
            pltpu.VMEM((T * B, 3 * H), jnp.float32),  # gi fwd (reused L0 & L1)
            pltpu.VMEM((T * B, 3 * H), jnp.float32),  # gi bwd (reused L0 & L1)
            pltpu.VMEM((T * B, H), jnp.float32),      # layer-0 fwd outputs
            pltpu.VMEM((T * B, H), jnp.float32),      # layer-0 bwd outputs
        ],
    )(tok2d, emb_pad,
      p0["w_ih"], p0["w_hh"], p0["b_ih"], p0["b_hh"],
      p1["w_ih"], p1["w_hh"], p1["b_ih"], p1["b_hh"],
      hidden0)

    output = out2d.reshape(T, B, 2 * H)
    return output, h_n, None


# ----------------------------------------------------------------------------
# Parameter init (gate-fused layout: weights (dirs, Din, 3H), biases (dirs,1,3H))
# ----------------------------------------------------------------------------
def init_encoder_params(key, *, vocab, embed, hidden, layers=2, directions=2):
    params = {}
    k_emb, key = jax.random.split(key)
    params["embedding"] = 0.1 * jax.random.normal(k_emb, (vocab, embed),
                                                  jnp.float32)
    gru = []
    for layer in range(layers):
        din = embed if layer == 0 else hidden * directions
        key, k1, k2, k3, k4 = jax.random.split(key, 5)
        scale = 1.0 / jnp.sqrt(hidden)
        gru.append(dict(
            w_ih=scale * jax.random.normal(k1, (directions, din, 3 * hidden),
                                           jnp.float32),
            w_hh=scale * jax.random.normal(k2, (directions, hidden, 3 * hidden),
                                           jnp.float32),
            b_ih=scale * jax.random.normal(k3, (directions, 1, 3 * hidden),
                                           jnp.float32),
            b_hh=scale * jax.random.normal(k4, (directions, 1, 3 * hidden),
                                           jnp.float32),
        ))
    params["gru"] = gru
    return params


# ----------------------------------------------------------------------------
# Pure-JAX reference (lax.scan GRU) for correctness checking.
# ----------------------------------------------------------------------------
def gru_pass_ref(x, w_ih, w_hh, b_ih, b_hh, h0, *, reverse):
    H = h0.shape[-1]

    def cell(h, xt):
        gi = xt @ w_ih + b_ih
        gh = h @ w_hh + b_hh
        r = jax.nn.sigmoid(gi[:, 0:H] + gh[:, 0:H])
        z = jax.nn.sigmoid(gi[:, H:2 * H] + gh[:, H:2 * H])
        n = jnp.tanh(gi[:, 2 * H:3 * H] + r * gh[:, 2 * H:3 * H])
        hn = (1.0 - z) * n + z * h
        return hn, hn

    xs = x[::-1] if reverse else x
    h_n, ys = lax.scan(cell, h0, xs)
    ys = ys[::-1] if reverse else ys
    return ys, h_n


def encoder_forward_ref(params, tokens, hidden0):
    embedded = jnp.take(params["embedding"], tokens, axis=0)   # (T, B, E)
    layer_in = embedded
    finals = []
    for layer, p in enumerate(params["gru"]):
        dir_outs = []
        for d in range(2):
            h0 = hidden0[layer * 2 + d]
            out, h_n = gru_pass_ref(layer_in, p["w_ih"][d], p["w_hh"][d],
                                    p["b_ih"][d], p["b_hh"][d], h0,
                                    reverse=(d == 1))
            dir_outs.append(out)
            finals.append(h_n)
        layer_in = jnp.concatenate(dir_outs, axis=-1)
    return layer_in, jnp.stack(finals, axis=0), None


if __name__ == "__main__":
    # Small, module-consistent hyperparameters.
    VOCAB = 72          # input_dimension
    EMBED = 64          # embed_dimension
    HIDDEN = 128        # hidden_dimension (small, lane-aligned)
    LAYERS = 2
    DIRECTIONS = 2      # bidirectional=True
    T, B = 8, 8         # seq_len, batch

    key = jax.random.PRNGKey(0)
    k_params, k_tok = jax.random.split(key)
    params = init_encoder_params(k_params, vocab=VOCAB, embed=EMBED,
                                 hidden=HIDDEN, layers=LAYERS,
                                 directions=DIRECTIONS)

    tokens = jax.random.randint(k_tok, (T, B), 0, VOCAB, dtype=jnp.int32)
    hidden0 = jnp.zeros((LAYERS * DIRECTIONS, B, HIDDEN), jnp.float32)  # init_hidden

    fwd = jax.jit(encoder_forward)
    output, hidden, cell = fwd(params, tokens, hidden0)
    jax.block_until_ready((output, hidden))

    # Numerical check against pure-JAX reference.
    out_ref, hid_ref, _ = encoder_forward_ref(params, tokens, hidden0)
    assert output.shape == (T, B, DIRECTIONS * HIDDEN)
    assert hidden.shape == (LAYERS * DIRECTIONS, B, HIDDEN)
    assert cell is None
    assert jnp.allclose(output, out_ref, atol=1e-4, rtol=1e-4), \
        float(jnp.max(jnp.abs(output - out_ref)))
    assert jnp.allclose(hidden, hid_ref, atol=1e-4, rtol=1e-4), \
        float(jnp.max(jnp.abs(hidden - hid_ref)))

    print("KERNEL_OK")
</pallas_src>

<mosaic_0001>
module attributes {stable_mosaic.version = 11 : i64} {
  func.func @encoder_kernel(%arg0: memref<64x1xi32, #tpu.memory_space<vmem>>, %arg1: memref<128x64xf32, #tpu.memory_space<vmem>>, %arg2: memref<2x64x384xf32, #tpu.memory_space<vmem>>, %arg3: memref<2x128x384xf32, #tpu.memory_space<vmem>>, %arg4: memref<2x1x384xf32, #tpu.memory_space<vmem>>, %arg5: memref<2x1x384xf32, #tpu.memory_space<vmem>>, %arg6: memref<2x256x384xf32, #tpu.memory_space<vmem>>, %arg7: memref<2x128x384xf32, #tpu.memory_space<vmem>>, %arg8: memref<2x1x384xf32, #tpu.memory_space<vmem>>, %arg9: memref<2x1x384xf32, #tpu.memory_space<vmem>>, %arg10: memref<4x8x128xf32, #tpu.memory_space<vmem>>, %arg11: memref<64x256xf32, #tpu.memory_space<vmem>>, %arg12: memref<4x8x128xf32, #tpu.memory_space<vmem>>, %arg13: memref<64x384xf32, #tpu.memory_space<vmem>>, %arg14: memref<64x384xf32, #tpu.memory_space<vmem>>, %arg15: memref<64x128xf32, #tpu.memory_space<vmem>>, %arg16: memref<64x128xf32, #tpu.memory_space<vmem>>) attributes {dimension_semantics = [], scalar_prefetch = 0 : i64, scratch_operands = 4 : i64, tpu.core_type = #tpu.core_type<tc>} {
    %c0 = arith.constant 0 : index
    %c0_0 = arith.constant 0 : index
    %0 = vector.load %arg0[%c0, %c0_0] : memref<64x1xi32, #tpu.memory_space<vmem>>, vector<64x1xi32>
    %1 = tpu.iota {dimensions = array<i32: 1>} : vector<64x128xi32>
    %2 = vector.broadcast %0 : vector<64x1xi32> to vector<64x128xi32>
    %3 = arith.cmpi eq, %2, %1 : vector<64x128xi32>
    %cst = arith.constant 1.000000e+00 : f32
    %cst_1 = arith.constant 0.000000e+00 : f32
    %4 = vector.broadcast %cst : f32 to vector<64x128xf32>
    %5 = vector.broadcast %cst_1 : f32 to vector<64x128xf32>
    %6 = arith.select %3, %4, %5 : vector<64x128xi1>, vector<64x128xf32>
    %c0_2 = arith.constant 0 : index
    %c0_3 = arith.constant 0 : index
    %7 = vector.load %arg1[%c0_2, %c0_3] : memref<128x64xf32, #tpu.memory_space<vmem>>, vector<128x64xf32>
    %cst_4 = arith.constant dense<0.000000e+00> : vector<64x64xf32>
    %8 = tpu.matmul %6, %7, %cst_4 {dimension_numbers = #tpu.dot_dimension_numbers<[1], [0], [0], [1], [0, 0, 1, 1], [], []>} : vector<64x128xf32>, vector<128x64xf32>, vector<64x64xf32> -> vector<64x64xf32>
    %c0_5 = arith.constant 0 : index
    %c0_6 = arith.constant 0 : index
    %c0_7 = arith.constant 0 : index
    %9 = vector.load %arg2[%c0_5, %c0_6, %c0_7] : memref<2x64x384xf32, #tpu.memory_space<vmem>>, vector<1x64x384xf32>
    %10 = vector.shape_cast %9 : vector<1x64x384xf32> to vector<64x384xf32>
    %cst_8 = arith.constant dense<0.000000e+00> : vector<64x384xf32>
    %11 = tpu.matmul %8, %10, %cst_8 {dimension_numbers = #tpu.dot_dimension_numbers<[1], [0], [0], [1], [0, 0, 1, 1], [], []>} : vector<64x64xf32>, vector<64x384xf32>, vector<64x384xf32> -> vector<64x384xf32>
    %c0_9 = arith.constant 0 : index
    %c0_10 = arith.constant 0 : index
    %c0_11 = arith.constant 0 : index
    %12 = vector.load %arg4[%c0_9, %c0_10, %c0_11] : memref<2x1x384xf32, #tpu.memory_space<vmem>>, vector<1x1x384xf32>
    %13 = vector.shape_cast %12 : vector<1x1x384xf32> to vector<1x384xf32>
    %14 = vector.broadcast %13 : vector<1x384xf32> to vector<64x384xf32>
    %15 = arith.addf %11, %14 : vector<64x384xf32>
    %c0_12 = arith.constant 0 : index
    %c0_13 = arith.constant 0 : index
    %16 = vector.load %arg13[%c0_12, %c0_13] : memref<64x384xf32, #tpu.memory_space<vmem>>, vector<64x384xf32>
    tpu.vector_store %arg13[%c0_12, %c0_13], %15 {strides = array<i32>} : memref<64x384xf32, #tpu.memory_space<vmem>>, vector<64x384xf32>,
    %c1 = arith.constant 1 : index
    %c0_14 = arith.constant 0 : index
    %c0_15 = arith.constant 0 : index
    %17 = vector.load %arg2[%c1, %c0_14, %c0_15] : memref<2x64x384xf32, #tpu.memory_space<vmem>>, vector<1x64x384xf32>
    %18 = vector.shape_cast %17 : vector<1x64x384xf32> to vector<64x384xf32>
    %cst_16 = arith.constant dense<0.000000e+00> : vector<64x384xf32>
    %19 = tpu.matmul %8, %18, %cst_16 {dimension_numbers = #tpu.dot_dimension_numbers<[1], [0], [0], [1], [0, 0, 1, 1], [], []>} : vector<64x64xf32>, vector<64x384xf32>, vector<64x384xf32> -> vector<64x384xf32>
    %c1_17 = arith.constant 1 : index
    %c0_18 = arith.constant 0 : index
    %c0_19 = arith.constant 0 : index
    %20 = vector.load %arg4[%c1_17, %c0_18, %c0_19] : memref<2x1x384xf32, #tpu.memory_space<vmem>>, vector<1x1x384xf32>
    %21 = vector.shape_cast %20 : vector<1x1x384xf32> to vector<1x384xf32>
    %22 = vector.broadcast %21 : vector<1x384xf32> to vector<64x384xf32>
    %23 = arith.addf %19, %22 : vector<64x384xf32>
    %c0_20 = arith.constant 0 : index
    %c0_21 = arith.constant 0 : index
    %24 = vector.load %arg14[%c0_20, %c0_21] : memref<64x384xf32, #tpu.memory_space<vmem>>, vector<64x384xf32>
    tpu.vector_store %arg14[%c0_20, %c0_21], %23 {strides = array<i32>} : memref<64x384xf32, #tpu.memory_space<vmem>>, vector<64x384xf32>,
    %c0_22 = arith.constant 0 : index
    %c0_23 = arith.constant 0 : index
    %c0_24 = arith.constant 0 : index
    %25 = vector.load %arg3[%c0_22, %c0_23, %c0_24] : memref<2x128x384xf32, #tpu.memory_space<vmem>>, vector<1x128x384xf32>
    %26 = vector.shape_cast %25 : vector<1x128x384xf32> to vector<128x384xf32>
    %c0_25 = arith.constant 0 : index
    %c0_26 = arith.constant 0 : index
    %c0_27 = arith.constant 0 : index
    %27 = vector.load %arg5[%c0_25, %c0_26, %c0_27] : memref<2x1x384xf32, #tpu.memory_space<vmem>>, vector<1x1x384xf32>
    %28 = vector.shape_cast %27 : vector<1x1x384xf32> to vector<1x384xf32>
    %c0_28 = arith.constant 0 : index
    %c0_29 = arith.constant 0 : index
    %c0_30 = arith.constant 0 : index
    %29 = vector.load %arg10[%c0_28, %c0_29, %c0_30] : memref<4x8x128xf32, #tpu.memory_space<vmem>>, vector<1x8x128xf32>
    %30 = vector.shape_cast %29 : vector<1x8x128xf32> to vector<8x128xf32>
    %c0_31 = arith.constant 0 : index
    %c0_32 = arith.constant 0 : index
    %31 = vector.load %arg13[%c0_31, %c0_32] : memref<64x384xf32, #tpu.memory_space<vmem>>, vector<8x384xf32>
    %cst_33 = arith.constant dense<0.000000e+00> : vector<8x384xf32>
    %32 = tpu.matmul %30, %26, %cst_33 {dimension_numbers = #tpu.dot_dimension_numbers<[1], [0], [0], [1], [0, 0, 1, 1], [], []>} : vector<8x128xf32>, vector<128x384xf32>, vector<8x384xf32> -> vector<8x384xf32>
    %33 = vector.broadcast %28 : vector<1x384xf32> to vector<8x384xf32>
    %34 = arith.addf %32, %33 : vector<8x384xf32>
    %35 = vector.extract_strided_slice %31 {offsets = [0, 0], sizes = [8, 128], strides = [1, 1]} : vector<8x384xf32> to vector<8x128xf32>
    %36 = vector.extract_strided_slice %34 {offsets = [0, 0], sizes = [8, 128], strides = [1, 1]} : vector<8x384xf32> to vector<8x128xf32>
    %37 = arith.addf %35, %36 : vector<8x128xf32>
    %38 = arith.negf %37 : vector<8x128xf32>
    %39 = math.exp %38 : vector<8x128xf32>
    %cst_34 = arith.constant 1.000000e+00 : f32
    %40 = vector.broadcast %cst_34 : f32 to vector<8x128xf32>
    %41 = arith.addf %40, %39 : vector<8x128xf32>
    %42 = arith.divf %40, %41 : vector<8x128xf32>
    %43 = vector.extract_strided_slice %31 {offsets = [0, 128], sizes = [8, 128], strides = [1, 1]} : vector<8x384xf32> to vector<8x128xf32>
    %44 = vector.extract_strided_slice %34 {offsets = [0, 128], sizes = [8, 128], strides = [1, 1]} : vector<8x384xf32> to vector<8x128xf32>
    %45 = arith.addf %43, %44 : vector<8x128xf32>
    %46 = arith.negf %45 : vector<8x128xf32>
    %47 = math.exp %46 : vector<8x128xf32>
    %cst_35 = arith.constant 1.000000e+00 : f32
    %48 = vector.broadcast %cst_35 : f32 to vector<8x128xf32>
    %49 = arith.addf %48, %47 : vector<8x128xf32>
    %50 = arith.divf %48, %49 : vector<8x128xf32>
    %51 = vector.extract_strided_slice %31 {offsets = [0, 256], sizes = [8, 128], strides = [1, 1]} : vector<8x384xf32> to vector<8x128xf32>
    %52 = vector.extract_strided_slice %34 {offsets = [0, 256], sizes = [8, 128], strides = [1, 1]} : vector<8x384xf32> to vector<8x128xf32>
    %53 = arith.mulf %42, %52 : vector<8x128xf32>
    %54 = arith.addf %51, %53 : vector<8x128xf32>
    %55 = math.tanh %54 : vector<8x128xf32>
    %cst_36 = arith.constant 1.000000e+00 : f32
    %56 = vector.broadcast %cst_36 : f32 to vector<8x128xf32>
    %57 = arith.subf %56, %50 : vector<8x128xf32>
    %58 = arith.mulf %57, %55 : vector<8x128xf32>
    %59 = arith.mulf %50, %30 : vector<8x128xf32>
    %60 = arith.addf %58, %59 : vector<8x128xf32>
    %c0_37 = arith.constant 0 : index
    %c0_38 = arith.constant 0 : index
    %61 = vector.load %arg15[%c0_37, %c0_38] : memref<64x128xf32, #tpu.memory_space<vmem>>, vector<8x128xf32>
    tpu.vector_store %arg15[%c0_37, %c0_38], %60 {strides = array<i32>} : memref<64x128xf32, #tpu.memory_space<vmem>>, vector<8x128xf32>,
    %c8 = arith.constant 8 : index
    %c0_39 = arith.constant 0 : index
    %62 = vector.load %arg13[%c8, %c0_39] : memref<64x384xf32, #tpu.memory_space<vmem>>, vector<8x384xf32>
    %cst_40 = arith.constant dense<0.000000e+00> : vector<8x384xf32>
    %63 = tpu.matmul %60, %26, %cst_40 {dimension_numbers = #tpu.dot_dimension_numbers<[1], [0], [0], [1], [0, 0, 1, 1], [], []>} : vector<8x128xf32>, vector<128x384xf32>, vector<8x384xf32> -> vector<8x384xf32>
    %64 = vector.broadcast %28 : vector<1x384xf32> to vector<8x384xf32>
    %65 = arith.addf %63, %64 : vector<8x384xf32>
    %66 = vector.extract_strided_slice %62 {offsets = [0, 0], sizes = [8, 128], strides = [1, 1]} : vector<8x384xf32> to vector<8x128xf32>
    %67 = vector.extract_strided_slice %65 {offsets = [0, 0], sizes = [8, 128], strides = [1, 1]} : vector<8x384xf32> to vector<8x128xf32>
    %68 = arith.addf %66, %67 : vector<8x128xf32>
    %69 = arith.negf %68 : vector<8x128xf32>
    %70 = math.exp %69 : vector<8x128xf32>
    %cst_41 = arith.constant 1.000000e+00 : f32
    %71 = vector.broadcast %cst_41 : f32 to vector<8x128xf32>
    %72 = arith.addf %71, %70 : vector<8x128xf32>
    %73 = arith.divf %71, %72 : vector<8x128xf32>
    %74 = vector.extract_strided_slice %62 {offsets = [0, 128], sizes = [8, 128], strides = [1, 1]} : vector<8x384xf32> to vector<8x128xf32>
    %75 = vector.extract_strided_slice %65 {offsets = [0, 128], sizes = [8, 128], strides = [1, 1]} : vector<8x384xf32> to vector<8x128xf32>
    %76 = arith.addf %74, %75 : vector<8x128xf32>
    %77 = arith.negf %76 : vector<8x128xf32>
    %78 = math.exp %77 : vector<8x128xf32>
    %cst_42 = arith.constant 1.000000e+00 : f32
    %79 = vector.broadcast %cst_42 : f32 to vector<8x128xf32>
    %80 = arith.addf %79, %78 : vector<8x128xf32>
    %81 = arith.divf %79, %80 : vector<8x128xf32>
    %82 = vector.extract_strided_slice %62 {offsets = [0, 256], sizes = [8, 128], strides = [1, 1]} : vector<8x384xf32> to vector<8x128xf32>
    %83 = vector.extract_strided_slice %65 {offsets = [0, 256], sizes = [8, 128], strides = [1, 1]} : vector<8x384xf32> to vector<8x128xf32>
    %84 = arith.mulf %73, %83 : vector<8x128xf32>
    %85 = arith.addf %82, %84 : vector<8x128xf32>
    %86 = math.tanh %85 : vector<8x128xf32>
    %cst_43 = arith.constant 1.000000e+00 : f32
    %87 = vector.broadcast %cst_43 : f32 to vector<8x128xf32>
    %88 = arith.subf %87, %81 : vector<8x128xf32>
    %89 = arith.mulf %88, %86 : vector<8x128xf32>
    %90 = arith.mulf %81, %60 : vector<8x128xf32>
    %91 = arith.addf %89, %90 : vector<8x128xf32>
    %c8_44 = arith.constant 8 : index
    %c0_45 = arith.constant 0 : index
    %92 = vector.load %arg15[%c8_44, %c0_45] : memref<64x128xf32, #tpu.memory_space<vmem>>, vector<8x128xf32>
    tpu.vector_store %arg15[%c8_44, %c0_45], %91 {strides = array<i32>} : memref<64x128xf32, #tpu.memory_space<vmem>>, vector<8x128xf32>,
    %c16 = arith.constant 16 : index
    %c0_46 = arith.constant 0 : index
    %93 = vector.load %arg13[%c16, %c0_46] : memref<64x384xf32, #tpu.memory_space<vmem>>, vector<8x384xf32>
    %cst_47 = arith.constant dense<0.000000e+00> : vector<8x384xf32>
    %94 = tpu.matmul %91, %26, %cst_47 {dimension_numbers = #tpu.dot_dimension_numbers<[1], [0], [0], [1], [0, 0, 1, 1], [], []>} : vector<8x128xf32>, vector<128x384xf32>, vector<8x384xf32> -> vector<8x384xf32>
    %95 = vector.broadcast %28 : vector<1x384xf32> to vector<8x384xf32>
    %96 = arith.addf %94, %95 : vector<8x384xf32>
    %97 = vector.extract_strided_slice %93 {offsets = [0, 0], sizes = [8, 128], strides = [1, 1]} : vector<8x384xf32> to vector<8x128xf32>
    %98 = vector.extract_strided_slice %96 {offsets = [0, 0], sizes = [8, 128], strides = [1, 1]} : vector<8x384xf32> to vector<8x128xf32>
    %99 = arith.addf %97, %98 : vector<8x128xf32>
    %100 = arith.negf %99 : vector<8x128xf32>
    %101 = math.exp %100 : vector<8x128xf32>
    %cst_48 = arith.constant 1.000000e+00 : f32
    %102 = vector.broadcast %cst_48 : f32 to vector<8x128xf32>
    %103 = arith.addf %102, %101 : vector<8x128xf32>
    %104 = arith.divf %102, %103 : vector<8x128xf32>
    %105 = vector.extract_strided_slice %93 {offsets = [0, 128], sizes = [8, 128], strides = [1, 1]} : vector<8x384xf32> to vector<8x128xf32>
    %106 = vector.extract_strided_slice %96 {offsets = [0, 128], sizes = [8, 128], strides = [1, 1]} : vector<8x384xf32> to vector<8x128xf32>
    %107 = arith.addf %105, %106 : vector<8x128xf32>
    %108 = arith.negf %107 : vector<8x128xf32>
    %109 = math.exp %108 : vector<8x128xf32>
    %cst_49 = arith.constant 1.000000e+00 : f32
    %110 = vector.broadcast %cst_49 : f32 to vector<8x128xf32>
    %111 = arith.addf %110, %109 : vector<8x128xf32>
    %112 = arith.divf %110, %111 : vector<8x128xf32>
    %113 = vector.extract_strided_slice %93 {offsets = [0, 256], sizes = [8, 128], strides = [1, 1]} : vector<8x384xf32> to vector<8x128xf32>
    %114 = vector.extract_strided_slice %96 {offsets = [0, 256], sizes = [8, 128], strides = [1, 1]} : vector<8x384xf32> to vector<8x128xf32>
    %115 = arith.mulf %104, %114 : vector<8x128xf32>
    %116 = arith.addf %113, %115 : vector<8x128xf32>
    %117 = math.tanh %116 : vector<8x128xf32>
    %cst_50 = arith.constant 1.000000e+00 : f32
    %118 = vector.broadcast %cst_50 : f32 to vector<8x128xf32>
    %119 = arith.subf %118, %112 : vector<8x128xf32>
    %120 = arith.mulf %119, %117 : vector<8x128xf32>
    %121 = arith.mulf %112, %91 : vector<8x128xf32>
    %122 = arith.addf %120, %121 : vector<8x128xf32>
    %c16_51 = arith.constant 16 : index
    %c0_52 = arith.constant 0 : index
    %123 = vector.load %arg15[%c16_51, %c0_52] : memref<64x128xf32, #tpu.memory_space<vmem>>, vector<8x128xf32>
    tpu.vector_store %arg15[%c16_51, %c0_52], %122 {strides = array<i32>} : memref<64x128xf32, #tpu.memory_space<vmem>>, vector<8x128xf32>,
    %c24 = arith.constant 24 : index
    %c0_53 = arith.constant 0 : index
    %124 = vector.load %arg13[%c24, %c0_53] : memref<64x384xf32, #tpu.memory_space<vmem>>, vector<8x384xf32>
    %cst_54 = arith.constant dense<0.000000e+00> : vector<8x384xf32>
    %125 = tpu.matmul %122, %26, %cst_54 {dimension_numbers = #tpu.dot_dimension_numbers<[1], [0], [0], [1], [0, 0, 1, 1], [], []>} : vector<8x128xf32>, vector<128x384xf32>, vector<8x384xf32> -> vector<8x384xf32>
    %126 = vector.broadcast %28 : vector<1x384xf32> to vector<8x384xf32>
    %127 = arith.addf %125, %126 : vector<8x384xf32>
    %128 = vector.extract_strided_slice %124 {offsets = [0, 0], sizes = [8, 128], strides = [1, 1]} : vector<8x384xf32> to vector<8x128xf32>
    %129 = vector.extract_strided_slice %127 {offsets = [0, 0], sizes = [8, 128], strides = [1, 1]} : vector<8x384xf32> to vector<8x128xf32>
    %130 = arith.addf %128, %129 : vector<8x128xf32>
    %131 = arith.negf %130 : vector<8x128xf32>
    %132 = math.exp %131 : vector<8x128xf32>
    %cst_55 = arith.constant 1.000000e+00 : f32
    %133 = vector.broadcast %cst_55 : f32 to vector<8x128xf32>
    %134 = arith.addf %133, %132 : vector<8x128xf32>
    %135 = arith.divf %133, %134 : vector<8x128xf32>
    %136 = vector.extract_strided_slice %124 {offsets = [0, 128], sizes = [8, 128], strides = [1, 1]} : vector<8x384xf32> to vector<8x128xf32>
    %137 = vector.extract_strided_slice %127 {offsets = [0, 128], sizes = [8, 128], strides = [1, 1]} : vector<8x384xf32> to vector<8x128xf32>
    %138 = arith.addf %136, %137 : vector<8x128xf32>
    %139 = arith.negf %138 : vector<8x128xf32>
    %140 = math.exp %139 : vector<8x128xf32>
    %cst_56 = arith.constant 1.000000e+00 : f32
    %141 = vector.broadcast %cst_56 : f32 to vector<8x128xf32>
    %142 = arith.addf %141, %140 : vector<8x128xf32>
    %143 = arith.divf %141, %142 : vector<8x128xf32>
    %144 = vector.extract_strided_slice %124 {offsets = [0, 256], sizes = [8, 128], strides = [1, 1]} : vector<8x384xf32> to vector<8x128xf32>
    %145 = vector.extract_strided_slice %127 {offsets = [0, 256], sizes = [8, 128], strides = [1, 1]} : vector<8x384xf32> to vector<8x128xf32>
    %146 = arith.mulf %135, %145 : vector<8x128xf32>
    %147 = arith.addf %144, %146 : vector<8x128xf32>
    %148 = math.tanh %147 : vector<8x128xf32>
    %cst_57 = arith.constant 1.000000e+00 : f32
    %149 = vector.broadcast %cst_57 : f32 to vector<8x128xf32>
    %150 = arith.subf %149, %143 : vector<8x128xf32>
    %151 = arith.mulf %150, %148 : vector<8x128xf32>
    %152 = arith.mulf %143, %122 : vector<8x128xf32>
    %153 = arith.addf %151, %152 : vector<8x128xf32>
    %c24_58 = arith.constant 24 : index
    %c0_59 = arith.constant 0 : index
    %154 = vector.load %arg15[%c24_58, %c0_59] : memref<64x128xf32, #tpu.memory_space<vmem>>, vector<8x128xf32>
    tpu.vector_store %arg15[%c24_58, %c0_59], %153 {strides = array<i32>} : memref<64x128xf32, #tpu.memory_space<vmem>>, vector<8x128xf32>,
    %c32 = arith.constant 32 : index
    %c0_60 = arith.constant 0 : index
    %155 = vector.load %arg13[%c32, %c0_60] : memref<64x384xf32, #tpu.memory_space<vmem>>, vector<8x384xf32>
    %cst_61 = arith.constant dense<0.000000e+00> : vector<8x384xf32>
    %156 = tpu.matmul %153, %26, %cst_61 {dimension_numbers = #tpu.dot_dimension_numbers<[1], [0], [0], [1], [0, 0, 1, 1], [], []>} : vector<8x128xf32>, vector<128x384xf32>, vector<8x384xf32> -> vector<8x384xf32>
    %157 = vector.broadcast %28 : vector<1x384xf32> to vector<8x384xf32>
    %158 = arith.addf %156, %157 : vector<8x384xf32>
    %159 = vector.extract_strided_slice %155 {offsets = [0, 0], sizes = [8, 128], strides = [1, 1]} : vector<8x384xf32> to vector<8x128xf32>
    %160 = vector.extract_strided_slice %158 {offsets = [0, 0], sizes = [8, 128], strides = [1, 1]} : vector<8x384xf32> to vector<8x128xf32>
    %161 = arith.addf %159, %160 : vector<8x128xf32>
    %162 = arith.negf %161 : vector<8x128xf32>
    %163 = math.exp %162 : vector<8x128xf32>
    %cst_62 = arith.constant 1.000000e+00 : f32
    %164 = vector.broadcast %cst_62 : f32 to vector<8x128xf32>
    %165 = arith.addf %164, %163 : vector<8x128xf32>
    %166 = arith.divf %164, %165 : vector<8x128xf32>
    %167 = vector.extract_strided_slice %155 {offsets = [0, 128], sizes = [8, 128], strides = [1, 1]} : vector<8x384xf32> to vector<8x128xf32>
    %168 = vector.extract_strided_slice %158 {offsets = [0, 128], sizes = [8, 128], strides = [1, 1]} : vector<8x384xf32> to vector<8x128xf32>
    %169 = arith.addf %167, %168 : vector<8x128xf32>
    %170 = arith.negf %169 : vector<8x128xf32>
    %171 = math.exp %170 : vector<8x128xf32>
    %cst_63 = arith.constant 1.000000e+00 : f32
    %172 = vector.broadcast %cst_63 : f32 to vector<8x128xf32>
    %173 = arith.addf %172, %171 : vector<8x128xf32>
    %174 = arith.divf %172, %173 : vector<8x128xf32>
    %175 = vector.extract_strided_slice %155 {offsets = [0, 256], sizes = [8, 128], strides = [1, 1]} : vector<8x384xf32> to vector<8x128xf32>
    %176 = vector.extract_strided_slice %158 {offsets = [0, 256], sizes = [8, 128], strides = [1, 1]} : vector<8x384xf32> to vector<8x128xf32>
    %177 = arith.mulf %166, %176 : vector<8x128xf32>
    %178 = arith.addf %175, %177 : vector<8x128xf32>
    %179 = math.tanh %178 : vector<8x128xf32>
    %cst_64 = arith.constant 1.000000e+00 : f32
    %180 = vector.broadcast %cst_64 : f32 to vector<8x128xf32>
    %181 = arith.subf %180, %174 : vector<8x128xf32>
    %182 = arith.mulf %181, %179 : vector<8x128xf32>
    %183 = arith.mulf %174, %153 : vector<8x128xf32>
    %184 = arith.addf %182, %183 : vector<8x128xf32>
    %c32_65 = arith.constant 32 : index
    %c0_66 = arith.constant 0 : index
    %185 = vector.load %arg15[%c32_65, %c0_66] : memref<64x128xf32, #tpu.memory_space<vmem>>, vector<8x128xf32>
    tpu.vector_store %arg15[%c32_65, %c0_66], %184 {strides = array<i32>} : memref<64x128xf32, #tpu.memory_space<vmem>>, vector<8x128xf32>,
    %c40 = arith.constant 40 : index
    %c0_67 = arith.constant 0 : index
    %186 = vector.load %arg13[%c40, %c0_67] : memref<64x384xf32, #tpu.memory_space<vmem>>, vector<8x384xf32>
    %cst_68 = arith.constant dense<0.000000e+00> : vector<8x384xf32>
    %187 = tpu.matmul %184, %26, %cst_68 {dimension_numbers = #tpu.dot_dimension_numbers<[1], [0], [0], [1], [0, 0, 1, 1], [], []>} : vector<8x128xf32>, vector<128x384xf32>, vector<8x384xf32> -> vector<8x384xf32>
    %188 = vector.broadcast %28 : vector<1x384xf32> to vector<8x384xf32>
    %189 = arith.addf %187, %188 : vector<8x384xf32>
    %190 = vector.extract_strided_slice %186 {offsets = [0, 0], sizes = [8, 128], strides = [1, 1]} : vector<8x384xf32> to vector<8x128xf32>
    %191 = vector.extract_strided_slice %189 {offsets = [0, 0], sizes = [8, 128], strides = [1, 1]} : vector<8x384xf32> to vector<8x128xf32>
    %192 = arith.addf %190, %191 : vector<8x128xf32>
    %193 = arith.negf %192 : vector<8x128xf32>
    %194 = math.exp %193 : vector<8x128xf32>
    %cst_69 = arith.constant 1.000000e+00 : f32
    %195 = vector.broadcast %cst_69 : f32 to vector<8x128xf32>
    %196 = arith.addf %195, %194 : vector<8x128xf32>
    %197 = arith.divf %195, %196 : vector<8x128xf32>
    %198 = vector.extract_strided_slice %186 {offsets = [0, 128], sizes = [8, 128], strides = [1, 1]} : vector<8x384xf32> to vector<8x128xf32>
    %199 = vector.extract_strided_slice %189 {offsets = [0, 128], sizes = [8, 128], strides = [1, 1]} : vector<8x384xf32> to vector<8x128xf32>
    %200 = arith.addf %198, %199 : vector<8x128xf32>
    %201 = arith.negf %200 : vector<8x128xf32>
    %202 = math.exp %201 : vector<8x128xf32>
    %cst_70 = arith.constant 1.000000e+00 : f32
    %203 = vector.broadcast %cst_70 : f32 to vector<8x128xf32>
    %204 = arith.addf %203, %202 : vector<8x128xf32>
    %205 = arith.divf %203, %204 : vector<8x128xf32>
    %206 = vector.extract_strided_slice %186 {offsets = [0, 256], sizes = [8, 128], strides = [1, 1]} : vector<8x384xf32> to vector<8x128xf32>
    %207 = vector.extract_strided_slice %189 {offsets = [0, 256], sizes = [8, 128], strides = [1, 1]} : vector<8x384xf32> to vector<8x128xf32>
    %208 = arith.mulf %197, %207 : vector<8x128xf32>
    %209 = arith.addf %206, %208 : vector<8x128xf32>
    %210 = math.tanh %209 : vector<8x128xf32>
    %cst_71 = arith.constant 1.000000e+00 : f32
    %211 = vector.broadcast %cst_71 : f32 to vector<8x128xf32>
    %212 = arith.subf %211, %205 : vector<8x128xf32>
    %213 = arith.mulf %212, %210 : vector<8x128xf32>
    %214 = arith.mulf %205, %184 : vector<8x128xf32>
    %215 = arith.addf %213, %214 : vector<8x128xf32>
    %c40_72 = arith.constant 40 : index
    %c0_73 = arith.constant 0 : index
    %216 = vector.load %arg15[%c40_72, %c0_73] : memref<64x128xf32, #tpu.memory_space<vmem>>, vector<8x128xf32>
    tpu.vector_store %arg15[%c40_72, %c0_73], %215 {strides = array<i32>} : memref<64x128xf32, #tpu.memory_space<vmem>>, vector<8x128xf32>,
    %c48 = arith.constant 48 : index
    %c0_74 = arith.constant 0 : index
    %217 = vector.load %arg13[%c48, %c0_74] : memref<64x384xf32, #tpu.memory_space<vmem>>, vector<8x384xf32>
    %cst_75 = arith.constant dense<0.000000e+00> : vector<8x384xf32>
    %218 = tpu.matmul %215, %26, %cst_75 {dimension_numbers = #tpu.dot_dimension_numbers<[1], [0], [0], [1], [0, 0, 1, 1], [], []>} : vector<8x128xf32>, vector<128x384xf32>, vector<8x384xf32> -> vector<8x384xf32>
    %219 = vector.broadcast %28 : vector<1x384xf32> to vector<8x384xf32>
    %220 = arith.addf %218, %219 : vector<8x384xf32>
    %221 = vector.extract_strided_slice %217 {offsets = [0, 0], sizes = [8, 128], strides = [1, 1]} : vector<8x384xf32> to vector<8x128xf32>
    %222 = vector.extract_strided_slice %220 {offsets = [0, 0], sizes = [8, 128], strides = [1, 1]} : vector<8x384xf32> to vector<8x128xf32>
    %223 = arith.addf %221, %222 : vector<8x128xf32>
    %224 = arith.negf %223 : vector<8x128xf32>
    %225 = math.exp %224 : vector<8x128xf32>
    %cst_76 = arith.constant 1.000000e+00 : f32
    %226 = vector.broadcast %cst_76 : f32 to vector<8x128xf32>
    %227 = arith.addf %226, %225 : vector<8x128xf32>
    %228 = arith.divf %226, %227 : vector<8x128xf32>
    %229 = vector.extract_strided_slice %217 {offsets = [0, 128], sizes = [8, 128], strides = [1, 1]} : vector<8x384xf32> to vector<8x128xf32>
    %230 = vector.extract_strided_slice %220 {offsets = [0, 128], sizes = [8, 128], strides = [1, 1]} : vector<8x384xf32> to vector<8x128xf32>
    %231 = arith.addf %229, %230 : vector<8x128xf32>
    %232 = arith.negf %231 : vector<8x128xf32>
    %233 = math.exp %232 : vector<8x128xf32>
    %cst_77 = arith.constant 1.000000e+00 : f32
    %234 = vector.broadcast %cst_77 : f32 to vector<8x128xf32>
    %235 = arith.addf %234, %233 : vector<8x128xf32>
    %236 = arith.divf %234, %235 : vector<8x128xf32>
    %237 = vector.extract_strided_slice %217 {offsets = [0, 256], sizes = [8, 128], strides = [1, 1]} : vector<8x384xf32> to vector<8x128xf32>
    %238 = vector.extract_strided_slice %220 {offsets = [0, 256], sizes = [8, 128], strides = [1, 1]} : vector<8x384xf32> to vector<8x128xf32>
    %239 = arith.mulf %228, %238 : vector<8x128xf32>
    %240 = arith.addf %237, %239 : vector<8x128xf32>
    %241 = math.tanh %240 : vector<8x128xf32>
    %cst_78 = arith.constant 1.000000e+00 : f32
    %242 = vector.broadcast %cst_78 : f32 to vector<8x128xf32>
    %243 = arith.subf %242, %236 : vector<8x128xf32>
    %244 = arith.mulf %243, %241 : vector<8x128xf32>
    %245 = arith.mulf %236, %215 : vector<8x128xf32>
    %246 = arith.addf %244, %245 : vector<8x128xf32>
    %c48_79 = arith.constant 48 : index
    %c0_80 = arith.constant 0 : index
    %247 = vector.load %arg15[%c48_79, %c0_80] : memref<64x128xf32, #tpu.memory_space<vmem>>, vector<8x128xf32>
    tpu.vector_store %arg15[%c48_79, %c0_80], %246 {strides = array<i32>} : memref<64x128xf32, #tpu.memory_space<vmem>>, vector<8x128xf32>,
    %c56 = arith.constant 56 : index
    %c0_81 = arith.constant 0 : index
    %248 = vector.load %arg13[%c56, %c0_81] : memref<64x384xf32, #tpu.memory_space<vmem>>, vector<8x384xf32>
    %cst_82 = arith.constant dense<0.000000e+00> : vector<8x384xf32>
    %249 = tpu.matmul %246, %26, %cst_82 {dimension_numbers = #tpu.dot_dimension_numbers<[1], [0], [0], [1], [0, 0, 1, 1], [], []>} : vector<8x128xf32>, vector<128x384xf32>, vector<8x384xf32> -> vector<8x384xf32>
    %250 = vector.broadcast %28 : vector<1x384xf32> to vector<8x384xf32>
    %251 = arith.addf %249, %250 : vector<8x384xf32>
    %252 = vector.extract_strided_slice %248 {offsets = [0, 0], sizes = [8, 128], strides = [1, 1]} : vector<8x384xf32> to vector<8x128xf32>
    %253 = vector.extract_strided_slice %251 {offsets = [0, 0], sizes = [8, 128], strides = [1, 1]} : vector<8x384xf32> to vector<8x128xf32>
    %254 = arith.addf %252, %253 : vector<8x128xf32>
    %255 = arith.negf %254 : vector<8x128xf32>
    %256 = math.exp %255 : vector<8x128xf32>
    %cst_83 = arith.constant 1.000000e+00 : f32
    %257 = vector.broadcast %cst_83 : f32 to vector<8x128xf32>
    %258 = arith.addf %257, %256 : vector<8x128xf32>
    %259 = arith.divf %257, %258 : vector<8x128xf32>
    %260 = vector.extract_strided_slice %248 {offsets = [0, 128], sizes = [8, 128], strides = [1, 1]} : vector<8x384xf32> to vector<8x128xf32>
    %261 = vector.extract_strided_slice %251 {offsets = [0, 128], sizes = [8, 128], strides = [1, 1]} : vector<8x384xf32> to vector<8x128xf32>
    %262 = arith.addf %260, %261 : vector<8x128xf32>
    %263 = arith.negf %262 : vector<8x128xf32>
    %264 = math.exp %263 : vector<8x128xf32>
    %cst_84 = arith.constant 1.000000e+00 : f32
    %265 = vector.broadcast %cst_84 : f32 to vector<8x128xf32>
    %266 = arith.addf %265, %264 : vector<8x128xf32>
    %267 = arith.divf %265, %266 : vector<8x128xf32>
    %268 = vector.extract_strided_slice %248 {offsets = [0, 256], sizes = [8, 128], strides = [1, 1]} : vector<8x384xf32> to vector<8x128xf32>
    %269 = vector.extract_strided_slice %251 {offsets = [0, 256], sizes = [8, 128], strides = [1, 1]} : vector<8x384xf32> to vector<8x128xf32>
    %270 = arith.mulf %259, %269 : vector<8x128xf32>
    %271 = arith.addf %268, %270 : vector<8x128xf32>
    %272 = math.tanh %271 : vector<8x128xf32>
    %cst_85 = arith.constant 1.000000e+00 : f32
    %273 = vector.broadcast %cst_85 : f32 to vector<8x128xf32>
    %274 = arith.subf %273, %267 : vector<8x128xf32>
    %275 = arith.mulf %274, %272 : vector<8x128xf32>
    %276 = arith.mulf %267, %246 : vector<8x128xf32>
    %277 = arith.addf %275, %276 : vector<8x128xf32>
    %c56_86 = arith.constant 56 : index
    %c0_87 = arith.constant 0 : index
    %278 = vector.load %arg15[%c56_86, %c0_87] : memref<64x128xf32, #tpu.memory_space<vmem>>, vector<8x128xf32>
    tpu.vector_store %arg15[%c56_86, %c0_87], %277 {strides = array<i32>} : memref<64x128xf32, #tpu.memory_space<vmem>>, vector<8x128xf32>,
    %c0_88 = arith.constant 0 : index
    %c0_89 = arith.constant 0 : index
    %c0_90 = arith.constant 0 : index
    %279 = vector.load %arg12[%c0_88, %c0_89, %c0_90] : memref<4x8x128xf32, #tpu.memory_space<vmem>>, vector<1x8x128xf32>
    %280 = vector.shape_cast %279 : vector<1x8x128xf32> to vector<8x128xf32>
    %281 = vector.shape_cast %277 : vector<8x128xf32> to vector<1x8x128xf32>
    tpu.vector_store %arg12[%c0_88, %c0_89, %c0_90], %281 {strides = array<i32>} : memref<4x8x128xf32, #tpu.memory_space<vmem>>, vector<1x8x128xf32>,
    %c1_91 = arith.constant 1 : index
    %c0_92 = arith.constant 0 : index
    %c0_93 = arith.constant 0 : index
    %282 = vector.load %arg3[%c1_91, %c0_92, %c0_93] : memref<2x128x384xf32, #tpu.memory_space<vmem>>, vector<1x128x384xf32>
    %283 = vector.shape_cast %282 : vector<1x128x384xf32> to vector<128x384xf32>
    %c1_94 = arith.constant 1 : index
    %c0_95 = arith.constant 0 : index
    %c0_96 = arith.constant 0 : index
    %284 = vector.load %arg5[%c1_94, %c0_95, %c0_96] : memref<2x1x384xf32, #tpu.memory_space<vmem>>, vector<1x1x384xf32>
    %285 = vector.shape_cast %284 : vector<1x1x384xf32> to vector<1x384xf32>
    %c1_97 = arith.constant 1 : index
    %c0_98 = arith.constant 0 : index
    %c0_99 = arith.constant 0 : index
    %286 = vector.load %arg10[%c1_97, %c0_98, %c0_99] : memref<4x8x128xf32, #tpu.memory_space<vmem>>, vector<1x8x128xf32>
    %287 = vector.shape_cast %286 : vector<1x8x128xf32> to vector<8x128xf32>
    %c56_100 = arith.constant 56 : index
    %c0_101 = arith.constant 0 : index
    %288 = vector.load %arg14[%c56_100, %c0_101] : memref<64x384xf32, #tpu.memory_space<vmem>>, vector<8x384xf32>
    %cst_102 = arith.constant dense<0.000000e+00> : vector<8x384xf32>
    %289 = tpu.matmul %287, %283, %cst_102 {dimension_numbers = #tpu.dot_dimension_numbers<[1], [0], [0], [1], [0, 0, 1, 1], [], []>} : vector<8x128xf32>, vector<128x384xf32>, vector<8x384xf32> -> vector<8x384xf32>
    %290 = vector.broadcast %285 : vector<1x384xf32> to vector<8x384xf32>
    %291 = arith.addf %289, %290 : vector<8x384xf32>
    %292 = vector.extract_strided_slice %288 {offsets = [0, 0], sizes = [8, 128], strides = [1, 1]} : vector<8x384xf32> to vector<8x128xf32>
    %293 = vector.extract_strided_slice %291 {offsets = [0, 0], sizes = [8, 128], strides = [1, 1]} : vector<8x384xf32> to vector<8x128xf32>
    %294 = arith.addf %292, %293 : vector<8x128xf32>
    %295 = arith.negf %294 : vector<8x128xf32>
    %296 = math.exp %295 : vector<8x128xf32>
    %cst_103 = arith.constant 1.000000e+00 : f32
    %297 = vector.broadcast %cst_103 : f32 to vector<8x128xf32>
    %298 = arith.addf %297, %296 : vector<8x128xf32>
    %299 = arith.divf %297, %298 : vector<8x128xf32>
    %300 = vector.extract_strided_slice %288 {offsets = [0, 128], sizes = [8, 128], strides = [1, 1]} : vector<8x384xf32> to vector<8x128xf32>
    %301 = vector.extract_strided_slice %291 {offsets = [0, 128], sizes = [8, 128], strides = [1, 1]} : vector<8x384xf32> to vector<8x128xf32>
    %302 = arith.addf %300, %301 : vector<8x128xf32>
    %303 = arith.negf %302 : vector<8x128xf32>
    %304 = math.exp %303 : vector<8x128xf32>
    %cst_104 = arith.constant 1.000000e+00 : f32
    %305 = vector.broadcast %cst_104 : f32 to vector<8x128xf32>
    %306 = arith.addf %305, %304 : vector<8x128xf32>
    %307 = arith.divf %305, %306 : vector<8x128xf32>
    %308 = vector.extract_strided_slice %288 {offsets = [0, 256], sizes = [8, 128], strides = [1, 1]} : vector<8x384xf32> to vector<8x128xf32>
    %309 = vector.extract_strided_slice %291 {offsets = [0, 256], sizes = [8, 128], strides = [1, 1]} : vector<8x384xf32> to vector<8x128xf32>
    %310 = arith.mulf %299, %309 : vector<8x128xf32>
    %311 = arith.addf %308, %310 : vector<8x128xf32>
    %312 = math.tanh %311 : vector<8x128xf32>
    %cst_105 = arith.constant 1.000000e+00 : f32
    %313 = vector.broadcast %cst_105 : f32 to vector<8x128xf32>
    %314 = arith.subf %313, %307 : vector<8x128xf32>
    %315 = arith.mulf %314, %312 : vector<8x128xf32>
    %316 = arith.mulf %307, %287 : vector<8x128xf32>
    %317 = arith.addf %315, %316 : vector<8x128xf32>
    %c56_106 = arith.constant 56 : index
    %c0_107 = arith.constant 0 : index
    %318 = vector.load %arg16[%c56_106, %c0_107] : memref<64x128xf32, #tpu.memory_space<vmem>>, vector<8x128xf32>
    tpu.vector_store %arg16[%c56_106, %c0_107], %317 {strides = array<i32>} : memref<64x128xf32, #tpu.memory_space<vmem>>, vector<8x128xf32>,
    %c48_108 = arith.constant 48 : index
    %c0_109 = arith.constant 0 : index
    %319 = vector.load %arg14[%c48_108, %c0_109] : memref<64x384xf32, #tpu.memory_space<vmem>>, vector<8x384xf32>
    %cst_110 = arith.constant dense<0.000000e+00> : vector<8x384xf32>
    %320 = tpu.matmul %317, %283, %cst_110 {dimension_numbers = #tpu.dot_dimension_numbers<[1], [0], [0], [1], [0, 0, 1, 1], [], []>} : vector<8x128xf32>, vector<128x384xf32>, vector<8x384xf32> -> vector<8x384xf32>
    %321 = vector.broadcast %285 : vector<1x384xf32> to vector<8x384xf32>
    %322 = arith.addf %320, %321 : vector<8x384xf32>
    %323 = vector.extract_strided_slice %319 {offsets = [0, 0], sizes = [8, 128], strides = [1, 1]} : vector<8x384xf32> to vector<8x128xf32>
    %324 = vector.extract_strided_slice %322 {offsets = [0, 0], sizes = [8, 128], strides = [1, 1]} : vector<8x384xf32> to vector<8x128xf32>
    %325 = arith.addf %323, %324 : vector<8x128xf32>
    %326 = arith.negf %325 : vector<8x128xf32>
    %327 = math.exp %326 : vector<8x128xf32>
    %cst_111 = arith.constant 1.000000e+00 : f32
    %328 = vector.broadcast %cst_111 : f32 to vector<8x128xf32>
    %329 = arith.addf %328, %327 : vector<8x128xf32>
    %330 = arith.divf %328, %329 : vector<8x128xf32>
    %331 = vector.extract_strided_slice %319 {offsets = [0, 128], sizes = [8, 128], strides = [1, 1]} : vector<8x384xf32> to vector<8x128xf32>
    %332 = vector.extract_strided_slice %322 {offsets = [0, 128], sizes = [8, 128], strides = [1, 1]} : vector<8x384xf32> to vector<8x128xf32>
    %333 = arith.addf %331, %332 : vector<8x128xf32>
    %334 = arith.negf %333 : vector<8x128xf32>
    %335 = math.exp %334 : vector<8x128xf32>
    %cst_112 = arith.constant 1.000000e+00 : f32
    %336 = vector.broadcast %cst_112 : f32 to vector<8x128xf32>
    %337 = arith.addf %336, %335 : vector<8x128xf32>
    %338 = arith.divf %336, %337 : vector<8x128xf32>
    %339 = vector.extract_strided_slice %319 {offsets = [0, 256], sizes = [8, 128], strides = [1, 1]} : vector<8x384xf32> to vector<8x128xf32>
    %340 = vector.extract_strided_slice %322 {offsets = [0, 256], sizes = [8, 128], strides = [1, 1]} : vector<8x384xf32> to vector<8x128xf32>
    %341 = arith.mulf %330, %340 : vector<8x128xf32>
    %342 = arith.addf %339, %341 : vector<8x128xf32>
    %343 = math.tanh %342 : vector<8x128xf32>
    %cst_113 = arith.constant 1.000000e+00 : f32
    %344 = vector.broadcast %cst_113 : f32 to vector<8x128xf32>
    %345 = arith.subf %344, %338 : vector<8x128xf32>
    %346 = arith.mulf %345, %343 : vector<8x128xf32>
    %347 = arith.mulf %338, %317 : vector<8x128xf32>
    %348 = arith.addf %346, %347 : vector<8x128xf32>
    %c48_114 = arith.constant 48 : index
    %c0_115 = arith.constant 0 : index
    %349 = vector.load %arg16[%c48_114, %c0_115] : memref<64x128xf32, #tpu.memory_space<vmem>>, vector<8x128xf32>
    tpu.vector_store %arg16[%c48_114, %c0_115], %348 {strides = array<i32>} : memref<64x128xf32, #tpu.memory_space<vmem>>, vector<8x128xf32>,
    %c40_116 = arith.constant 40 : index
    %c0_117 = arith.constant 0 : index
    %350 = vector.load %arg14[%c40_116, %c0_117] : memref<64x384xf32, #tpu.memory_space<vmem>>, vector<8x384xf32>
    %cst_118 = arith.constant dense<0.000000e+00> : vector<8x384xf32>
    %351 = tpu.matmul %348, %283, %cst_118 {dimension_numbers = #tpu.dot_dimension_numbers<[1], [0], [0], [1], [0, 0, 1, 1], [], []>} : vector<8x128xf32>, vector<128x384xf32>, vector<8x384xf32> -> vector<8x384xf32>
    %352 = vector.broadcast %285 : vector<1x384xf32> to vector<8x384xf32>
    %353 = arith.addf %351, %352 : vector<8x384xf32>
    %354 = vector.extract_strided_slice %350 {offsets = [0, 0], sizes = [8, 128], strides = [1, 1]} : vector<8x384xf32> to vector<8x128xf32>
    %355 = vector.extract_strided_slice %353 {offsets = [0, 0], sizes = [8, 128], strides = [1, 1]} : vector<8x384xf32> to vector<8x128xf32>
    %356 = arith.addf %354, %355 : vector<8x128xf32>
    %357 = arith.negf %356 : vector<8x128xf32>
    %358 = math.exp %357 : vector<8x128xf32>
    %cst_119 = arith.constant 1.000000e+00 : f32
    %359 = vector.broadcast %cst_119 : f32 to vector<8x128xf32>
    %360 = arith.addf %359, %358 : vector<8x128xf32>
    %361 = arith.divf %359, %360 : vector<8x128xf32>
    %362 = vector.extract_strided_slice %350 {offsets = [0, 128], sizes = [8, 128], strides = [1, 1]} : vector<8x384xf32> to vector<8x128xf32>
    %363 = vector.extract_strided_slice %353 {offsets = [0, 128], sizes = [8, 128], strides = [1, 1]} : vector<8x384xf32> to vector<8x128xf32>
    %364 = arith.addf %362, %363 : vector<8x128xf32>
    %365 = arith.negf %364 : vector<8x128xf32>
    %366 = math.exp %365 : vector<8x128xf32>
    %cst_120 = arith.constant 1.000000e+00 : f32
    %367 = vector.broadcast %cst_120 : f32 to vector<8x128xf32>
    %368 = arith.addf %367, %366 : vector<8x128xf32>
    %369 = arith.divf %367, %368 : vector<8x128xf32>
    %370 = vector.extract_strided_slice %350 {offsets = [0, 256], sizes = [8, 128], strides = [1, 1]} : vector<8x384xf32> to vector<8x128xf32>
    %371 = vector.extract_strided_slice %353 {offsets = [0, 256], sizes = [8, 128], strides = [1, 1]} : vector<8x384xf32> to vector<8x128xf32>
    %372 = arith.mulf %361, %371 : vector<8x128xf32>
    %373 = arith.addf %370, %372 : vector<8x128xf32>
    %374 = math.tanh %373 : vector<8x128xf32>
    %cst_121 = arith.constant 1.000000e+00 : f32
    %375 = vector.broadcast %cst_121 : f32 to vector<8x128xf32>
    %376 = arith.subf %375, %369 : vector<8x128xf32>
    %377 = arith.mulf %376, %374 : vector<8x128xf32>
    %378 = arith.mulf %369, %348 : vector<8x128xf32>
    %379 = arith.addf %377, %378 : vector<8x128xf32>
    %c40_122 = arith.constant 40 : index
    %c0_123 = arith.constant 0 : index
    %380 = vector.load %arg16[%c40_122, %c0_123] : memref<64x128xf32, #tpu.memory_space<vmem>>, vector<8x128xf32>
    tpu.vector_store %arg16[%c40_122, %c0_123], %379 {strides = array<i32>} : memref<64x128xf32, #tpu.memory_space<vmem>>, vector<8x128xf32>,
    %c32_124 = arith.constant 32 : index
    %c0_125 = arith.constant 0 : index
    %381 = vector.load %arg14[%c32_124, %c0_125] : memref<64x384xf32, #tpu.memory_space<vmem>>, vector<8x384xf32>
    %cst_126 = arith.constant dense<0.000000e+00> : vector<8x384xf32>
    %382 = tpu.matmul %379, %283, %cst_126 {dimension_numbers = #tpu.dot_dimension_numbers<[1], [0], [0], [1], [0, 0, 1, 1], [], []>} : vector<8x128xf32>, vector<128x384xf32>, vector<8x384xf32> -> vector<8x384xf32>
    %383 = vector.broadcast %285 : vector<1x384xf32> to vector<8x384xf32>
    %384 = arith.addf %382, %383 : vector<8x384xf32>
    %385 = vector.extract_strided_slice %381 {offsets = [0, 0], sizes = [8, 128], strides = [1, 1]} : vector<8x384xf32> to vector<8x128xf32>
    %386 = vector.extract_strided_slice %384 {offsets = [0, 0], sizes = [8, 128], strides = [1, 1]} : vector<8x384xf32> to vector<8x128xf32>
    %387 = arith.addf %385, %386 : vector<8x128xf32>
    %388 = arith.negf %387 : vector<8x128xf32>
    %389 = math.exp %388 : vector<8x128xf32>
    %cst_127 = arith.constant 1.000000e+00 : f32
    %390 = vector.broadcast %cst_127 : f32 to vector<8x128xf32>
    %391 = arith.addf %390, %389 : vector<8x128xf32>
    %392 = arith.divf %390, %391 : vector<8x128xf32>
    %393 = vector.extract_strided_slice %381 {offsets = [0, 128], sizes = [8, 128], strides = [1, 1]} : vector<8x384xf32> to vector<8x128xf32>
    %394 = vector.extract_strided_slice %384 {offsets = [0, 128], sizes = [8, 128], strides = [1, 1]} : vector<8x384xf32> to vector<8x128xf32>
    %395 = arith.addf %393, %394 : vector<8x128xf32>
    %396 = arith.negf %395 : vector<8x128xf32>
    %397 = math.exp %396 : vector<8x128xf32>
    %cst_128 = arith.constant 1.000000e+00 : f32
    %398 = vector.broadcast %cst_128 : f32 to vector<8x128xf32>
    %399 = arith.addf %398, %397 : vector<8x128xf32>
    %400 = arith.divf %398, %399 : vector<8x128xf32>
    %401 = vector.extract_strided_slice %381 {offsets = [0, 256], sizes = [8, 128], strides = [1, 1]} : vector<8x384xf32> to vector<8x128xf32>
    %402 = vector.extract_strided_slice %384 {offsets = [0, 256], sizes = [8, 128], strides = [1, 1]} : vector<8x384xf32> to vector<8x128xf32>
    %403 = arith.mulf %392, %402 : vector<8x128xf32>
    %404 = arith.addf %401, %403 : vector<8x128xf32>
    %405 = math.tanh %404 : vector<8x128xf32>
    %cst_129 = arith.constant 1.000000e+00 : f32
    %406 = vector.broadcast %cst_129 : f32 to vector<8x128xf32>
    %407 = arith.subf %406, %400 : vector<8x128xf32>
    %408 = arith.mulf %407, %405 : vector<8x128xf32>
    %409 = arith.mulf %400, %379 : vector<8x128xf32>
    %410 = arith.addf %408, %409 : vector<8x128xf32>
    %c32_130 = arith.constant 32 : index
    %c0_131 = arith.constant 0 : index
    %411 = vector.load %arg16[%c32_130, %c0_131] : memref<64x128xf32, #tpu.memory_space<vmem>>, vector<8x128xf32>
    tpu.vector_store %arg16[%c32_130, %c0_131], %410 {strides = array<i32>} : memref<64x128xf32, #tpu.memory_space<vmem>>, vector<8x128xf32>,
    %c24_132 = arith.constant 24 : index
    %c0_133 = arith.constant 0 : index
    %412 = vector.load %arg14[%c24_132, %c0_133] : memref<64x384xf32, #tpu.memory_space<vmem>>, vector<8x384xf32>
    %cst_134 = arith.constant dense<0.000000e+00> : vector<8x384xf32>
    %413 = tpu.matmul %410, %283, %cst_134 {dimension_numbers = #tpu.dot_dimension_numbers<[1], [0], [0], [1], [0, 0, 1, 1], [], []>} : vector<8x128xf32>, vector<128x384xf32>, vector<8x384xf32> -> vector<8x384xf32>
    %414 = vector.broadcast %285 : vector<1x384xf32> to vector<8x384xf32>
    %415 = arith.addf %413, %414 : vector<8x384xf32>
    %416 = vector.extract_strided_slice %412 {offsets = [0, 0], sizes = [8, 128], strides = [1, 1]} : vector<8x384xf32> to vector<8x128xf32>
    %417 = vector.extract_strided_slice %415 {offsets = [0, 0], sizes = [8, 128], strides = [1, 1]} : vector<8x384xf32> to vector<8x128xf32>
    %418 = arith.addf %416, %417 : vector<8x128xf32>
    %419 = arith.negf %418 : vector<8x128xf32>
    %420 = math.exp %419 : vector<8x128xf32>
    %cst_135 = arith.constant 1.000000e+00 : f32
    %421 = vector.broadcast %cst_135 : f32 to vector<8x128xf32>
    %422 = arith.addf %421, %420 : vector<8x128xf32>
    %423 = arith.divf %421, %422 : vector<8x128xf32>
    %424 = vector.extract_strided_slice %412 {offsets = [0, 128], sizes = [8, 128], strides = [1, 1]} : vector<8x384xf32> to vector<8x128xf32>
    %425 = vector.extract_strided_slice %415 {offsets = [0, 128], sizes = [8, 128], strides = [1, 1]} : vector<8x384xf32> to vector<8x128xf32>
    %426 = arith.addf %424, %425 : vector<8x128xf32>
    %427 = arith.negf %426 : vector<8x128xf32>
    %428 = math.exp %427 : vector<8x128xf32>
    %cst_136 = arith.constant 1.000000e+00 : f32
    %429 = vector.broadcast %cst_136 : f32 to vector<8x128xf32>
    %430 = arith.addf %429, %428 : vector<8x128xf32>
    %431 = arith.divf %429, %430 : vector<8x128xf32>
    %432 = vector.extract_strided_slice %412 {offsets = [0, 256], sizes = [8, 128], strides = [1, 1]} : vector<8x384xf32> to vector<8x128xf32>
    %433 = vector.extract_strided_slice %415 {offsets = [0, 256], sizes = [8, 128], strides = [1, 1]} : vector<8x384xf32> to vector<8x128xf32>
    %434 = arith.mulf %423, %433 : vector<8x128xf32>
    %435 = arith.addf %432, %434 : vector<8x128xf32>
    %436 = math.tanh %435 : vector<8x128xf32>
    %cst_137 = arith.constant 1.000000e+00 : f32
    %437 = vector.broadcast %cst_137 : f32 to vector<8x128xf32>
    %438 = arith.subf %437, %431 : vector<8x128xf32>
    %439 = arith.mulf %438, %436 : vector<8x128xf32>
    %440 = arith.mulf %431, %410 : vector<8x128xf32>
    %441 = arith.addf %439, %440 : vector<8x128xf32>
    %c24_138 = arith.constant 24 : index
    %c0_139 = arith.constant 0 : index
    %442 = vector.load %arg16[%c24_138, %c0_139] : memref<64x128xf32, #tpu.memory_space<vmem>>, vector<8x128xf32>
    tpu.vector_store %arg16[%c24_138, %c0_139], %441 {strides = array<i32>} : memref<64x128xf32, #tpu.memory_space<vmem>>, vector<8x128xf32>,
    %c16_140 = arith.constant 16 : index
    %c0_141 = arith.constant 0 : index
    %443 = vector.load %arg14[%c16_140, %c0_141] : memref<64x384xf32, #tpu.memory_space<vmem>>, vector<8x384xf32>
    %cst_142 = arith.constant dense<0.000000e+00> : vector<8x384xf32>
    %444 = tpu.matmul %441, %283, %cst_142 {dimension_numbers = #tpu.dot_dimension_numbers<[1], [0], [0], [1], [0, 0, 1, 1], [], []>} : vector<8x128xf32>, vector<128x384xf32>, vector<8x384xf32> -> vector<8x384xf32>
    %445 = vector.broadcast %285 : vector<1x384xf32> to vector<8x384xf32>
    %446 = arith.addf %444, %445 : vector<8x384xf32>
    %447 = vector.extract_strided_slice %443 {offsets = [0, 0], sizes = [8, 128], strides = [1, 1]} : vector<8x384xf32> to vector<8x128xf32>
    %448 = vector.extract_strided_slice %446 {offsets = [0, 0], sizes = [8, 128], strides = [1, 1]} : vector<8x384xf32> to vector<8x128xf32>
    %449 = arith.addf %447, %448 : vector<8x128xf32>
    %450 = arith.negf %449 : vector<8x128xf32>
    %451 = math.exp %450 : vector<8x128xf32>
    %cst_143 = arith.constant 1.000000e+00 : f32
    %452 = vector.broadcast %cst_143 : f32 to vector<8x128xf32>
    %453 = arith.addf %452, %451 : vector<8x128xf32>
    %454 = arith.divf %452, %453 : vector<8x128xf32>
    %455 = vector.extract_strided_slice %443 {offsets = [0, 128], sizes = [8, 128], strides = [1, 1]} : vector<8x384xf32> to vector<8x128xf32>
    %456 = vector.extract_strided_slice %446 {offsets = [0, 128], sizes = [8, 128], strides = [1, 1]} : vector<8x384xf32> to vector<8x128xf32>
    %457 = arith.addf %455, %456 : vector<8x128xf32>
    %458 = arith.negf %457 : vector<8x128xf32>
    %459 = math.exp %458 : vector<8x128xf32>
    %cst_144 = arith.constant 1.000000e+00 : f32
    %460 = vector.broadcast %cst_144 : f32 to vector<8x128xf32>
    %461 = arith.addf %460, %459 : vector<8x128xf32>
    %462 = arith.divf %460, %461 : vector<8x128xf32>
    %463 = vector.extract_strided_slice %443 {offsets = [0, 256], sizes = [8, 128], strides = [1, 1]} : vector<8x384xf32> to vector<8x128xf32>
    %464 = vector.extract_strided_slice %446 {offsets = [0, 256], sizes = [8, 128], strides = [1, 1]} : vector<8x384xf32> to vector<8x128xf32>
    %465 = arith.mulf %454, %464 : vector<8x128xf32>
    %466 = arith.addf %463, %465 : vector<8x128xf32>
    %467 = math.tanh %466 : vector<8x128xf32>
    %cst_145 = arith.constant 1.000000e+00 : f32
    %468 = vector.broadcast %cst_145 : f32 to vector<8x128xf32>
    %469 = arith.subf %468, %462 : vector<8x128xf32>
    %470 = arith.mulf %469, %467 : vector<8x128xf32>
    %471 = arith.mulf %462, %441 : vector<8x128xf32>
    %472 = arith.addf %470, %471 : vector<8x128xf32>
    %c16_146 = arith.constant 16 : index
    %c0_147 = arith.constant 0 : index
    %473 = vector.load %arg16[%c16_146, %c0_147] : memref<64x128xf32, #tpu.memory_space<vmem>>, vector<8x128xf32>
    tpu.vector_store %arg16[%c16_146, %c0_147], %472 {strides = array<i32>} : memref<64x128xf32, #tpu.memory_space<vmem>>, vector<8x128xf32>,
    %c8_148 = arith.constant 8 : index
    %c0_149 = arith.constant 0 : index
    %474 = vector.load %arg14[%c8_148, %c0_149] : memref<64x384xf32, #tpu.memory_space<vmem>>, vector<8x384xf32>
    %cst_150 = arith.constant dense<0.000000e+00> : vector<8x384xf32>
    %475 = tpu.matmul %472, %283, %cst_150 {dimension_numbers = #tpu.dot_dimension_numbers<[1], [0], [0], [1], [0, 0, 1, 1], [], []>} : vector<8x128xf32>, vector<128x384xf32>, vector<8x384xf32> -> vector<8x384xf32>
    %476 = vector.broadcast %285 : vector<1x384xf32> to vector<8x384xf32>
    %477 = arith.addf %475, %476 : vector<8x384xf32>
    %478 = vector.extract_strided_slice %474 {offsets = [0, 0], sizes = [8, 128], strides = [1, 1]} : vector<8x384xf32> to vector<8x128xf32>
    %479 = vector.extract_strided_slice %477 {offsets = [0, 0], sizes = [8, 128], strides = [1, 1]} : vector<8x384xf32> to vector<8x128xf32>
    %480 = arith.addf %478, %479 : vector<8x128xf32>
    %481 = arith.negf %480 : vector<8x128xf32>
    %482 = math.exp %481 : vector<8x128xf32>
    %cst_151 = arith.constant 1.000000e+00 : f32
    %483 = vector.broadcast %cst_151 : f32 to vector<8x128xf32>
    %484 = arith.addf %483, %482 : vector<8x128xf32>
    %485 = arith.divf %483, %484 : vector<8x128xf32>
    %486 = vector.extract_strided_slice %474 {offsets = [0, 128], sizes = [8, 128], strides = [1, 1]} : vector<8x384xf32> to vector<8x128xf32>
    %487 = vector.extract_strided_slice %477 {offsets = [0, 128], sizes = [8, 128], strides = [1, 1]} : vector<8x384xf32> to vector<8x128xf32>
    %488 = arith.addf %486, %487 : vector<8x128xf32>
    %489 = arith.negf %488 : vector<8x128xf32>
    %490 = math.exp %489 : vector<8x128xf32>
    %cst_152 = arith.constant 1.000000e+00 : f32
    %491 = vector.broadcast %cst_152 : f32 to vector<8x128xf32>
    %492 = arith.addf %491, %490 : vector<8x128xf32>
    %493 = arith.divf %491, %492 : vector<8x128xf32>
    %494 = vector.extract_strided_slice %474 {offsets = [0, 256], sizes = [8, 128], strides = [1, 1]} : vector<8x384xf32> to vector<8x128xf32>
    %495 = vector.extract_strided_slice %477 {offsets = [0, 256], sizes = [8, 128], strides = [1, 1]} : vector<8x384xf32> to vector<8x128xf32>
    %496 = arith.mulf %485, %495 : vector<8x128xf32>
    %497 = arith.addf %494, %496 : vector<8x128xf32>
    %498 = math.tanh %497 : vector<8x128xf32>
    %cst_153 = arith.constant 1.000000e+00 : f32
    %499 = vector.broadcast %cst_153 : f32 to vector<8x128xf32>
    %500 = arith.subf %499, %493 : vector<8x128xf32>
    %501 = arith.mulf %500, %498 : vector<8x128xf32>
    %502 = arith.mulf %493, %472 : vector<8x128xf32>
    %503 = arith.addf %501, %502 : vector<8x128xf32>
    %c8_154 = arith.constant 8 : index
    %c0_155 = arith.constant 0 : index
    %504 = vector.load %arg16[%c8_154, %c0_155] : memref<64x128xf32, #tpu.memory_space<vmem>>, vector<8x128xf32>
    tpu.vector_store %arg16[%c8_154, %c0_155], %503 {strides = array<i32>} : memref<64x128xf32, #tpu.memory_space<vmem>>, vector<8x128xf32>,
    %c0_156 = arith.constant 0 : index
    %c0_157 = arith.constant 0 : index
    %505 = vector.load %arg14[%c0_156, %c0_157] : memref<64x384xf32, #tpu.memory_space<vmem>>, vector<8x384xf32>
    %cst_158 = arith.constant dense<0.000000e+00> : vector<8x384xf32>
    %506 = tpu.matmul %503, %283, %cst_158 {dimension_numbers = #tpu.dot_dimension_numbers<[1], [0], [0], [1], [0, 0, 1, 1], [], []>} : vector<8x128xf32>, vector<128x384xf32>, vector<8x384xf32> -> vector<8x384xf32>
    %507 = vector.broadcast %285 : vector<1x384xf32> to vector<8x384xf32>
    %508 = arith.addf %506, %507 : vector<8x384xf32>
    %509 = vector.extract_strided_slice %505 {offsets = [0, 0], sizes = [8, 128], strides = [1, 1]} : vector<8x384xf32> to vector<8x128xf32>
    %510 = vector.extract_strided_slice %508 {offsets = [0, 0], sizes = [8, 128], strides = [1, 1]} : vector<8x384xf32> to vector<8x128xf32>
    %511 = arith.addf %509, %510 : vector<8x128xf32>
    %512 = arith.negf %511 : vector<8x128xf32>
    %513 = math.exp %512 : vector<8x128xf32>
    %cst_159 = arith.constant 1.000000e+00 : f32
    %514 = vector.broadcast %cst_159 : f32 to vector<8x128xf32>
    %515 = arith.addf %514, %513 : vector<8x128xf32>
    %516 = arith.divf %514, %515 : vector<8x128xf32>
    %517 = vector.extract_strided_slice %505 {offsets = [0, 128], sizes = [8, 128], strides = [1, 1]} : vector<8x384xf32> to vector<8x128xf32>
    %518 = vector.extract_strided_slice %508 {offsets = [0, 128], sizes = [8, 128], strides = [1, 1]} : vector<8x384xf32> to vector<8x128xf32>
    %519 = arith.addf %517, %518 : vector<8x128xf32>
    %520 = arith.negf %519 : vector<8x128xf32>
    %521 = math.exp %520 : vector<8x128xf32>
    %cst_160 = arith.constant 1.000000e+00 : f32
    %522 = vector.broadcast %cst_160 : f32 to vector<8x128xf32>
    %523 = arith.addf %522, %521 : vector<8x128xf32>
    %524 = arith.divf %522, %523 : vector<8x128xf32>
    %525 = vector.extract_strided_slice %505 {offsets = [0, 256], sizes = [8, 128], strides = [1, 1]} : vector<8x384xf32> to vector<8x128xf32>
    %526 = vector.extract_strided_slice %508 {offsets = [0, 256], sizes = [8, 128], strides = [1, 1]} : vector<8x384xf32> to vector<8x128xf32>
    %527 = arith.mulf %516, %526 : vector<8x128xf32>
    %528 = arith.addf %525, %527 : vector<8x128xf32>
    %529 = math.tanh %528 : vector<8x128xf32>
    %cst_161 = arith.constant 1.000000e+00 : f32
    %530 = vector.broadcast %cst_161 : f32 to vector<8x128xf32>
    %531 = arith.subf %530, %524 : vector<8x128xf32>
    %532 = arith.mulf %531, %529 : vector<8x128xf32>
    %533 = arith.mulf %524, %503 : vector<8x128xf32>
    %534 = arith.addf %532, %533 : vector<8x128xf32>
    %c0_162 = arith.constant 0 : index
    %c0_163 = arith.constant 0 : index
    %535 = vector.load %arg16[%c0_162, %c0_163] : memref<64x128xf32, #tpu.memory_space<vmem>>, vector<8x128xf32>
    tpu.vector_store %arg16[%c0_162, %c0_163], %534 {strides = array<i32>} : memref<64x128xf32, #tpu.memory_space<vmem>>, vector<8x128xf32>,
    %c1_164 = arith.constant 1 : index
    %c0_165 = arith.constant 0 : index
    %c0_166 = arith.constant 0 : index
    %536 = vector.load %arg12[%c1_164, %c0_165, %c0_166] : memref<4x8x128xf32, #tpu.memory_space<vmem>>, vector<1x8x128xf32>
    %537 = vector.shape_cast %536 : vector<1x8x128xf32> to vector<8x128xf32>
    %538 = vector.shape_cast %534 : vector<8x128xf32> to vector<1x8x128xf32>
    tpu.vector_store %arg12[%c1_164, %c0_165, %c0_166], %538 {strides = array<i32>} : memref<4x8x128xf32, #tpu.memory_space<vmem>>, vector<1x8x128xf32>,
    %c0_167 = arith.constant 0 : index
    %c0_168 = arith.constant 0 : index
    %539 = vector.load %arg15[%c0_167, %c0_168] : memref<64x128xf32, #tpu.memory_space<vmem>>, vector<64x128xf32>
    %c0_169 = arith.constant 0 : index
    %c0_170 = arith.constant 0 : index
    %540 = vector.load %arg16[%c0_169, %c0_170] : memref<64x128xf32, #tpu.memory_space<vmem>>, vector<64x128xf32>
    %541 = tpu.concatenate %539, %540 in 1 : vector<64x128xf32>, vector<64x128xf32> -> vector<64x256xf32>
    %c0_171 = arith.constant 0 : index
    %c0_172 = arith.constant 0 : index
    %c0_173 = arith.constant 0 : index
    %542 = vector.load %arg6[%c0_171, %c0_172, %c0_173] : memref<2x256x384xf32, #tpu.memory_space<vmem>>, vector<1x256x384xf32>
    %543 = vector.shape_cast %542 : vector<1x256x384xf32> to vector<256x384xf32>
    %cst_174 = arith.constant dense<0.000000e+00> : vector<64x384xf32>
    %544 = tpu.matmul %541, %543, %cst_174 {dimension_numbers = #tpu.dot_dimension_numbers<[1], [0], [0], [1], [0, 0, 1, 1], [], []>} : vector<64x256xf32>, vector<256x384xf32>, vector<64x384xf32> -> vector<64x384xf32>
    %c0_175 = arith.constant 0 : index
    %c0_176 = arith.constant 0 : index
    %c0_177 = arith.constant 0 : index
    %545 = vector.load %arg8[%c0_175, %c0_176, %c0_177] : memref<2x1x384xf32, #tpu.memory_space<vmem>>, vector<1x1x384xf32>
    %546 = vector.shape_cast %545 : vector<1x1x384xf32> to vector<1x384xf32>
    %547 = vector.broadcast %546 : vector<1x384xf32> to vector<64x384xf32>
    %548 = arith.addf %544, %547 : vector<64x384xf32>
    %c0_178 = arith.constant 0 : index
    %c0_179 = arith.constant 0 : index
    %549 = vector.load %arg13[%c0_178, %c0_179] : memref<64x384xf32, #tpu.memory_space<vmem>>, vector<64x384xf32>
    tpu.vector_store %arg13[%c0_178, %c0_179], %548 {strides = array<i32>} : memref<64x384xf32, #tpu.memory_space<vmem>>, vector<64x384xf32>,
    %c1_180 = arith.constant 1 : index
    %c0_181 = arith.constant 0 : index
    %c0_182 = arith.constant 0 : index
    %550 = vector.load %arg6[%c1_180, %c0_181, %c0_182] : memref<2x256x384xf32, #tpu.memory_space<vmem>>, vector<1x256x384xf32>
    %551 = vector.shape_cast %550 : vector<1x256x384xf32> to vector<256x384xf32>
    %cst_183 = arith.constant dense<0.000000e+00> : vector<64x384xf32>
    %552 = tpu.matmul %541, %551, %cst_183 {dimension_numbers = #tpu.dot_dimension_numbers<[1], [0], [0], [1], [0, 0, 1, 1], [], []>} : vector<64x256xf32>, vector<256x384xf32>, vector<64x384xf32> -> vector<64x384xf32>
    %c1_184 = arith.constant 1 : index
    %c0_185 = arith.constant 0 : index
    %c0_186 = arith.constant 0 : index
    %553 = vector.load %arg8[%c1_184, %c0_185, %c0_186] : memref<2x1x384xf32, #tpu.memory_space<vmem>>, vector<1x1x384xf32>
    %554 = vector.shape_cast %553 : vector<1x1x384xf32> to vector<1x384xf32>
    %555 = vector.broadcast %554 : vector<1x384xf32> to vector<64x384xf32>
    %556 = arith.addf %552, %555 : vector<64x384xf32>
    %c0_187 = arith.constant 0 : index
    %c0_188 = arith.constant 0 : index
    %557 = vector.load %arg14[%c0_187, %c0_188] : memref<64x384xf32, #tpu.memory_space<vmem>>, vector<64x384xf32>
    tpu.vector_store %arg14[%c0_187, %c0_188], %556 {strides = array<i32>} : memref<64x384xf32, #tpu.memory_space<vmem>>, vector<64x384xf32>,
    %c0_189 = arith.constant 0 : index
    %c0_190 = arith.constant 0 : index
    %c0_191 = arith.constant 0 : index
    %558 = vector.load %arg7[%c0_189, %c0_190, %c0_191] : memref<2x128x384xf32, #tpu.memory_space<vmem>>, vector<1x128x384xf32>
    %559 = vector.shape_cast %558 : vector<1x128x384xf32> to vector<128x384xf32>
    %c0_192 = arith.constant 0 : index
    %c0_193 = arith.constant 0 : index
    %c0_194 = arith.constant 0 : index
    %560 = vector.load %arg9[%c0_192, %c0_193, %c0_194] : memref<2x1x384xf32, #tpu.memory_space<vmem>>, vector<1x1x384xf32>
    %561 = vector.shape_cast %560 : vector<1x1x384xf32> to vector<1x384xf32>
    %c2 = arith.constant 2 : index
    %c0_195 = arith.constant 0 : index
    %c0_196 = arith.constant 0 : index
    %562 = vector.load %arg10[%c2, %c0_195, %c0_196] : memref<4x8x128xf32, #tpu.memory_space<vmem>>, vector<1x8x128xf32>
    %563 = vector.shape_cast %562 : vector<1x8x128xf32> to vector<8x128xf32>
    %c0_197 = arith.constant 0 : index
    %c0_198 = arith.constant 0 : index
    %564 = vector.load %arg13[%c0_197, %c0_198] : memref<64x384xf32, #tpu.memory_space<vmem>>, vector<8x384xf32>
    %cst_199 = arith.constant dense<0.000000e+00> : vector<8x384xf32>
    %565 = tpu.matmul %563, %559, %cst_199 {dimension_numbers = #tpu.dot_dimension_numbers<[1], [0], [0], [1], [0, 0, 1, 1], [], []>} : vector<8x128xf32>, vector<128x384xf32>, vector<8x384xf32> -> vector<8x384xf32>
    %566 = vector.broadcast %561 : vector<1x384xf32> to vector<8x384xf32>
    %567 = arith.addf %565, %566 : vector<8x384xf32>
    %568 = vector.extract_strided_slice %564 {offsets = [0, 0], sizes = [8, 128], strides = [1, 1]} : vector<8x384xf32> to vector<8x128xf32>
    %569 = vector.extract_strided_slice %567 {offsets = [0, 0], sizes = [8, 128], strides = [1, 1]} : vector<8x384xf32> to vector<8x128xf32>
    %570 = arith.addf %568, %569 : vector<8x128xf32>
    %571 = arith.negf %570 : vector<8x128xf32>
    %572 = math.exp %571 : vector<8x128xf32>
    %cst_200 = arith.constant 1.000000e+00 : f32
    %573 = vector.broadcast %cst_200 : f32 to vector<8x128xf32>
    %574 = arith.addf %573, %572 : vector<8x128xf32>
    %575 = arith.divf %573, %574 : vector<8x128xf32>
    %576 = vector.extract_strided_slice %564 {offsets = [0, 128], sizes = [8, 128], strides = [1, 1]} : vector<8x384xf32> to vector<8x128xf32>
    %577 = vector.extract_strided_slice %567 {offsets = [0, 128], sizes = [8, 128], strides = [1, 1]} : vector<8x384xf32> to vector<8x128xf32>
    %578 = arith.addf %576, %577 : vector<8x128xf32>
    %579 = arith.negf %578 : vector<8x128xf32>
    %580 = math.exp %579 : vector<8x128xf32>
    %cst_201 = arith.constant 1.000000e+00 : f32
    %581 = vector.broadcast %cst_201 : f32 to vector<8x128xf32>
    %582 = arith.addf %581, %580 : vector<8x128xf32>
    %583 = arith.divf %581, %582 : vector<8x128xf32>
    %584 = vector.extract_strided_slice %564 {offsets = [0, 256], sizes = [8, 128], strides = [1, 1]} : vector<8x384xf32> to vector<8x128xf32>
    %585 = vector.extract_strided_slice %567 {offsets = [0, 256], sizes = [8, 128], strides = [1, 1]} : vector<8x384xf32> to vector<8x128xf32>
    %586 = arith.mulf %575, %585 : vector<8x128xf32>
    %587 = arith.addf %584, %586 : vector<8x128xf32>
    %588 = math.tanh %587 : vector<8x128xf32>
    %cst_202 = arith.constant 1.000000e+00 : f32
    %589 = vector.broadcast %cst_202 : f32 to vector<8x128xf32>
    %590 = arith.subf %589, %583 : vector<8x128xf32>
    %591 = arith.mulf %590, %588 : vector<8x128xf32>
    %592 = arith.mulf %583, %563 : vector<8x128xf32>
    %593 = arith.addf %591, %592 : vector<8x128xf32>
    %c0_203 = arith.constant 0 : index
    %c0_204 = arith.constant 0 : index
    %594 = vector.load %arg11[%c0_203, %c0_204] : memref<64x256xf32, #tpu.memory_space<vmem>>, vector<8x128xf32>
    tpu.vector_store %arg11[%c0_203, %c0_204], %593 {strides = array<i32>} : memref<64x256xf32, #tpu.memory_space<vmem>>, vector<8x128xf32>,
    %c8_205 = arith.constant 8 : index
    %c0_206 = arith.constant 0 : index
    %595 = vector.load %arg13[%c8_205, %c0_206] : memref<64x384xf32, #tpu.memory_space<vmem>>, vector<8x384xf32>
    %cst_207 = arith.constant dense<0.000000e+00> : vector<8x384xf32>
    %596 = tpu.matmul %593, %559, %cst_207 {dimension_numbers = #tpu.dot_dimension_numbers<[1], [0], [0], [1], [0, 0, 1, 1], [], []>} : vector<8x128xf32>, vector<128x384xf32>, vector<8x384xf32> -> vector<8x384xf32>
    %597 = vector.broadcast %561 : vector<1x384xf32> to vector<8x384xf32>
    %598 = arith.addf %596, %597 : vector<8x384xf32>
    %599 = vector.extract_strided_slice %595 {offsets = [0, 0], sizes = [8, 128], strides = [1, 1]} : vector<8x384xf32> to vector<8x128xf32>
    %600 = vector.extract_strided_slice %598 {offsets = [0, 0], sizes = [8, 128], strides = [1, 1]} : vector<8x384xf32> to vector<8x128xf32>
    %601 = arith.addf %599, %600 : vector<8x128xf32>
    %602 = arith.negf %601 : vector<8x128xf32>
    %603 = math.exp %602 : vector<8x128xf32>
    %cst_208 = arith.constant 1.000000e+00 : f32
    %604 = vector.broadcast %cst_208 : f32 to vector<8x128xf32>
    %605 = arith.addf %604, %603 : vector<8x128xf32>
    %606 = arith.divf %604, %605 : vector<8x128xf32>
    %607 = vector.extract_strided_slice %595 {offsets = [0, 128], sizes = [8, 128], strides = [1, 1]} : vector<8x384xf32> to vector<8x128xf32>
    %608 = vector.extract_strided_slice %598 {offsets = [0, 128], sizes = [8, 128], strides = [1, 1]} : vector<8x384xf32> to vector<8x128xf32>
    %609 = arith.addf %607, %608 : vector<8x128xf32>
    %610 = arith.negf %609 : vector<8x128xf32>
    %611 = math.exp %610 : vector<8x128xf32>
    %cst_209 = arith.constant 1.000000e+00 : f32
    %612 = vector.broadcast %cst_209 : f32 to vector<8x128xf32>
    %613 = arith.addf %612, %611 : vector<8x128xf32>
    %614 = arith.divf %612, %613 : vector<8x128xf32>
    %615 = vector.extract_strided_slice %595 {offsets = [0, 256], sizes = [8, 128], strides = [1, 1]} : vector<8x384xf32> to vector<8x128xf32>
    %616 = vector.extract_strided_slice %598 {offsets = [0, 256], sizes = [8, 128], strides = [1, 1]} : vector<8x384xf32> to vector<8x128xf32>
    %617 = arith.mulf %606, %616 : vector<8x128xf32>
    %618 = arith.addf %615, %617 : vector<8x128xf32>
    %619 = math.tanh %618 : vector<8x128xf32>
    %cst_210 = arith.constant 1.000000e+00 : f32
    %620 = vector.broadcast %cst_210 : f32 to vector<8x128xf32>
    %621 = arith.subf %620, %614 : vector<8x128xf32>
    %622 = arith.mulf %621, %619 : vector<8x128xf32>
    %623 = arith.mulf %614, %593 : vector<8x128xf32>
    %624 = arith.addf %622, %623 : vector<8x128xf32>
    %c8_211 = arith.constant 8 : index
    %c0_212 = arith.constant 0 : index
    %625 = vector.load %arg11[%c8_211, %c0_212] : memref<64x256xf32, #tpu.memory_space<vmem>>, vector<8x128xf32>
    tpu.vector_store %arg11[%c8_211, %c0_212], %624 {strides = array<i32>} : memref<64x256xf32, #tpu.memory_space<vmem>>, vector<8x128xf32>,
    %c16_213 = arith.constant 16 : index
    %c0_214 = arith.constant 0 : index
    %626 = vector.load %arg13[%c16_213, %c0_214] : memref<64x384xf32, #tpu.memory_space<vmem>>, vector<8x384xf32>
    %cst_215 = arith.constant dense<0.000000e+00> : vector<8x384xf32>
    %627 = tpu.matmul %624, %559, %cst_215 {dimension_numbers = #tpu.dot_dimension_numbers<[1], [0], [0], [1], [0, 0, 1, 1], [], []>} : vector<8x128xf32>, vector<128x384xf32>, vector<8x384xf32> -> vector<8x384xf32>
    %628 = vector.broadcast %561 : vector<1x384xf32> to vector<8x384xf32>
    %629 = arith.addf %627, %628 : vector<8x384xf32>
    %630 = vector.extract_strided_slice %626 {offsets = [0, 0], sizes = [8, 128], strides = [1, 1]} : vector<8x384xf32> to vector<8x128xf32>
    %631 = vector.extract_strided_slice %629 {offsets = [0, 0], sizes = [8, 128], strides = [1, 1]} : vector<8x384xf32> to vector<8x128xf32>
    %632 = arith.addf %630, %631 : vector<8x128xf32>
    %633 = arith.negf %632 : vector<8x128xf32>
    %634 = math.exp %633 : vector<8x128xf32>
    %cst_216 = arith.constant 1.000000e+00 : f32
    %635 = vector.broadcast %cst_216 : f32 to vector<8x128xf32>
    %636 = arith.addf %635, %634 : vector<8x128xf32>
    %637 = arith.divf %635, %636 : vector<8x128xf32>
    %638 = vector.extract_strided_slice %626 {offsets = [0, 128], sizes = [8, 128], strides = [1, 1]} : vector<8x384xf32> to vector<8x128xf32>
    %639 = vector.extract_strided_slice %629 {offsets = [0, 128], sizes = [8, 128], strides = [1, 1]} : vector<8x384xf32> to vector<8x128xf32>
    %640 = arith.addf %638, %639 : vector<8x128xf32>
    %641 = arith.negf %640 : vector<8x128xf32>
    %642 = math.exp %641 : vector<8x128xf32>
    %cst_217 = arith.constant 1.000000e+00 : f32
    %643 = vector.broadcast %cst_217 : f32 to vector<8x128xf32>
    %644 = arith.addf %643, %642 : vector<8x128xf32>
    %645 = arith.divf %643, %644 : vector<8x128xf32>
    %646 = vector.extract_strided_slice %626 {offsets = [0, 256], sizes = [8, 128], strides = [1, 1]} : vector<8x384xf32> to vector<8x128xf32>
    %647 = vector.extract_strided_slice %629 {offsets = [0, 256], sizes = [8, 128], strides = [1, 1]} : vector<8x384xf32> to vector<8x128xf32>
    %648 = arith.mulf %637, %647 : vector<8x128xf32>
    %649 = arith.addf %646, %648 : vector<8x128xf32>
    %650 = math.tanh %649 : vector<8x128xf32>
    %cst_218 = arith.constant 1.000000e+00 : f32
    %651 = vector.broadcast %cst_218 : f32 to vector<8x128xf32>
    %652 = arith.subf %651, %645 : vector<8x128xf32>
    %653 = arith.mulf %652, %650 : vector<8x128xf32>
    %654 = arith.mulf %645, %624 : vector<8x128xf32>
    %655 = arith.addf %653, %654 : vector<8x128xf32>
    %c16_219 = arith.constant 16 : index
    %c0_220 = arith.constant 0 : index
    %656 = vector.load %arg11[%c16_219, %c0_220] : memref<64x256xf32, #tpu.memory_space<vmem>>, vector<8x128xf32>
    tpu.vector_store %arg11[%c16_219, %c0_220], %655 {strides = array<i32>} : memref<64x256xf32, #tpu.memory_space<vmem>>, vector<8x128xf32>,
    %c24_221 = arith.constant 24 : index
    %c0_222 = arith.constant 0 : index
    %657 = vector.load %arg13[%c24_221, %c0_222] : memref<64x384xf32, #tpu.memory_space<vmem>>, vector<8x384xf32>
    %cst_223 = arith.constant dense<0.000000e+00> : vector<8x384xf32>
    %658 = tpu.matmul %655, %559, %cst_223 {dimension_numbers = #tpu.dot_dimension_numbers<[1], [0], [0], [1], [0, 0, 1, 1], [], []>} : vector<8x128xf32>, vector<128x384xf32>, vector<8x384xf32> -> vector<8x384xf32>
    %659 = vector.broadcast %561 : vector<1x384xf32> to vector<8x384xf32>
    %660 = arith.addf %658, %659 : vector<8x384xf32>
    %661 = vector.extract_strided_slice %657 {offsets = [0, 0], sizes = [8, 128], strides = [1, 1]} : vector<8x384xf32> to vector<8x128xf32>
    %662 = vector.extract_strided_slice %660 {offsets = [0, 0], sizes = [8, 128], strides = [1, 1]} : vector<8x384xf32> to vector<8x128xf32>
    %663 = arith.addf %661, %662 : vector<8x128xf32>
    %664 = arith.negf %663 : vector<8x128xf32>
    %665 = math.exp %664 : vector<8x128xf32>
    %cst_224 = arith.constant 1.000000e+00 : f32
    %666 = vector.broadcast %cst_224 : f32 to vector<8x128xf32>
    %667 = arith.addf %666, %665 : vector<8x128xf32>
    %668 = arith.divf %666, %667 : vector<8x128xf32>
    %669 = vector.extract_strided_slice %657 {offsets = [0, 128], sizes = [8, 128], strides = [1, 1]} : vector<8x384xf32> to vector<8x128xf32>
    %670 = vector.extract_strided_slice %660 {offsets = [0, 128], sizes = [8, 128], strides = [1, 1]} : vector<8x384xf32> to vector<8x128xf32>
    %671 = arith.addf %669, %670 : vector<8x128xf32>
    %672 = arith.negf %671 : vector<8x128xf32>
    %673 = math.exp %672 : vector<8x128xf32>
    %cst_225 = arith.constant 1.000000e+00 : f32
    %674 = vector.broadcast %cst_225 : f32 to vector<8x128xf32>
    %675 = arith.addf %674, %673 : vector<8x128xf32>
    %676 = arith.divf %674, %675 : vector<8x128xf32>
    %677 = vector.extract_strided_slice %657 {offsets = [0, 256], sizes = [8, 128], strides = [1, 1]} : vector<8x384xf32> to vector<8x128xf32>
    %678 = vector.extract_strided_slice %660 {offsets = [0, 256], sizes = [8, 128], strides = [1, 1]} : vector<8x384xf32> to vector<8x128xf32>
    %679 = arith.mulf %668, %678 : vector<8x128xf32>
    %680 = arith.addf %677, %679 : vector<8x128xf32>
    %681 = math.tanh %680 : vector<8x128xf32>
    %cst_226 = arith.constant 1.000000e+00 : f32
    %682 = vector.broadcast %cst_226 : f32 to vector<8x128xf32>
    %683 = arith.subf %682, %676 : vector<8x128xf32>
    %684 = arith.mulf %683, %681 : vector<8x128xf32>
    %685 = arith.mulf %676, %655 : vector<8x128xf32>
    %686 = arith.addf %684, %685 : vector<8x128xf32>
    %c24_227 = arith.constant 24 : index
    %c0_228 = arith.constant 0 : index
    %687 = vector.load %arg11[%c24_227, %c0_228] : memref<64x256xf32, #tpu.memory_space<vmem>>, vector<8x128xf32>
    tpu.vector_store %arg11[%c24_227, %c0_228], %686 {strides = array<i32>} : memref<64x256xf32, #tpu.memory_space<vmem>>, vector<8x128xf32>,
    %c32_229 = arith.constant 32 : index
    %c0_230 = arith.constant 0 : index
    %688 = vector.load %arg13[%c32_229, %c0_230] : memref<64x384xf32, #tpu.memory_space<vmem>>, vector<8x384xf32>
    %cst_231 = arith.constant dense<0.000000e+00> : vector<8x384xf32>
    %689 = tpu.matmul %686, %559, %cst_231 {dimension_numbers = #tpu.dot_dimension_numbers<[1], [0], [0], [1], [0, 0, 1, 1], [], []>} : vector<8x128xf32>, vector<128x384xf32>, vector<8x384xf32> -> vector<8x384xf32>
    %690 = vector.broadcast %561 : vector<1x384xf32> to vector<8x384xf32>
    %691 = arith.addf %689, %690 : vector<8x384xf32>
    %692 = vector.extract_strided_slice %688 {offsets = [0, 0], sizes = [8, 128], strides = [1, 1]} : vector<8x384xf32> to vector<8x128xf32>
    %693 = vector.extract_strided_slice %691 {offsets = [0, 0], sizes = [8, 128], strides = [1, 1]} : vector<8x384xf32> to vector<8x128xf32>
    %694 = arith.addf %692, %693 : vector<8x128xf32>
    %695 = arith.negf %694 : vector<8x128xf32>
    %696 = math.exp %695 : vector<8x128xf32>
    %cst_232 = arith.constant 1.000000e+00 : f32
    %697 = vector.broadcast %cst_232 : f32 to vector<8x128xf32>
    %698 = arith.addf %697, %696 : vector<8x128xf32>
    %699 = arith.divf %697, %698 : vector<8x128xf32>
    %700 = vector.extract_strided_slice %688 {offsets = [0, 128], sizes = [8, 128], strides = [1, 1]} : vector<8x384xf32> to vector<8x128xf32>
    %701 = vector.extract_strided_slice %691 {offsets = [0, 128], sizes = [8, 128], strides = [1, 1]} : vector<8x384xf32> to vector<8x128xf32>
    %702 = arith.addf %700, %701 : vector<8x128xf32>
    %703 = arith.negf %702 : vector<8x128xf32>
    %704 = math.exp %703 : vector<8x128xf32>
    %cst_233 = arith.constant 1.000000e+00 : f32
    %705 = vector.broadcast %cst_233 : f32 to vector<8x128xf32>
    %706 = arith.addf %705, %704 : vector<8x128xf32>
    %707 = arith.divf %705, %706 : vector<8x128xf32>
    %708 = vector.extract_strided_slice %688 {offsets = [0, 256], sizes = [8, 128], strides = [1, 1]} : vector<8x384xf32> to vector<8x128xf32>
    %709 = vector.extract_strided_slice %691 {offsets = [0, 256], sizes = [8, 128], strides = [1, 1]} : vector<8x384xf32> to vector<8x128xf32>
    %710 = arith.mulf %699, %709 : vector<8x128xf32>
    %711 = arith.addf %708, %710 : vector<8x128xf32>
    %712 = math.tanh %711 : vector<8x128xf32>
    %cst_234 = arith.constant 1.000000e+00 : f32
    %713 = vector.broadcast %cst_234 : f32 to vector<8x128xf32>
    %714 = arith.subf %713, %707 : vector<8x128xf32>
    %715 = arith.mulf %714, %712 : vector<8x128xf32>
    %716 = arith.mulf %707, %686 : vector<8x128xf32>
    %717 = arith.addf %715, %716 : vector<8x128xf32>
    %c32_235 = arith.constant 32 : index
    %c0_236 = arith.constant 0 : index
    %718 = vector.load %arg11[%c32_235, %c0_236] : memref<64x256xf32, #tpu.memory_space<vmem>>, vector<8x128xf32>
    tpu.vector_store %arg11[%c32_235, %c0_236], %717 {strides = array<i32>} : memref<64x256xf32, #tpu.memory_space<vmem>>, vector<8x128xf32>,
    %c40_237 = arith.constant 40 : index
    %c0_238 = arith.constant 0 : index
    %719 = vector.load %arg13[%c40_237, %c0_238] : memref<64x384xf32, #tpu.memory_space<vmem>>, vector<8x384xf32>
    %cst_239 = arith.constant dense<0.000000e+00> : vector<8x384xf32>
    %720 = tpu.matmul %717, %559, %cst_239 {dimension_numbers = #tpu.dot_dimension_numbers<[1], [0], [0], [1], [0, 0, 1, 1], [], []>} : vector<8x128xf32>, vector<128x384xf32>, vector<8x384xf32> -> vector<8x384xf32>
    %721 = vector.broadcast %561 : vector<1x384xf32> to vector<8x384xf32>
    %722 = arith.addf %720, %721 : vector<8x384xf32>
    %723 = vector.extract_strided_slice %719 {offsets = [0, 0], sizes = [8, 128], strides = [1, 1]} : vector<8x384xf32> to vector<8x128xf32>
    %724 = vector.extract_strided_slice %722 {offsets = [0, 0], sizes = [8, 128], strides = [1, 1]} : vector<8x384xf32> to vector<8x128xf32>
    %725 = arith.addf %723, %724 : vector<8x128xf32>
    %726 = arith.negf %725 : vector<8x128xf32>
    %727 = math.exp %726 : vector<8x128xf32>
    %cst_240 = arith.constant 1.000000e+00 : f32
    %728 = vector.broadcast %cst_240 : f32 to vector<8x128xf32>
    %729 = arith.addf %728, %727 : vector<8x128xf32>
    %730 = arith.divf %728, %729 : vector<8x128xf32>
    %731 = vector.extract_strided_slice %719 {offsets = [0, 128], sizes = [8, 128], strides = [1, 1]} : vector<8x384xf32> to vector<8x128xf32>
    %732 = vector.extract_strided_slice %722 {offsets = [0, 128], sizes = [8, 128], strides = [1, 1]} : vector<8x384xf32> to vector<8x128xf32>
    %733 = arith.addf %731, %732 : vector<8x128xf32>
    %734 = arith.negf %733 : vector<8x128xf32>
    %735 = math.exp %734 : vector<8x128xf32>
    %cst_241 = arith.constant 1.000000e+00 : f32
    %736 = vector.broadcast %cst_241 : f32 to vector<8x128xf32>
    %737 = arith.addf %736, %735 : vector<8x128xf32>
    %738 = arith.divf %736, %737 : vector<8x128xf32>
    %739 = vector.extract_strided_slice %719 {offsets = [0, 256], sizes = [8, 128], strides = [1, 1]} : vector<8x384xf32> to vector<8x128xf32>
    %740 = vector.extract_strided_slice %722 {offsets = [0, 256], sizes = [8, 128], strides = [1, 1]} : vector<8x384xf32> to vector<8x128xf32>
    %741 = arith.mulf %730, %740 : vector<8x128xf32>
    %742 = arith.addf %739, %741 : vector<8x128xf32>
    %743 = math.tanh %742 : vector<8x128xf32>
    %cst_242 = arith.constant 1.000000e+00 : f32
    %744 = vector.broadcast %cst_242 : f32 to vector<8x128xf32>
    %745 = arith.subf %744, %738 : vector<8x128xf32>
    %746 = arith.mulf %745, %743 : vector<8x128xf32>
    %747 = arith.mulf %738, %717 : vector<8x128xf32>
    %748 = arith.addf %746, %747 : vector<8x128xf32>
    %c40_243 = arith.constant 40 : index
    %c0_244 = arith.constant 0 : index
    %749 = vector.load %arg11[%c40_243, %c0_244] : memref<64x256xf32, #tpu.memory_space<vmem>>, vector<8x128xf32>
    tpu.vector_store %arg11[%c40_243, %c0_244], %748 {strides = array<i32>} : memref<64x256xf32, #tpu.memory_space<vmem>>, vector<8x128xf32>,
    %c48_245 = arith.constant 48 : index
    %c0_246 = arith.constant 0 : index
    %750 = vector.load %arg13[%c48_245, %c0_246] : memref<64x384xf32, #tpu.memory_space<vmem>>, vector<8x384xf32>
    %cst_247 = arith.constant dense<0.000000e+00> : vector<8x384xf32>
    %751 = tpu.matmul %748, %559, %cst_247 {dimension_numbers = #tpu.dot_dimension_numbers<[1], [0], [0], [1], [0, 0, 1, 1], [], []>} : vector<8x128xf32>, vector<128x384xf32>, vector<8x384xf32> -> vector<8x384xf32>
    %752 = vector.broadcast %561 : vector<1x384xf32> to vector<8x384xf32>
    %753 = arith.addf %751, %752 : vector<8x384xf32>
    %754 = vector.extract_strided_slice %750 {offsets = [0, 0], sizes = [8, 128], strides = [1, 1]} : vector<8x384xf32> to vector<8x128xf32>
    %755 = vector.extract_strided_slice %753 {offsets = [0, 0], sizes = [8, 128], strides = [1, 1]} : vector<8x384xf32> to vector<8x128xf32>
    %756 = arith.addf %754, %755 : vector<8x128xf32>
    %757 = arith.negf %756 : vector<8x128xf32>
    %758 = math.exp %757 : vector<8x128xf32>
    %cst_248 = arith.constant 1.000000e+00 : f32
    %759 = vector.broadcast %cst_248 : f32 to vector<8x128xf32>
    %760 = arith.addf %759, %758 : vector<8x128xf32>
    %761 = arith.divf %759, %760 : vector<8x128xf32>
    %762 = vector.extract_strided_slice %750 {offsets = [0, 128], sizes = [8, 128], strides = [1, 1]} : vector<8x384xf32> to vector<8x128xf32>
    %763 = vector.extract_strided_slice %753 {offsets = [0, 128], sizes = [8, 128], strides = [1, 1]} : vector<8x384xf32> to vector<8x128xf32>
    %764 = arith.addf %762, %763 : vector<8x128xf32>
    %765 = arith.negf %764 : vector<8x128xf32>
    %766 = math.exp %765 : vector<8x128xf32>
    %cst_249 = arith.constant 1.000000e+00 : f32
    %767 = vector.broadcast %cst_249 : f32 to vector<8x128xf32>
    %768 = arith.addf %767, %766 : vector<8x128xf32>
    %769 = arith.divf %767, %768 : vector<8x128xf32>
    %770 = vector.extract_strided_slice %750 {offsets = [0, 256], sizes = [8, 128], strides = [1, 1]} : vector<8x384xf32> to vector<8x128xf32>
    %771 = vector.extract_strided_slice %753 {offsets = [0, 256], sizes = [8, 128], strides = [1, 1]} : vector<8x384xf32> to vector<8x128xf32>
    %772 = arith.mulf %761, %771 : vector<8x128xf32>
    %773 = arith.addf %770, %772 : vector<8x128xf32>
    %774 = math.tanh %773 : vector<8x128xf32>
    %cst_250 = arith.constant 1.000000e+00 : f32
    %775 = vector.broadcast %cst_250 : f32 to vector<8x128xf32>
    %776 = arith.subf %775, %769 : vector<8x128xf32>
    %777 = arith.mulf %776, %774 : vector<8x128xf32>
    %778 = arith.mulf %769, %748 : vector<8x128xf32>
    %779 = arith.addf %777, %778 : vector<8x128xf32>
    %c48_251 = arith.constant 48 : index
    %c0_252 = arith.constant 0 : index
    %780 = vector.load %arg11[%c48_251, %c0_252] : memref<64x256xf32, #tpu.memory_space<vmem>>, vector<8x128xf32>
    tpu.vector_store %arg11[%c48_251, %c0_252], %779 {strides = array<i32>} : memref<64x256xf32, #tpu.memory_space<vmem>>, vector<8x128xf32>,
    %c56_253 = arith.constant 56 : index
    %c0_254 = arith.constant 0 : index
    %781 = vector.load %arg13[%c56_253, %c0_254] : memref<64x384xf32, #tpu.memory_space<vmem>>, vector<8x384xf32>
    %cst_255 = arith.constant dense<0.000000e+00> : vector<8x384xf32>
    %782 = tpu.matmul %779, %559, %cst_255 {dimension_numbers = #tpu.dot_dimension_numbers<[1], [0], [0], [1], [0, 0, 1, 1], [], []>} : vector<8x128xf32>, vector<128x384xf32>, vector<8x384xf32> -> vector<8x384xf32>
    %783 = vector.broadcast %561 : vector<1x384xf32> to vector<8x384xf32>
    %784 = arith.addf %782, %783 : vector<8x384xf32>
    %785 = vector.extract_strided_slice %781 {offsets = [0, 0], sizes = [8, 128], strides = [1, 1]} : vector<8x384xf32> to vector<8x128xf32>
    %786 = vector.extract_strided_slice %784 {offsets = [0, 0], sizes = [8, 128], strides = [1, 1]} : vector<8x384xf32> to vector<8x128xf32>
    %787 = arith.addf %785, %786 : vector<8x128xf32>
    %788 = arith.negf %787 : vector<8x128xf32>
    %789 = math.exp %788 : vector<8x128xf32>
    %cst_256 = arith.constant 1.000000e+00 : f32
    %790 = vector.broadcast %cst_256 : f32 to vector<8x128xf32>
    %791 = arith.addf %790, %789 : vector<8x128xf32>
    %792 = arith.divf %790, %791 : vector<8x128xf32>
    %793 = vector.extract_strided_slice %781 {offsets = [0, 128], sizes = [8, 128], strides = [1, 1]} : vector<8x384xf32> to vector<8x128xf32>
    %794 = vector.extract_strided_slice %784 {offsets = [0, 128], sizes = [8, 128], strides = [1, 1]} : vector<8x384xf32> to vector<8x128xf32>
    %795 = arith.addf %793, %794 : vector<8x128xf32>
    %796 = arith.negf %795 : vector<8x128xf32>
    %797 = math.exp %796 : vector<8x128xf32>
    %cst_257 = arith.constant 1.000000e+00 : f32
    %798 = vector.broadcast %cst_257 : f32 to vector<8x128xf32>
    %799 = arith.addf %798, %797 : vector<8x128xf32>
    %800 = arith.divf %798, %799 : vector<8x128xf32>
    %801 = vector.extract_strided_slice %781 {offsets = [0, 256], sizes = [8, 128], strides = [1, 1]} : vector<8x384xf32> to vector<8x128xf32>
    %802 = vector.extract_strided_slice %784 {offsets = [0, 256], sizes = [8, 128], strides = [1, 1]} : vector<8x384xf32> to vector<8x128xf32>
    %803 = arith.mulf %792, %802 : vector<8x128xf32>
    %804 = arith.addf %801, %803 : vector<8x128xf32>
    %805 = math.tanh %804 : vector<8x128xf32>
    %cst_258 = arith.constant 1.000000e+00 : f32
    %806 = vector.broadcast %cst_258 : f32 to vector<8x128xf32>
    %807 = arith.subf %806, %800 : vector<8x128xf32>
    %808 = arith.mulf %807, %805 : vector<8x128xf32>
    %809 = arith.mulf %800, %779 : vector<8x128xf32>
    %810 = arith.addf %808, %809 : vector<8x128xf32>
    %c56_259 = arith.constant 56 : index
    %c0_260 = arith.constant 0 : index
    %811 = vector.load %arg11[%c56_259, %c0_260] : memref<64x256xf32, #tpu.memory_space<vmem>>, vector<8x128xf32>
    tpu.vector_store %arg11[%c56_259, %c0_260], %810 {strides = array<i32>} : memref<64x256xf32, #tpu.memory_space<vmem>>, vector<8x128xf32>,
    %c2_261 = arith.constant 2 : index
    %c0_262 = arith.constant 0 : index
    %c0_263 = arith.constant 0 : index
    %812 = vector.load %arg12[%c2_261, %c0_262, %c0_263] : memref<4x8x128xf32, #tpu.memory_space<vmem>>, vector<1x8x128xf32>
    %813 = vector.shape_cast %812 : vector<1x8x128xf32> to vector<8x128xf32>
    %814 = vector.shape_cast %810 : vector<8x128xf32> to vector<1x8x128xf32>
    tpu.vector_store %arg12[%c2_261, %c0_262, %c0_263], %814 {strides = array<i32>} : memref<4x8x128xf32, #tpu.memory_space<vmem>>, vector<1x8x128xf32>,
    %c1_264 = arith.constant 1 : index
    %c0_265 = arith.constant 0 : index
    %c0_266 = arith.constant 0 : index
    %815 = vector.load %arg7[%c1_264, %c0_265, %c0_266] : memref<2x128x384xf32, #tpu.memory_space<vmem>>, vector<1x128x384xf32>
    %816 = vector.shape_cast %815 : vector<1x128x384xf32> to vector<128x384xf32>
    %c1_267 = arith.constant 1 : index
    %c0_268 = arith.constant 0 : index
    %c0_269 = arith.constant 0 : index
    %817 = vector.load %arg9[%c1_267, %c0_268, %c0_269] : memref<2x1x384xf32, #tpu.memory_space<vmem>>, vector<1x1x384xf32>
    %818 = vector.shape_cast %817 : vector<1x1x384xf32> to vector<1x384xf32>
    %c3 = arith.constant 3 : index
    %c0_270 = arith.constant 0 : index
    %c0_271 = arith.constant 0 : index
    %819 = vector.load %arg10[%c3, %c0_270, %c0_271] : memref<4x8x128xf32, #tpu.memory_space<vmem>>, vector<1x8x128xf32>
    %820 = vector.shape_cast %819 : vector<1x8x128xf32> to vector<8x128xf32>
    %c56_272 = arith.constant 56 : index
    %c0_273 = arith.constant 0 : index
    %821 = vector.load %arg14[%c56_272, %c0_273] : memref<64x384xf32, #tpu.memory_space<vmem>>, vector<8x384xf32>
    %cst_274 = arith.constant dense<0.000000e+00> : vector<8x384xf32>
    %822 = tpu.matmul %820, %816, %cst_274 {dimension_numbers = #tpu.dot_dimension_numbers<[1], [0], [0], [1], [0, 0, 1, 1], [], []>} : vector<8x128xf32>, vector<128x384xf32>, vector<8x384xf32> -> vector<8x384xf32>
    %823 = vector.broadcast %818 : vector<1x384xf32> to vector<8x384xf32>
    %824 = arith.addf %822, %823 : vector<8x384xf32>
    %825 = vector.extract_strided_slice %821 {offsets = [0, 0], sizes = [8, 128], strides = [1, 1]} : vector<8x384xf32> to vector<8x128xf32>
    %826 = vector.extract_strided_slice %824 {offsets = [0, 0], sizes = [8, 128], strides = [1, 1]} : vector<8x384xf32> to vector<8x128xf32>
    %827 = arith.addf %825, %826 : vector<8x128xf32>
    %828 = arith.negf %827 : vector<8x128xf32>
    %829 = math.exp %828 : vector<8x128xf32>
    %cst_275 = arith.constant 1.000000e+00 : f32
    %830 = vector.broadcast %cst_275 : f32 to vector<8x128xf32>
    %831 = arith.addf %830, %829 : vector<8x128xf32>
    %832 = arith.divf %830, %831 : vector<8x128xf32>
    %833 = vector.extract_strided_slice %821 {offsets = [0, 128], sizes = [8, 128], strides = [1, 1]} : vector<8x384xf32> to vector<8x128xf32>
    %834 = vector.extract_strided_slice %824 {offsets = [0, 128], sizes = [8, 128], strides = [1, 1]} : vector<8x384xf32> to vector<8x128xf32>
    %835 = arith.addf %833, %834 : vector<8x128xf32>
    %836 = arith.negf %835 : vector<8x128xf32>
    %837 = math.exp %836 : vector<8x128xf32>
    %cst_276 = arith.constant 1.000000e+00 : f32
    %838 = vector.broadcast %cst_276 : f32 to vector<8x128xf32>
    %839 = arith.addf %838, %837 : vector<8x128xf32>
    %840 = arith.divf %838, %839 : vector<8x128xf32>
    %841 = vector.extract_strided_slice %821 {offsets = [0, 256], sizes = [8, 128], strides = [1, 1]} : vector<8x384xf32> to vector<8x128xf32>
    %842 = vector.extract_strided_slice %824 {offsets = [0, 256], sizes = [8, 128], strides = [1, 1]} : vector<8x384xf32> to vector<8x128xf32>
    %843 = arith.mulf %832, %842 : vector<8x128xf32>
    %844 = arith.addf %841, %843 : vector<8x128xf32>
    %845 = math.tanh %844 : vector<8x128xf32>
    %cst_277 = arith.constant 1.000000e+00 : f32
    %846 = vector.broadcast %cst_277 : f32 to vector<8x128xf32>
    %847 = arith.subf %846, %840 : vector<8x128xf32>
    %848 = arith.mulf %847, %845 : vector<8x128xf32>
    %849 = arith.mulf %840, %820 : vector<8x128xf32>
    %850 = arith.addf %848, %849 : vector<8x128xf32>
    %c56_278 = arith.constant 56 : index
    %c128 = arith.constant 128 : index
    %851 = vector.load %arg11[%c56_278, %c128] : memref<64x256xf32, #tpu.memory_space<vmem>>, vector<8x128xf32>
    tpu.vector_store %arg11[%c56_278, %c128], %850 {strides = array<i32>} : memref<64x256xf32, #tpu.memory_space<vmem>>, vector<8x128xf32>,
    %c48_279 = arith.constant 48 : index
    %c0_280 = arith.constant 0 : index
    %852 = vector.load %arg14[%c48_279, %c0_280] : memref<64x384xf32, #tpu.memory_space<vmem>>, vector<8x384xf32>
    %cst_281 = arith.constant dense<0.000000e+00> : vector<8x384xf32>
    %853 = tpu.matmul %850, %816, %cst_281 {dimension_numbers = #tpu.dot_dimension_numbers<[1], [0], [0], [1], [0, 0, 1, 1], [], []>} : vector<8x128xf32>, vector<128x384xf32>, vector<8x384xf32> -> vector<8x384xf32>
    %854 = vector.broadcast %818 : vector<1x384xf32> to vector<8x384xf32>
    %855 = arith.addf %853, %854 : vector<8x384xf32>
    %856 = vector.extract_strided_slice %852 {offsets = [0, 0], sizes = [8, 128], strides = [1, 1]} : vector<8x384xf32> to vector<8x128xf32>
    %857 = vector.extract_strided_slice %855 {offsets = [0, 0], sizes = [8, 128], strides = [1, 1]} : vector<8x384xf32> to vector<8x128xf32>
    %858 = arith.addf %856, %857 : vector<8x128xf32>
    %859 = arith.negf %858 : vector<8x128xf32>
    %860 = math.exp %859 : vector<8x128xf32>
    %cst_282 = arith.constant 1.000000e+00 : f32
    %861 = vector.broadcast %cst_282 : f32 to vector<8x128xf32>
    %862 = arith.addf %861, %860 : vector<8x128xf32>
    %863 = arith.divf %861, %862 : vector<8x128xf32>
    %864 = vector.extract_strided_slice %852 {offsets = [0, 128], sizes = [8, 128], strides = [1, 1]} : vector<8x384xf32> to vector<8x128xf32>
    %865 = vector.extract_strided_slice %855 {offsets = [0, 128], sizes = [8, 128], strides = [1, 1]} : vector<8x384xf32> to vector<8x128xf32>
    %866 = arith.addf %864, %865 : vector<8x128xf32>
    %867 = arith.negf %866 : vector<8x128xf32>
    %868 = math.exp %867 : vector<8x128xf32>
    %cst_283 = arith.constant 1.000000e+00 : f32
    %869 = vector.broadcast %cst_283 : f32 to vector<8x128xf32>
    %870 = arith.addf %869, %868 : vector<8x128xf32>
    %871 = arith.divf %869, %870 : vector<8x128xf32>
    %872 = vector.extract_strided_slice %852 {offsets = [0, 256], sizes = [8, 128], strides = [1, 1]} : vector<8x384xf32> to vector<8x128xf32>
    %873 = vector.extract_strided_slice %855 {offsets = [0, 256], sizes = [8, 128], strides = [1, 1]} : vector<8x384xf32> to vector<8x128xf32>
    %874 = arith.mulf %863, %873 : vector<8x128xf32>
    %875 = arith.addf %872, %874 : vector<8x128xf32>
    %876 = math.tanh %875 : vector<8x128xf32>
    %cst_284 = arith.constant 1.000000e+00 : f32
    %877 = vector.broadcast %cst_284 : f32 to vector<8x128xf32>
    %878 = arith.subf %877, %871 : vector<8x128xf32>
    %879 = arith.mulf %878, %876 : vector<8x128xf32>
    %880 = arith.mulf %871, %850 : vector<8x128xf32>
    %881 = arith.addf %879, %880 : vector<8x128xf32>
    %c48_285 = arith.constant 48 : index
    %c128_286 = arith.constant 128 : index
    %882 = vector.load %arg11[%c48_285, %c128_286] : memref<64x256xf32, #tpu.memory_space<vmem>>, vector<8x128xf32>
    tpu.vector_store %arg11[%c48_285, %c128_286], %881 {strides = array<i32>} : memref<64x256xf32, #tpu.memory_space<vmem>>, vector<8x128xf32>,
    %c40_287 = arith.constant 40 : index
    %c0_288 = arith.constant 0 : index
    %883 = vector.load %arg14[%c40_287, %c0_288] : memref<64x384xf32, #tpu.memory_space<vmem>>, vector<8x384xf32>
    %cst_289 = arith.constant dense<0.000000e+00> : vector<8x384xf32>
    %884 = tpu.matmul %881, %816, %cst_289 {dimension_numbers = #tpu.dot_dimension_numbers<[1], [0], [0], [1], [0, 0, 1, 1], [], []>} : vector<8x128xf32>, vector<128x384xf32>, vector<8x384xf32> -> vector<8x384xf32>
    %885 = vector.broadcast %818 : vector<1x384xf32> to vector<8x384xf32>
    %886 = arith.addf %884, %885 : vector<8x384xf32>
    %887 = vector.extract_strided_slice %883 {offsets = [0, 0], sizes = [8, 128], strides = [1, 1]} : vector<8x384xf32> to vector<8x128xf32>
    %888 = vector.extract_strided_slice %886 {offsets = [0, 0], sizes = [8, 128], strides = [1, 1]} : vector<8x384xf32> to vector<8x128xf32>
    %889 = arith.addf %887, %888 : vector<8x128xf32>
    %890 = arith.negf %889 : vector<8x128xf32>
    %891 = math.exp %890 : vector<8x128xf32>
    %cst_290 = arith.constant 1.000000e+00 : f32
    %892 = vector.broadcast %cst_290 : f32 to vector<8x128xf32>
    %893 = arith.addf %892, %891 : vector<8x128xf32>
    %894 = arith.divf %892, %893 : vector<8x128xf32>
    %895 = vector.extract_strided_slice %883 {offsets = [0, 128], sizes = [8, 128], strides = [1, 1]} : vector<8x384xf32> to vector<8x128xf32>
    %896 = vector.extract_strided_slice %886 {offsets = [0, 128], sizes = [8, 128], strides = [1, 1]} : vector<8x384xf32> to vector<8x128xf32>
    %897 = arith.addf %895, %896 : vector<8x128xf32>
    %898 = arith.negf %897 : vector<8x128xf32>
    %899 = math.exp %898 : vector<8x128xf32>
    %cst_291 = arith.constant 1.000000e+00 : f32
    %900 = vector.broadcast %cst_291 : f32 to vector<8x128xf32>
    %901 = arith.addf %900, %899 : vector<8x128xf32>
    %902 = arith.divf %900, %901 : vector<8x128xf32>
    %903 = vector.extract_strided_slice %883 {offsets = [0, 256], sizes = [8, 128], strides = [1, 1]} : vector<8x384xf32> to vector<8x128xf32>
    %904 = vector.extract_strided_slice %886 {offsets = [0, 256], sizes = [8, 128], strides = [1, 1]} : vector<8x384xf32> to vector<8x128xf32>
    %905 = arith.mulf %894, %904 : vector<8x128xf32>
    %906 = arith.addf %903, %905 : vector<8x128xf32>
    %907 = math.tanh %906 : vector<8x128xf32>
    %cst_292 = arith.constant 1.000000e+00 : f32
    %908 = vector.broadcast %cst_292 : f32 to vector<8x128xf32>
    %909 = arith.subf %908, %902 : vector<8x128xf32>
    %910 = arith.mulf %909, %907 : vector<8x128xf32>
    %911 = arith.mulf %902, %881 : vector<8x128xf32>
    %912 = arith.addf %910, %911 : vector<8x128xf32>
    %c40_293 = arith.constant 40 : index
    %c128_294 = arith.constant 128 : index
    %913 = vector.load %arg11[%c40_293, %c128_294] : memref<64x256xf32, #tpu.memory_space<vmem>>, vector<8x128xf32>
    tpu.vector_store %arg11[%c40_293, %c128_294], %912 {strides = array<i32>} : memref<64x256xf32, #tpu.memory_space<vmem>>, vector<8x128xf32>,
    %c32_295 = arith.constant 32 : index
    %c0_296 = arith.constant 0 : index
    %914 = vector.load %arg14[%c32_295, %c0_296] : memref<64x384xf32, #tpu.memory_space<vmem>>, vector<8x384xf32>
    %cst_297 = arith.constant dense<0.000000e+00> : vector<8x384xf32>
    %915 = tpu.matmul %912, %816, %cst_297 {dimension_numbers = #tpu.dot_dimension_numbers<[1], [0], [0], [1], [0, 0, 1, 1], [], []>} : vector<8x128xf32>, vector<128x384xf32>, vector<8x384xf32> -> vector<8x384xf32>
    %916 = vector.broadcast %818 : vector<1x384xf32> to vector<8x384xf32>
    %917 = arith.addf %915, %916 : vector<8x384xf32>
    %918 = vector.extract_strided_slice %914 {offsets = [0, 0], sizes = [8, 128], strides = [1, 1]} : vector<8x384xf32> to vector<8x128xf32>
    %919 = vector.extract_strided_slice %917 {offsets = [0, 0], sizes = [8, 128], strides = [1, 1]} : vector<8x384xf32> to vector<8x128xf32>
    %920 = arith.addf %918, %919 : vector<8x128xf32>
    %921 = arith.negf %920 : vector<8x128xf32>
    %922 = math.exp %921 : vector<8x128xf32>
    %cst_298 = arith.constant 1.000000e+00 : f32
    %923 = vector.broadcast %cst_298 : f32 to vector<8x128xf32>
    %924 = arith.addf %923, %922 : vector<8x128xf32>
    %925 = arith.divf %923, %924 : vector<8x128xf32>
    %926 = vector.extract_strided_slice %914 {offsets = [0, 128], sizes = [8, 128], strides = [1, 1]} : vector<8x384xf32> to vector<8x128xf32>
    %927 = vector.extract_strided_slice %917 {offsets = [0, 128], sizes = [8, 128], strides = [1, 1]} : vector<8x384xf32> to vector<8x128xf32>
    %928 = arith.addf %926, %927 : vector<8x128xf32>
    %929 = arith.negf %928 : vector<8x128xf32>
    %930 = math.exp %929 : vector<8x128xf32>
    %cst_299 = arith.constant 1.000000e+00 : f32
    %931 = vector.broadcast %cst_299 : f32 to vector<8x128xf32>
    %932 = arith.addf %931, %930 : vector<8x128xf32>
    %933 = arith.divf %931, %932 : vector<8x128xf32>
    %934 = vector.extract_strided_slice %914 {offsets = [0, 256], sizes = [8, 128], strides = [1, 1]} : vector<8x384xf32> to vector<8x128xf32>
    %935 = vector.extract_strided_slice %917 {offsets = [0, 256], sizes = [8, 128], strides = [1, 1]} : vector<8x384xf32> to vector<8x128xf32>
    %936 = arith.mulf %925, %935 : vector<8x128xf32>
    %937 = arith.addf %934, %936 : vector<8x128xf32>
    %938 = math.tanh %937 : vector<8x128xf32>
    %cst_300 = arith.constant 1.000000e+00 : f32
    %939 = vector.broadcast %cst_300 : f32 to vector<8x128xf32>
    %940 = arith.subf %939, %933 : vector<8x128xf32>
    %941 = arith.mulf %940, %938 : vector<8x128xf32>
    %942 = arith.mulf %933, %912 : vector<8x128xf32>
    %943 = arith.addf %941, %942 : vector<8x128xf32>
    %c32_301 = arith.constant 32 : index
    %c128_302 = arith.constant 128 : index
    %944 = vector.load %arg11[%c32_301, %c128_302] : memref<64x256xf32, #tpu.memory_space<vmem>>, vector<8x128xf32>
    tpu.vector_store %arg11[%c32_301, %c128_302], %943 {strides = array<i32>} : memref<64x256xf32, #tpu.memory_space<vmem>>, vector<8x128xf32>,
    %c24_303 = arith.constant 24 : index
    %c0_304 = arith.constant 0 : index
    %945 = vector.load %arg14[%c24_303, %c0_304] : memref<64x384xf32, #tpu.memory_space<vmem>>, vector<8x384xf32>
    %cst_305 = arith.constant dense<0.000000e+00> : vector<8x384xf32>
    %946 = tpu.matmul %943, %816, %cst_305 {dimension_numbers = #tpu.dot_dimension_numbers<[1], [0], [0], [1], [0, 0, 1, 1], [], []>} : vector<8x128xf32>, vector<128x384xf32>, vector<8x384xf32> -> vector<8x384xf32>
    %947 = vector.broadcast %818 : vector<1x384xf32> to vector<8x384xf32>
    %948 = arith.addf %946, %947 : vector<8x384xf32>
    %949 = vector.extract_strided_slice %945 {offsets = [0, 0], sizes = [8, 128], strides = [1, 1]} : vector<8x384xf32> to vector<8x128xf32>
    %950 = vector.extract_strided_slice %948 {offsets = [0, 0], sizes = [8, 128], strides = [1, 1]} : vector<8x384xf32> to vector<8x128xf32>
    %951 = arith.addf %949, %950 : vector<8x128xf32>
    %952 = arith.negf %951 : vector<8x128xf32>
    %953 = math.exp %952 : vector<8x128xf32>
    %cst_306 = arith.constant 1.000000e+00 : f32
    %954 = vector.broadcast %cst_306 : f32 to vector<8x128xf32>
    %955 = arith.addf %954, %953 : vector<8x128xf32>
    %956 = arith.divf %954, %955 : vector<8x128xf32>
    %957 = vector.extract_strided_slice %945 {offsets = [0, 128], sizes = [8, 128], strides = [1, 1]} : vector<8x384xf32> to vector<8x128xf32>
    %958 = vector.extract_strided_slice %948 {offsets = [0, 128], sizes = [8, 128], strides = [1, 1]} : vector<8x384xf32> to vector<8x128xf32>
    %959 = arith.addf %957, %958 : vector<8x128xf32>
    %960 = arith.negf %959 : vector<8x128xf32>
    %961 = math.exp %960 : vector<8x128xf32>
    %cst_307 = arith.constant 1.000000e+00 : f32
    %962 = vector.broadcast %cst_307 : f32 to vector<8x128xf32>
    %963 = arith.addf %962, %961 : vector<8x128xf32>
    %964 = arith.divf %962, %963 : vector<8x128xf32>
    %965 = vector.extract_strided_slice %945 {offsets = [0, 256], sizes = [8, 128], strides = [1, 1]} : vector<8x384xf32> to vector<8x128xf32>
    %966 = vector.extract_strided_slice %948 {offsets = [0, 256], sizes = [8, 128], strides = [1, 1]} : vector<8x384xf32> to vector<8x128xf32>
    %967 = arith.mulf %956, %966 : vector<8x128xf32>
    %968 = arith.addf %965, %967 : vector<8x128xf32>
    %969 = math.tanh %968 : vector<8x128xf32>
    %cst_308 = arith.constant 1.000000e+00 : f32
    %970 = vector.broadcast %cst_308 : f32 to vector<8x128xf32>
    %971 = arith.subf %970, %964 : vector<8x128xf32>
    %972 = arith.mulf %971, %969 : vector<8x128xf32>
    %973 = arith.mulf %964, %943 : vector<8x128xf32>
    %974 = arith.addf %972, %973 : vector<8x128xf32>
    %c24_309 = arith.constant 24 : index
    %c128_310 = arith.constant 128 : index
    %975 = vector.load %arg11[%c24_309, %c128_310] : memref<64x256xf32, #tpu.memory_space<vmem>>, vector<8x128xf32>
    tpu.vector_store %arg11[%c24_309, %c128_310], %974 {strides = array<i32>} : memref<64x256xf32, #tpu.memory_space<vmem>>, vector<8x128xf32>,
    %c16_311 = arith.constant 16 : index
    %c0_312 = arith.constant 0 : index
    %976 = vector.load %arg14[%c16_311, %c0_312] : memref<64x384xf32, #tpu.memory_space<vmem>>, vector<8x384xf32>
    %cst_313 = arith.constant dense<0.000000e+00> : vector<8x384xf32>
    %977 = tpu.matmul %974, %816, %cst_313 {dimension_numbers = #tpu.dot_dimension_numbers<[1], [0], [0], [1], [0, 0, 1, 1], [], []>} : vector<8x128xf32>, vector<128x384xf32>, vector<8x384xf32> -> vector<8x384xf32>
    %978 = vector.broadcast %818 : vector<1x384xf32> to vector<8x384xf32>
    %979 = arith.addf %977, %978 : vector<8x384xf32>
    %980 = vector.extract_strided_slice %976 {offsets = [0, 0], sizes = [8, 128], strides = [1, 1]} : vector<8x384xf32> to vector<8x128xf32>
    %981 = vector.extract_strided_slice %979 {offsets = [0, 0], sizes = [8, 128], strides = [1, 1]} : vector<8x384xf32> to vector<8x128xf32>
    %982 = arith.addf %980, %981 : vector<8x128xf32>
    %983 = arith.negf %982 : vector<8x128xf32>
    %984 = math.exp %983 : vector<8x128xf32>
    %cst_314 = arith.constant 1.000000e+00 : f32
    %985 = vector.broadcast %cst_314 : f32 to vector<8x128xf32>
    %986 = arith.addf %985, %984 : vector<8x128xf32>
    %987 = arith.divf %985, %986 : vector<8x128xf32>
    %988 = vector.extract_strided_slice %976 {offsets = [0, 128], sizes = [8, 128], strides = [1, 1]} : vector<8x384xf32> to vector<8x128xf32>
    %989 = vector.extract_strided_slice %979 {offsets = [0, 128], sizes = [8, 128], strides = [1, 1]} : vector<8x384xf32> to vector<8x128xf32>
    %990 = arith.addf %988, %989 : vector<8x128xf32>
    %991 = arith.negf %990 : vector<8x128xf32>
    %992 = math.exp %991 : vector<8x128xf32>
    %cst_315 = arith.constant 1.000000e+00 : f32
    %993 = vector.broadcast %cst_315 : f32 to vector<8x128xf32>
    %994 = arith.addf %993, %992 : vector<8x128xf32>
    %995 = arith.divf %993, %994 : vector<8x128xf32>
    %996 = vector.extract_strided_slice %976 {offsets = [0, 256], sizes = [8, 128], strides = [1, 1]} : vector<8x384xf32> to vector<8x128xf32>
    %997 = vector.extract_strided_slice %979 {offsets = [0, 256], sizes = [8, 128], strides = [1, 1]} : vector<8x384xf32> to vector<8x128xf32>
    %998 = arith.mulf %987, %997 : vector<8x128xf32>
    %999 = arith.addf %996, %998 : vector<8x128xf32>
    %1000 = math.tanh %999 : vector<8x128xf32>
    %cst_316 = arith.constant 1.000000e+00 : f32
    %1001 = vector.broadcast %cst_316 : f32 to vector<8x128xf32>
    %1002 = arith.subf %1001, %995 : vector<8x128xf32>
    %1003 = arith.mulf %1002, %1000 : vector<8x128xf32>
    %1004 = arith.mulf %995, %974 : vector<8x128xf32>
    %1005 = arith.addf %1003, %1004 : vector<8x128xf32>
    %c16_317 = arith.constant 16 : index
    %c128_318 = arith.constant 128 : index
    %1006 = vector.load %arg11[%c16_317, %c128_318] : memref<64x256xf32, #tpu.memory_space<vmem>>, vector<8x128xf32>
    tpu.vector_store %arg11[%c16_317, %c128_318], %1005 {strides = array<i32>} : memref<64x256xf32, #tpu.memory_space<vmem>>, vector<8x128xf32>,
    %c8_319 = arith.constant 8 : index
    %c0_320 = arith.constant 0 : index
    %1007 = vector.load %arg14[%c8_319, %c0_320] : memref<64x384xf32, #tpu.memory_space<vmem>>, vector<8x384xf32>
    %cst_321 = arith.constant dense<0.000000e+00> : vector<8x384xf32>
    %1008 = tpu.matmul %1005, %816, %cst_321 {dimension_numbers = #tpu.dot_dimension_numbers<[1], [0], [0], [1], [0, 0, 1, 1], [], []>} : vector<8x128xf32>, vector<128x384xf32>, vector<8x384xf32> -> vector<8x384xf32>
    %1009 = vector.broadcast %818 : vector<1x384xf32> to vector<8x384xf32>
    %1010 = arith.addf %1008, %1009 : vector<8x384xf32>
    %1011 = vector.extract_strided_slice %1007 {offsets = [0, 0], sizes = [8, 128], strides = [1, 1]} : vector<8x384xf32> to vector<8x128xf32>
    %1012 = vector.extract_strided_slice %1010 {offsets = [0, 0], sizes = [8, 128], strides = [1, 1]} : vector<8x384xf32> to vector<8x128xf32>
    %1013 = arith.addf %1011, %1012 : vector<8x128xf32>
    %1014 = arith.negf %1013 : vector<8x128xf32>
    %1015 = math.exp %1014 : vector<8x128xf32>
    %cst_322 = arith.constant 1.000000e+00 : f32
    %1016 = vector.broadcast %cst_322 : f32 to vector<8x128xf32>
    %1017 = arith.addf %1016, %1015 : vector<8x128xf32>
    %1018 = arith.divf %1016, %1017 : vector<8x128xf32>
    %1019 = vector.extract_strided_slice %1007 {offsets = [0, 128], sizes = [8, 128], strides = [1, 1]} : vector<8x384xf32> to vector<8x128xf32>
    %1020 = vector.extract_strided_slice %1010 {offsets = [0, 128], sizes = [8, 128], strides = [1, 1]} : vector<8x384xf32> to vector<8x128xf32>
    %1021 = arith.addf %1019, %1020 : vector<8x128xf32>
    %1022 = arith.negf %1021 : vector<8x128xf32>
    %1023 = math.exp %1022 : vector<8x128xf32>
    %cst_323 = arith.constant 1.000000e+00 : f32
    %1024 = vector.broadcast %cst_323 : f32 to vector<8x128xf32>
    %1025 = arith.addf %1024, %1023 : vector<8x128xf32>
    %1026 = arith.divf %1024, %1025 : vector<8x128xf32>
    %1027 = vector.extract_strided_slice %1007 {offsets = [0, 256], sizes = [8, 128], strides = [1, 1]} : vector<8x384xf32> to vector<8x128xf32>
    %1028 = vector.extract_strided_slice %1010 {offsets = [0, 256], sizes = [8, 128], strides = [1, 1]} : vector<8x384xf32> to vector<8x128xf32>
    %1029 = arith.mulf %1018, %1028 : vector<8x128xf32>
    %1030 = arith.addf %1027, %1029 : vector<8x128xf32>
    %1031 = math.tanh %1030 : vector<8x128xf32>
    %cst_324 = arith.constant 1.000000e+00 : f32
    %1032 = vector.broadcast %cst_324 : f32 to vector<8x128xf32>
    %1033 = arith.subf %1032, %1026 : vector<8x128xf32>
    %1034 = arith.mulf %1033, %1031 : vector<8x128xf32>
    %1035 = arith.mulf %1026, %1005 : vector<8x128xf32>
    %1036 = arith.addf %1034, %1035 : vector<8x128xf32>
    %c8_325 = arith.constant 8 : index
    %c128_326 = arith.constant 128 : index
    %1037 = vector.load %arg11[%c8_325, %c128_326] : memref<64x256xf32, #tpu.memory_space<vmem>>, vector<8x128xf32>
    tpu.vector_store %arg11[%c8_325, %c128_326], %1036 {strides = array<i32>} : memref<64x256xf32, #tpu.memory_space<vmem>>, vector<8x128xf32>,
    %c0_327 = arith.constant 0 : index
    %c0_328 = arith.constant 0 : index
    %1038 = vector.load %arg14[%c0_327, %c0_328] : memref<64x384xf32, #tpu.memory_space<vmem>>, vector<8x384xf32>
    %cst_329 = arith.constant dense<0.000000e+00> : vector<8x384xf32>
    %1039 = tpu.matmul %1036, %816, %cst_329 {dimension_numbers = #tpu.dot_dimension_numbers<[1], [0], [0], [1], [0, 0, 1, 1], [], []>} : vector<8x128xf32>, vector<128x384xf32>, vector<8x384xf32> -> vector<8x384xf32>
    %1040 = vector.broadcast %818 : vector<1x384xf32> to vector<8x384xf32>
    %1041 = arith.addf %1039, %1040 : vector<8x384xf32>
    %1042 = vector.extract_strided_slice %1038 {offsets = [0, 0], sizes = [8, 128], strides = [1, 1]} : vector<8x384xf32> to vector<8x128xf32>
    %1043 = vector.extract_strided_slice %1041 {offsets = [0, 0], sizes = [8, 128], strides = [1, 1]} : vector<8x384xf32> to vector<8x128xf32>
    %1044 = arith.addf %1042, %1043 : vector<8x128xf32>
    %1045 = arith.negf %1044 : vector<8x128xf32>
    %1046 = math.exp %1045 : vector<8x128xf32>
    %cst_330 = arith.constant 1.000000e+00 : f32
    %1047 = vector.broadcast %cst_330 : f32 to vector<8x128xf32>
    %1048 = arith.addf %1047, %1046 : vector<8x128xf32>
    %1049 = arith.divf %1047, %1048 : vector<8x128xf32>
    %1050 = vector.extract_strided_slice %1038 {offsets = [0, 128], sizes = [8, 128], strides = [1, 1]} : vector<8x384xf32> to vector<8x128xf32>
    %1051 = vector.extract_strided_slice %1041 {offsets = [0, 128], sizes = [8, 128], strides = [1, 1]} : vector<8x384xf32> to vector<8x128xf32>
    %1052 = arith.addf %1050, %1051 : vector<8x128xf32>
    %1053 = arith.negf %1052 : vector<8x128xf32>
    %1054 = math.exp %1053 : vector<8x128xf32>
    %cst_331 = arith.constant 1.000000e+00 : f32
    %1055 = vector.broadcast %cst_331 : f32 to vector<8x128xf32>
    %1056 = arith.addf %1055, %1054 : vector<8x128xf32>
    %1057 = arith.divf %1055, %1056 : vector<8x128xf32>
    %1058 = vector.extract_strided_slice %1038 {offsets = [0, 256], sizes = [8, 128], strides = [1, 1]} : vector<8x384xf32> to vector<8x128xf32>
    %1059 = vector.extract_strided_slice %1041 {offsets = [0, 256], sizes = [8, 128], strides = [1, 1]} : vector<8x384xf32> to vector<8x128xf32>
    %1060 = arith.mulf %1049, %1059 : vector<8x128xf32>
    %1061 = arith.addf %1058, %1060 : vector<8x128xf32>
    %1062 = math.tanh %1061 : vector<8x128xf32>
    %cst_332 = arith.constant 1.000000e+00 : f32
    %1063 = vector.broadcast %cst_332 : f32 to vector<8x128xf32>
    %1064 = arith.subf %1063, %1057 : vector<8x128xf32>
    %1065 = arith.mulf %1064, %1062 : vector<8x128xf32>
    %1066 = arith.mulf %1057, %1036 : vector<8x128xf32>
    %1067 = arith.addf %1065, %1066 : vector<8x128xf32>
    %c0_333 = arith.constant 0 : index
    %c128_334 = arith.constant 128 : index
    %1068 = vector.load %arg11[%c0_333, %c128_334] : memref<64x256xf32, #tpu.memory_space<vmem>>, vector<8x128xf32>
    tpu.vector_store %arg11[%c0_333, %c128_334], %1067 {strides = array<i32>} : memref<64x256xf32, #tpu.memory_space<vmem>>, vector<8x128xf32>,
    %c3_335 = arith.constant 3 : index
    %c0_336 = arith.constant 0 : index
    %c0_337 = arith.constant 0 : index
    %1069 = vector.load %arg12[%c3_335, %c0_336, %c0_337] : memref<4x8x128xf32, #tpu.memory_space<vmem>>, vector<1x8x128xf32>
    %1070 = vector.shape_cast %1069 : vector<1x8x128xf32> to vector<8x128xf32>
    %1071 = vector.shape_cast %1067 : vector<8x128xf32> to vector<1x8x128xf32>
    tpu.vector_store %arg12[%c3_335, %c0_336, %c0_337], %1071 {strides = array<i32>} : memref<4x8x128xf32, #tpu.memory_space<vmem>>, vector<1x8x128xf32>,
    return
  }
}

</mosaic_0001>

<bundles_post_ra>
// kernel: encoder_forward.1
= control target key start
LH: loop header
LB: loop body
LE: loop exit
PB: predicated region body
PF: predicated region fallthrough
CT: control target
= control target key end

     0   :  { %18 = vsyncpa [#allocation7], 0  ;;  %s14475_s0 = inlined_call_operand.vmem [shape: s32[64,1], index: 0, kind: input, shape index: {}]   ;;  %s14476_s1 = inlined_call_operand.vmem [shape: f32[128,64], index: 1, kind: input, shape index: {}]   ;;  %s14477_s2 = inlined_call_operand.vmem [shape: f32[2,64,384], index: 2, kind: input, shape index: {}]   ;;  %s14478_s3 = inlined_call_operand.hbm [shape: f32[2,128,384], index: 3, kind: input, shape index: {}]   ;;  %s14479_s4 = inlined_call_operand.hbm [shape: f32[2,1,384], index: 4, kind: input, shape index: {}]   ;;  %s14480_s5 = inlined_call_operand.hbm [shape: f32[2,1,384], index: 5, kind: input, shape index: {}]   ;;  %s14481_s6 = inlined_call_operand.hbm [shape: f32[2,256,384], index: 6, kind: input, shape index: {}]   ;;  %s14482_s7 = inlined_call_operand.hbm [shape: f32[2,128,384], index: 7, kind: input, shape index: {}]   ;;  %s14483_s8 = inlined_call_operand.vmem [shape: f32[2,1,384], index: 8, kind: input, shape index: {}]   ;;  %s14484_s9 = inlined_call_operand.hbm [shape: f32[2,1,384], index: 9, kind: input, shape index: {}]   ;;  %s14485_s10 = inlined_call_operand.vmem [shape: f32[4,8,128], index: 10, kind: input, shape index: {}]   ;;  %s14486_s11 = inlined_call_operand.hbm [shape: f32[64,256], index: 11, kind: output, shape index: {0}]   ;;  %s14487_s12 = inlined_call_operand.hbm [shape: f32[4,8,128], index: 12, kind: output, shape index: {1}]  }
   0x1   :  { %19 = vsyncpa [#allocation10], 0 }
   0x2   :  { %20 = vsyncpa [#allocation13], 0 }
   0x3   :  { %21 = vsyncpa [#allocation16], 0 }
   0x4   :  { %22 = vsyncpa [#allocation8], 0 }
   0x5   :  { %23 = vsyncpa [#allocation19], 0  ;;  %s12112_s21 = smov [#allocation9]   ;;  %s11924_s25 = scalar_lea.hbm %s14479_s4, 96 }
   0x6   :  { %s47_s22 = sshll.u32 %s12112_s21, 4  ;;  %p11925_p0 = scmp.ne.s32.totalorder %s14479_s4, %s11924_s25  ;;  %s48_s22 = int_to_ptr.vmem [resolvable:$true] %s47_s22 }
   0x7   :  { %p11928_p1 = scmp.lt.u32.totalorder %s11924_s25, %s14479_s4 }
   0x9   :  { %p11930_p2 = pnand %p11928_p1, %p11925_p0 }
   0xb   :  { %11933 = shalt.err (!%p11930_p2)
}
   0xc   :  { %s11934_s30 = scalar_lea.vmem %s48_s22, 96  ;;  %p11939_p4 = scmp.lt.s32.totalorder %s48_s22, %s48_s22 }
   0xd   :  { %p11935_p3 = scmp.ne.s32.totalorder %s48_s22, %s11934_s30  ;;  %p11940_p5 = scmp.lt.s32.totalorder %s11934_s30, %s11934_s30 }
   0xf   :  { %p11941_p6 = por %p11940_p5, %p11939_p4 }
  0x11   :  { %p11942_p7 = pnand %p11941_p6, %p11935_p3 }
  0x13   :  { %11945 = shalt.err (!%p11942_p7)
}
  0x14   :  { %s12113_s13 = smov 48   ;;  %s12114_s14 = smov 3  }
  0x15   :  { %53 = dma.hbm_to_vmem [thread:$0]  %s14479_s4, 96, %s48_s22, [#allocation10], %s12113_s13, %s12113_s13, %s12114_s14  }
  0x16   :  { %s12115_s17 = smov [#allocation12]   ;;  %s12116_s19 = smov [#allocation6]  }
  0x17   :  { %s71_s18 = sshll.u32 %s12115_s17, 4  ;;  %s35_s20 = sshll.u32 %s12116_s19, 4  ;;  %s72_s18 = int_to_ptr.vmem [resolvable:$true] %s71_s18  ;;  %s36_s20 = int_to_ptr.vmem [resolvable:$true] %s35_s20 }
  0x18   :  { %s11946_s24 = scalar_lea.hbm %s14481_s6, 24576 }
  0x19   :  { %p11947_p8 = scmp.ne.s32.totalorder %s14481_s6, %s11946_s24  ;;  %p11950_p9 = scmp.lt.u32.totalorder %s11946_s24, %s14481_s6 }
  0x1b   :  { %p11952_p10 = pnand %p11950_p9, %p11947_p8 }
  0x1d   :  { %11955 = shalt.err (!%p11952_p10)
}
  0x1e   :  { %s11956_s4 = scalar_lea.vmem %s72_s18, 24576  ;;  %p11961_p12 = scmp.lt.s32.totalorder %s72_s18, %s72_s18 }
  0x1f   :  { %p11957_p11 = scmp.ne.s32.totalorder %s72_s18, %s11956_s4  ;;  %p11962_p13 = scmp.lt.s32.totalorder %s11956_s4, %s11956_s4 }
  0x21   :  { %p11963_p0 = por %p11962_p13, %p11961_p12 }
  0x23   :  { %p11964_p1 = pnand %p11963_p0, %p11957_p11 }
  0x25   :  { %11967 = shalt.err (!%p11964_p1)
}
  0x26   :  { %s12117_s22 = smov 384   ;;  %s12118_s29 = smov 24  }
  0x27   :  { %77 = dma.hbm_to_vmem [thread:$0]  %s14481_s6, 24576, %s72_s18, [#allocation13], %s12117_s22, %s12117_s22, %s12118_s29  }
  0x28   :  { %s11968_s19 = scalar_lea.hbm %s14478_s3, 12288 }
  0x29   :  { %p11969_p2 = scmp.ne.s32.totalorder %s14478_s3, %s11968_s19  ;;  %p11972_p3 = scmp.lt.u32.totalorder %s11968_s19, %s14478_s3 }
  0x2b   :  { %p11974_p4 = pnand %p11972_p3, %p11969_p2 }
  0x2d   :  { %11977 = shalt.err (!%p11974_p4)
}
  0x2e   :  { %s11978_s26 = scalar_lea.vmem %s36_s20, 12288  ;;  %p11983_p6 = scmp.lt.s32.totalorder %s36_s20, %s36_s20 }
  0x2f   :  { %p11979_p5 = scmp.ne.s32.totalorder %s36_s20, %s11978_s26  ;;  %p11984_p7 = scmp.lt.s32.totalorder %s11978_s26, %s11978_s26 }
  0x31   :  { %p11985_p8 = por %p11984_p7, %p11983_p6 }
  0x33   :  { %p11986_p9 = pnand %p11985_p8, %p11979_p5 }
  0x35   :  { %11989 = shalt.err (!%p11986_p9)
}
  0x36   :  { %41 = dma.hbm_to_vmem [thread:$0]  %s14478_s3, 12288, %s36_s20, [#allocation7], %s12117_s22, %s12117_s22, %s12118_s29  }
  0x37   :  { %s12119_s27 = smov [#allocation11]   ;;  %s12120_s4 = smov [#allocation14]  }
  0x38   :  { %s59_s28 = sshll.u32 %s12119_s27, 4  ;;  %s83_s30 = sshll.u32 %s12120_s4, 4  ;;  %s60_s28 = int_to_ptr.vmem [resolvable:$true] %s59_s28  ;;  %s84_s30 = int_to_ptr.vmem [resolvable:$true] %s83_s30 }
  0x39   :  { %s11990_s17 = scalar_lea.hbm %s14480_s5, 96 }
  0x3a   :  { %p11991_p10 = scmp.ne.s32.totalorder %s14480_s5, %s11990_s17  ;;  %p11994_p11 = scmp.lt.u32.totalorder %s11990_s17, %s14480_s5 }
  0x3c   :  { %p11996_p12 = pnand %p11994_p11, %p11991_p10 }
  0x3e   :  { %11999 = shalt.err (!%p11996_p12)
}
  0x3f   :  { %s12000_s3 = scalar_lea.vmem %s60_s28, 96  ;;  %p12005_p0 = scmp.lt.s32.totalorder %s60_s28, %s60_s28 }
  0x40   :  { %p12001_p13 = scmp.ne.s32.totalorder %s60_s28, %s12000_s3  ;;  %p12006_p1 = scmp.lt.s32.totalorder %s12000_s3, %s12000_s3 }
  0x42   :  { %p12007_p2 = por %p12006_p1, %p12005_p0 }
  0x44   :  { %p12008_p3 = pnand %p12007_p2, %p12001_p13 }
  0x46   :  { %12011 = shalt.err (!%p12008_p3)
}
  0x47   :  { %65 = dma.hbm_to_vmem [thread:$0]  %s14480_s5, 96, %s60_s28, [#allocation10], %s12113_s13, %s12113_s13, %s12114_s14  }
  0x48   :  { %s12012_s18 = scalar_lea.hbm %s14482_s7, 12288 }
  0x49   :  { %p12013_p4 = scmp.ne.s32.totalorder %s14482_s7, %s12012_s18  ;;  %p12016_p5 = scmp.lt.u32.totalorder %s12012_s18, %s14482_s7 }
  0x4b   :  { %p12018_p6 = pnand %p12016_p5, %p12013_p4 }
  0x4d   :  { %12021 = shalt.err (!%p12018_p6)
}
  0x4e   :  { %s12022_s17 = scalar_lea.vmem %s84_s30, 12288  ;;  %p12027_p8 = scmp.lt.s32.totalorder %s84_s30, %s84_s30 }
  0x4f   :  { %p12023_p7 = scmp.ne.s32.totalorder %s84_s30, %s12022_s17  ;;  %p12028_p9 = scmp.lt.s32.totalorder %s12022_s17, %s12022_s17 }
  0x51   :  { %p12029_p10 = por %p12028_p9, %p12027_p8 }
  0x53   :  { %p12030_p11 = pnand %p12029_p10, %p12023_p7 }
  0x55   :  { %12033 = shalt.err (!%p12030_p11)
}
  0x56   :  { %89 = dma.hbm_to_vmem [thread:$0]  %s14482_s7, 12288, %s84_s30, [#allocation13], %s12117_s22, %s12117_s22, %s12118_s29  }
  0x57   :  { %s12121_s19 = smov [#allocation15]   ;;  %s12034_s3 = scalar_lea.hbm %s14484_s9, 96 }
  0x58   :  { %s97_s21 = sshll.u32 %s12121_s19, 4  ;;  %p12035_p12 = scmp.ne.s32.totalorder %s14484_s9, %s12034_s3  ;;  %s98_s21 = int_to_ptr.vmem [resolvable:$true] %s97_s21 }
  0x59   :  { %p12038_p13 = scmp.lt.u32.totalorder %s12034_s3, %s14484_s9 }
  0x5b   :  { %p12040_p0 = pnand %p12038_p13, %p12035_p12 }
  0x5d   :  { %12043 = shalt.err (!%p12040_p0)
}
  0x5e   :  { %s12044_s18 = scalar_lea.vmem %s98_s21, 96  ;;  %p12049_p2 = scmp.lt.s32.totalorder %s98_s21, %s98_s21 }
  0x5f   :  { %p12045_p1 = scmp.ne.s32.totalorder %s98_s21, %s12044_s18  ;;  %p12050_p3 = scmp.lt.s32.totalorder %s12044_s18, %s12044_s18 }
  0x61   :  { %p12051_p4 = por %p12050_p3, %p12049_p2 }
  0x63   :  { %p12052_p5 = pnand %p12051_p4, %p12045_p1 }
  0x65   :  { %12055 = shalt.err (!%p12052_p5)
}
  0x66   :  { %103 = dma.hbm_to_vmem [thread:$0]  %s14484_s9, 96, %s98_s21, [#allocation16], %s12113_s13, %s12113_s13, %s12114_s14  }
  0x67   :  { %12100 = dma.done.wait [#allocation7], 12288  }
  0x68   :  { %12101 = vsyncadd [#allocation7], 4294955008 }
  0x69   :  { %12102 = dma.done.wait [#allocation10], 192  }
  0x6a   :  { %12103 = vsyncadd [#allocation10], 4294967104 }
  0x6b   :  { %12104 = dma.done.wait [#allocation13], 36864  }
  0x6c   :  { %12105 = vsyncadd [#allocation13], 4294930432 }
  0x6d   :  { %12106 = dma.done.wait [#allocation16], 96  }
  0x6e   :  { %12107 = vsyncadd [#allocation16], 4294967200  ;;  %v12122_v0 = vmov 0   ;;  %v126_v1 = vld [vmem:[%s14475_s0 + $0x10] sm:$0xff]  ;;  %v124_v2 = vld [vmem:[%s14475_s0] sm:$0xff]  ;;  %v132_v60 = vlaneseq  ;;  %vm336_vm8 = vcmask 523264  }
  0x6f   :  { %11600 = vset.pattern.permute.xlu1 %v12122_v0  ;;  %11599 = vset.pattern.permute.xlu0 %v12122_v0  ;;  %v127_v3 = vld [vmem:[%s14475_s0 + $0x18] sm:$0xff]  ;;  %v125_v4 = vld [vmem:[%s14475_s0 + $0x8] sm:$0xff]  ;;  %v174_v5 = vld [vmem:[%s14476_s1] sm:$0xff]  ;;  %vm12126_vm9 = vmmov 0   ;;  %s12128_s13 = smov [#allocation18]  }
  0x70   :  { %141 = vperm.xlu1 %11600, %v126_v1   ;;  %135 = vperm.xlu0 %11599, %v124_v2   ;;  %v175_v6 = vld [vmem:[%s14476_s1 + $0x8] sm:$0xff]  ;;  %v176_v7 = vld [vmem:[%s14476_s1 + $0x10] sm:$0xff]  ;;  %v177_v8 = vld [vmem:[%s14476_s1 + $0x18] sm:$0xff]  ;;  %v133_v61 = vand.u32 127, %v132_v60  ;;  %v12123_v2 = vmov 1.0   ;;  %s7223_s14 = sshll.u32 %s12128_s13, 4  ;;  %s14444_s14 = int_to_ptr.vmem [resolvable:$true] %s7223_s14 }
  0x71   :  { %v9306_v9 = vpack.c.bf16 %v175_v6, %v174_v5  ;;  %v9310_v10 = vpack.c.bf16 %v177_v8, %v176_v7  ;;  %v178_v11 = vld [vmem:[%s14476_s1 + $0x20] sm:$0xff]  ;;  %v179_v12 = vld [vmem:[%s14476_s1 + $0x28] sm:$0xff]  ;;  %v180_v16 = vld [vmem:[%s14476_s1 + $0x30] sm:$0xff] }
  0x72   :  { %v129_v13 = vld [vmem:[%s14475_s0 + $0x28] sm:$0xff]  ;;  %v128_v14 = vld [vmem:[%s14475_s0 + $0x20] sm:$0xff]  ;;  %v9314_v15 = vpack.c.bf16 %v179_v12, %v178_v11  ;;  %v181_v17 = vld [vmem:[%s14476_s1 + $0x38] sm:$0xff] }
  0x73   :  { %9307 = vmatprep.subr.bf16.mxu0 %v9306_v9  ;;  %v131_v18 = vld [vmem:[%s14475_s0 + $0x38] sm:$0xff]  ;;  %v130_v19 = vld [vmem:[%s14475_s0 + $0x30] sm:$0xff]  ;;  %v9318_v20 = vpack.c.bf16 %v181_v17, %v180_v16  ;;  %v182_v21 = vld [vmem:[%s14476_s1 + $0x40] sm:$0xff] }
  0x74   :  { %144 = vperm.xlu1 %11600, %v127_v3   ;;  %138 = vperm.xlu0 %11599, %v125_v4   ;;  %v183_v22 = vld [vmem:[%s14476_s1 + $0x48] sm:$0xff]  ;;  %v184_v24 = vld [vmem:[%s14476_s1 + $0x50] sm:$0xff]  ;;  %v185_v25 = vld [vmem:[%s14476_s1 + $0x58] sm:$0xff] }
  0x75   :  { %9309 = vmatpush3.bf16.msra.mxu0 %v9306_v9  ;;  %v9322_v23 = vpack.c.bf16 %v183_v22, %v182_v21  ;;  %v296_v26 = vld [vmem:[%s14477_s2 + $0x8] sm:$0xff]  ;;  %v299_v27 = vld [vmem:[%s14477_s2 + $0x20] sm:$0xff]  ;;  %v298_v30 = vld [vmem:[%s14477_s2 + $0x18] sm:$0xff]  ;;  %v9326_v31 = vpack.c.bf16 %v185_v25, %v184_v24 }
  0x76   :  { %9311 = vmatprep.subr.bf16.mxu0 %v9310_v10  ;;  %v295_v28 = vld [vmem:[%s14477_s2] sm:$0xff]  ;;  %v9338_v29 = vpack.c.bf16 %v299_v27, %v296_v26  ;;  %v302_v33 = vld [vmem:[%s14477_s2 + $0x38] sm:$0xff]  ;;  %v305_v34 = vld [vmem:[%s14477_s2 + $0x50] sm:$0xff] }
  0x77   :  { %v9340_v32 = vpack.c.bf16 %v298_v30, %v295_v28  ;;  %v301_v35 = vld [vmem:[%s14477_s2 + $0x30] sm:$0xff]  ;;  %v186_v36 = vld [vmem:[%s14476_s1 + $0x60] sm:$0xff]  ;;  %v187_v37 = vld [vmem:[%s14476_s1 + $0x68] sm:$0xff]  ;;  %v9342_v38 = vpack.c.bf16 %v305_v34, %v302_v33 }
  0x78   :  { %150 = vperm.xlu1 %11600, %v129_v13   ;;  %147 = vperm.xlu0 %11599, %v128_v14   ;;  %v304_v39 = vld [vmem:[%s14477_s2 + $0x48] sm:$0xff]  ;;  %v311_v42 = vld [vmem:[%s14477_s2 + $0x80] sm:$0xff]  ;;  %v310_v45 = vld [vmem:[%s14477_s2 + $0x78] sm:$0xff]  ;;  %v9330_v46 = vpack.c.bf16 %v187_v37, %v186_v36 }
  0x79   :  { %9313 = vmatpush3.bf16.msra.mxu0 %v9310_v10  ;;  %9339 = vmatprep.subr.bf16.mxu1 %v9338_v29  ;;  %v9344_v40 = vpack.c.bf16 %v304_v39, %v301_v35  ;;  %v308_v41 = vld [vmem:[%s14477_s2 + $0x68] sm:$0xff]  ;;  %v307_v44 = vld [vmem:[%s14477_s2 + $0x60] sm:$0xff]  ;;  %v314_v47 = vld [vmem:[%s14477_s2 + $0x98] sm:$0xff] }
  0x7a   :  { %9315 = vmatprep.subr.bf16.mxu0 %v9314_v15  ;;  %9341 = vmatpush1.bf16.msra.mxu1 %v9340_v32  ;;  %v9346_v43 = vpack.c.bf16 %v311_v42, %v308_v41  ;;  %v317_v48 = vld [vmem:[%s14477_s2 + $0xb0] sm:$0xff]  ;;  %v189_v50 = vld [vmem:[%s14476_s1 + $0x78] sm:$0xff]  ;;  %v9348_v51 = vpack.c.bf16 %v310_v45, %v307_v44  ;;  %v316_v54 = vld [vmem:[%s14477_s2 + $0xa8] sm:$0xff] }
  0x7b   :  { %9343 = vmatprep.subr.bf16.mxu1 %v9342_v38  ;;  %v188_v49 = vld [vmem:[%s14476_s1 + $0x70] sm:$0xff]  ;;  %v9350_v52 = vpack.c.bf16 %v317_v48, %v314_v47  ;;  %v300_v57 = vld [vmem:[%s14477_s2 + $0x28] sm:$0xff]  ;;  %v303_v0 = vld [vmem:[%s14477_s2 + $0x40] sm:$0xff] }
  0x7c   :  { %156 = vperm.xlu1 %11600, %v131_v18   ;;  %153 = vperm.xlu0 %11599, %v130_v19   ;;  %v313_v53 = vld [vmem:[%s14477_s2 + $0x90] sm:$0xff]  ;;  %v9334_v55 = vpack.c.bf16 %v189_v50, %v188_v49  ;;  %v306_v1 = vld [vmem:[%s14477_s2 + $0x58] sm:$0xff]  ;;  %v312_v7 = vld [vmem:[%s14477_s2 + $0x88] sm:$0xff]  ;;  %v14488_v18 = vmov 0.0  }
  0x7d   :  { %9317 = vmatpush3.bf16.msra.mxu0 %v9314_v15  ;;  %v297_v56 = vld [vmem:[%s14477_s2 + $0x10] sm:$0xff]  ;;  %v9352_v58 = vpack.c.bf16 %v316_v54, %v313_v53  ;;  %v9358_v5 = vpack.c.bf16 %v306_v1, %v303_v0  ;;  %v315_v11 = vld [vmem:[%s14477_s2 + $0xa0] sm:$0xff]  ;;  %v318_v12 = vld [vmem:[%s14477_s2 + $0xb8] sm:$0xff]  ;;  %425 = vmatprep.mubr.f32.mxu1 %v14488_v18 }
  0x7e   :  { %9319 = vmatprep.subr.bf16.mxu0 %v9318_v20  ;;  %9345 = vmatpush1.bf16.msra.mxu1 %v9344_v40  ;;  %v9354_v59 = vpack.c.bf16 %v300_v57, %v297_v56  ;;  %v309_v6 = vld [vmem:[%s14477_s2 + $0x70] sm:$0xff]  ;;  %v9366_v14 = vpack.c.bf16 %v318_v12, %v315_v11  ;;  %v7271_v17 = vld [vmem:[%s14477_s2 + $0xe8] sm:$0xff]  ;;  %v7270_v21 = vld [vmem:[%s14477_s2 + $0xe0] sm:$0xff] }
  0x7f   :  { %9347 = vmatprep.subr.bf16.mxu1 %v9346_v43  ;;  %v9362_v10 = vpack.c.bf16 %v312_v7, %v309_v6  ;;  %v7268_v16 = vld [vmem:[%s14477_s2 + $0xd0] sm:$0xff]  ;;  %v7269_v24 = vld [vmem:[%s14477_s2 + $0xd8] sm:$0xff]  ;;  %v7274_v25 = vld [vmem:[%s14477_s2 + $0x100] sm:$0xff] }
  0x80   :  { %v9386_v19 = vpack.c.bf16 %v7271_v17, %v7268_v16  ;;  %v7277_v26 = vld [vmem:[%s14477_s2 + $0x118] sm:$0xff]  ;;  %v7276_v28 = vld [vmem:[%s14477_s2 + $0x110] sm:$0xff]  ;;  %v7275_v35 = vld [vmem:[%s14477_s2 + $0x108] sm:$0xff] }
  0x81   :  { %9321 = vmatpush3.bf16.msra.mxu0 %v9318_v20  ;;  %v7267_v20 = vld [vmem:[%s14477_s2 + $0xc8] sm:$0xff]  ;;  %v7273_v27 = vld [vmem:[%s14477_s2 + $0xf8] sm:$0xff]  ;;  %v9390_v32 = vpack.c.bf16 %v7277_v26, %v7274_v25  ;;  %v7272_v34 = vld [vmem:[%s14477_s2 + $0xf0] sm:$0xff] }
  0x82   :  { %9323 = vmatprep.subr.bf16.mxu0 %v9322_v23  ;;  %9349 = vmatpush1.bf16.msra.mxu1 %v9348_v51  ;;  %v9370_v22 = vpack.c.bf16 %v7270_v21, %v7267_v20  ;;  %v9374_v33 = vpack.c.bf16 %v7276_v28, %v7273_v27  ;;  %v7280_v36 = vld [vmem:[%s14477_s2 + $0x130] sm:$0xff]  ;;  %v7283_v37 = vld [vmem:[%s14477_s2 + $0x148] sm:$0xff]  ;;  %v7282_v39 = vld [vmem:[%s14477_s2 + $0x140] sm:$0xff]  ;;  %v9376_v41 = vpack.c.bf16 %v7275_v35, %v7272_v34 }
  0x83   :  { %9351 = vmatprep.subr.bf16.mxu1 %v9350_v52  ;;  %v7279_v38 = vld [vmem:[%s14477_s2 + $0x128] sm:$0xff]  ;;  %v9394_v43 = vpack.c.bf16 %v7283_v37, %v7280_v36  ;;  %v7286_v44 = vld [vmem:[%s14477_s2 + $0x160] sm:$0xff]  ;;  %v7281_v47 = vld [vmem:[%s14477_s2 + $0x138] sm:$0xff] }
  0x84   :  { %v9378_v45 = vpack.c.bf16 %v7282_v39, %v7279_v38  ;;  %v7289_v48 = vld [vmem:[%s14477_s2 + $0x178] sm:$0xff]  ;;  %v7288_v50 = vld [vmem:[%s14477_s2 + $0x170] sm:$0xff]  ;;  %v7287_v57 = vld [vmem:[%s14477_s2 + $0x168] sm:$0xff] }
  0x85   :  { %9325 = vmatpush3.bf16.msra.mxu0 %v9322_v23  ;;  %v7266_v23 = vld [vmem:[%s14477_s2 + $0xc0] sm:$0xff]  ;;  %v7285_v49 = vld [vmem:[%s14477_s2 + $0x158] sm:$0xff]  ;;  %v9398_v54 = vpack.c.bf16 %v7289_v48, %v7286_v44  ;;  %v7284_v56 = vld [vmem:[%s14477_s2 + $0x150] sm:$0xff] }
  0x86   :  { %9327 = vmatprep.subr.bf16.mxu0 %v9326_v31  ;;  %9353 = vmatpush1.bf16.msra.mxu1 %v9352_v58  ;;  %v9372_v29 = vpack.c.bf16 %v7269_v24, %v7266_v23  ;;  %v889_v58 = vld [vmem:[#allocation6 + $0x8] sm:$0xff]  ;;  %v890_v0 = vld [vmem:[#allocation6 + $0x10] sm:$0xff]  ;;  %v899_v6 = vld [vmem:[#allocation6 + $0x58] sm:$0xff] }
  0x87   :  { %9371 = vmatprep.subr.bf16.mxu1 %v9370_v22  ;;  %v893_v1 = vld [vmem:[#allocation6 + $0x28] sm:$0xff]  ;;  %v908_v11 = vld [vmem:[#allocation6 + $0xa0] sm:$0xff]  ;;  %v911_v12 = vld [vmem:[#allocation6 + $0xb8] sm:$0xff] }
  0x88   :  { %v12588_v16 = vpack.c.bf16 %v911_v12, %v908_v11  ;;  %v898_v17 = vld [vmem:[#allocation6 + $0x50] sm:$0xff]  ;;  %v917_v20 = vld [vmem:[#allocation6 + $0xe8] sm:$0xff]  ;;  %v904_v27 = vld [vmem:[#allocation6 + $0x80] sm:$0xff] }
  0x89   :  { %9329 = vmatpush3.bf16.msra.mxu0 %v9326_v31  ;;  %v894_v23 = vld [vmem:[#allocation6 + $0x30] sm:$0xff]  ;;  %v897_v24 = vld [vmem:[#allocation6 + $0x48] sm:$0xff]  ;;  %v920_v28 = vld [vmem:[#allocation6 + $0x100] sm:$0xff] }
  0x8a   :  { %9331 = vmatprep.subr.bf16.mxu0 %v9330_v46  ;;  %v901_v25 = vld [vmem:[#allocation6 + $0x68] sm:$0xff]  ;;  %v900_v34 = vld [vmem:[#allocation6 + $0x60] sm:$0xff]  ;;  %v903_v35 = vld [vmem:[#allocation6 + $0x78] sm:$0xff] }
  0x8b   :  { %v907_v36 = vld [vmem:[#allocation6 + $0x98] sm:$0xff]  ;;  %v910_v38 = vld [vmem:[#allocation6 + $0xb0] sm:$0xff]  ;;  %v929_v39 = vld [vmem:[#allocation6 + $0x148] sm:$0xff] }
  0x8c   :  { %v906_v44 = vld [vmem:[#allocation6 + $0x90] sm:$0xff]  ;;  %v916_v48 = vld [vmem:[#allocation6 + $0xe0] sm:$0xff]  ;;  %v927_v11 = vld [vmem:[#allocation6 + $0x138] sm:$0xff] }
  0x8d   :  { %9333 = vmatpush3.bf16.msra.mxu0 %v9330_v46  ;;  %v7278_v46 = vld [vmem:[%s14477_s2 + $0x120] sm:$0xff]  ;;  %v934_v12 = vld [vmem:[#allocation6 + $0x170] sm:$0xff] }
  0x8e   :  { %9335 = vmatprep.subr.bf16.mxu0 %v9334_v55  ;;  %v9380_v52 = vpack.c.bf16 %v7281_v47, %v7278_v46  ;;  %v913_v46 = vld [vmem:[#allocation6 + $0xc8] sm:$0xff] }
  0x91   :  { %9337 = vmatpush3.bf16.msra.mxu0 %v9334_v55  ;;  %v9382_v55 = vpack.c.bf16 %v7288_v50, %v7285_v49  ;;  %v935_v49 = vld [vmem:[#allocation6 + $0x178] sm:$0xff] }
  0x92   :  { %9355 = vmatprep.subr.bf16.mxu0 %v9354_v59 }
  0xef   :  { %v142_v62 = vpop.permute.xlu1 %141  ;;  %v136_v63 = vpop.permute.xlu0 %135 }
  0xf0   :  { %vm158_vm0 = vcmp.eq.s32.totalorder %v136_v63, %v133_v61  ;;  %vm160_vm1 = vcmp.eq.s32.totalorder %v142_v62, %v133_v61  ;;  %v9384_v63 = vpack.c.bf16 %v7287_v57, %v7284_v56  ;;  %v919_v57 = vld [vmem:[#allocation6 + $0xf8] sm:$0xff] }
  0xf1   :  { %8118 = vmatprep.mubr.msk.f32.mxu0 %vm158_vm0, %v12123_v2 }
  0xf3   :  { %v145_v3 = vpop.permute.xlu1 %144  ;;  %v139_v4 = vpop.permute.xlu0 %138 }
  0xf4   :  { %vm159_vm2 = vcmp.eq.s32.totalorder %v139_v4, %v133_v61  ;;  %vm161_vm3 = vcmp.eq.s32.totalorder %v145_v3, %v133_v61  ;;  %v12554_v3 = vpack.c.bf16 %v893_v1, %v890_v0  ;;  %v14490_v4 = vmov 0.0|0.0   ;;  %v921_v0 = vld [vmem:[#allocation6 + $0x108] sm:$0xff] }
  0xf5   :  { %8119 = vmatmul.mubr.msk.f32.vlgmr.msra.gmra.mrb[0].mxu0 %vm159_vm2, %v12123_v2  ;;  %v925_v1 = vld [vmem:[#allocation6 + $0x128] sm:$0xff] }
  0xf6   :  { %8121 = vmatprep.mubr.msk.f32.mxu0 %vm160_vm1, %v12123_v2  ;;  %9357 = vmatpush3.bf16.msra.mxu0 %v9354_v59  ;;  %v892_v59 = vld [vmem:[#allocation6 + $0x20] sm:$0xff] }
  0xf7   :  { %v151_v8 = vpop.permute.xlu1 %150  ;;  %v148_v9 = vpop.permute.xlu0 %147  ;;  %9359 = vmatprep.subr.bf16.mxu0 %v9358_v5 }
  0xf8   :  { %vm162_vm4 = vcmp.eq.s32.totalorder %v148_v9, %v133_v61  ;;  %vm163_vm5 = vcmp.eq.s32.totalorder %v151_v8, %v133_v61  ;;  %v902_v8 = vld [vmem:[#allocation6 + $0x70] sm:$0xff]  ;;  %v905_v9 = vld [vmem:[#allocation6 + $0x88] sm:$0xff] }
  0xf9   :  { %8122 = vmatmul.mubr.msk.f32.gmra.mrb[2].mxu0 %vm161_vm3, %v12123_v2 }
  0xfa   :  { %8124 = vmatprep.mubr.msk.f32.mxu0 %vm162_vm4, %v12123_v2  ;;  %9361 = vmatpush3.bf16.msra.mxu0 %v9358_v5  ;;  %v896_v5 = vld [vmem:[#allocation6 + $0x40] sm:$0xff] }
  0xfb   :  { %v154_v13 = vpop.permute.xlu0 %153  ;;  %9363 = vmatprep.subr.bf16.mxu0 %v9362_v10  ;;  %v157_v15 = vpop.permute.xlu1 %156  ;;  %v12566_v7 = vpack.c.bf16 %v899_v6, %v896_v5  ;;  %v928_v5 = vld [vmem:[#allocation6 + $0x140] sm:$0xff] }
  0xfc   :  { %vm164_vm6 = vcmp.eq.s32.totalorder %v154_v13, %v133_v61  ;;  %vm165_vm7 = vcmp.eq.s32.totalorder %v157_v15, %v133_v61  ;;  %v888_v13 = vld [vmem:[#allocation6] sm:$0xff]  ;;  %v895_v15 = vld [vmem:[#allocation6 + $0x38] sm:$0xff] }
  0xfd   :  { %8125 = vmatmul.mubr.msk.f32.gmra.mrb[4].mxu0 %vm163_vm5, %v12123_v2  ;;  %v12598_v22 = vpack.c.bf16 %v898_v17, %v895_v15  ;;  %v12665_v6 = vld [vmem:[%s14485_s10] sm:$0xff]  ;;  %v930_v15 = vld [vmem:[#allocation6 + $0x150] sm:$0xff]  ;;  %v933_v17 = vld [vmem:[#allocation6 + $0x168] sm:$0xff] }
  0xfe   :  { %8127 = vmatprep.mubr.msk.f32.mxu0 %vm164_vm6, %v12123_v2  ;;  %9365 = vmatpush3.bf16.msra.mxu0 %v9362_v10  ;;  %v12577_v10 = vpack.c.bf16 %v905_v9, %v902_v8  ;;  %v12668_v8 = vpack.c.bf16 %v928_v5, %v925_v1  ;;  %v924_v9 = vld [vmem:[#allocation6 + $0x120] sm:$0xff] }
  0xff   :  { %9367 = vmatprep.subr.bf16.mxu0 %v9366_v14 }
 0x101   :  { %8128 = vmatmul.mubr.msk.f32.gmra.mrb[6].mxu0 %vm165_vm7, %v12123_v2  ;;  %v12547_v2 = vpack.c.bf16 %v892_v59, %v889_v58  ;;  %v922_v58 = vld [vmem:[#allocation6 + $0x110] sm:$0xff] }
 0x102   :  { %9369 = vmatpush3.bf16.msra.mxu0 %v9366_v14  ;;  %v891_v14 = vld [vmem:[#allocation6 + $0x18] sm:$0xff]  ;;  %v12652_v59 = vpack.c.bf16 %v922_v58, %v919_v57 }
 0x103   :  { %9387 = vmatprep.subr.bf16.mxu0 %v9386_v19  ;;  %v12596_v21 = vpack.c.bf16 %v891_v14, %v888_v13  ;;  %v12679_v13 = vpack.c.bf16 %v927_v11, %v924_v9 }
 0x1c8   :  { %v12464_v30 = vpop.f32.mrb[0].mxu0 }
 0x1c9   :  { %v12466_v31 = vpop.f32.mrb[1].mxu0 }
 0x1ca   :  { %7250 = vmatmul.mubr.msk.f32.vlgmr.msra.gmra.mrb[0].mxu1 %vm336_vm8, %v12466_v31  ;;  %8146 = vmatprep.mubr.msk.f32.mxu0 %vm336_vm8, %v12466_v31 }
 0x1cb   :  { %8147 = vmatmul.mubr.msk.f32.vlgmr.msra.gmra.mrb[8].mxu0 %vm336_vm8, %v12464_v30  ;;  %9373 = vmatpush1.bf16.msra.mxu1 %v9372_v29  ;;  %v923_v29 = vld [vmem:[#allocation6 + $0x118] sm:$0xff] }
 0x1cc   :  { %v12492_v40 = vpop.f32.mrb[2].mxu0  ;;  %9389 = vmatpush3.bf16.msra.mxu0 %v9386_v19  ;;  %431 = vmatprep.mubr.f32.mxu1 %v14488_v18  ;;  %v914_v19 = vld [vmem:[#allocation6 + $0xd0] sm:$0xff]  ;;  %v12616_v37 = vpack.c.bf16 %v923_v29, %v920_v28 }
 0x1cd   :  { %v12495_v42 = vpop.f32.mrb[3].mxu0  ;;  %9391 = vmatprep.subr.bf16.mxu0 %v9390_v32  ;;  %9375 = vmatprep.subr.bf16.mxu1 %v9374_v33  ;;  %v12601_v26 = vpack.c.bf16 %v917_v20, %v914_v19  ;;  %v12613_v33 = vpack.c.bf16 %v904_v27, %v901_v25  ;;  %v319_v19 = vld [vmem:[#allocation9] sm:$0x7] }
 0x1ce   :  { %7251 = vmatmul.mubr.msk.f32.gmra.mrb[2].mxu1 %vm336_vm8, %v12464_v30  ;;  %8149 = vmatprep.mubr.msk.f32.mxu0 %vm336_vm8, %v12495_v42 }
 0x1cf   :  { %8150 = vmatmul.mubr.msk.f32.gmra.mrb[10].mxu0 %vm336_vm8, %v12492_v40  ;;  %437 = vmatprep.mubr.f32.mxu1 %v14488_v18 }
 0x1d0   :  { %v12522_v51 = vpop.f32.mrb[4].mxu0  ;;  %9393 = vmatpush3.bf16.msra.mxu0 %v9390_v32  ;;  %9377 = vmatpush1.bf16.msra.mxu1 %v9376_v41  ;;  %v12610_v32 = vpack.c.bf16 %v897_v24, %v894_v23  ;;  %v12623_v41 = vpack.c.bf16 %v903_v35, %v900_v34 }
 0x1d1   :  { %v12524_v53 = vpop.f32.mrb[5].mxu0  ;;  %9395 = vmatprep.subr.bf16.mxu0 %v9394_v43  ;;  %9379 = vmatprep.subr.bf16.mxu1 %v9378_v45  ;;  %v909_v45 = vld [vmem:[#allocation6 + $0xa8] sm:$0xff] }
 0x1d2   :  { %7252 = vmatmul.mubr.msk.f32.gmra.mrb[4].mxu1 %vm336_vm8, %v12495_v42  ;;  %8152 = vmatprep.mubr.msk.f32.mxu0 %vm336_vm8, %v12524_v53  ;;  %v12636_v50 = vpack.c.bf16 %v909_v45, %v906_v44 }
 0x1d3   :  { %8153 = vmatmul.mubr.msk.f32.gmra.mrb[12].mxu0 %vm336_vm8, %v12522_v51  ;;  %443 = vmatprep.mubr.f32.mxu1 %v14488_v18 }
 0x1d4   :  { %v12539_v61 = vpop.f32.mrb[6].mxu0  ;;  %9397 = vmatpush3.bf16.msra.mxu0 %v9394_v43  ;;  %9381 = vmatpush1.bf16.msra.mxu1 %v9380_v52  ;;  %v12626_v43 = vpack.c.bf16 %v910_v38, %v907_v36  ;;  %v12639_v52 = vpack.c.bf16 %v916_v48, %v913_v46 }
 0x1d5   :  { %v12541_v62 = vpop.f32.mrb[7].mxu0  ;;  %9399 = vmatprep.subr.bf16.mxu0 %v9398_v54  ;;  %9383 = vmatprep.subr.bf16.mxu1 %v9382_v55  ;;  %v915_v55 = vld [vmem:[#allocation6 + $0xd8] sm:$0xff] }
 0x1d6   :  { %7253 = vmatmul.mubr.msk.f32.gmra.mrb[6].mxu1 %vm336_vm8, %v12492_v40  ;;  %8155 = vmatprep.mubr.msk.f32.mxu0 %vm336_vm8, %v12541_v62 }
 0x1d7   :  { %8156 = vmatmul.mubr.msk.f32.gmra.mrb[14].mxu0 %vm336_vm8, %v12539_v61  ;;  %449 = vmatprep.mubr.f32.mxu1 %v14488_v18 }
 0x1d8   :  { %9401 = vmatpush3.bf16.msra.mxu0 %v9398_v54  ;;  %8174 = vmatprep.mubr.msk.f32.mxu0 %vm336_vm8, %v12466_v31  ;;  %v912_v54 = vld [vmem:[#allocation6 + $0xc0] sm:$0xff] }
 0x1d9   :  { %9385 = vmatpush1.bf16.msra.mxu1 %v9384_v63  ;;  %9434 = vmatprep.subr.bf16.mxu0 %v14490_v4  ;;  %v918_v63 = vld [vmem:[#allocation6 + $0xf0] sm:$0xff] }
 0x1da   :  { %7254 = vmatmul.mubr.msk.f32.gmra.mrb[8].mxu1 %vm336_vm8, %v12524_v53  ;;  %9403 = vmatprep.subr.bf16.mxu1 %v12547_v2 }
 0x1db   :  { %8175 = vmatmul.mubr.msk.f32.vlgmr.msra.gmra.mrb[16].mxu0 %vm336_vm8, %v12464_v30  ;;  %455 = vmatprep.mubr.f32.mxu1 %v14488_v18 }
 0x1dc   :  { %8177 = vmatprep.mubr.msk.f32.mxu0 %vm336_vm8, %v12495_v42  ;;  %9436 = vmatpush3.bf16.msra.mxu0 %v12554_v3 }
 0x1dd   :  { %9437 = vmatprep.subr.bf16.mxu0 %v14490_v4 }
 0x1de   :  { %7255 = vmatmul.mubr.msk.f32.gmra.mrb[10].mxu1 %vm336_vm8, %v12522_v51 }
 0x1df   :  { %8178 = vmatmul.mubr.msk.f32.gmra.mrb[18].mxu0 %vm336_vm8, %v12492_v40  ;;  %461 = vmatprep.mubr.f32.mxu1 %v14488_v18 }
 0x1e0   :  { %8180 = vmatprep.mubr.msk.f32.mxu0 %vm336_vm8, %v12524_v53  ;;  %9439 = vmatpush3.bf16.msra.mxu0 %v12566_v7 }
 0x1e1   :  { %9440 = vmatprep.subr.bf16.mxu0 %v14490_v4 }
 0x1e2   :  { %7256 = vmatmul.mubr.msk.f32.gmra.mrb[12].mxu1 %vm336_vm8, %v12541_v62 }
 0x1e3   :  { %8181 = vmatmul.mubr.msk.f32.gmra.mrb[20].mxu0 %vm336_vm8, %v12522_v51  ;;  %467 = vmatprep.mubr.f32.mxu1 %v14488_v18 }
 0x1e4   :  { %8183 = vmatprep.mubr.msk.f32.mxu0 %vm336_vm8, %v12541_v62  ;;  %9442 = vmatpush3.bf16.msra.mxu0 %v12577_v10 }
 0x1e5   :  { %9443 = vmatprep.subr.bf16.mxu0 %v14490_v4 }
 0x1e6   :  { %7257 = vmatmul.mubr.msk.f32.gmra.mrb[14].mxu1 %vm336_vm8, %v12539_v61 }
 0x1e7   :  { %8184 = vmatmul.mubr.msk.f32.gmra.mrb[22].mxu0 %vm336_vm8, %v12539_v61  ;;  %710 = vmatprep.mubr.f32.mxu1 %v14488_v18 }
 0x1e8   :  { %9445 = vmatpush3.bf16.msra.mxu0 %v12588_v16  ;;  %8218 = vmatprep.mubr.msk.f32.mxu0 %vm12126_vm9, %v14488_v18 }
 0x1e9   :  { %9446 = vmatprep.subr.bf16.mxu0 %v14490_v4 }
 0x1ea   :  { %7290 = vmatmul.mubr.msk.f32.vlgmr.msra.gmra.mrb[16].mxu1 %vm336_vm8, %v12466_v31  ;;  %v926_v31 = vld [vmem:[#allocation6 + $0x130] sm:$0xff] }
 0x1eb   :  { %9405 = vmatpush1.bf16.msra.mxu1 %v12596_v21  ;;  %716 = vmatprep.mubr.f32.mxu1 %v14488_v18  ;;  %v12629_v47 = vpack.c.bf16 %v929_v39, %v926_v31  ;;  %v629_v31 = vld [vmem:[#allocation9 + $0x3] sm:$0x7] }
 0x1ec   :  { %9407 = vmatprep.subr.bf16.mxu1 %v12598_v22  ;;  %9448 = vmatpush3.bf16.msra.mxu0 %v12601_v26 }
 0x1ed   :  { %9449 = vmatprep.subr.bf16.mxu0 %v14490_v4 }
 0x1ee   :  { %7291 = vmatmul.mubr.msk.f32.gmra.mrb[18].mxu1 %vm336_vm8, %v12464_v30  ;;  %v932_v30 = vld [vmem:[#allocation6 + $0x160] sm:$0xff] }
 0x1ef   :  { %9409 = vmatpush1.bf16.msra.mxu1 %v12610_v32  ;;  %722 = vmatprep.mubr.f32.mxu1 %v14488_v18  ;;  %v12642_v56 = vpack.c.bf16 %v935_v49, %v932_v30 }
 0x1f0   :  { %9411 = vmatprep.subr.bf16.mxu1 %v12613_v33  ;;  %9451 = vmatpush3.bf16.msra.mxu0 %v12616_v37 }
 0x1f1   :  { %9452 = vmatprep.subr.bf16.mxu0 %v14490_v4 }
 0x1f2   :  { %7292 = vmatmul.mubr.msk.f32.gmra.mrb[20].mxu1 %vm336_vm8, %v12495_v42  ;;  %v12649_v42 = vpack.c.bf16 %v915_v55, %v912_v54 }
 0x1f3   :  { %9413 = vmatpush1.bf16.msra.mxu1 %v12623_v41  ;;  %728 = vmatprep.mubr.f32.mxu1 %v14488_v18 }
 0x1f4   :  { %9415 = vmatprep.subr.bf16.mxu1 %v12626_v43  ;;  %9454 = vmatpush3.bf16.msra.mxu0 %v12629_v47 }
 0x1f5   :  { %9455 = vmatprep.subr.bf16.mxu0 %v14490_v4 }
 0x1f6   :  { %7293 = vmatmul.mubr.msk.f32.gmra.mrb[22].mxu1 %vm336_vm8, %v12492_v40  ;;  %v12660_v40 = vpack.c.bf16 %v921_v0, %v918_v63 }
 0x1f7   :  { %9417 = vmatpush1.bf16.msra.mxu1 %v12636_v50  ;;  %734 = vmatprep.mubr.f32.mxu1 %v14488_v18 }
 0x1f8   :  { %9419 = vmatprep.subr.bf16.mxu1 %v12639_v52  ;;  %9457 = vmatpush3.bf16.msra.mxu0 %v12642_v56 }
 0x1f9   :  { %9490 = vmatprep.subr.bf16.mxu0 %v14490_v4 }
 0x1fa   :  { %7294 = vmatmul.mubr.msk.f32.gmra.mrb[24].mxu1 %vm336_vm8, %v12524_v53  ;;  %v931_v53 = vld [vmem:[#allocation6 + $0x158] sm:$0xff] }
 0x1fb   :  { %9421 = vmatpush1.bf16.msra.mxu1 %v12649_v42  ;;  %740 = vmatprep.mubr.f32.mxu1 %v14488_v18  ;;  %v12682_v14 = vpack.c.bf16 %v934_v12, %v931_v53 }
 0x1fc   :  { %9423 = vmatprep.subr.bf16.mxu1 %v12652_v59  ;;  %8219 = vmatmul.mubr.f32.vlgmr.msra.gmra.mrb[24].mxu0 %v12665_v6 }
 0x1fd   :  { %9492 = vmatpush3.bf16.msra.mxu0 %v12554_v3  ;;  %8253 = vmatprep.mubr.msk.f32.mxu0 %vm12126_vm9, %v14488_v18 }
 0x1fe   :  { %7295 = vmatmul.mubr.msk.f32.gmra.mrb[26].mxu1 %vm336_vm8, %v12522_v51  ;;  %9493 = vmatprep.subr.bf16.mxu0 %v14490_v4  ;;  %v12690_v51 = vpack.c.bf16 %v933_v17, %v930_v15 }
 0x1ff   :  { %9425 = vmatpush1.bf16.msra.mxu1 %v12660_v40  ;;  %746 = vmatprep.mubr.f32.mxu1 %v14488_v18 }
 0x200   :  { %9427 = vmatprep.subr.bf16.mxu1 %v12668_v8 }
 0x201   :  { %9495 = vmatpush3.bf16.msra.mxu0 %v12566_v7 }
 0x202   :  { %7296 = vmatmul.mubr.msk.f32.gmra.mrb[28].mxu1 %vm336_vm8, %v12541_v62  ;;  %9496 = vmatprep.subr.bf16.mxu0 %v14490_v4 }
 0x203   :  { %9429 = vmatpush1.bf16.msra.mxu1 %v12679_v13  ;;  %752 = vmatprep.mubr.f32.mxu1 %v14488_v18 }
 0x204   :  { %9431 = vmatprep.subr.bf16.mxu1 %v12682_v14 }
 0x205   :  { %9498 = vmatpush3.bf16.msra.mxu0 %v12577_v10 }
 0x206   :  { %7297 = vmatmul.mubr.msk.f32.gmra.mrb[30].mxu1 %vm336_vm8, %v12539_v61  ;;  %9499 = vmatprep.subr.bf16.mxu0 %v14490_v4  ;;  %v322_v61 = vshrl.u32 %v132_v60, 7 }
 0x207   :  { %9433 = vmatpush1.bf16.msra.mxu1 %v12690_v51  ;;  %1021 = vmatprep.mubr.f32.mxu1 %v14488_v18 }
 0x208   :  { %9459 = vmatprep.subr.bf16.mxu1 %v12547_v2  ;;  %v12729_v62 = vsub.s32 2, %v322_v61 }
 0x209   :  { %9501 = vmatpush3.bf16.msra.mxu0 %v12588_v16 }
 0x20a   :  { %1022 = vmatmul.mubr.f32.vlgmr.msra.gmra.mrb[0].mxu1 %v12665_v6  ;;  %9502 = vmatprep.subr.bf16.mxu0 %v14490_v4  ;;  %v332_v20 = vrot.slane %v319_v19, %v12729_v62  ;;  %v12745_v46 = vrot.slane %v629_v31, %v12729_v62 }
 0x20b   :  { %9461 = vmatpush1.bf16.msra.mxu1 %v12596_v21  ;;  %1187 = vmatprep.mubr.f32.mxu1 %v14488_v18 }
 0x20c   :  { %9463 = vmatprep.subr.bf16.mxu1 %v12598_v22 }
 0x20d   :  { %9504 = vmatpush3.bf16.msra.mxu0 %v12601_v26 }
 0x20e   :  { %9505 = vmatprep.subr.bf16.mxu0 %v14490_v4 }
 0x20f   :  { %9465 = vmatpush1.bf16.msra.mxu1 %v12610_v32 }
 0x210   :  { %9467 = vmatprep.subr.bf16.mxu1 %v12613_v33 }
 0x211   :  { %9507 = vmatpush3.bf16.msra.mxu0 %v12616_v37 }
 0x212   :  { %9508 = vmatprep.subr.bf16.mxu0 %v14490_v4 }
 0x213   :  { %9469 = vmatpush1.bf16.msra.mxu1 %v12623_v41 }
 0x214   :  { %9471 = vmatprep.subr.bf16.mxu1 %v12626_v43 }
 0x215   :  { %9510 = vmatpush3.bf16.msra.mxu0 %v12629_v47 }
 0x216   :  { %9511 = vmatprep.subr.bf16.mxu0 %v14490_v4 }
 0x217   :  { %9473 = vmatpush1.bf16.msra.mxu1 %v12636_v50 }
 0x218   :  { %9475 = vmatprep.subr.bf16.mxu1 %v12639_v52 }
 0x219   :  { %9513 = vmatpush3.bf16.msra.mxu0 %v12642_v56 }
 0x21a   :  { %9546 = vmatprep.subr.bf16.mxu0 %v14490_v4 }
 0x21b   :  { %9477 = vmatpush1.bf16.msra.mxu1 %v12649_v42 }
 0x21c   :  { %9479 = vmatprep.subr.bf16.mxu1 %v12652_v59 }
 0x21f   :  { %9481 = vmatpush1.bf16.msra.mxu1 %v12660_v40 }
 0x220   :  { %9483 = vmatprep.subr.bf16.mxu1 %v12668_v8 }
 0x223   :  { %9485 = vmatpush1.bf16.msra.mxu1 %v12679_v13 }
 0x224   :  { %9487 = vmatprep.subr.bf16.mxu1 %v12682_v14 }
 0x227   :  { %9489 = vmatpush1.bf16.msra.mxu1 %v12690_v51 }
 0x228   :  { %9515 = vmatprep.subr.bf16.mxu1 %v12547_v2 }
 0x29e   :  { %v8148_v23 = vpop.f32.mrb[8].mxu0 }
 0x29f   :  { %v12732_v24 = vadd.f32 %v8148_v23, %v332_v20  ;;  %v540_v25 = vpop.f32.mrb[9].mxu0 }
 0x2a0   :  { %v541_v4 = vadd.f32 %v540_v25, %v332_v20 }
 0x2a2   :  { %v8151_v27 = vpop.f32.mrb[10].mxu0 }
 0x2a3   :  { %v12734_v28 = vadd.f32 %v8151_v27, %v332_v20  ;;  %v550_v29 = vpop.f32.mrb[11].mxu0  ;;  %v12772_v27 = vsub.s32 0, %v322_v61 }
 0x2a4   :  { %v12736_v34 = vadd.f32 %v550_v29, %v332_v20  ;;  %v936_v29 = vld [vmem:[#allocation11] sm:$0x7] }
 0x2a5   :  { %v945_v31 = vrot.slane %v936_v29, %v12772_v27 }
 0x2a6   :  { %v8154_v35 = vpop.f32.mrb[12].mxu0 }
 0x2a7   :  { %v12738_v36 = vadd.f32 %v8154_v35, %v332_v20  ;;  %v560_v38 = vpop.f32.mrb[13].mxu0  ;;  %v12774_v35 = vsub.s32 1, %v322_v61 }
 0x2a8   :  { %v12740_v60 = vadd.f32 %v560_v38, %v332_v20  ;;  %v324_v38 = vrot.slane %v319_v19, %v12772_v27 }
 0x2a9   :  { %14497 = vst [vmem:[#allocation27_spill] sm:$0xff] %v12774_v35 }
 0x2aa   :  { %v8157_v39 = vpop.f32.mrb[14].mxu0 }
 0x2ab   :  { %v12742_v44 = vadd.f32 %v8157_v39, %v332_v20  ;;  %v570_v45 = vpop.f32.mrb[15].mxu0  ;;  %v328_v39 = vrot.slane %v319_v19, %v12774_v35  ;;  %v12787_v19 = vrot.slane %v936_v29, %v12729_v62 }
 0x2ac   :  { %v12747_v48 = vadd.f32 %v570_v45, %v332_v20  ;;  %v949_v45 = vrot.slane %v936_v29, %v12774_v35  ;;  %v14499_v20 = vmov 0.0  }
 0x2ae   :  { %v8176_v30 = vpop.f32.mrb[16].mxu0 }
 0x2af   :  { %v12750_v49 = vadd.f32 %v8176_v30, %v12745_v46  ;;  %v825_v54 = vpop.f32.mrb[17].mxu0  ;;  %v12780_v30 = vadd.f32 %v945_v31, %v324_v38 }
 0x2b0   :  { %v12753_v55 = vadd.f32 %v825_v54, %v12745_v46 }
 0x2b2   :  { %14496 = vst [vmem:[#allocation26_spill] sm:$0xff] %v12753_v55  ;;  %v8179_v57 = vpop.f32.mrb[18].mxu0 }
 0x2b3   :  { %v12756_v58 = vadd.f32 %v8179_v57, %v12745_v46  ;;  %v835_v63 = vpop.f32.mrb[19].mxu0  ;;  %v12782_v57 = vadd.f32 %v949_v45, %v328_v39 }
 0x2b4   :  { %v12759_v0 = vadd.f32 %v835_v63, %v12745_v46 }
 0x2b6   :  { %v8182_v1 = vpop.f32.mrb[20].mxu0 }
 0x2b7   :  { %v12762_v5 = vadd.f32 %v8182_v1, %v12745_v46  ;;  %v845_v9 = vpop.f32.mrb[21].mxu0 }
 0x2b8   :  { %v12765_v11 = vadd.f32 %v845_v9, %v12745_v46 }
 0x2ba   :  { %v12767_v53 = vpop.f32.mrb[22].mxu0 }
 0x2bb   :  { %v855_v12 = vpop.f32.mrb[23].mxu0 }
 0x2bc   :  { %v12770_v15 = vadd.f32 %v855_v12, %v12745_v46 }
 0x2cf   :  { %v1094_v17 = vpop.f32.mrb[24].mxu0 }
 0x2d0   :  { %v8220_v23 = vpop.f32.mrb[25].mxu0  ;;  %v1095_v39 = vadd.f32 %v1094_v17, %v12787_v19 }
 0x2dd   :  { %v1023_v54 = vpop.f32.mrb[0].mxu1 }
 0x2de   :  { %v11387_v63 = vadd.f32 %v12780_v30, %v1023_v54  ;;  %v1025_v1 = vpop.f32.mrb[1].mxu1 }
 0x2df   :  { %v11389_v61 = vadd.f32 %v12782_v57, %v1025_v1 }
 0x2e0   :  { %v7306_v9 = vmul.f32 -1.442695, %v11387_v63 }
 0x2e1   :  { %v7307_v12 = vmul.f32 -1.442695, %v11389_v61 }
 0x2e2   :  { %11601 = vpow2.f32 %v7306_v9 }
 0x2e3   :  { %11603 = vpow2.f32 %v7307_v12 }
 0x2ec   :  { %v11602_v23 = vpop.eup %11601 }
 0x2ed   :  { %v1102_v18 = vadd.f32 1.0, %v11602_v23  ;;  %v11604_v38 = vpop.eup %11603 }
 0x2ee   :  { %v1109_v31 = vadd.f32 1.0, %v11604_v38 }
 0x2ef   :  { %11605 = vrcp.f32 %v1102_v18 }
 0x2f0   :  { %11607 = vrcp.f32 %v1109_v31 }
 0x2f9   :  { %v11606_v45 = vpop.eup %11605 }
 0x2fa   :  { %v1112_v54 = vmul.f32 %v11606_v45, %v1095_v39  ;;  %v11608_v1 = vpop.eup %11607 }
 0x2fb   :  { %v1115_v9 = vsub.f32 1.0, %v11608_v1  ;;  %v1117_v12 = vmul.f32 %v11608_v1, %v12665_v6 }
 0x2fc   :  { %v1113_v63 = vadd.f32 %v1112_v54, %v541_v4  ;;  %v14498_v4 = vmov 0.0|0.0  }
 0x2fe   :  { %11609 = vtanh.f32 %v1113_v63 }
 0x308   :  { %v11610_v61 = vpop.eup %11609 }
 0x309   :  { %v1116_v23 = vmul.f32 %v11610_v61, %v1115_v9 }
 0x30b   :  { %v12791_v18 = vadd.f32 %v1117_v12, %v1116_v23 }
 0x30d   :  { %1188 = vmatmul.mubr.f32.vlgmr.msra.gmra.mrb[2].mxu1 %v12791_v18  ;;  %8254 = vmatmul.mubr.f32.vlgmr.msra.gmra.mrb[26].mxu0 %v12791_v18 }
 0x30e   :  { %9517 = vmatpush1.bf16.msra.mxu1 %v12596_v21  ;;  %9548 = vmatpush3.bf16.msra.mxu0 %v12554_v3 }
 0x30f   :  { %9519 = vmatprep.subr.bf16.mxu1 %v12598_v22  ;;  %9549 = vmatprep.subr.bf16.mxu0 %v14498_v4 }
 0x310   :  { %1353 = vmatprep.mubr.f32.mxu1 %v14499_v20  ;;  %8288 = vmatprep.mubr.msk.f32.mxu0 %vm12126_vm9, %v14499_v20 }
 0x312   :  { %9521 = vmatpush1.bf16.msra.mxu1 %v12610_v32  ;;  %9551 = vmatpush3.bf16.msra.mxu0 %v12566_v7 }
 0x313   :  { %9523 = vmatprep.subr.bf16.mxu1 %v12613_v33  ;;  %9552 = vmatprep.subr.bf16.mxu0 %v14498_v4 }
 0x316   :  { %9525 = vmatpush1.bf16.msra.mxu1 %v12623_v41  ;;  %9554 = vmatpush3.bf16.msra.mxu0 %v12577_v10 }
 0x317   :  { %9527 = vmatprep.subr.bf16.mxu1 %v12626_v43  ;;  %9555 = vmatprep.subr.bf16.mxu0 %v14498_v4 }
 0x31a   :  { %9529 = vmatpush1.bf16.msra.mxu1 %v12636_v50  ;;  %9557 = vmatpush3.bf16.msra.mxu0 %v12588_v16 }
 0x31b   :  { %9531 = vmatprep.subr.bf16.mxu1 %v12639_v52  ;;  %9558 = vmatprep.subr.bf16.mxu0 %v14498_v4 }
 0x31e   :  { %9533 = vmatpush1.bf16.msra.mxu1 %v12649_v42  ;;  %9560 = vmatpush3.bf16.msra.mxu0 %v12601_v26 }
 0x31f   :  { %9535 = vmatprep.subr.bf16.mxu1 %v12652_v59  ;;  %9561 = vmatprep.subr.bf16.mxu0 %v14498_v4 }
 0x322   :  { %9537 = vmatpush1.bf16.msra.mxu1 %v12660_v40  ;;  %9563 = vmatpush3.bf16.msra.mxu0 %v12616_v37 }
 0x323   :  { %9539 = vmatprep.subr.bf16.mxu1 %v12668_v8  ;;  %9564 = vmatprep.subr.bf16.mxu0 %v14498_v4 }
 0x326   :  { %9541 = vmatpush1.bf16.msra.mxu1 %v12679_v13  ;;  %9566 = vmatpush3.bf16.msra.mxu0 %v12629_v47 }
 0x327   :  { %9543 = vmatprep.subr.bf16.mxu1 %v12682_v14  ;;  %9567 = vmatprep.subr.bf16.mxu0 %v14498_v4 }
 0x32a   :  { %9545 = vmatpush1.bf16.msra.mxu1 %v12690_v51  ;;  %9569 = vmatpush3.bf16.msra.mxu0 %v12642_v56 }
 0x32b   :  { %9571 = vmatprep.subr.bf16.mxu1 %v12547_v2  ;;  %9602 = vmatprep.subr.bf16.mxu0 %v14498_v4 }
 0x3e0   :  { %v1189_v6 = vpop.f32.mrb[2].mxu1  ;;  %v1260_v25 = vpop.f32.mrb[26].mxu0 }
 0x3e1   :  { %v11391_v17 = vadd.f32 %v12780_v30, %v1189_v6  ;;  %v1191_v29 = vpop.f32.mrb[3].mxu1  ;;  %v8255_v38 = vpop.f32.mrb[27].mxu0  ;;  %v1261_v61 = vadd.f32 %v1260_v25, %v12787_v19 }
 0x3e2   :  { %v11393_v39 = vadd.f32 %v12782_v57, %v1191_v29 }
 0x3e3   :  { %v7308_v31 = vmul.f32 -1.442695, %v11391_v17 }
 0x3e4   :  { %v7309_v45 = vmul.f32 -1.442695, %v11393_v39 }
 0x3e5   :  { %11611 = vpow2.f32 %v7308_v31 }
 0x3e6   :  { %11613 = vpow2.f32 %v7309_v45 }
 0x3ef   :  { %v11612_v54 = vpop.eup %11611 }
 0x3f0   :  { %v1268_v63 = vadd.f32 1.0, %v11612_v54  ;;  %v11614_v1 = vpop.eup %11613 }
 0x3f1   :  { %v1275_v9 = vadd.f32 1.0, %v11614_v1 }
 0x3f2   :  { %11615 = vrcp.f32 %v1268_v63 }
 0x3f3   :  { %11617 = vrcp.f32 %v1275_v9 }
 0x3fc   :  { %v11616_v12 = vpop.eup %11615 }
 0x3fd   :  { %v1278_v23 = vmul.f32 %v11616_v12, %v1261_v61  ;;  %v11618_v38 = vpop.eup %11617 }
 0x3fe   :  { %v1281_v17 = vsub.f32 1.0, %v11618_v38  ;;  %v1283_v31 = vmul.f32 %v11618_v38, %v12791_v18 }
 0x3ff   :  { %v1279_v6 = vadd.f32 %v1278_v23, %v12732_v24 }
 0x401   :  { %11619 = vtanh.f32 %v1279_v6 }
 0x40b   :  { %v11620_v55 = vpop.eup %11619 }
 0x40c   :  { %v1282_v29 = vmul.f32 %v11620_v55, %v1281_v17 }
 0x40e   :  { %v12835_v39 = vadd.f32 %v1283_v31, %v1282_v29 }
 0x410   :  { %1354 = vmatmul.mubr.f32.vlgmr.msra.gmra.mrb[4].mxu1 %v12835_v39  ;;  %8289 = vmatmul.mubr.f32.vlgmr.msra.gmra.mrb[28].mxu0 %v12835_v39 }
 0x411   :  { %9573 = vmatpush1.bf16.msra.mxu1 %v12596_v21  ;;  %9604 = vmatpush3.bf16.msra.mxu0 %v12554_v3 }
 0x412   :  { %9575 = vmatprep.subr.bf16.mxu1 %v12598_v22  ;;  %9605 = vmatprep.subr.bf16.mxu0 %v14498_v4 }
 0x413   :  { %1519 = vmatprep.mubr.f32.mxu1 %v14499_v20  ;;  %8323 = vmatprep.mubr.msk.f32.mxu0 %vm12126_vm9, %v14499_v20 }
 0x415   :  { %9577 = vmatpush1.bf16.msra.mxu1 %v12610_v32  ;;  %9607 = vmatpush3.bf16.msra.mxu0 %v12566_v7 }
 0x416   :  { %9579 = vmatprep.subr.bf16.mxu1 %v12613_v33  ;;  %9608 = vmatprep.subr.bf16.mxu0 %v14498_v4 }
 0x419   :  { %9581 = vmatpush1.bf16.msra.mxu1 %v12623_v41  ;;  %9610 = vmatpush3.bf16.msra.mxu0 %v12577_v10 }
 0x41a   :  { %9583 = vmatprep.subr.bf16.mxu1 %v12626_v43  ;;  %9611 = vmatprep.subr.bf16.mxu0 %v14498_v4 }
 0x41d   :  { %9585 = vmatpush1.bf16.msra.mxu1 %v12636_v50  ;;  %9613 = vmatpush3.bf16.msra.mxu0 %v12588_v16 }
 0x41e   :  { %9587 = vmatprep.subr.bf16.mxu1 %v12639_v52  ;;  %9614 = vmatprep.subr.bf16.mxu0 %v14498_v4 }
 0x421   :  { %9589 = vmatpush1.bf16.msra.mxu1 %v12649_v42  ;;  %9616 = vmatpush3.bf16.msra.mxu0 %v12601_v26 }
 0x422   :  { %9591 = vmatprep.subr.bf16.mxu1 %v12652_v59  ;;  %9617 = vmatprep.subr.bf16.mxu0 %v14498_v4 }
 0x425   :  { %9593 = vmatpush1.bf16.msra.mxu1 %v12660_v40  ;;  %9619 = vmatpush3.bf16.msra.mxu0 %v12616_v37 }
 0x426   :  { %9595 = vmatprep.subr.bf16.mxu1 %v12668_v8  ;;  %9620 = vmatprep.subr.bf16.mxu0 %v14498_v4 }
 0x429   :  { %9597 = vmatpush1.bf16.msra.mxu1 %v12679_v13  ;;  %9622 = vmatpush3.bf16.msra.mxu0 %v12629_v47 }
 0x42a   :  { %9599 = vmatprep.subr.bf16.mxu1 %v12682_v14  ;;  %9623 = vmatprep.subr.bf16.mxu0 %v14498_v4 }
 0x42d   :  { %9601 = vmatpush1.bf16.msra.mxu1 %v12690_v51  ;;  %9625 = vmatpush3.bf16.msra.mxu0 %v12642_v56 }
 0x42e   :  { %9627 = vmatprep.subr.bf16.mxu1 %v12547_v2  ;;  %9658 = vmatprep.subr.bf16.mxu0 %v14498_v4 }
 0x4e3   :  { %v1355_v24 = vpop.f32.mrb[4].mxu1  ;;  %v1426_v55 = vpop.f32.mrb[28].mxu0 }
 0x4e4   :  { %v11395_v25 = vadd.f32 %v12780_v30, %v1355_v24  ;;  %v1357_v45 = vpop.f32.mrb[5].mxu1  ;;  %v8290_v54 = vpop.f32.mrb[29].mxu0  ;;  %v1427_v38 = vadd.f32 %v1426_v55, %v12787_v19 }
 0x4e5   :  { %v11397_v1 = vadd.f32 %v12782_v57, %v1357_v45 }
 0x4e6   :  { %v7310_v63 = vmul.f32 -1.442695, %v11395_v25 }
 0x4e7   :  { %v7311_v9 = vmul.f32 -1.442695, %v11397_v1 }
 0x4e8   :  { %11621 = vpow2.f32 %v7310_v63 }
 0x4e9   :  { %11623 = vpow2.f32 %v7311_v9 }
 0x4f2   :  { %v11622_v61 = vpop.eup %11621 }
 0x4f3   :  { %v1434_v12 = vadd.f32 1.0, %v11622_v61  ;;  %v11624_v23 = vpop.eup %11623 }
 0x4f4   :  { %v1441_v6 = vadd.f32 1.0, %v11624_v23 }
 0x4f5   :  { %11625 = vrcp.f32 %v1434_v12 }
 0x4f6   :  { %11627 = vrcp.f32 %v1441_v6 }
 0x4ff   :  { %v11626_v17 = vpop.eup %11625 }
 0x500   :  { %v1444_v29 = vmul.f32 %v11626_v17, %v1427_v38  ;;  %v11628_v24 = vpop.eup %11627 }
 0x501   :  { %v1447_v25 = vsub.f32 1.0, %v11628_v24  ;;  %v1449_v63 = vmul.f32 %v11628_v24, %v12835_v39 }
 0x502   :  { %v1445_v31 = vadd.f32 %v1444_v29, %v12736_v34 }
 0x504   :  { %11629 = vtanh.f32 %v1445_v31 }
 0x50e   :  { %v11630_v54 = vpop.eup %11629 }
 0x50f   :  { %v1448_v45 = vmul.f32 %v11630_v54, %v1447_v25 }
 0x511   :  { %v12879_v1 = vadd.f32 %v1449_v63, %v1448_v45 }
 0x513   :  { %1520 = vmatmul.mubr.f32.vlgmr.msra.gmra.mrb[6].mxu1 %v12879_v1  ;;  %8324 = vmatmul.mubr.f32.vlgmr.msra.gmra.mrb[30].mxu0 %v12879_v1 }
 0x514   :  { %9629 = vmatpush1.bf16.msra.mxu1 %v12596_v21  ;;  %9660 = vmatpush3.bf16.msra.mxu0 %v12554_v3 }
 0x515   :  { %9631 = vmatprep.subr.bf16.mxu1 %v12598_v22  ;;  %9661 = vmatprep.subr.bf16.mxu0 %v14498_v4 }
 0x516   :  { %1685 = vmatprep.mubr.f32.mxu1 %v14499_v20  ;;  %8358 = vmatprep.mubr.msk.f32.mxu0 %vm12126_vm9, %v14499_v20 }
 0x518   :  { %9633 = vmatpush1.bf16.msra.mxu1 %v12610_v32  ;;  %9663 = vmatpush3.bf16.msra.mxu0 %v12566_v7 }
 0x519   :  { %9635 = vmatprep.subr.bf16.mxu1 %v12613_v33  ;;  %9664 = vmatprep.subr.bf16.mxu0 %v14498_v4 }
 0x51c   :  { %9637 = vmatpush1.bf16.msra.mxu1 %v12623_v41  ;;  %9666 = vmatpush3.bf16.msra.mxu0 %v12577_v10 }
 0x51d   :  { %9639 = vmatprep.subr.bf16.mxu1 %v12626_v43  ;;  %9667 = vmatprep.subr.bf16.mxu0 %v14498_v4 }
 0x520   :  { %9641 = vmatpush1.bf16.msra.mxu1 %v12636_v50  ;;  %9669 = vmatpush3.bf16.msra.mxu0 %v12588_v16 }
 0x521   :  { %9643 = vmatprep.subr.bf16.mxu1 %v12639_v52  ;;  %9670 = vmatprep.subr.bf16.mxu0 %v14498_v4 }
 0x524   :  { %9645 = vmatpush1.bf16.msra.mxu1 %v12649_v42  ;;  %9672 = vmatpush3.bf16.msra.mxu0 %v12601_v26 }
 0x525   :  { %9647 = vmatprep.subr.bf16.mxu1 %v12652_v59  ;;  %9673 = vmatprep.subr.bf16.mxu0 %v14498_v4 }
 0x528   :  { %9649 = vmatpush1.bf16.msra.mxu1 %v12660_v40  ;;  %9675 = vmatpush3.bf16.msra.mxu0 %v12616_v37 }
 0x529   :  { %9651 = vmatprep.subr.bf16.mxu1 %v12668_v8  ;;  %9676 = vmatprep.subr.bf16.mxu0 %v14498_v4 }
 0x52c   :  { %9653 = vmatpush1.bf16.msra.mxu1 %v12679_v13  ;;  %9678 = vmatpush3.bf16.msra.mxu0 %v12629_v47 }
 0x52d   :  { %9655 = vmatprep.subr.bf16.mxu1 %v12682_v14  ;;  %9679 = vmatprep.subr.bf16.mxu0 %v14498_v4 }
 0x530   :  { %9657 = vmatpush1.bf16.msra.mxu1 %v12690_v51  ;;  %9681 = vmatpush3.bf16.msra.mxu0 %v12642_v56 }
 0x531   :  { %9683 = vmatprep.subr.bf16.mxu1 %v12547_v2  ;;  %9714 = vmatprep.subr.bf16.mxu0 %v14498_v4 }
 0x5e6   :  { %v1521_v34 = vpop.f32.mrb[6].mxu1  ;;  %v1592_v55 = vpop.f32.mrb[30].mxu0 }
 0x5e7   :  { %v11399_v9 = vadd.f32 %v12780_v30, %v1521_v34  ;;  %v1523_v61 = vpop.f32.mrb[7].mxu1  ;;  %v8325_v12 = vpop.f32.mrb[31].mxu0  ;;  %v1593_v25 = vadd.f32 %v1592_v55, %v12787_v19 }
 0x5e8   :  { %v11401_v6 = vadd.f32 %v12782_v57, %v1523_v61 }
 0x5e9   :  { %v7312_v23 = vmul.f32 -1.442695, %v11399_v9 }
 0x5ea   :  { %v7313_v38 = vmul.f32 -1.442695, %v11401_v6 }
 0x5eb   :  { %11631 = vpow2.f32 %v7312_v23 }
 0x5ec   :  { %11633 = vpow2.f32 %v7313_v38 }
 0x5f5   :  { %v11632_v17 = vpop.eup %11631 }
 0x5f6   :  { %v1600_v29 = vadd.f32 1.0, %v11632_v17  ;;  %v11634_v31 = vpop.eup %11633 }
 0x5f7   :  { %v1607_v24 = vadd.f32 1.0, %v11634_v31 }
 0x5f8   :  { %11635 = vrcp.f32 %v1600_v29 }
 0x5f9   :  { %11637 = vrcp.f32 %v1607_v24 }
 0x602   :  { %v11636_v54 = vpop.eup %11635 }
 0x603   :  { %v1610_v45 = vmul.f32 %v11636_v54, %v1593_v25  ;;  %v11638_v34 = vpop.eup %11637 }
 0x604   :  { %v1613_v9 = vsub.f32 1.0, %v11638_v34  ;;  %v1615_v23 = vmul.f32 %v11638_v34, %v12879_v1 }
 0x605   :  { %v1611_v63 = vadd.f32 %v1610_v45, %v12734_v28 }
 0x607   :  { %11639 = vtanh.f32 %v1611_v63 }
 0x611   :  { %v11640_v12 = vpop.eup %11639 }
 0x612   :  { %v1614_v61 = vmul.f32 %v11640_v12, %v1613_v9 }
 0x614   :  { %v12923_v6 = vadd.f32 %v1615_v23, %v1614_v61 }
 0x616   :  { %1686 = vmatmul.mubr.f32.vlgmr.msra.gmra.mrb[8].mxu1 %v12923_v6  ;;  %8359 = vmatmul.mubr.f32.vlgmr.msra.gmra.mrb[32].mxu0 %v12923_v6 }
 0x617   :  { %9685 = vmatpush1.bf16.msra.mxu1 %v12596_v21  ;;  %9716 = vmatpush3.bf16.msra.mxu0 %v12554_v3 }
 0x618   :  { %9687 = vmatprep.subr.bf16.mxu1 %v12598_v22  ;;  %9717 = vmatprep.subr.bf16.mxu0 %v14498_v4 }
 0x619   :  { %1851 = vmatprep.mubr.f32.mxu1 %v14499_v20  ;;  %8393 = vmatprep.mubr.msk.f32.mxu0 %vm12126_vm9, %v14499_v20 }
 0x61b   :  { %9689 = vmatpush1.bf16.msra.mxu1 %v12610_v32  ;;  %9719 = vmatpush3.bf16.msra.mxu0 %v12566_v7 }
 0x61c   :  { %9691 = vmatprep.subr.bf16.mxu1 %v12613_v33  ;;  %9720 = vmatprep.subr.bf16.mxu0 %v14498_v4 }
 0x61f   :  { %9693 = vmatpush1.bf16.msra.mxu1 %v12623_v41  ;;  %9722 = vmatpush3.bf16.msra.mxu0 %v12577_v10 }
 0x620   :  { %9695 = vmatprep.subr.bf16.mxu1 %v12626_v43  ;;  %9723 = vmatprep.subr.bf16.mxu0 %v14498_v4 }
 0x623   :  { %9697 = vmatpush1.bf16.msra.mxu1 %v12636_v50  ;;  %9725 = vmatpush3.bf16.msra.mxu0 %v12588_v16 }
 0x624   :  { %9699 = vmatprep.subr.bf16.mxu1 %v12639_v52  ;;  %9726 = vmatprep.subr.bf16.mxu0 %v14498_v4 }
 0x627   :  { %9701 = vmatpush1.bf16.msra.mxu1 %v12649_v42  ;;  %9728 = vmatpush3.bf16.msra.mxu0 %v12601_v26 }
 0x628   :  { %9703 = vmatprep.subr.bf16.mxu1 %v12652_v59  ;;  %9729 = vmatprep.subr.bf16.mxu0 %v14498_v4 }
 0x62b   :  { %9705 = vmatpush1.bf16.msra.mxu1 %v12660_v40  ;;  %9731 = vmatpush3.bf16.msra.mxu0 %v12616_v37 }
 0x62c   :  { %9707 = vmatprep.subr.bf16.mxu1 %v12668_v8  ;;  %9732 = vmatprep.subr.bf16.mxu0 %v14498_v4 }
 0x62f   :  { %9709 = vmatpush1.bf16.msra.mxu1 %v12679_v13  ;;  %9734 = vmatpush3.bf16.msra.mxu0 %v12629_v47 }
 0x630   :  { %9711 = vmatprep.subr.bf16.mxu1 %v12682_v14  ;;  %9735 = vmatprep.subr.bf16.mxu0 %v14498_v4 }
 0x633   :  { %9713 = vmatpush1.bf16.msra.mxu1 %v12690_v51  ;;  %9737 = vmatpush3.bf16.msra.mxu0 %v12642_v56 }
 0x634   :  { %9739 = vmatprep.subr.bf16.mxu1 %v12547_v2  ;;  %9770 = vmatprep.subr.bf16.mxu0 %v14498_v4 }
 0x6e9   :  { %v1687_v28 = vpop.f32.mrb[8].mxu1  ;;  %v1758_v55 = vpop.f32.mrb[32].mxu0 }
 0x6ea   :  { %v11403_v38 = vadd.f32 %v12780_v30, %v1687_v28  ;;  %v1689_v17 = vpop.f32.mrb[9].mxu1  ;;  %v8360_v29 = vpop.f32.mrb[33].mxu0  ;;  %v1759_v9 = vadd.f32 %v1758_v55, %v12787_v19 }
 0x6eb   :  { %v11405_v24 = vadd.f32 %v12782_v57, %v1689_v17 }
 0x6ec   :  { %v7314_v31 = vmul.f32 -1.442695, %v11403_v38 }
 0x6ed   :  { %v7315_v25 = vmul.f32 -1.442695, %v11405_v24 }
 0x6ee   :  { %11641 = vpow2.f32 %v7314_v31 }
 0x6ef   :  { %11643 = vpow2.f32 %v7315_v25 }
 0x6f8   :  { %v11642_v54 = vpop.eup %11641 }
 0x6f9   :  { %v1766_v45 = vadd.f32 1.0, %v11642_v54  ;;  %v11644_v63 = vpop.eup %11643 }
 0x6fa   :  { %v1773_v34 = vadd.f32 1.0, %v11644_v63 }
 0x6fb   :  { %11645 = vrcp.f32 %v1766_v45 }
 0x6fc   :  { %11647 = vrcp.f32 %v1773_v34 }
 0x705   :  { %v11646_v12 = vpop.eup %11645 }
 0x706   :  { %v1776_v61 = vmul.f32 %v11646_v12, %v1759_v9  ;;  %v11648_v28 = vpop.eup %11647 }
 0x707   :  { %v1779_v38 = vsub.f32 1.0, %v11648_v28  ;;  %v1781_v31 = vmul.f32 %v11648_v28, %v12923_v6 }
 0x708   :  { %v1777_v23 = vadd.f32 %v1776_v61, %v12740_v60 }
 0x70a   :  { %11649 = vtanh.f32 %v1777_v23 }
 0x714   :  { %v11650_v29 = vpop.eup %11649 }
 0x715   :  { %v1780_v17 = vmul.f32 %v11650_v29, %v1779_v38 }
 0x717   :  { %v12967_v24 = vadd.f32 %v1781_v31, %v1780_v17 }
 0x719   :  { %1852 = vmatmul.mubr.f32.vlgmr.msra.gmra.mrb[10].mxu1 %v12967_v24  ;;  %8394 = vmatmul.mubr.f32.vlgmr.msra.gmra.mrb[34].mxu0 %v12967_v24 }
 0x71a   :  { %9741 = vmatpush1.bf16.msra.mxu1 %v12596_v21  ;;  %9772 = vmatpush3.bf16.msra.mxu0 %v12554_v3 }
 0x71b   :  { %9743 = vmatprep.subr.bf16.mxu1 %v12598_v22  ;;  %9773 = vmatprep.subr.bf16.mxu0 %v14498_v4 }
 0x71c   :  { %2017 = vmatprep.mubr.f32.mxu1 %v14499_v20  ;;  %8428 = vmatprep.mubr.msk.f32.mxu0 %vm12126_vm9, %v14499_v20 }
 0x71e   :  { %9745 = vmatpush1.bf16.msra.mxu1 %v12610_v32  ;;  %9775 = vmatpush3.bf16.msra.mxu0 %v12566_v7 }
 0x71f   :  { %9747 = vmatprep.subr.bf16.mxu1 %v12613_v33  ;;  %9776 = vmatprep.subr.bf16.mxu0 %v14498_v4 }
 0x722   :  { %9749 = vmatpush1.bf16.msra.mxu1 %v12623_v41  ;;  %9778 = vmatpush3.bf16.msra.mxu0 %v12577_v10 }
 0x723   :  { %9751 = vmatprep.subr.bf16.mxu1 %v12626_v43  ;;  %9779 = vmatprep.subr.bf16.mxu0 %v14498_v4 }
 0x726   :  { %9753 = vmatpush1.bf16.msra.mxu1 %v12636_v50  ;;  %9781 = vmatpush3.bf16.msra.mxu0 %v12588_v16 }
 0x727   :  { %9755 = vmatprep.subr.bf16.mxu1 %v12639_v52  ;;  %9782 = vmatprep.subr.bf16.mxu0 %v14498_v4 }
 0x72a   :  { %9757 = vmatpush1.bf16.msra.mxu1 %v12649_v42  ;;  %9784 = vmatpush3.bf16.msra.mxu0 %v12601_v26 }
 0x72b   :  { %9759 = vmatprep.subr.bf16.mxu1 %v12652_v59  ;;  %9785 = vmatprep.subr.bf16.mxu0 %v14498_v4 }
 0x72e   :  { %9761 = vmatpush1.bf16.msra.mxu1 %v12660_v40  ;;  %9787 = vmatpush3.bf16.msra.mxu0 %v12616_v37 }
 0x72f   :  { %9763 = vmatprep.subr.bf16.mxu1 %v12668_v8  ;;  %9788 = vmatprep.subr.bf16.mxu0 %v14498_v4 }
 0x732   :  { %9765 = vmatpush1.bf16.msra.mxu1 %v12679_v13  ;;  %9790 = vmatpush3.bf16.msra.mxu0 %v12629_v47 }
 0x733   :  { %9767 = vmatprep.subr.bf16.mxu1 %v12682_v14  ;;  %9791 = vmatprep.subr.bf16.mxu0 %v14498_v4 }
 0x736   :  { %9769 = vmatpush1.bf16.msra.mxu1 %v12690_v51  ;;  %9793 = vmatpush3.bf16.msra.mxu0 %v12642_v56 }
 0x737   :  { %9795 = vmatprep.subr.bf16.mxu1 %v12547_v2  ;;  %9826 = vmatprep.subr.bf16.mxu0 %v14498_v4 }
 0x7ec   :  { %v1853_v60 = vpop.f32.mrb[10].mxu1  ;;  %v1924_v55 = vpop.f32.mrb[34].mxu0 }
 0x7ed   :  { %v11407_v25 = vadd.f32 %v12780_v30, %v1853_v60  ;;  %v1855_v54 = vpop.f32.mrb[11].mxu1  ;;  %v8395_v45 = vpop.f32.mrb[35].mxu0  ;;  %v1925_v2 = vadd.f32 %v1924_v55, %v12787_v19  ;;  %v2289_v55 = vld [vmem:[#allocation6 + $0x1a8] sm:$0xff] }
 0x7ee   :  { %v11409_v34 = vadd.f32 %v12782_v57, %v1855_v54 }
 0x7ef   :  { %v7316_v63 = vmul.f32 -1.442695, %v11407_v25 }
 0x7f0   :  { %v7317_v9 = vmul.f32 -1.442695, %v11409_v34 }
 0x7f1   :  { %11651 = vpow2.f32 %v7316_v63 }
 0x7f2   :  { %11653 = vpow2.f32 %v7317_v9  ;;  %v2291_v9 = vld [vmem:[#allocation6 + $0x1b8] sm:$0xff] }
 0x7fb   :  { %v11652_v12 = vpop.eup %11651 }
 0x7fc   :  { %v1932_v61 = vadd.f32 1.0, %v11652_v12  ;;  %v11654_v23 = vpop.eup %11653  ;;  %v2294_v12 = vld [vmem:[#allocation6 + $0x1d0] sm:$0xff] }
 0x7fd   :  { %v1939_v28 = vadd.f32 1.0, %v11654_v23 }
 0x7fe   :  { %11655 = vrcp.f32 %v1932_v61 }
 0x7ff   :  { %11657 = vrcp.f32 %v1939_v28 }
 0x808   :  { %v11656_v38 = vpop.eup %11655 }
 0x809   :  { %v1942_v29 = vmul.f32 %v11656_v38, %v1925_v2  ;;  %v11658_v31 = vpop.eup %11657  ;;  %v2290_v2 = vld [vmem:[#allocation6 + $0x1b0] sm:$0xff] }
 0x80a   :  { %v1945_v60 = vsub.f32 1.0, %v11658_v31  ;;  %v1947_v45 = vmul.f32 %v11658_v31, %v12967_v24  ;;  %v2292_v31 = vld [vmem:[#allocation6 + $0x1c0] sm:$0xff] }
 0x80b   :  { %v1943_v17 = vadd.f32 %v1942_v29, %v12738_v36  ;;  %v2286_v36 = vld [vmem:[#allocation6 + $0x190] sm:$0xff] }
 0x80c   :  { %v13059_v38 = vpack.c.bf16 %v2289_v55, %v2286_v36  ;;  %v2310_v36 = vld [vmem:[#allocation6 + $0x250] sm:$0xff]  ;;  %v2313_v55 = vld [vmem:[#allocation6 + $0x268] sm:$0xff] }
 0x80d   :  { %11659 = vtanh.f32 %v1943_v17  ;;  %v2293_v17 = vld [vmem:[#allocation6 + $0x1c8] sm:$0xff] }
 0x817   :  { %v11660_v25 = vpop.eup %11659 }
 0x818   :  { %v1946_v54 = vmul.f32 %v11660_v25, %v1945_v60  ;;  %v2295_v60 = vld [vmem:[#allocation6 + $0x1d8] sm:$0xff]  ;;  %v2297_v25 = vld [vmem:[#allocation6 + $0x1e8] sm:$0xff] }
 0x81a   :  { %v13011_v63 = vadd.f32 %v1947_v45, %v1946_v54  ;;  %v2300_v54 = vld [vmem:[#allocation6 + $0x200] sm:$0xff]  ;;  %v13068_v45 = vpack.c.bf16 %v2293_v17, %v2290_v2  ;;  %v2317_v17 = vld [vmem:[#allocation6 + $0x288] sm:$0xff] }
 0x81c   :  { %14500 = vst [vmem:[#allocation28_spill] sm:$0xff] %v13011_v63  ;;  %2018 = vmatmul.mubr.f32.vlgmr.msra.gmra.mrb[12].mxu1 %v13011_v63  ;;  %8429 = vmatmul.mubr.f32.vlgmr.msra.gmra.mrb[36].mxu0 %v13011_v63 }
 0x81d   :  { %9797 = vmatpush1.bf16.msra.mxu1 %v12596_v21  ;;  %9828 = vmatpush3.bf16.msra.mxu0 %v12554_v3  ;;  %v2285_v3 = vld [vmem:[#allocation6 + $0x188] sm:$0xff] }
 0x81e   :  { %9799 = vmatprep.subr.bf16.mxu1 %v12598_v22  ;;  %9829 = vmatprep.subr.bf16.mxu0 %v14498_v4 }
 0x81f   :  { %2183 = vmatprep.mubr.f32.mxu1 %v14499_v20  ;;  %8463 = vmatprep.mubr.msk.f32.mxu0 %vm12126_vm9, %v14499_v20 }
 0x821   :  { %9801 = vmatpush1.bf16.msra.mxu1 %v12610_v32  ;;  %9831 = vmatpush3.bf16.msra.mxu0 %v12566_v7  ;;  %v2288_v7 = vld [vmem:[#allocation6 + $0x1a0] sm:$0xff] }
 0x822   :  { %9803 = vmatprep.subr.bf16.mxu1 %v12613_v33  ;;  %9832 = vmatprep.subr.bf16.mxu0 %v14498_v4 }
 0x825   :  { %9805 = vmatpush1.bf16.msra.mxu1 %v12623_v41  ;;  %9834 = vmatpush3.bf16.msra.mxu0 %v12577_v10  ;;  %v13049_v10 = vpack.c.bf16 %v2288_v7, %v2285_v3  ;;  %v2296_v3 = vld [vmem:[#allocation6 + $0x1e0] sm:$0xff]  ;;  %v13071_v7 = vpack.c.bf16 %v2295_v60, %v2292_v31  ;;  %v2319_v60 = vld [vmem:[#allocation6 + $0x298] sm:$0xff] }
 0x826   :  { %9807 = vmatprep.subr.bf16.mxu1 %v12626_v43  ;;  %9835 = vmatprep.subr.bf16.mxu0 %v14498_v4  ;;  %v2316_v31 = vld [vmem:[#allocation6 + $0x280] sm:$0xff] }
 0x829   :  { %9809 = vmatpush1.bf16.msra.mxu1 %v12636_v50  ;;  %9837 = vmatpush3.bf16.msra.mxu0 %v12588_v16 }
 0x82a   :  { %9811 = vmatprep.subr.bf16.mxu1 %v12639_v52  ;;  %9838 = vmatprep.subr.bf16.mxu0 %v14498_v4 }
 0x82d   :  { %9813 = vmatpush1.bf16.msra.mxu1 %v12649_v42  ;;  %9840 = vmatpush3.bf16.msra.mxu0 %v12601_v26 }
 0x82e   :  { %9815 = vmatprep.subr.bf16.mxu1 %v12652_v59  ;;  %9841 = vmatprep.subr.bf16.mxu0 %v14498_v4 }
 0x831   :  { %9817 = vmatpush1.bf16.msra.mxu1 %v12660_v40  ;;  %9843 = vmatpush3.bf16.msra.mxu0 %v12616_v37 }
 0x832   :  { %9819 = vmatprep.subr.bf16.mxu1 %v12668_v8  ;;  %9844 = vmatprep.subr.bf16.mxu0 %v14498_v4 }
 0x835   :  { %9821 = vmatpush1.bf16.msra.mxu1 %v12679_v13  ;;  %9846 = vmatpush3.bf16.msra.mxu0 %v12629_v47  ;;  %v2284_v13 = vld [vmem:[#allocation6 + $0x180] sm:$0xff] }
 0x836   :  { %9823 = vmatprep.subr.bf16.mxu1 %v12682_v14  ;;  %9847 = vmatprep.subr.bf16.mxu0 %v14498_v4 }
 0x839   :  { %9825 = vmatpush1.bf16.msra.mxu1 %v12690_v51  ;;  %9849 = vmatpush3.bf16.msra.mxu0 %v12642_v56  ;;  %v2287_v51 = vld [vmem:[#allocation6 + $0x198] sm:$0xff] }
 0x83a   :  { %9882 = vmatprep.subr.bf16.mxu0 %v14498_v4  ;;  %9851 = vmatprep.subr.bf16.mxu1 %v13049_v10  ;;  %v13057_v28 = vpack.c.bf16 %v2287_v51, %v2284_v13  ;;  %v2311_v51 = vld [vmem:[#allocation6 + $0x258] sm:$0xff] }
 0x8ef   :  { %v2019_v16 = vpop.f32.mrb[12].mxu1  ;;  %v2090_v21 = vpop.f32.mrb[36].mxu0 }
 0x8f0   :  { %v11411_v22 = vadd.f32 %v12780_v30, %v2019_v16  ;;  %v2021_v26 = vpop.f32.mrb[13].mxu1  ;;  %v8430_v32 = vpop.f32.mrb[37].mxu0  ;;  %v2091_v56 = vadd.f32 %v2090_v21, %v12787_v19  ;;  %v13074_v16 = vpack.c.bf16 %v2300_v54, %v2297_v25  ;;  %v2299_v21 = vld [vmem:[#allocation6 + $0x1f8] sm:$0xff]  ;;  %v2321_v25 = vld [vmem:[#allocation6 + $0x2a8] sm:$0xff]  ;;  %v2324_v54 = vld [vmem:[#allocation6 + $0x2c0] sm:$0xff] }
 0x8f1   :  { %v11413_v37 = vadd.f32 %v12782_v57, %v2021_v26  ;;  %v2301_v26 = vld [vmem:[#allocation6 + $0x208] sm:$0xff]  ;;  %v2303_v32 = vld [vmem:[#allocation6 + $0x218] sm:$0xff] }
 0x8f2   :  { %v7318_v33 = vmul.f32 -1.442695, %v11411_v22  ;;  %v2298_v22 = vld [vmem:[#allocation6 + $0x1f0] sm:$0xff] }
 0x8f3   :  { %v7319_v41 = vmul.f32 -1.442695, %v11413_v37  ;;  %v13081_v37 = vpack.c.bf16 %v2299_v21, %v2296_v3  ;;  %v2320_v21 = vld [vmem:[#allocation6 + $0x2a0] sm:$0xff] }
 0x8f4   :  { %11661 = vpow2.f32 %v7318_v33  ;;  %v2306_v33 = vld [vmem:[#allocation6 + $0x230] sm:$0xff] }
 0x8f5   :  { %11663 = vpow2.f32 %v7319_v41  ;;  %v2302_v41 = vld [vmem:[#allocation6 + $0x210] sm:$0xff] }
 0x8fe   :  { %v11662_v43 = vpop.eup %11661 }
 0x8ff   :  { %v2098_v47 = vadd.f32 1.0, %v11662_v43  ;;  %v11664_v50 = vpop.eup %11663  ;;  %v13084_v43 = vpack.c.bf16 %v2301_v26, %v2298_v22  ;;  %v13114_v22 = vpack.c.bf16 %v2319_v60, %v2316_v31  ;;  %v13117_v26 = vpack.c.bf16 %v2324_v54, %v2321_v25 }
 0x900   :  { %v2105_v52 = vadd.f32 1.0, %v11664_v50  ;;  %v2305_v50 = vld [vmem:[#allocation6 + $0x228] sm:$0xff] }
 0x901   :  { %11665 = vrcp.f32 %v2098_v47  ;;  %v13087_v47 = vpack.c.bf16 %v2306_v33, %v2303_v32  ;;  %v2323_v32 = vld [vmem:[#allocation6 + $0x2b8] sm:$0xff]  ;;  %v2322_v33 = vld [vmem:[#allocation6 + $0x2b0] sm:$0xff] }
 0x902   :  { %11667 = vrcp.f32 %v2105_v52  ;;  %v2304_v52 = vld [vmem:[#allocation6 + $0x220] sm:$0xff] }
 0x90b   :  { %v11666_v42 = vpop.eup %11665 }
 0x90c   :  { %v2108_v59 = vmul.f32 %v11666_v42, %v2091_v56  ;;  %v11668_v8 = vpop.eup %11667  ;;  %v2307_v56 = vld [vmem:[#allocation6 + $0x238] sm:$0xff]  ;;  %v2309_v42 = vld [vmem:[#allocation6 + $0x248] sm:$0xff] }
 0x90d   :  { %v2111_v14 = vsub.f32 1.0, %v11668_v8  ;;  %v2113_v23 = vmul.f32 %v11668_v8, %v13011_v63  ;;  %v2308_v8 = vld [vmem:[#allocation6 + $0x240] sm:$0xff]  ;;  %v13094_v13 = vpack.c.bf16 %v2307_v56, %v2304_v52  ;;  %v2330_v52 = vld [vmem:[#allocation6 + $0x2f0] sm:$0xff]  ;;  %v13121_v56 = vpack.c.bf16 %v2323_v32, %v2320_v21 }
 0x90e   :  { %v2109_v40 = vadd.f32 %v2108_v59, %v12747_v48  ;;  %v13063_v48 = vpack.c.bf16 %v2294_v12, %v2291_v9  ;;  %v2312_v59 = vld [vmem:[#allocation6 + $0x260] sm:$0xff]  ;;  %v2318_v9 = vld [vmem:[#allocation6 + $0x290] sm:$0xff]  ;;  %v13101_v12 = vpack.c.bf16 %v2311_v51, %v2308_v8  ;;  %v2329_v51 = vld [vmem:[#allocation6 + $0x2e8] sm:$0xff] }
 0x910   :  { %11669 = vtanh.f32 %v2109_v40  ;;  %v13091_v40 = vpack.c.bf16 %v2305_v50, %v2302_v41  ;;  %v2325_v41 = vld [vmem:[#allocation6 + $0x2c8] sm:$0xff]  ;;  %v2327_v50 = vld [vmem:[#allocation6 + $0x2d8] sm:$0xff] }
 0x911   :  { %v13127_v8 = vpack.c.bf16 %v2330_v52, %v2327_v50 }
 0x91a   :  { %v11670_v34 = vpop.eup %11669 }
 0x91b   :  { %v2112_v61 = vmul.f32 %v11670_v34, %v2111_v14  ;;  %v13097_v14 = vpack.c.bf16 %v2312_v59, %v2309_v42  ;;  %v2315_v34 = vld [vmem:[#allocation6 + $0x278] sm:$0xff]  ;;  %v2326_v42 = vld [vmem:[#allocation6 + $0x2d0] sm:$0xff]  ;;  %v13124_v59 = vpack.c.bf16 %v2325_v41, %v2322_v33 }
 0x91c   :  { %v13107_v2 = vpack.c.bf16 %v2318_v9, %v2315_v34  ;;  %v13131_v34 = vpack.c.bf16 %v2329_v51, %v2326_v42  ;;  %v2333_v42 = vld [vmem:[#allocation11 + $0x3] sm:$0x7] }
 0x91d   :  { %v13061_v29 = vadd.f32 %v2113_v23, %v2112_v61  ;;  %v2314_v61 = vld [vmem:[#allocation6 + $0x270] sm:$0xff]  ;;  %v13104_v23 = vpack.c.bf16 %v2313_v55, %v2310_v36  ;;  %v2328_v36 = vld [vmem:[#allocation6 + $0x2e0] sm:$0xff]  ;;  %v2331_v55 = vld [vmem:[#allocation6 + $0x2f8] sm:$0xff]  ;;  %v2343_v63 = vrot.slane %v2333_v42, %v12772_v27 }
 0x91e   :  { %v13111_v3 = vpack.c.bf16 %v2317_v17, %v2314_v61  ;;  %v13134_v9 = vpack.c.bf16 %v2331_v55, %v2328_v36  ;;  %v13142_v61 = vld [vmem:[%s14485_s10 + $0x8] sm:$0xff]  ;;  %v11921_v36 = vld [vmem:[#allocation9 + $0x3] sm:$0x7] }
 0x91f   :  { %2184 = vmatmul.mubr.f32.vlgmr.msra.gmra.mrb[14].mxu1 %v13061_v29  ;;  %8464 = vmatmul.mubr.f32.vlgmr.msra.gmra.mrb[38].mxu0 %v13061_v29  ;;  %v634_v55 = vrot.slane %v11921_v36, %v12772_v27 }
 0x920   :  { %9853 = vmatpush1.bf16.msra.mxu1 %v13057_v28  ;;  %9884 = vmatpush3.bf16.msra.mxu0 %v13059_v38 }
 0x921   :  { %9855 = vmatprep.subr.bf16.mxu1 %v13063_v48  ;;  %9885 = vmatprep.subr.bf16.mxu0 %v14498_v4 }
 0x922   :  { %2419 = vmatprep.mubr.f32.mxu1 %v14499_v20  ;;  %8498 = vmatprep.mubr.msk.f32.mxu0 %vm12126_vm9, %v14499_v20 }
 0x924   :  { %9857 = vmatpush1.bf16.msra.mxu1 %v13068_v45  ;;  %9887 = vmatpush3.bf16.msra.mxu0 %v13071_v7 }
 0x925   :  { %9859 = vmatprep.subr.bf16.mxu1 %v13074_v16  ;;  %9888 = vmatprep.subr.bf16.mxu0 %v14498_v4 }
 0x928   :  { %9861 = vmatpush1.bf16.msra.mxu1 %v13081_v37  ;;  %9890 = vmatpush3.bf16.msra.mxu0 %v13084_v43 }
 0x929   :  { %9863 = vmatprep.subr.bf16.mxu1 %v13087_v47  ;;  %9891 = vmatprep.subr.bf16.mxu0 %v14498_v4 }
 0x92c   :  { %9865 = vmatpush1.bf16.msra.mxu1 %v13091_v40  ;;  %9893 = vmatpush3.bf16.msra.mxu0 %v13094_v13 }
 0x92d   :  { %9867 = vmatprep.subr.bf16.mxu1 %v13097_v14  ;;  %9894 = vmatprep.subr.bf16.mxu0 %v14498_v4 }
 0x930   :  { %9869 = vmatpush1.bf16.msra.mxu1 %v13101_v12  ;;  %9896 = vmatpush3.bf16.msra.mxu0 %v13104_v23 }
 0x931   :  { %9871 = vmatprep.subr.bf16.mxu1 %v13107_v2  ;;  %9897 = vmatprep.subr.bf16.mxu0 %v14498_v4 }
 0x934   :  { %9873 = vmatpush1.bf16.msra.mxu1 %v13111_v3  ;;  %9899 = vmatpush3.bf16.msra.mxu0 %v13114_v22 }
 0x935   :  { %9875 = vmatprep.subr.bf16.mxu1 %v13117_v26  ;;  %9900 = vmatprep.subr.bf16.mxu0 %v14498_v4 }
 0x938   :  { %9877 = vmatpush1.bf16.msra.mxu1 %v13121_v56  ;;  %9902 = vmatpush3.bf16.msra.mxu0 %v13124_v59 }
 0x939   :  { %9879 = vmatprep.subr.bf16.mxu1 %v13127_v8  ;;  %9903 = vmatprep.subr.bf16.mxu0 %v14498_v4 }
 0x93c   :  { %9881 = vmatpush1.bf16.msra.mxu1 %v13131_v34  ;;  %9905 = vmatpush3.bf16.msra.mxu0 %v13134_v9 }
 0x93d   :  { %9907 = vmatprep.subr.bf16.mxu1 %v13049_v10  ;;  %9938 = vmatprep.subr.bf16.mxu0 %v14498_v4 }
 0x93f   :  { %2420 = vmatmul.mubr.f32.vlgmr.msra.gmra.mrb[30].mxu1 %v13142_v61  ;;  %8499 = vmatmul.mubr.f32.vlgmr.msra.gmra.mrb[40].mxu0 %v13142_v61 }
 0x940   :  { %9909 = vmatpush1.bf16.msra.mxu1 %v13057_v28  ;;  %9940 = vmatpush3.bf16.msra.mxu0 %v13059_v38 }
 0x941   :  { %9911 = vmatprep.subr.bf16.mxu1 %v13063_v48  ;;  %9941 = vmatprep.subr.bf16.mxu0 %v14498_v4 }
 0x942   :  { %2585 = vmatprep.mubr.f32.mxu1 %v14499_v20  ;;  %8533 = vmatprep.mubr.msk.f32.mxu0 %vm12126_vm9, %v14499_v20 }
 0x944   :  { %9913 = vmatpush1.bf16.msra.mxu1 %v13068_v45  ;;  %9943 = vmatpush3.bf16.msra.mxu0 %v13071_v7 }
 0x945   :  { %9915 = vmatprep.subr.bf16.mxu1 %v13074_v16  ;;  %9944 = vmatprep.subr.bf16.mxu0 %v14498_v4 }
 0x948   :  { %9917 = vmatpush1.bf16.msra.mxu1 %v13081_v37  ;;  %9946 = vmatpush3.bf16.msra.mxu0 %v13084_v43 }
 0x949   :  { %9919 = vmatprep.subr.bf16.mxu1 %v13087_v47  ;;  %9947 = vmatprep.subr.bf16.mxu0 %v14498_v4 }
 0x94c   :  { %9921 = vmatpush1.bf16.msra.mxu1 %v13091_v40  ;;  %9949 = vmatpush3.bf16.msra.mxu0 %v13094_v13 }
 0x94d   :  { %9923 = vmatprep.subr.bf16.mxu1 %v13097_v14  ;;  %9950 = vmatprep.subr.bf16.mxu0 %v14498_v4 }
 0x950   :  { %9925 = vmatpush1.bf16.msra.mxu1 %v13101_v12  ;;  %9952 = vmatpush3.bf16.msra.mxu0 %v13104_v23 }
 0x951   :  { %9927 = vmatprep.subr.bf16.mxu1 %v13107_v2  ;;  %9953 = vmatprep.subr.bf16.mxu0 %v14498_v4 }
 0x954   :  { %9929 = vmatpush1.bf16.msra.mxu1 %v13111_v3  ;;  %9955 = vmatpush3.bf16.msra.mxu0 %v13114_v22 }
 0x955   :  { %9931 = vmatprep.subr.bf16.mxu1 %v13117_v26  ;;  %9956 = vmatprep.subr.bf16.mxu0 %v14498_v4 }
 0x958   :  { %9933 = vmatpush1.bf16.msra.mxu1 %v13121_v56  ;;  %9958 = vmatpush3.bf16.msra.mxu0 %v13124_v59 }
 0x959   :  { %9935 = vmatprep.subr.bf16.mxu1 %v13127_v8  ;;  %9959 = vmatprep.subr.bf16.mxu0 %v14498_v4 }
 0x95c   :  { %9937 = vmatpush1.bf16.msra.mxu1 %v13131_v34  ;;  %9961 = vmatpush3.bf16.msra.mxu0 %v13134_v9 }
 0x95d   :  { %9963 = vmatprep.subr.bf16.mxu1 %v13049_v10  ;;  %9994 = vmatprep.subr.bf16.mxu0 %v14498_v4 }
 0x9f2   :  { %v2185_v17 = vpop.f32.mrb[14].mxu1  ;;  %v2256_v31 = vpop.f32.mrb[38].mxu0 }
 0x9f3   :  { %v11415_v60 = vadd.f32 %v12780_v30, %v2185_v17  ;;  %v2187_v25 = vpop.f32.mrb[15].mxu1  ;;  %v8465_v54 = vpop.f32.mrb[39].mxu0  ;;  %v2257_v30 = vadd.f32 %v2256_v31, %v12787_v19 }
 0x9f4   :  { %v11417_v32 = vadd.f32 %v12782_v57, %v2187_v25  ;;  %v2347_v57 = vrot.slane %v2333_v42, %v12774_v35  ;;  %v13191_v54 = vadd.f32 %v2343_v63, %v634_v55 }
 0x9f5   :  { %v7320_v21 = vmul.f32 -1.442695, %v11415_v60  ;;  %v638_v60 = vrot.slane %v11921_v36, %v12774_v35 }
 0x9f6   :  { %v7321_v33 = vmul.f32 -1.442695, %v11417_v32 }
 0x9f7   :  { %11671 = vpow2.f32 %v7320_v21 }
 0x9f8   :  { %11673 = vpow2.f32 %v7321_v33  ;;  %v13194_v33 = vadd.f32 %v2347_v57, %v638_v60 }
 0xa01   :  { %v11672_v41 = vpop.eup %11671 }
 0xa02   :  { %v2264_v50 = vadd.f32 1.0, %v11672_v41  ;;  %v11674_v52 = vpop.eup %11673 }
 0xa03   :  { %v2271_v51 = vadd.f32 1.0, %v11674_v52 }
 0xa04   :  { %11675 = vrcp.f32 %v2264_v50 }
 0xa05   :  { %11677 = vrcp.f32 %v2271_v51 }
 0xa0e   :  { %v11676_v17 = vpop.eup %11675 }
 0xa0f   :  { %v2274_v25 = vmul.f32 %v11676_v17, %v2257_v30  ;;  %v11678_v35 = vpop.eup %11677 }
 0xa10   :  { %v2277_v51 = vsub.f32 1.0, %v11678_v35 }
 0xa11   :  { %v2275_v21 = vadd.f32 %v2274_v25, %v12742_v44  ;;  %v2279_v44 = vmul.f32 %v11678_v35, %v13061_v29  ;;  %v13200_v25 = vrot.slane %v2333_v42, %v12729_v62 }
 0xa12   :  { %v2421_v32 = vpop.f32.mrb[30].mxu1  ;;  %v2492_v41 = vpop.f32.mrb[40].mxu0 }
 0xa13   :  { %11679 = vtanh.f32 %v2275_v21  ;;  %v11447_v50 = vadd.f32 %v13191_v54, %v2421_v32  ;;  %v2423_v52 = vpop.f32.mrb[31].mxu1  ;;  %v8500_v19 = vpop.f32.mrb[41].mxu0 }
 0xa14   :  { %v11449_v36 = vadd.f32 %v13194_v33, %v2423_v52  ;;  %v861_v19 = vadd.f32 %v12767_v53, %v12745_v46 }
 0xa15   :  { %v7323_v31 = vmul.f32 -1.442695, %v11447_v50  ;;  %v2493_v50 = vadd.f32 %v2492_v41, %v13200_v25 }
 0xa16   :  { %v7324_v30 = vmul.f32 -1.442695, %v11449_v36 }
 0xa17   :  { %11681 = vpow2.f32 %v7323_v31 }
 0xa18   :  { %11683 = vpow2.f32 %v7324_v30 }
 0xa1d   :  { %v11680_v63 = vpop.eup %11679 }
 0xa1e   :  { %v2278_v55 = vmul.f32 %v11680_v63, %v2277_v51 }
 0xa20   :  { %v2280_v17 = vadd.f32 %v2279_v44, %v2278_v55 }
 0xa21   :  { %v11682_v60 = vpop.eup %11681 }
 0xa22   :  { %v2500_v57 = vadd.f32 1.0, %v11682_v60  ;;  %2282 = vst [vmem:[#allocation18] sm:$0xff] %v2280_v17  ;;  %v11684_v21 = vpop.eup %11683 }
 0xa23   :  { %v2507_v32 = vadd.f32 1.0, %v11684_v21 }
 0xa24   :  { %11685 = vrcp.f32 %v2500_v57 }
 0xa25   :  { %11687 = vrcp.f32 %v2507_v32 }
 0xa2e   :  { %v11686_v52 = vpop.eup %11685 }
 0xa2f   :  { %v2510_v31 = vmul.f32 %v11686_v52, %v2493_v50  ;;  %v11688_v35 = vpop.eup %11687 }
 0xa30   :  { %v2513_v30 = vsub.f32 1.0, %v11688_v35  ;;  %v2515_v63 = vmul.f32 %v11688_v35, %v13142_v61 }
 0xa31   :  { %v2511_v36 = vadd.f32 %v2510_v31, %v861_v19 }
 0xa33   :  { %11689 = vtanh.f32 %v2511_v36 }
 0xa3d   :  { %v11690_v51 = vpop.eup %11689 }
 0xa3e   :  { %v2514_v55 = vmul.f32 %v11690_v51, %v2513_v30 }
 0xa40   :  { %v13206_v42 = vadd.f32 %v2515_v63, %v2514_v55 }
 0xa42   :  { %2586 = vmatmul.mubr.f32.vlgmr.msra.gmra.mrb[28].mxu1 %v13206_v42  ;;  %8534 = vmatmul.mubr.f32.vlgmr.msra.gmra.mrb[42].mxu0 %v13206_v42 }
 0xa43   :  { %9965 = vmatpush1.bf16.msra.mxu1 %v13057_v28  ;;  %9996 = vmatpush3.bf16.msra.mxu0 %v13059_v38 }
 0xa44   :  { %9967 = vmatprep.subr.bf16.mxu1 %v13063_v48  ;;  %9997 = vmatprep.subr.bf16.mxu0 %v14498_v4 }
 0xa45   :  { %2751 = vmatprep.mubr.f32.mxu1 %v14499_v20  ;;  %8568 = vmatprep.mubr.msk.f32.mxu0 %vm12126_vm9, %v14499_v20 }
 0xa47   :  { %9969 = vmatpush1.bf16.msra.mxu1 %v13068_v45  ;;  %9999 = vmatpush3.bf16.msra.mxu0 %v13071_v7 }
 0xa48   :  { %9971 = vmatprep.subr.bf16.mxu1 %v13074_v16  ;;  %10000 = vmatprep.subr.bf16.mxu0 %v14498_v4 }
 0xa4b   :  { %9973 = vmatpush1.bf16.msra.mxu1 %v13081_v37  ;;  %10002 = vmatpush3.bf16.msra.mxu0 %v13084_v43 }
 0xa4c   :  { %9975 = vmatprep.subr.bf16.mxu1 %v13087_v47  ;;  %10003 = vmatprep.subr.bf16.mxu0 %v14498_v4 }
 0xa4f   :  { %9977 = vmatpush1.bf16.msra.mxu1 %v13091_v40  ;;  %10005 = vmatpush3.bf16.msra.mxu0 %v13094_v13 }
 0xa50   :  { %9979 = vmatprep.subr.bf16.mxu1 %v13097_v14  ;;  %10006 = vmatprep.subr.bf16.mxu0 %v14498_v4 }
 0xa53   :  { %9981 = vmatpush1.bf16.msra.mxu1 %v13101_v12  ;;  %10008 = vmatpush3.bf16.msra.mxu0 %v13104_v23 }
 0xa54   :  { %9983 = vmatprep.subr.bf16.mxu1 %v13107_v2  ;;  %10009 = vmatprep.subr.bf16.mxu0 %v14498_v4 }
 0xa57   :  { %9985 = vmatpush1.bf16.msra.mxu1 %v13111_v3  ;;  %10011 = vmatpush3.bf16.msra.mxu0 %v13114_v22 }
 0xa58   :  { %9987 = vmatprep.subr.bf16.mxu1 %v13117_v26  ;;  %10012 = vmatprep.subr.bf16.mxu0 %v14498_v4 }
 0xa5b   :  { %9989 = vmatpush1.bf16.msra.mxu1 %v13121_v56  ;;  %10014 = vmatpush3.bf16.msra.mxu0 %v13124_v59 }
 0xa5c   :  { %9991 = vmatprep.subr.bf16.mxu1 %v13127_v8  ;;  %10015 = vmatprep.subr.bf16.mxu0 %v14498_v4 }
 0xa5f   :  { %9993 = vmatpush1.bf16.msra.mxu1 %v13131_v34  ;;  %10017 = vmatpush3.bf16.msra.mxu0 %v13134_v9 }
 0xa60   :  { %10019 = vmatprep.subr.bf16.mxu1 %v13049_v10  ;;  %10050 = vmatprep.subr.bf16.mxu0 %v14498_v4 }
 0xb15   :  { %v2587_v46 = vpop.f32.mrb[28].mxu1  ;;  %v2658_v53 = vpop.f32.mrb[42].mxu0 }
 0xb16   :  { %v11443_v61 = vadd.f32 %v13191_v54, %v2587_v46  ;;  %v2589_v41 = vpop.f32.mrb[29].mxu1  ;;  %v8535_v44 = vpop.f32.mrb[43].mxu0  ;;  %v2659_v19 = vadd.f32 %v2658_v53, %v13200_v25 }
 0xb17   :  { %v11445_v60 = vadd.f32 %v13194_v33, %v2589_v41 }
 0xb18   :  { %v7325_v17 = vmul.f32 -1.442695, %v11443_v61 }
 0xb19   :  { %v7326_v57 = vmul.f32 -1.442695, %v11445_v60 }
 0xb1a   :  { %11691 = vpow2.f32 %v7325_v17 }
 0xb1b   :  { %11693 = vpow2.f32 %v7326_v57 }
 0xb24   :  { %v11692_v21 = vpop.eup %11691 }
 0xb25   :  { %v2666_v32 = vadd.f32 1.0, %v11692_v21  ;;  %v11694_v50 = vpop.eup %11693 }
 0xb26   :  { %v2673_v52 = vadd.f32 1.0, %v11694_v50 }
 0xb27   :  { %11695 = vrcp.f32 %v2666_v32 }
 0xb28   :  { %11697 = vrcp.f32 %v2673_v52 }
 0xb31   :  { %v11696_v31 = vpop.eup %11695 }
 0xb32   :  { %v2676_v36 = vmul.f32 %v11696_v31, %v2659_v19  ;;  %v11698_v30 = vpop.eup %11697 }
 0xb33   :  { %v2679_v51 = vsub.f32 1.0, %v11698_v30  ;;  %v2681_v46 = vmul.f32 %v11698_v30, %v13206_v42 }
 0xb34   :  { %v2677_v35 = vadd.f32 %v2676_v36, %v12770_v15 }
 0xb36   :  { %11699 = vtanh.f32 %v2677_v35 }
 0xb40   :  { %v11700_v63 = vpop.eup %11699 }
 0xb41   :  { %v2680_v55 = vmul.f32 %v11700_v63, %v2679_v51 }
 0xb43   :  { %v13250_v61 = vadd.f32 %v2681_v46, %v2680_v55 }
 0xb45   :  { %2752 = vmatmul.mubr.f32.vlgmr.msra.gmra.mrb[26].mxu1 %v13250_v61  ;;  %8569 = vmatmul.mubr.f32.vlgmr.msra.gmra.mrb[44].mxu0 %v13250_v61 }
 0xb46   :  { %10021 = vmatpush1.bf16.msra.mxu1 %v13057_v28  ;;  %10052 = vmatpush3.bf16.msra.mxu0 %v13059_v38 }
 0xb47   :  { %10023 = vmatprep.subr.bf16.mxu1 %v13063_v48  ;;  %10053 = vmatprep.subr.bf16.mxu0 %v14498_v4 }
 0xb48   :  { %2917 = vmatprep.mubr.f32.mxu1 %v14499_v20  ;;  %8603 = vmatprep.mubr.msk.f32.mxu0 %vm12126_vm9, %v14499_v20 }
 0xb4a   :  { %10025 = vmatpush1.bf16.msra.mxu1 %v13068_v45  ;;  %10055 = vmatpush3.bf16.msra.mxu0 %v13071_v7 }
 0xb4b   :  { %10027 = vmatprep.subr.bf16.mxu1 %v13074_v16  ;;  %10056 = vmatprep.subr.bf16.mxu0 %v14498_v4 }
 0xb4e   :  { %10029 = vmatpush1.bf16.msra.mxu1 %v13081_v37  ;;  %10058 = vmatpush3.bf16.msra.mxu0 %v13084_v43 }
 0xb4f   :  { %10031 = vmatprep.subr.bf16.mxu1 %v13087_v47  ;;  %10059 = vmatprep.subr.bf16.mxu0 %v14498_v4 }
 0xb52   :  { %10033 = vmatpush1.bf16.msra.mxu1 %v13091_v40  ;;  %10061 = vmatpush3.bf16.msra.mxu0 %v13094_v13 }
 0xb53   :  { %10035 = vmatprep.subr.bf16.mxu1 %v13097_v14  ;;  %10062 = vmatprep.subr.bf16.mxu0 %v14498_v4 }
 0xb56   :  { %10037 = vmatpush1.bf16.msra.mxu1 %v13101_v12  ;;  %10064 = vmatpush3.bf16.msra.mxu0 %v13104_v23 }
 0xb57   :  { %10039 = vmatprep.subr.bf16.mxu1 %v13107_v2  ;;  %10065 = vmatprep.subr.bf16.mxu0 %v14498_v4 }
 0xb5a   :  { %10041 = vmatpush1.bf16.msra.mxu1 %v13111_v3  ;;  %10067 = vmatpush3.bf16.msra.mxu0 %v13114_v22 }
 0xb5b   :  { %10043 = vmatprep.subr.bf16.mxu1 %v13117_v26  ;;  %10068 = vmatprep.subr.bf16.mxu0 %v14498_v4 }
 0xb5e   :  { %10045 = vmatpush1.bf16.msra.mxu1 %v13121_v56  ;;  %10070 = vmatpush3.bf16.msra.mxu0 %v13124_v59 }
 0xb5f   :  { %10047 = vmatprep.subr.bf16.mxu1 %v13127_v8  ;;  %10071 = vmatprep.subr.bf16.mxu0 %v14498_v4 }
 0xb62   :  { %10049 = vmatpush1.bf16.msra.mxu1 %v13131_v34  ;;  %10073 = vmatpush3.bf16.msra.mxu0 %v13134_v9 }
 0xb63   :  { %10075 = vmatprep.subr.bf16.mxu1 %v13049_v10  ;;  %10106 = vmatprep.subr.bf16.mxu0 %v14498_v4 }
 0xc18   :  { %v2753_v15 = vpop.f32.mrb[26].mxu1  ;;  %v2824_v53 = vpop.f32.mrb[44].mxu0 }
 0xc19   :  { %v11439_v41 = vadd.f32 %v13191_v54, %v2753_v15  ;;  %v2755_v44 = vpop.f32.mrb[27].mxu1  ;;  %v8570_v17 = vpop.f32.mrb[45].mxu0  ;;  %v2825_v31 = vadd.f32 %v2824_v53, %v13200_v25 }
 0xc1a   :  { %v11441_v57 = vadd.f32 %v13194_v33, %v2755_v44 }
 0xc1b   :  { %v7327_v60 = vmul.f32 -1.442695, %v11439_v41 }
 0xc1c   :  { %v7328_v21 = vmul.f32 -1.442695, %v11441_v57 }
 0xc1d   :  { %11701 = vpow2.f32 %v7327_v60 }
 0xc1e   :  { %11703 = vpow2.f32 %v7328_v21 }
 0xc27   :  { %v11702_v32 = vpop.eup %11701 }
 0xc28   :  { %v2832_v50 = vadd.f32 1.0, %v11702_v32  ;;  %v11704_v52 = vpop.eup %11703 }
 0xc29   :  { %v2839_v19 = vadd.f32 1.0, %v11704_v52 }
 0xc2a   :  { %11705 = vrcp.f32 %v2832_v50 }
 0xc2b   :  { %11707 = vrcp.f32 %v2839_v19 }
 0xc34   :  { %v11706_v36 = vpop.eup %11705 }
 0xc35   :  { %v2842_v35 = vmul.f32 %v11706_v36, %v2825_v31  ;;  %v11708_v51 = vpop.eup %11707 }
 0xc36   :  { %v2845_v63 = vsub.f32 1.0, %v11708_v51  ;;  %v2847_v15 = vmul.f32 %v11708_v51, %v13250_v61 }
 0xc37   :  { %v2843_v30 = vadd.f32 %v2842_v35, %v12762_v5 }
 0xc39   :  { %11709 = vtanh.f32 %v2843_v30 }
 0xc43   :  { %v11710_v55 = vpop.eup %11709 }
 0xc44   :  { %v2846_v46 = vmul.f32 %v11710_v55, %v2845_v63 }
 0xc46   :  { %v13294_v41 = vadd.f32 %v2847_v15, %v2846_v46 }
 0xc48   :  { %2918 = vmatmul.mubr.f32.vlgmr.msra.gmra.mrb[24].mxu1 %v13294_v41  ;;  %8604 = vmatmul.mubr.f32.vlgmr.msra.gmra.mrb[46].mxu0 %v13294_v41 }
 0xc49   :  { %10077 = vmatpush1.bf16.msra.mxu1 %v13057_v28  ;;  %10108 = vmatpush3.bf16.msra.mxu0 %v13059_v38 }
 0xc4a   :  { %10079 = vmatprep.subr.bf16.mxu1 %v13063_v48  ;;  %10109 = vmatprep.subr.bf16.mxu0 %v14498_v4 }
 0xc4b   :  { %3083 = vmatprep.mubr.f32.mxu1 %v14499_v20  ;;  %8638 = vmatprep.mubr.msk.f32.mxu0 %vm12126_vm9, %v14499_v20 }
 0xc4d   :  { %10081 = vmatpush1.bf16.msra.mxu1 %v13068_v45  ;;  %10111 = vmatpush3.bf16.msra.mxu0 %v13071_v7 }
 0xc4e   :  { %10083 = vmatprep.subr.bf16.mxu1 %v13074_v16  ;;  %10112 = vmatprep.subr.bf16.mxu0 %v14498_v4 }
 0xc51   :  { %10085 = vmatpush1.bf16.msra.mxu1 %v13081_v37  ;;  %10114 = vmatpush3.bf16.msra.mxu0 %v13084_v43 }
 0xc52   :  { %10087 = vmatprep.subr.bf16.mxu1 %v13087_v47  ;;  %10115 = vmatprep.subr.bf16.mxu0 %v14498_v4 }
 0xc55   :  { %10089 = vmatpush1.bf16.msra.mxu1 %v13091_v40  ;;  %10117 = vmatpush3.bf16.msra.mxu0 %v13094_v13 }
 0xc56   :  { %10091 = vmatprep.subr.bf16.mxu1 %v13097_v14  ;;  %10118 = vmatprep.subr.bf16.mxu0 %v14498_v4 }
 0xc59   :  { %10093 = vmatpush1.bf16.msra.mxu1 %v13101_v12  ;;  %10120 = vmatpush3.bf16.msra.mxu0 %v13104_v23 }
 0xc5a   :  { %10095 = vmatprep.subr.bf16.mxu1 %v13107_v2  ;;  %10121 = vmatprep.subr.bf16.mxu0 %v14498_v4 }
 0xc5d   :  { %10097 = vmatpush1.bf16.msra.mxu1 %v13111_v3  ;;  %10123 = vmatpush3.bf16.msra.mxu0 %v13114_v22 }
 0xc5e   :  { %10099 = vmatprep.subr.bf16.mxu1 %v13117_v26  ;;  %10124 = vmatprep.subr.bf16.mxu0 %v14498_v4 }
 0xc61   :  { %10101 = vmatpush1.bf16.msra.mxu1 %v13121_v56  ;;  %10126 = vmatpush3.bf16.msra.mxu0 %v13124_v59 }
 0xc62   :  { %10103 = vmatprep.subr.bf16.mxu1 %v13127_v8  ;;  %10127 = vmatprep.subr.bf16.mxu0 %v14498_v4 }
 0xc65   :  { %10105 = vmatpush1.bf16.msra.mxu1 %v13131_v34  ;;  %10129 = vmatpush3.bf16.msra.mxu0 %v13134_v9 }
 0xc66   :  { %10131 = vmatprep.subr.bf16.mxu1 %v13049_v10  ;;  %10162 = vmatprep.subr.bf16.mxu0 %v14498_v4 }
 0xd1b   :  { %v2919_v5 = vpop.f32.mrb[24].mxu1  ;;  %v2990_v53 = vpop.f32.mrb[46].mxu0 }
 0xd1c   :  { %v11435_v44 = vadd.f32 %v13191_v54, %v2919_v5  ;;  %v2921_v17 = vpop.f32.mrb[25].mxu1  ;;  %v8605_v60 = vpop.f32.mrb[47].mxu0  ;;  %v2991_v36 = vadd.f32 %v2990_v53, %v13200_v25 }
 0xd1d   :  { %v11437_v21 = vadd.f32 %v13194_v33, %v2921_v17 }
 0xd1e   :  { %v7329_v57 = vmul.f32 -1.442695, %v11435_v44 }
 0xd1f   :  { %v7330_v32 = vmul.f32 -1.442695, %v11437_v21 }
 0xd20   :  { %11711 = vpow2.f32 %v7329_v57 }
 0xd21   :  { %11713 = vpow2.f32 %v7330_v32 }
 0xd2a   :  { %v11712_v50 = vpop.eup %11711 }
 0xd2b   :  { %v2998_v52 = vadd.f32 1.0, %v11712_v50  ;;  %v11714_v19 = vpop.eup %11713 }
 0xd2c   :  { %v3005_v31 = vadd.f32 1.0, %v11714_v19 }
 0xd2d   :  { %11715 = vrcp.f32 %v2998_v52 }
 0xd2e   :  { %11717 = vrcp.f32 %v3005_v31 }
 0xd37   :  { %v11716_v35 = vpop.eup %11715 }
 0xd38   :  { %v3008_v30 = vmul.f32 %v11716_v35, %v2991_v36  ;;  %v11718_v63 = vpop.eup %11717 }
 0xd39   :  { %v3011_v55 = vsub.f32 1.0, %v11718_v63  ;;  %v3013_v5 = vmul.f32 %v11718_v63, %v13294_v41 }
 0xd3a   :  { %v3009_v51 = vadd.f32 %v3008_v30, %v12765_v11 }
 0xd3c   :  { %11719 = vtanh.f32 %v3009_v51 }
 0xd46   :  { %v11720_v46 = vpop.eup %11719 }
 0xd47   :  { %v3012_v15 = vmul.f32 %v11720_v46, %v3011_v55 }
 0xd49   :  { %v13338_v44 = vadd.f32 %v3013_v5, %v3012_v15 }
 0xd4b   :  { %3084 = vmatmul.mubr.f32.vlgmr.msra.gmra.mrb[22].mxu1 %v13338_v44  ;;  %8639 = vmatmul.mubr.f32.vlgmr.msra.gmra.mrb[48].mxu0 %v13338_v44 }
 0xd4c   :  { %10133 = vmatpush1.bf16.msra.mxu1 %v13057_v28  ;;  %10164 = vmatpush3.bf16.msra.mxu0 %v13059_v38 }
 0xd4d   :  { %10135 = vmatprep.subr.bf16.mxu1 %v13063_v48  ;;  %10165 = vmatprep.subr.bf16.mxu0 %v14498_v4 }
 0xd4e   :  { %3249 = vmatprep.mubr.f32.mxu1 %v14499_v20  ;;  %8673 = vmatprep.mubr.msk.f32.mxu0 %vm12126_vm9, %v14499_v20 }
 0xd50   :  { %10137 = vmatpush1.bf16.msra.mxu1 %v13068_v45  ;;  %10167 = vmatpush3.bf16.msra.mxu0 %v13071_v7 }
 0xd51   :  { %10139 = vmatprep.subr.bf16.mxu1 %v13074_v16  ;;  %10168 = vmatprep.subr.bf16.mxu0 %v14498_v4 }
 0xd54   :  { %10141 = vmatpush1.bf16.msra.mxu1 %v13081_v37  ;;  %10170 = vmatpush3.bf16.msra.mxu0 %v13084_v43 }
 0xd55   :  { %10143 = vmatprep.subr.bf16.mxu1 %v13087_v47  ;;  %10171 = vmatprep.subr.bf16.mxu0 %v14498_v4 }
 0xd58   :  { %10145 = vmatpush1.bf16.msra.mxu1 %v13091_v40  ;;  %10173 = vmatpush3.bf16.msra.mxu0 %v13094_v13 }
 0xd59   :  { %10147 = vmatprep.subr.bf16.mxu1 %v13097_v14  ;;  %10174 = vmatprep.subr.bf16.mxu0 %v14498_v4 }
 0xd5c   :  { %10149 = vmatpush1.bf16.msra.mxu1 %v13101_v12  ;;  %10176 = vmatpush3.bf16.msra.mxu0 %v13104_v23 }
 0xd5d   :  { %10151 = vmatprep.subr.bf16.mxu1 %v13107_v2  ;;  %10177 = vmatprep.subr.bf16.mxu0 %v14498_v4 }
 0xd60   :  { %10153 = vmatpush1.bf16.msra.mxu1 %v13111_v3  ;;  %10179 = vmatpush3.bf16.msra.mxu0 %v13114_v22 }
 0xd61   :  { %10155 = vmatprep.subr.bf16.mxu1 %v13117_v26  ;;  %10180 = vmatprep.subr.bf16.mxu0 %v14498_v4 }
 0xd64   :  { %10157 = vmatpush1.bf16.msra.mxu1 %v13121_v56  ;;  %10182 = vmatpush3.bf16.msra.mxu0 %v13124_v59 }
 0xd65   :  { %10159 = vmatprep.subr.bf16.mxu1 %v13127_v8  ;;  %10183 = vmatprep.subr.bf16.mxu0 %v14498_v4 }
 0xd68   :  { %10161 = vmatpush1.bf16.msra.mxu1 %v13131_v34  ;;  %10185 = vmatpush3.bf16.msra.mxu0 %v13134_v9 }
 0xd69   :  { %10187 = vmatprep.subr.bf16.mxu1 %v13049_v10  ;;  %10218 = vmatprep.subr.bf16.mxu0 %v14498_v4 }
 0xe1e   :  { %v3085_v11 = vpop.f32.mrb[22].mxu1  ;;  %v3156_v53 = vpop.f32.mrb[48].mxu0 }
 0xe1f   :  { %v11431_v17 = vadd.f32 %v13191_v54, %v3085_v11  ;;  %v3087_v60 = vpop.f32.mrb[23].mxu1  ;;  %v8640_v57 = vpop.f32.mrb[49].mxu0  ;;  %v3157_v35 = vadd.f32 %v3156_v53, %v13200_v25 }
 0xe20   :  { %v11433_v32 = vadd.f32 %v13194_v33, %v3087_v60 }
 0xe21   :  { %v7331_v21 = vmul.f32 -1.442695, %v11431_v17 }
 0xe22   :  { %v7332_v50 = vmul.f32 -1.442695, %v11433_v32 }
 0xe23   :  { %11721 = vpow2.f32 %v7331_v21 }
 0xe24   :  { %11723 = vpow2.f32 %v7332_v50 }
 0xe2d   :  { %v11722_v52 = vpop.eup %11721 }
 0xe2e   :  { %v3164_v19 = vadd.f32 1.0, %v11722_v52  ;;  %v11724_v31 = vpop.eup %11723 }
 0xe2f   :  { %v3171_v36 = vadd.f32 1.0, %v11724_v31 }
 0xe30   :  { %11725 = vrcp.f32 %v3164_v19 }
 0xe31   :  { %11727 = vrcp.f32 %v3171_v36 }
 0xe3a   :  { %v11726_v30 = vpop.eup %11725 }
 0xe3b   :  { %v3174_v51 = vmul.f32 %v11726_v30, %v3157_v35  ;;  %v11728_v55 = vpop.eup %11727 }
 0xe3c   :  { %v3177_v46 = vsub.f32 1.0, %v11728_v55  ;;  %v3179_v11 = vmul.f32 %v11728_v55, %v13338_v44 }
 0xe3d   :  { %v3175_v63 = vadd.f32 %v3174_v51, %v12756_v58 }
 0xe3f   :  { %11729 = vtanh.f32 %v3175_v63 }
 0xe49   :  { %v11730_v15 = vpop.eup %11729 }
 0xe4a   :  { %v3178_v5 = vmul.f32 %v11730_v15, %v3177_v46 }
 0xe4c   :  { %v13382_v17 = vadd.f32 %v3179_v11, %v3178_v5 }
 0xe4e   :  { %3250 = vmatmul.mubr.f32.vlgmr.msra.gmra.mrb[20].mxu1 %v13382_v17  ;;  %8674 = vmatmul.mubr.f32.vlgmr.msra.gmra.mrb[50].mxu0 %v13382_v17 }
 0xe4f   :  { %10189 = vmatpush1.bf16.msra.mxu1 %v13057_v28  ;;  %10220 = vmatpush3.bf16.msra.mxu0 %v13059_v38 }
 0xe50   :  { %10191 = vmatprep.subr.bf16.mxu1 %v13063_v48  ;;  %10221 = vmatprep.subr.bf16.mxu0 %v14498_v4 }
 0xe51   :  { %3415 = vmatprep.mubr.f32.mxu1 %v14499_v20  ;;  %8708 = vmatprep.mubr.msk.f32.mxu0 %vm12126_vm9, %v14499_v20 }
 0xe53   :  { %10193 = vmatpush1.bf16.msra.mxu1 %v13068_v45  ;;  %10223 = vmatpush3.bf16.msra.mxu0 %v13071_v7 }
 0xe54   :  { %10195 = vmatprep.subr.bf16.mxu1 %v13074_v16  ;;  %10224 = vmatprep.subr.bf16.mxu0 %v14498_v4 }
 0xe57   :  { %10197 = vmatpush1.bf16.msra.mxu1 %v13081_v37  ;;  %10226 = vmatpush3.bf16.msra.mxu0 %v13084_v43 }
 0xe58   :  { %10199 = vmatprep.subr.bf16.mxu1 %v13087_v47  ;;  %10227 = vmatprep.subr.bf16.mxu0 %v14498_v4 }
 0xe5b   :  { %10201 = vmatpush1.bf16.msra.mxu1 %v13091_v40  ;;  %10229 = vmatpush3.bf16.msra.mxu0 %v13094_v13 }
 0xe5c   :  { %10203 = vmatprep.subr.bf16.mxu1 %v13097_v14  ;;  %10230 = vmatprep.subr.bf16.mxu0 %v14498_v4 }
 0xe5f   :  { %10205 = vmatpush1.bf16.msra.mxu1 %v13101_v12  ;;  %10232 = vmatpush3.bf16.msra.mxu0 %v13104_v23 }
 0xe60   :  { %10207 = vmatprep.subr.bf16.mxu1 %v13107_v2  ;;  %10233 = vmatprep.subr.bf16.mxu0 %v14498_v4 }
 0xe63   :  { %10209 = vmatpush1.bf16.msra.mxu1 %v13111_v3  ;;  %10235 = vmatpush3.bf16.msra.mxu0 %v13114_v22 }
 0xe64   :  { %10211 = vmatprep.subr.bf16.mxu1 %v13117_v26  ;;  %10236 = vmatprep.subr.bf16.mxu0 %v14498_v4 }
 0xe67   :  { %10213 = vmatpush1.bf16.msra.mxu1 %v13121_v56  ;;  %10238 = vmatpush3.bf16.msra.mxu0 %v13124_v59 }
 0xe68   :  { %10215 = vmatprep.subr.bf16.mxu1 %v13127_v8  ;;  %10239 = vmatprep.subr.bf16.mxu0 %v14498_v4 }
 0xe6b   :  { %10217 = vmatpush1.bf16.msra.mxu1 %v13131_v34  ;;  %10241 = vmatpush3.bf16.msra.mxu0 %v13134_v9 }
 0xe6c   :  { %10243 = vmatprep.subr.bf16.mxu1 %v13049_v10  ;;  %10274 = vmatprep.subr.bf16.mxu0 %v14498_v4 }
 0xf21   :  { %v3251_v58 = vpop.f32.mrb[20].mxu1  ;;  %v3322_v53 = vpop.f32.mrb[50].mxu0 }
 0xf22   :  { %v11427_v60 = vadd.f32 %v13191_v54, %v3251_v58  ;;  %v3253_v57 = vpop.f32.mrb[21].mxu1  ;;  %v8675_v21 = vpop.f32.mrb[51].mxu0  ;;  %v3323_v10 = vadd.f32 %v3322_v53, %v13200_v25  ;;  %v3705_v53 = vld [vmem:[#allocation12 + $0x38] sm:$0xff] }
 0xf23   :  { %v11429_v50 = vadd.f32 %v13194_v33, %v3253_v57 }
 0xf24   :  { %v7333_v32 = vmul.f32 -1.442695, %v11427_v60  ;;  %v3708_v60 = vld [vmem:[#allocation12 + $0x50] sm:$0xff] }
 0xf25   :  { %v7334_v52 = vmul.f32 -1.442695, %v11429_v50 }
 0xf26   :  { %11731 = vpow2.f32 %v7333_v32 }
 0xf27   :  { %11733 = vpow2.f32 %v7334_v52  ;;  %v10302_v52 = vpack.c.bf16 %v3708_v60, %v3705_v53  ;;  %v3748_v60 = vld [vmem:[#allocation12 + $0x190] sm:$0xff] }
 0xf30   :  { %v11732_v19 = vpop.eup %11731 }
 0xf31   :  { %v3330_v31 = vadd.f32 1.0, %v11732_v19  ;;  %v11734_v36 = vpop.eup %11733  ;;  %v3704_v19 = vld [vmem:[#allocation12 + $0x30] sm:$0xff] }
 0xf32   :  { %v3337_v35 = vadd.f32 1.0, %v11734_v36  ;;  %v3711_v36 = vld [vmem:[#allocation12 + $0x68] sm:$0xff] }
 0xf33   :  { %11735 = vrcp.f32 %v3330_v31  ;;  %v3707_v31 = vld [vmem:[#allocation12 + $0x48] sm:$0xff] }
 0xf34   :  { %11737 = vrcp.f32 %v3337_v35  ;;  %v3714_v35 = vld [vmem:[#allocation12 + $0x80] sm:$0xff] }
 0xf3d   :  { %v11736_v30 = vpop.eup %11735 }
 0xf3e   :  { %v3340_v51 = vmul.f32 %v11736_v30, %v3323_v10  ;;  %v11738_v55 = vpop.eup %11737  ;;  %v10306_v10 = vpack.c.bf16 %v3714_v35, %v3711_v36  ;;  %v3710_v30 = vld [vmem:[#allocation12 + $0x60] sm:$0xff]  ;;  %v3703_v36 = vld [vmem:[#allocation12 + $0x28] sm:$0xff] }
 0xf3f   :  { %v3343_v46 = vsub.f32 1.0, %v11738_v55  ;;  %v3345_v11 = vmul.f32 %v11738_v55, %v13382_v17  ;;  %v3720_v55 = vld [vmem:[#allocation12 + $0xb0] sm:$0xff]  ;;  %v3746_v35 = vld [vmem:[#allocation12 + $0x180] sm:$0xff] }
 0xf40   :  { %v3341_v63 = vadd.f32 %v3340_v51, %v12759_v0  ;;  %v3699_v0 = vld [vmem:[#allocation12 + $0x8] sm:$0xff]  ;;  %v3713_v51 = vld [vmem:[#allocation12 + $0x78] sm:$0xff] }
 0xf42   :  { %11739 = vtanh.f32 %v3341_v63  ;;  %v3717_v63 = vld [vmem:[#allocation12 + $0x98] sm:$0xff] }
 0xf4c   :  { %v11740_v15 = vpop.eup %11739 }
 0xf4d   :  { %v3344_v5 = vmul.f32 %v11740_v15, %v3343_v46  ;;  %v10308_v46 = vpack.c.bf16 %v3713_v51, %v3710_v30  ;;  %v10310_v15 = vpack.c.bf16 %v3720_v55, %v3717_v63  ;;  %v3754_v51 = vld [vmem:[#allocation12 + $0x1c0] sm:$0xff]  ;;  %v3757_v63 = vld [vmem:[#allocation12 + $0x1d8] sm:$0xff] }
 0xf4e   :  { %v10366_v55 = vpack.c.bf16 %v3757_v63, %v3754_v51  ;;  %v3770_v51 = vld [vmem:[#allocation12 + $0x240] sm:$0xff]  ;;  %v3773_v63 = vld [vmem:[#allocation12 + $0x258] sm:$0xff] }
 0xf4f   :  { %v13426_v58 = vadd.f32 %v3345_v11, %v3344_v5  ;;  %v3716_v5 = vld [vmem:[#allocation12 + $0x90] sm:$0xff]  ;;  %v3719_v11 = vld [vmem:[#allocation12 + $0xa8] sm:$0xff] }
 0xf51   :  { %3416 = vmatmul.mubr.f32.vlgmr.msra.gmra.mrb[18].mxu1 %v13426_v58  ;;  %8709 = vmatmul.mubr.f32.vlgmr.msra.gmra.mrb[52].mxu0 %v13426_v58 }
 0xf52   :  { %10245 = vmatpush1.bf16.msra.mxu1 %v13057_v28  ;;  %10276 = vmatpush3.bf16.msra.mxu0 %v13059_v38  ;;  %v3702_v28 = vld [vmem:[#allocation12 + $0x20] sm:$0xff] }
 0xf53   :  { %10247 = vmatprep.subr.bf16.mxu1 %v13063_v48  ;;  %10277 = vmatprep.subr.bf16.mxu0 %v14498_v4  ;;  %v10298_v38 = vpack.c.bf16 %v3702_v28, %v3699_v0  ;;  %v10312_v0 = vpack.c.bf16 %v3719_v11, %v3716_v5  ;;  %v3723_v28 = vld [vmem:[#allocation12 + $0xc8] sm:$0xff]  ;;  %v3706_v5 = vld [vmem:[#allocation12 + $0x40] sm:$0xff] }
 0xf54   :  { %3581 = vmatprep.mubr.f32.mxu1 %v14499_v20  ;;  %8743 = vmatprep.mubr.msk.f32.mxu0 %vm12126_vm9, %v14499_v20 }
 0xf56   :  { %10249 = vmatpush1.bf16.msra.mxu1 %v13068_v45  ;;  %10279 = vmatpush3.bf16.msra.mxu0 %v13071_v7 }
 0xf57   :  { %10251 = vmatprep.subr.bf16.mxu1 %v13074_v16  ;;  %10280 = vmatprep.subr.bf16.mxu0 %v14498_v4 }
 0xf5a   :  { %10253 = vmatpush1.bf16.msra.mxu1 %v13081_v37  ;;  %10282 = vmatpush3.bf16.msra.mxu0 %v13084_v43 }
 0xf5b   :  { %10255 = vmatprep.subr.bf16.mxu1 %v13087_v47  ;;  %10283 = vmatprep.subr.bf16.mxu0 %v14498_v4 }
 0xf5e   :  { %10257 = vmatpush1.bf16.msra.mxu1 %v13091_v40  ;;  %10285 = vmatpush3.bf16.msra.mxu0 %v13094_v13 }
 0xf5f   :  { %10259 = vmatprep.subr.bf16.mxu1 %v13097_v14  ;;  %10286 = vmatprep.subr.bf16.mxu0 %v14498_v4 }
 0xf62   :  { %10261 = vmatpush1.bf16.msra.mxu1 %v13101_v12  ;;  %10288 = vmatpush3.bf16.msra.mxu0 %v13104_v23 }
 0xf63   :  { %10263 = vmatprep.subr.bf16.mxu1 %v13107_v2  ;;  %10289 = vmatprep.subr.bf16.mxu0 %v14498_v4 }
 0xf66   :  { %10265 = vmatpush1.bf16.msra.mxu1 %v13111_v3  ;;  %10291 = vmatpush3.bf16.msra.mxu0 %v13114_v22 }
 0xf67   :  { %10267 = vmatprep.subr.bf16.mxu1 %v13117_v26  ;;  %10292 = vmatprep.subr.bf16.mxu0 %v14498_v4 }
 0xf6a   :  { %10269 = vmatpush1.bf16.msra.mxu1 %v13121_v56  ;;  %10294 = vmatpush3.bf16.msra.mxu0 %v13124_v59 }
 0xf6b   :  { %10271 = vmatprep.subr.bf16.mxu1 %v13127_v8  ;;  %10295 = vmatprep.subr.bf16.mxu0 %v14498_v4  ;;  %v3698_v8 = vld [vmem:[#allocation12] sm:$0xff] }
 0xf6e   :  { %10273 = vmatpush1.bf16.msra.mxu1 %v13131_v34  ;;  %10297 = vmatpush3.bf16.msra.mxu0 %v13134_v9  ;;  %v3701_v34 = vld [vmem:[#allocation12 + $0x18] sm:$0xff] }
 0xf6f   :  { %10299 = vmatprep.subr.bf16.mxu1 %v10298_v38  ;;  %v10300_v32 = vpack.c.bf16 %v3701_v34, %v3698_v8  ;;  %v3726_v38 = vld [vmem:[#allocation12 + $0xe0] sm:$0xff]  ;;  %v3740_v34 = vld [vmem:[#allocation12 + $0x150] sm:$0xff] }
0x1024   :  { %v3417_v48 = vpop.f32.mrb[18].mxu1  ;;  %v3488_v45 = vpop.f32.mrb[52].mxu0 }
0x1025   :  { %v11423_v7 = vadd.f32 %v13191_v54, %v3417_v48  ;;  %v3419_v16 = vpop.f32.mrb[19].mxu1  ;;  %v8710_v37 = vpop.f32.mrb[53].mxu0  ;;  %v3489_v2 = vadd.f32 %v3488_v45, %v13200_v25  ;;  %v10314_v48 = vpack.c.bf16 %v3726_v38, %v3723_v28  ;;  %v3722_v45 = vld [vmem:[#allocation12 + $0xc0] sm:$0xff]  ;;  %v3752_v28 = vld [vmem:[#allocation12 + $0x1b0] sm:$0xff]  ;;  %v3755_v38 = vld [vmem:[#allocation12 + $0x1c8] sm:$0xff] }
0x1026   :  { %v11425_v47 = vadd.f32 %v13194_v33, %v3419_v16  ;;  %v3729_v37 = vld [vmem:[#allocation12 + $0xf8] sm:$0xff] }
0x1027   :  { %v7335_v43 = vmul.f32 -1.442695, %v11423_v7  ;;  %v3725_v7 = vld [vmem:[#allocation12 + $0xd8] sm:$0xff] }
0x1028   :  { %v7336_v40 = vmul.f32 -1.442695, %v11425_v47  ;;  %v10316_v16 = vpack.c.bf16 %v3725_v7, %v3722_v45  ;;  %v10336_v45 = vpack.c.bf16 %v3755_v38, %v3752_v28  ;;  %v3760_v7 = vld [vmem:[#allocation12 + $0x1f0] sm:$0xff]  ;;  %v3730_v38 = vld [vmem:[#allocation12 + $0x100] sm:$0xff] }
0x1029   :  { %11741 = vpow2.f32 %v7335_v43  ;;  %v3732_v43 = vld [vmem:[#allocation12 + $0x110] sm:$0xff] }
0x102a   :  { %11743 = vpow2.f32 %v7336_v40  ;;  %v10318_v47 = vpack.c.bf16 %v3732_v43, %v3729_v37  ;;  %v3728_v40 = vld [vmem:[#allocation12 + $0xf0] sm:$0xff]  ;;  %v3759_v43 = vld [vmem:[#allocation12 + $0x1e8] sm:$0xff] }
0x102b   :  { %v3780_v28 = vld [vmem:[#allocation12 + $0x290] sm:$0xff] }
0x1033   :  { %v11742_v13 = vpop.eup %11741 }
0x1034   :  { %v3496_v14 = vadd.f32 1.0, %v11742_v13  ;;  %v11744_v12 = vpop.eup %11743  ;;  %v3731_v13 = vld [vmem:[#allocation12 + $0x108] sm:$0xff] }
0x1035   :  { %v3503_v23 = vadd.f32 1.0, %v11744_v12  ;;  %v3735_v12 = vld [vmem:[#allocation12 + $0x128] sm:$0xff] }
0x1036   :  { %11745 = vrcp.f32 %v3496_v14  ;;  %v10320_v14 = vpack.c.bf16 %v3731_v13, %v3728_v40  ;;  %v3712_v40 = vld [vmem:[#allocation12 + $0x70] sm:$0xff] }
0x1037   :  { %11747 = vrcp.f32 %v3503_v23  ;;  %v3738_v23 = vld [vmem:[#allocation12 + $0x140] sm:$0xff] }
0x1040   :  { %v11746_v3 = vpop.eup %11745 }
0x1041   :  { %v3506_v22 = vmul.f32 %v11746_v3, %v3489_v2  ;;  %v11748_v56 = vpop.eup %11747  ;;  %v10322_v2 = vpack.c.bf16 %v3738_v23, %v3735_v12  ;;  %v3734_v3 = vld [vmem:[#allocation12 + $0x120] sm:$0xff]  ;;  %v3761_v23 = vld [vmem:[#allocation12 + $0x1f8] sm:$0xff] }
0x1042   :  { %v3509_v59 = vsub.f32 1.0, %v11748_v56  ;;  %v3511_v21 = vmul.f32 %v11748_v56, %v13426_v58  ;;  %v3741_v56 = vld [vmem:[#allocation12 + $0x158] sm:$0xff]  ;;  %v3758_v12 = vld [vmem:[#allocation12 + $0x1e0] sm:$0xff] }
0x1043   :  { %v3507_v26 = vadd.f32 %v3506_v22, %v12750_v49  ;;  %v10304_v49 = vpack.c.bf16 %v3707_v31, %v3704_v19  ;;  %v3737_v22 = vld [vmem:[#allocation12 + $0x138] sm:$0xff]  ;;  %v3700_v19 = vld [vmem:[#allocation12 + $0x10] sm:$0xff] }
0x1045   :  { %11749 = vtanh.f32 %v3507_v26  ;;  %v10324_v26 = vpack.c.bf16 %v3737_v22, %v3734_v3  ;;  %v10340_v3 = vpack.c.bf16 %v3761_v23, %v3758_v12  ;;  %v3766_v22 = vld [vmem:[#allocation12 + $0x220] sm:$0xff] }
0x104f   :  { %v11750_v9 = vpop.eup %11749 }
0x1050   :  { %v3510_v57 = vmul.f32 %v11750_v9, %v3509_v59  ;;  %v3744_v59 = vld [vmem:[#allocation12 + $0x170] sm:$0xff]  ;;  %v3743_v9 = vld [vmem:[#allocation12 + $0x168] sm:$0xff] }
0x1051   :  { %v10326_v8 = vpack.c.bf16 %v3744_v59, %v3741_v56  ;;  %v10328_v53 = vpack.c.bf16 %v3743_v9, %v3740_v34  ;;  %v3765_v59 = vld [vmem:[#allocation12 + $0x218] sm:$0xff]  ;;  %v3718_v34 = vld [vmem:[#allocation12 + $0xa0] sm:$0xff] }
0x1052   :  { %v13468_v50 = vadd.f32 %v3511_v21, %v3510_v57  ;;  %v3751_v57 = vld [vmem:[#allocation12 + $0x1a8] sm:$0xff] }
0x1053   :  { %v10362_v21 = vpack.c.bf16 %v3751_v57, %v3748_v60  ;;  %v3764_v60 = vld [vmem:[#allocation12 + $0x210] sm:$0xff]  ;;  %v3767_v57 = vld [vmem:[#allocation12 + $0x228] sm:$0xff] }
0x1054   :  { %3582 = vmatmul.mubr.f32.vlgmr.msra.gmra.mrb[16].mxu1 %v13468_v50  ;;  %8744 = vmatmul.mubr.f32.vlgmr.msra.gmra.mrb[54].mxu0 %v13468_v50 }
0x1055   :  { %10301 = vmatpush1.bf16.msra.mxu1 %v10300_v32  ;;  %v3747_v32 = vld [vmem:[#allocation12 + $0x188] sm:$0xff]  ;;  %10363 = vmatprep.subr.bf16.mxu0 %v10362_v21 }
0x1056   :  { %10303 = vmatprep.subr.bf16.mxu1 %v10302_v52  ;;  %v3750_v52 = vld [vmem:[#allocation12 + $0x1a0] sm:$0xff] }
0x1057   :  { %v10330_v31 = vpack.c.bf16 %v3750_v52, %v3747_v32  ;;  %v10344_v32 = vpack.c.bf16 %v3767_v57, %v3764_v60  ;;  %v3772_v52 = vld [vmem:[#allocation12 + $0x250] sm:$0xff]  ;;  %v3742_v57 = vld [vmem:[#allocation12 + $0x160] sm:$0xff] }
0x1058   :  { %v3792_v60 = vld [vmem:[#allocation12 + $0x2f0] sm:$0xff] }
0x1059   :  { %10305 = vmatpush1.bf16.msra.mxu1 %v10304_v49  ;;  %v3749_v49 = vld [vmem:[#allocation12 + $0x198] sm:$0xff] }
0x105a   :  { %10307 = vmatprep.subr.bf16.mxu1 %v10306_v10  ;;  %v10364_v10 = vpack.c.bf16 %v3703_v36, %v3700_v19  ;;  %v10332_v30 = vpack.c.bf16 %v3749_v49, %v3746_v35  ;;  %v3775_v19 = vld [vmem:[#allocation12 + $0x268] sm:$0xff]  ;;  %v3774_v35 = vld [vmem:[#allocation12 + $0x260] sm:$0xff]  ;;  %v3724_v49 = vld [vmem:[#allocation12 + $0xd0] sm:$0xff] }
0x105b   :  { %v3771_v36 = vld [vmem:[#allocation12 + $0x248] sm:$0xff] }
0x105c   :  { %10365 = vmatpush3.bf16.msra.mxu0 %v10364_v10  ;;  %v10346_v10 = vpack.c.bf16 %v3774_v35, %v3771_v36  ;;  %v4055_v35 = vld [vmem:[#allocation12 + $0x308] sm:$0xff] }
0x105d   :  { %10309 = vmatpush1.bf16.msra.mxu1 %v10308_v46  ;;  %v3753_v46 = vld [vmem:[#allocation12 + $0x1b8] sm:$0xff]  ;;  %10367 = vmatprep.subr.bf16.mxu0 %v10366_v55 }
0x105e   :  { %10311 = vmatprep.subr.bf16.mxu1 %v10310_v15  ;;  %v3756_v15 = vld [vmem:[#allocation12 + $0x1d0] sm:$0xff] }
0x105f   :  { %v10334_v11 = vpack.c.bf16 %v3756_v15, %v3753_v46  ;;  %v10348_v46 = vpack.c.bf16 %v3773_v63, %v3770_v51  ;;  %v3778_v15 = vld [vmem:[#allocation12 + $0x280] sm:$0xff]  ;;  %v4107_v51 = vld [vmem:[#allocation12 + $0x4a8] sm:$0xff] }
0x1061   :  { %10313 = vmatpush1.bf16.msra.mxu1 %v10312_v0  ;;  %v3709_v0 = vld [vmem:[#allocation12 + $0x58] sm:$0xff] }
0x1062   :  { %10315 = vmatprep.subr.bf16.mxu1 %v10314_v48  ;;  %v10368_v48 = vpack.c.bf16 %v3709_v0, %v3706_v5  ;;  %v3781_v5 = vld [vmem:[#allocation12 + $0x298] sm:$0xff] }
0x1063   :  { %v10382_v0 = vpack.c.bf16 %v3781_v5, %v3778_v15 }
0x1064   :  { %10369 = vmatpush3.bf16.msra.mxu0 %v10368_v48  ;;  %v3733_v48 = vld [vmem:[#allocation12 + $0x118] sm:$0xff] }
0x1065   :  { %10317 = vmatpush1.bf16.msra.mxu1 %v10316_v16  ;;  %v3763_v16 = vld [vmem:[#allocation12 + $0x208] sm:$0xff] }
0x1066   :  { %10319 = vmatprep.subr.bf16.mxu1 %v10318_v47  ;;  %v10370_v37 = vpack.c.bf16 %v3763_v16, %v3760_v7  ;;  %v3762_v47 = vld [vmem:[#allocation12 + $0x200] sm:$0xff]  ;;  %v10384_v7 = vpack.c.bf16 %v3733_v48, %v3730_v38  ;;  %v3776_v16 = vld [vmem:[#allocation12 + $0x270] sm:$0xff] }
0x1067   :  { %v10338_v13 = vpack.c.bf16 %v3762_v47, %v3759_v43  ;;  %v3784_v43 = vld [vmem:[#allocation12 + $0x2b0] sm:$0xff] }
0x1068   :  { %10371 = vmatprep.subr.bf16.mxu0 %v10370_v37  ;;  %v3779_v37 = vld [vmem:[#allocation12 + $0x288] sm:$0xff] }
0x1069   :  { %10321 = vmatpush1.bf16.msra.mxu1 %v10320_v14  ;;  %v3715_v14 = vld [vmem:[#allocation12 + $0x88] sm:$0xff]  ;;  %v10352_v47 = vpack.c.bf16 %v3779_v37, %v3776_v16 }
0x106a   :  { %10323 = vmatprep.subr.bf16.mxu1 %v10322_v2  ;;  %v10372_v2 = vpack.c.bf16 %v3715_v14, %v3712_v40  ;;  %v3787_v40 = vld [vmem:[#allocation12 + $0x2c8] sm:$0xff]  ;;  %v3786_v14 = vld [vmem:[#allocation12 + $0x2c0] sm:$0xff] }
0x106b   :  { %v10386_v12 = vpack.c.bf16 %v3787_v40, %v3784_v43  ;;  %v14501_v40 = vld [vmem:[#allocation26_spill] sm:$0xff] }
0x106c   :  { %10373 = vmatpush3.bf16.msra.mxu0 %v10372_v2  ;;  %v3736_v2 = vld [vmem:[#allocation12 + $0x130] sm:$0xff] }
0x106d   :  { %10325 = vmatpush1.bf16.msra.mxu1 %v10324_v26  ;;  %v3769_v26 = vld [vmem:[#allocation12 + $0x238] sm:$0xff] }
0x106e   :  { %10327 = vmatprep.subr.bf16.mxu1 %v10326_v8  ;;  %v10374_v56 = vpack.c.bf16 %v3769_v26, %v3766_v22  ;;  %v3768_v8 = vld [vmem:[#allocation12 + $0x230] sm:$0xff]  ;;  %v3782_v22 = vld [vmem:[#allocation12 + $0x2a0] sm:$0xff] }
0x106f   :  { %v10342_v9 = vpack.c.bf16 %v3768_v8, %v3765_v59  ;;  %v3790_v59 = vld [vmem:[#allocation12 + $0x2e0] sm:$0xff]  ;;  %v3793_v8 = vld [vmem:[#allocation12 + $0x2f8] sm:$0xff] }
0x1070   :  { %10375 = vmatprep.subr.bf16.mxu0 %v10374_v56  ;;  %v3785_v56 = vld [vmem:[#allocation12 + $0x2b8] sm:$0xff] }
0x1071   :  { %10329 = vmatpush1.bf16.msra.mxu1 %v10328_v53  ;;  %v3721_v53 = vld [vmem:[#allocation12 + $0xb8] sm:$0xff] }
0x1072   :  { %10331 = vmatprep.subr.bf16.mxu1 %v10330_v31  ;;  %v10376_v21 = vpack.c.bf16 %v3721_v53, %v3718_v34  ;;  %v10378_v31 = vpack.c.bf16 %v3775_v19, %v3772_v52  ;;  %v10356_v34 = vpack.c.bf16 %v3785_v56, %v3782_v22  ;;  %v3789_v53 = vld [vmem:[#allocation12 + $0x2d8] sm:$0xff]  ;;  %v3788_v52 = vld [vmem:[#allocation12 + $0x2d0] sm:$0xff]  ;;  %v3791_v19 = vld [vmem:[#allocation12 + $0x2e8] sm:$0xff] }
0x1073   :  { %v10360_v36 = vpack.c.bf16 %v3791_v19, %v3788_v52  ;;  %v4056_v22 = vld [vmem:[#allocation12 + $0x310] sm:$0xff]  ;;  %v4061_v56 = vld [vmem:[#allocation12 + $0x338] sm:$0xff]  ;;  %v4062_v52 = vld [vmem:[#allocation12 + $0x340] sm:$0xff] }
0x1074   :  { %10377 = vmatpush3.bf16.msra.mxu0 %v10376_v21  ;;  %v10358_v21 = vpack.c.bf16 %v3792_v60, %v3789_v53  ;;  %v4060_v60 = vld [vmem:[#allocation12 + $0x330] sm:$0xff]  ;;  %v4065_v19 = vld [vmem:[#allocation12 + $0x358] sm:$0xff] }
0x1075   :  { %10333 = vmatpush1.bf16.msra.mxu1 %v10332_v30  ;;  %v3727_v30 = vld [vmem:[#allocation12 + $0xe8] sm:$0xff]  ;;  %10379 = vmatprep.subr.bf16.mxu0 %v10378_v31 }
0x1076   :  { %10335 = vmatprep.subr.bf16.mxu1 %v10334_v11  ;;  %v10380_v55 = vpack.c.bf16 %v3727_v30, %v3724_v49  ;;  %v3777_v11 = vld [vmem:[#allocation12 + $0x278] sm:$0xff]  ;;  %v4058_v49 = vld [vmem:[#allocation12 + $0x320] sm:$0xff]  ;;  %v4104_v30 = vld [vmem:[#allocation12 + $0x490] sm:$0xff] }
0x1077   :  { %v10458_v63 = vpack.c.bf16 %v4107_v51, %v4104_v30  ;;  %v10464_v30 = vpack.c.bf16 %v4065_v19, %v4062_v52  ;;  %v4066_v51 = vld [vmem:[#allocation12 + $0x360] sm:$0xff] }
0x1078   :  { %10381 = vmatpush3.bf16.msra.mxu0 %v10380_v55 }
0x1079   :  { %10337 = vmatpush1.bf16.msra.mxu1 %v10336_v45  ;;  %v10350_v45 = vpack.c.bf16 %v3780_v28, %v3777_v11  ;;  %10383 = vmatprep.subr.bf16.mxu0 %v10382_v0 }
0x107a   :  { %10339 = vmatprep.subr.bf16.mxu1 %v10338_v13  ;;  %v3783_v13 = vld [vmem:[#allocation12 + $0x2a8] sm:$0xff] }
0x107b   :  { %v10354_v23 = vpack.c.bf16 %v3786_v14, %v3783_v13 }
0x107c   :  { %10385 = vmatpush3.bf16.msra.mxu0 %v10384_v7 }
0x107d   :  { %10341 = vmatpush1.bf16.msra.mxu1 %v10340_v3  ;;  %v3739_v3 = vld [vmem:[#allocation12 + $0x148] sm:$0xff]  ;;  %10387 = vmatprep.subr.bf16.mxu0 %v10386_v12 }
0x107e   :  { %10343 = vmatprep.subr.bf16.mxu1 %v10342_v9  ;;  %v10388_v26 = vpack.c.bf16 %v3739_v3, %v3736_v2  ;;  %v10390_v9 = vpack.c.bf16 %v3793_v8, %v3790_v59  ;;  %v4064_v59 = vld [vmem:[#allocation12 + $0x350] sm:$0xff]  ;;  %v4110_v8 = vld [vmem:[#allocation12 + $0x4c0] sm:$0xff] }
0x1080   :  { %10389 = vmatpush3.bf16.msra.mxu0 %v10388_v26  ;;  %v4059_v26 = vld [vmem:[#allocation12 + $0x328] sm:$0xff] }
0x1081   :  { %10345 = vmatpush1.bf16.msra.mxu1 %v10344_v32  ;;  %v3745_v32 = vld [vmem:[#allocation12 + $0x178] sm:$0xff]  ;;  %10391 = vmatprep.subr.bf16.mxu0 %v10390_v9  ;;  %v10460_v53 = vpack.c.bf16 %v4059_v26, %v4056_v22 }
0x1082   :  { %10347 = vmatprep.subr.bf16.mxu1 %v10346_v10  ;;  %v10392_v31 = vpack.c.bf16 %v3745_v32, %v3742_v57  ;;  %v10394_v10 = vpack.c.bf16 %v4058_v49, %v4055_v35  ;;  %v4063_v57 = vld [vmem:[#allocation12 + $0x348] sm:$0xff]  ;;  %v4116_v35 = vld [vmem:[#allocation12 + $0x4f0] sm:$0xff] }
0x1083   :  { %v4119_v49 = vld [vmem:[#allocation12 + $0x508] sm:$0xff] }
0x1084   :  { %10393 = vmatpush3.bf16.msra.mxu0 %v10392_v31  ;;  %v4067_v31 = vld [vmem:[#allocation12 + $0x368] sm:$0xff] }
0x1085   :  { %10349 = vmatpush1.bf16.msra.mxu1 %v10348_v46  ;;  %10395 = vmatprep.subr.bf16.mxu0 %v10394_v10  ;;  %v10400_v10 = vpack.c.bf16 %v4063_v57, %v4060_v60 }
0x1086   :  { %10351 = vmatprep.subr.bf16.mxu1 %v10350_v45 }
0x1089   :  { %10353 = vmatpush1.bf16.msra.mxu1 %v10352_v47 }
0x108a   :  { %10355 = vmatprep.subr.bf16.mxu1 %v10354_v23  ;;  %v4057_v23 = vld [vmem:[#allocation12 + $0x318] sm:$0xff] }
0x108d   :  { %10357 = vmatpush1.bf16.msra.mxu1 %v10356_v34 }
0x108e   :  { %10359 = vmatprep.subr.bf16.mxu1 %v10358_v21  ;;  %v10398_v21 = vpack.c.bf16 %v4064_v59, %v4061_v56  ;;  %v4080_v56 = vld [vmem:[#allocation12 + $0x3d0] sm:$0xff]  ;;  %v4083_v59 = vld [vmem:[#allocation12 + $0x3e8] sm:$0xff] }
0x108f   :  { %v10476_v57 = vpack.c.bf16 %v4083_v59, %v4080_v56  ;;  %v4105_v56 = vld [vmem:[#allocation12 + $0x498] sm:$0xff] }
0x1091   :  { %10361 = vmatpush1.bf16.msra.mxu1 %v10360_v36  ;;  %v4070_v36 = vld [vmem:[#allocation12 + $0x380] sm:$0xff] }
0x1092   :  { %10459 = vmatprep.subr.bf16.mxu1 %v10458_v63  ;;  %v4069_v63 = vld [vmem:[#allocation12 + $0x378] sm:$0xff] }
0x1127   :  { %v3583_v55 = vpop.f32.mrb[16].mxu1  ;;  %v3654_v46 = vpop.f32.mrb[54].mxu0 }
0x1128   :  { %v11419_v15 = vadd.f32 %v13191_v54, %v3583_v55  ;;  %v3585_v5 = vpop.f32.mrb[17].mxu1  ;;  %v8745_v11 = vpop.f32.mrb[55].mxu0  ;;  %v3655_v37 = vadd.f32 %v3654_v46, %v13200_v25  ;;  %v4113_v25 = vld [vmem:[#allocation12 + $0x4d8] sm:$0xff]  ;;  %v10402_v55 = vpack.c.bf16 %v4070_v36, %v4067_v31  ;;  %v10466_v46 = vpack.c.bf16 %v4119_v49, %v4116_v35  ;;  %v4086_v31 = vld [vmem:[#allocation12 + $0x400] sm:$0xff]  ;;  %v4091_v35 = vld [vmem:[#allocation12 + $0x428] sm:$0xff] }
0x1129   :  { %v11421_v28 = vadd.f32 %v13194_v33, %v3585_v5  ;;  %v4054_v33 = vld [vmem:[#allocation12 + $0x300] sm:$0xff]  ;;  %v10462_v32 = vpack.c.bf16 %v4113_v25, %v4110_v8  ;;  %v4071_v5 = vld [vmem:[#allocation12 + $0x388] sm:$0xff]  ;;  %v4073_v11 = vld [vmem:[#allocation12 + $0x398] sm:$0xff] }
0x112a   :  { %v7337_v0 = vmul.f32 -1.442695, %v11419_v15  ;;  %v10396_v9 = vpack.c.bf16 %v4057_v23, %v4054_v33  ;;  %v4068_v15 = vld [vmem:[#allocation12 + $0x370] sm:$0xff]  ;;  %v4085_v8 = vld [vmem:[#allocation12 + $0x3f8] sm:$0xff]  ;;  %v4094_v49 = vld [vmem:[#allocation12 + $0x440] sm:$0xff] }
0x112b   :  { %v7338_v38 = vmul.f32 -1.442695, %v11421_v28  ;;  %v4122_v28 = vld [vmem:[#allocation12 + $0x520] sm:$0xff]  ;;  %v4088_v25 = vld [vmem:[#allocation12 + $0x410] sm:$0xff]  ;;  %v4089_v36 = vld [vmem:[#allocation12 + $0x418] sm:$0xff] }
0x112c   :  { %11751 = vpow2.f32 %v7337_v0  ;;  %v4076_v0 = vld [vmem:[#allocation12 + $0x3b0] sm:$0xff]  ;;  %v10414_v52 = vpack.c.bf16 %v4088_v25, %v4085_v8  ;;  %v4410_v25 = vld [vmem:[#allocation14] sm:$0xff] }
0x112d   :  { %11753 = vpow2.f32 %v7338_v38  ;;  %v4125_v38 = vld [vmem:[#allocation12 + $0x538] sm:$0xff] }
0x1136   :  { %v11752_v48 = vpop.eup %11751 }
0x1137   :  { %v3662_v45 = vadd.f32 1.0, %v11752_v48  ;;  %v11754_v7 = vpop.eup %11753  ;;  %v10404_v48 = vpack.c.bf16 %v4069_v63, %v4066_v51  ;;  %v10480_v63 = vpack.c.bf16 %v4089_v36, %v4086_v31  ;;  %v4108_v31 = vld [vmem:[#allocation12 + $0x4b0] sm:$0xff]  ;;  %v4111_v36 = vld [vmem:[#allocation12 + $0x4c8] sm:$0xff] }
0x1138   :  { %v3669_v16 = vadd.f32 1.0, %v11754_v7  ;;  %v4072_v7 = vld [vmem:[#allocation12 + $0x390] sm:$0xff] }
0x1139   :  { %11755 = vrcp.f32 %v3662_v45  ;;  %v10468_v45 = vpack.c.bf16 %v4071_v5, %v4068_v15  ;;  %v10418_v15 = vpack.c.bf16 %v4094_v49, %v4091_v35 }
0x113a   :  { %11757 = vrcp.f32 %v3669_v16  ;;  %v4075_v16 = vld [vmem:[#allocation12 + $0x3a8] sm:$0xff] }
0x113b   :  { %v10408_v33 = vpack.c.bf16 %v4075_v16, %v4072_v7  ;;  %v4149_v7 = vld [vmem:[#allocation12 + $0x5f8] sm:$0xff] }
0x1143   :  { %v11756_v43 = vpop.eup %11755 }
0x1144   :  { %v3672_v47 = vmul.f32 %v11756_v43, %v3655_v37  ;;  %v11758_v13 = vpop.eup %11757  ;;  %v10406_v37 = vpack.c.bf16 %v4076_v0, %v4073_v11  ;;  %v10470_v43 = vpack.c.bf16 %v4125_v38, %v4122_v28  ;;  %v4092_v11 = vld [vmem:[#allocation12 + $0x430] sm:$0xff]  ;;  %v4095_v0 = vld [vmem:[#allocation12 + $0x448] sm:$0xff]  ;;  %v4097_v28 = vld [vmem:[#allocation12 + $0x458] sm:$0xff] }
0x1145   :  { %v3675_v14 = vsub.f32 1.0, %v11758_v13  ;;  %v3677_v3 = vmul.f32 %v11758_v13, %v13468_v50  ;;  %v4082_v13 = vld [vmem:[#allocation12 + $0x3e0] sm:$0xff]  ;;  %v14502_v38 = vld [vmem:[#allocation28_spill] sm:$0xff] }
0x1146   :  { %v3673_v54 = vadd.f32 %v3672_v47, %v14501_v40  ;;  %v4074_v47 = vld [vmem:[#allocation12 + $0x3a0] sm:$0xff]  ;;  %v4077_v40 = vld [vmem:[#allocation12 + $0x3b8] sm:$0xff] }
0x1147   :  { %v10472_v23 = vpack.c.bf16 %v4077_v40, %v4074_v47  ;;  %v4099_v47 = vld [vmem:[#allocation12 + $0x468] sm:$0xff] }
0x1148   :  { %11759 = vtanh.f32 %v3673_v54  ;;  %v4079_v54 = vld [vmem:[#allocation12 + $0x3c8] sm:$0xff] }
0x1149   :  { %v10410_v22 = vpack.c.bf16 %v4082_v13, %v4079_v54  ;;  %v4098_v13 = vld [vmem:[#allocation12 + $0x460] sm:$0xff] }
0x1152   :  { %v11760_v12 = vpop.eup %11759 }
0x1153   :  { %v3676_v2 = vmul.f32 %v11760_v12, %v3675_v14  ;;  %v4128_v14 = vld [vmem:[#allocation12 + $0x550] sm:$0xff]  ;;  %v4131_v12 = vld [vmem:[#allocation12 + $0x568] sm:$0xff] }
0x1154   :  { %v10474_v26 = vpack.c.bf16 %v4131_v12, %v4128_v14  ;;  %v4101_v14 = vld [vmem:[#allocation12 + $0x478] sm:$0xff]  ;;  %v4103_v12 = vld [vmem:[#allocation12 + $0x488] sm:$0xff] }
0x1155   :  { %v13477_v34 = vadd.f32 %v3677_v3, %v3676_v2  ;;  %v4078_v2 = vld [vmem:[#allocation12 + $0x3c0] sm:$0xff]  ;;  %v4081_v3 = vld [vmem:[#allocation12 + $0x3d8] sm:$0xff] }
0x1156   :  { %v10412_v60 = vpack.c.bf16 %v4081_v3, %v4078_v2  ;;  %v4414_v2 = vld [vmem:[#allocation14 + $0x20] sm:$0xff] }
0x1157   :  { %3875 = vmatprep.mubr.f32.mxu1 %v13477_v34  ;;  %3681 = vst [vmem:[#allocation18 + $0x8] sm:$0xff] %v13477_v34  ;;  %3988 = vmatprep.mubr.f32.mxu0 %v13477_v34 }
0x1158   :  { %3876 = vmatmul.mubr.f32.vlgmr.msra.gmra.mrb[32].mxu1 %v12791_v18  ;;  %3989 = vmatmul.mubr.f32.vlgmr.msra.gmra.mrb[56].mxu0 %v12791_v18 }
0x1159   :  { %10397 = vmatpush1.bf16.msra.mxu0 %v10396_v9  ;;  %3881 = vmatprep.mubr.f32.mxu1 %v13468_v50  ;;  %v4134_v9 = vld [vmem:[#allocation12 + $0x580] sm:$0xff] }
0x115a   :  { %3993 = vmatprep.mubr.f32.mxu0 %v13468_v50  ;;  %10461 = vmatpush3.bf16.msra.mxu1 %v10460_v53  ;;  %v4137_v53 = vld [vmem:[#allocation12 + $0x598] sm:$0xff] }
0x115b   :  { %10399 = vmatprep.subr.bf16.mxu0 %v10398_v21  ;;  %10463 = vmatprep.subr.bf16.mxu1 %v10462_v32  ;;  %v4084_v21 = vld [vmem:[#allocation12 + $0x3f0] sm:$0xff]  ;;  %v4087_v32 = vld [vmem:[#allocation12 + $0x408] sm:$0xff]  ;;  %v10478_v19 = vpack.c.bf16 %v4137_v53, %v4134_v9  ;;  %v4413_v9 = vld [vmem:[#allocation14 + $0x18] sm:$0xff] }
0x115c   :  { %3882 = vmatmul.mubr.f32.gmra.mrb[34].mxu1 %v12835_v39  ;;  %3994 = vmatmul.mubr.f32.gmra.mrb[58].mxu0 %v12835_v39  ;;  %v10416_v51 = vpack.c.bf16 %v4087_v32, %v4084_v21  ;;  %v4109_v53 = vld [vmem:[#allocation12 + $0x4b8] sm:$0xff]  ;;  %v4420_v32 = vld [vmem:[#allocation14 + $0x50] sm:$0xff] }
0x115d   :  { %10401 = vmatpush1.bf16.msra.mxu0 %v10400_v10  ;;  %3887 = vmatprep.mubr.f32.mxu1 %v13426_v58  ;;  %v4140_v10 = vld [vmem:[#allocation12 + $0x5b0] sm:$0xff]  ;;  %v4417_v21 = vld [vmem:[#allocation14 + $0x38] sm:$0xff] }
0x115e   :  { %3998 = vmatprep.mubr.f32.mxu0 %v13426_v58  ;;  %10465 = vmatpush3.bf16.msra.mxu1 %v10464_v30  ;;  %v4143_v30 = vld [vmem:[#allocation12 + $0x5c8] sm:$0xff]  ;;  %v13521_v49 = vpack.c.bf16 %v4420_v32, %v4417_v21  ;;  %v4434_v21 = vld [vmem:[#allocation14 + $0xc0] sm:$0xff]  ;;  %v4437_v32 = vld [vmem:[#allocation14 + $0xd8] sm:$0xff] }
0x115f   :  { %10403 = vmatprep.subr.bf16.mxu0 %v10402_v55  ;;  %10467 = vmatprep.subr.bf16.mxu1 %v10466_v46  ;;  %v4090_v55 = vld [vmem:[#allocation12 + $0x420] sm:$0xff]  ;;  %v4093_v46 = vld [vmem:[#allocation12 + $0x438] sm:$0xff]  ;;  %v10482_v5 = vpack.c.bf16 %v4143_v30, %v4140_v10  ;;  %v4416_v10 = vld [vmem:[#allocation14 + $0x30] sm:$0xff] }
0x1160   :  { %3888 = vmatmul.mubr.f32.gmra.mrb[36].mxu1 %v12879_v1  ;;  %3999 = vmatmul.mubr.f32.gmra.mrb[60].mxu0 %v12879_v1  ;;  %v10420_v16 = vpack.c.bf16 %v4093_v46, %v4090_v55  ;;  %v4419_v30 = vld [vmem:[#allocation14 + $0x48] sm:$0xff]  ;;  %v4426_v46 = vld [vmem:[#allocation14 + $0x80] sm:$0xff] }
0x1161   :  { %10405 = vmatpush1.bf16.msra.mxu0 %v10404_v48  ;;  %3893 = vmatprep.mubr.f32.mxu1 %v13382_v17  ;;  %v4100_v48 = vld [vmem:[#allocation12 + $0x470] sm:$0xff]  ;;  %v4423_v55 = vld [vmem:[#allocation14 + $0x68] sm:$0xff] }
0x1162   :  { %4003 = vmatprep.mubr.f32.mxu0 %v13382_v17  ;;  %10469 = vmatpush3.bf16.msra.mxu1 %v10468_v45  ;;  %v4146_v45 = vld [vmem:[#allocation12 + $0x5e0] sm:$0xff]  ;;  %v10422_v40 = vpack.c.bf16 %v4100_v48, %v4097_v28  ;;  %v13529_v28 = vpack.c.bf16 %v4426_v46, %v4423_v55 }
0x1163   :  { %10407 = vmatprep.subr.bf16.mxu0 %v10406_v37  ;;  %10471 = vmatprep.subr.bf16.mxu1 %v10470_v43  ;;  %v10484_v37 = vpack.c.bf16 %v4095_v0, %v4092_v11  ;;  %v4096_v43 = vld [vmem:[#allocation12 + $0x450] sm:$0xff]  ;;  %v10486_v54 = vpack.c.bf16 %v4149_v7, %v4146_v45  ;;  %v4117_v11 = vld [vmem:[#allocation12 + $0x4f8] sm:$0xff]  ;;  %v4422_v48 = vld [vmem:[#allocation14 + $0x60] sm:$0xff] }
0x1164   :  { %3894 = vmatmul.mubr.f32.gmra.mrb[38].mxu1 %v12923_v6  ;;  %4004 = vmatmul.mubr.f32.gmra.mrb[62].mxu0 %v12923_v6  ;;  %v10424_v3 = vpack.c.bf16 %v4099_v47, %v4096_v43  ;;  %v4425_v45 = vld [vmem:[#allocation14 + $0x78] sm:$0xff]  ;;  %v4432_v43 = vld [vmem:[#allocation14 + $0xb0] sm:$0xff] }
0x1165   :  { %10409 = vmatpush1.bf16.msra.mxu0 %v10408_v33  ;;  %3899 = vmatprep.mubr.f32.mxu1 %v13338_v44  ;;  %v4106_v33 = vld [vmem:[#allocation12 + $0x4a0] sm:$0xff]  ;;  %v4121_v7 = vld [vmem:[#allocation12 + $0x518] sm:$0xff] }
0x1166   :  { %4008 = vmatprep.mubr.f32.mxu0 %v13338_v44  ;;  %10473 = vmatpush3.bf16.msra.mxu1 %v10472_v23  ;;  %v4411_v23 = vld [vmem:[#allocation14 + $0x8] sm:$0xff]  ;;  %v10426_v59 = vpack.c.bf16 %v4106_v33, %v4103_v12  ;;  %v4428_v33 = vld [vmem:[#allocation14 + $0x90] sm:$0xff] }
0x1167   :  { %10411 = vmatprep.subr.bf16.mxu0 %v10410_v22  ;;  %10475 = vmatprep.subr.bf16.mxu1 %v10474_v26  ;;  %v10488_v22 = vpack.c.bf16 %v4101_v14, %v4098_v13  ;;  %v4102_v26 = vld [vmem:[#allocation12 + $0x480] sm:$0xff]  ;;  %v13510_v8 = vpack.c.bf16 %v4414_v2, %v4411_v23  ;;  %v4123_v13 = vld [vmem:[#allocation12 + $0x528] sm:$0xff] }
0x1168   :  { %3900 = vmatmul.mubr.f32.gmra.mrb[40].mxu1 %v12967_v24  ;;  %4009 = vmatmul.mubr.f32.gmra.mrb[64].mxu0 %v12967_v24  ;;  %v4431_v23 = vld [vmem:[#allocation14 + $0xa8] sm:$0xff] }
0x1169   :  { %10413 = vmatpush1.bf16.msra.mxu0 %v10412_v60  ;;  %3905 = vmatprep.mubr.f32.mxu1 %v13294_v41  ;;  %v13512_v60 = vld [vmem:[#allocation18] sm:$0xff] }
0x116a   :  { %4013 = vmatprep.mubr.f32.mxu0 %v13294_v41  ;;  %10477 = vmatpush3.bf16.msra.mxu1 %v10476_v57  ;;  %v4112_v57 = vld [vmem:[#allocation12 + $0x4d0] sm:$0xff]  ;;  %v4127_v2 = vld [vmem:[#allocation12 + $0x548] sm:$0xff] }
0x116b   :  { %10415 = vmatprep.subr.bf16.mxu0 %v10414_v52  ;;  %10479 = vmatprep.subr.bf16.mxu1 %v10478_v19  ;;  %v10428_v52 = vpack.c.bf16 %v4105_v56, %v4102_v26  ;;  %v13518_v19 = vpack.c.bf16 %v4413_v9, %v4410_v25  ;;  %v10430_v35 = vpack.c.bf16 %v4112_v57, %v4109_v53  ;;  %v4438_v26 = vld [vmem:[#allocation14 + $0xe0] sm:$0xff]  ;;  %v4129_v9 = vld [vmem:[#allocation12 + $0x558] sm:$0xff] }
0x116c   :  { %3906 = vmatmul.mubr.f32.gmra.mrb[42].mxu1 %v14502_v38  ;;  %4014 = vmatmul.mubr.f32.gmra.mrb[66].mxu0 %v14502_v38  ;;  %v4126_v25 = vld [vmem:[#allocation12 + $0x540] sm:$0xff] }
0x116d   :  { %10417 = vmatpush1.bf16.msra.mxu0 %v10416_v51  ;;  %3911 = vmatprep.mubr.f32.mxu1 %v13250_v61  ;;  %v4115_v51 = vld [vmem:[#allocation12 + $0x4e8] sm:$0xff] }
0x116e   :  { %4018 = vmatprep.mubr.f32.mxu0 %v13250_v61  ;;  %10481 = vmatpush3.bf16.msra.mxu1 %v10480_v63  ;;  %v4118_v63 = vld [vmem:[#allocation12 + $0x500] sm:$0xff] }
0x116f   :  { %10419 = vmatprep.subr.bf16.mxu0 %v10418_v15  ;;  %10483 = vmatprep.subr.bf16.mxu1 %v10482_v5  ;;  %v13526_v15 = vpack.c.bf16 %v4419_v30, %v4416_v10  ;;  %v4114_v5 = vld [vmem:[#allocation12 + $0x4e0] sm:$0xff]  ;;  %v10434_v0 = vpack.c.bf16 %v4118_v63, %v4115_v51  ;;  %v10444_v10 = vpack.c.bf16 %v4129_v9, %v4126_v25  ;;  %v4132_v51 = vld [vmem:[#allocation12 + $0x570] sm:$0xff]  ;;  %v4135_v63 = vld [vmem:[#allocation12 + $0x588] sm:$0xff] }
0x1170   :  { %3912 = vmatmul.mubr.f32.gmra.mrb[44].mxu1 %v13061_v29  ;;  %4019 = vmatmul.mubr.f32.gmra.mrb[68].mxu0 %v13061_v29  ;;  %v10436_v47 = vpack.c.bf16 %v4117_v11, %v4114_v5  ;;  %v13550_v30 = vpack.c.bf16 %v4437_v32, %v4434_v21  ;;  %v4443_v5 = vld [vmem:[#allocation14 + $0x108] sm:$0xff]  ;;  %v4452_v21 = vld [vmem:[#allocation14 + $0x150] sm:$0xff] }
0x1171   :  { %10421 = vmatpush1.bf16.msra.mxu0 %v10420_v16  ;;  %3917 = vmatprep.mubr.f32.mxu1 %v13206_v42  ;;  %v4124_v16 = vld [vmem:[#allocation12 + $0x530] sm:$0xff]  ;;  %v4139_v11 = vld [vmem:[#allocation12 + $0x5a8] sm:$0xff] }
0x1172   :  { %4023 = vmatprep.mubr.f32.mxu0 %v13206_v42  ;;  %10485 = vmatpush3.bf16.msra.mxu1 %v10484_v37  ;;  %v4429_v37 = vld [vmem:[#allocation14 + $0x98] sm:$0xff]  ;;  %v10438_v14 = vpack.c.bf16 %v4124_v16, %v4121_v7  ;;  %v10448_v7 = vpack.c.bf16 %v4135_v63, %v4132_v51  ;;  %v4147_v25 = vld [vmem:[#allocation12 + $0x5e8] sm:$0xff]  ;;  %v4418_v63 = vld [vmem:[#allocation14 + $0x40] sm:$0xff] }
0x1173   :  { %10423 = vmatprep.subr.bf16.mxu0 %v10422_v40  ;;  %10487 = vmatprep.subr.bf16.mxu1 %v10486_v54  ;;  %v13534_v40 = vpack.c.bf16 %v4425_v45, %v4422_v48  ;;  %v4120_v54 = vld [vmem:[#allocation12 + $0x510] sm:$0xff]  ;;  %v13537_v12 = vpack.c.bf16 %v4432_v43, %v4429_v37  ;;  %v4447_v48 = vld [vmem:[#allocation14 + $0x128] sm:$0xff]  ;;  %v4450_v45 = vld [vmem:[#allocation14 + $0x140] sm:$0xff] }
0x1174   :  { %3918 = vmatmul.mubr.f32.gmra.mrb[46].mxu1 %v13512_v60  ;;  %4024 = vmatmul.mubr.f32.gmra.mrb[70].mxu0 %v13512_v60  ;;  %v10440_v56 = vpack.c.bf16 %v4123_v13, %v4120_v54  ;;  %v4138_v37 = vld [vmem:[#allocation12 + $0x5a0] sm:$0xff]  ;;  %v4141_v43 = vld [vmem:[#allocation12 + $0x5b8] sm:$0xff]  ;;  %v13561_v54 = vpack.c.bf16 %v4450_v45, %v4447_v48  ;;  %v4455_v32 = vld [vmem:[#allocation14 + $0x168] sm:$0xff] }
0x1175   :  { %10425 = vmatpush1.bf16.msra.mxu0 %v10424_v3  ;;  %4232 = vmatprep.mubr.f32.mxu0 %v13477_v34  ;;  %v4130_v3 = vld [vmem:[#allocation12 + $0x560] sm:$0xff]  ;;  %v4439_v48 = vld [vmem:[#allocation14 + $0xe8] sm:$0xff]  ;;  %v4445_v45 = vld [vmem:[#allocation14 + $0x118] sm:$0xff] }
0x1176   :  { %10489 = vmatpush3.bf16.msra.mxu1 %v10488_v22  ;;  %4345 = vmatprep.mubr.f32.mxu1 %v13477_v34  ;;  %v10432_v34 = vpack.c.bf16 %v4111_v36, %v4108_v31  ;;  %v4435_v22 = vld [vmem:[#allocation14 + $0xc8] sm:$0xff]  ;;  %v10442_v53 = vpack.c.bf16 %v4130_v3, %v4127_v2  ;;  %v4136_v31 = vld [vmem:[#allocation12 + $0x590] sm:$0xff]  ;;  %v4441_v36 = vld [vmem:[#allocation14 + $0xf8] sm:$0xff] }
0x1177   :  { %10427 = vmatprep.subr.bf16.mxu0 %v10426_v59  ;;  %10491 = vmatprep.subr.bf16.mxu1 %v13510_v8  ;;  %v13542_v59 = vpack.c.bf16 %v4431_v23, %v4428_v33  ;;  %v13545_v57 = vpack.c.bf16 %v4438_v26, %v4435_v22  ;;  %v4446_v13 = vld [vmem:[#allocation14 + $0x120] sm:$0xff]  ;;  %v4145_v33 = vld [vmem:[#allocation12 + $0x5d8] sm:$0xff]  ;;  %v4148_v23 = vld [vmem:[#allocation12 + $0x5f0] sm:$0xff]  ;;  %v10452_v22 = vpack.c.bf16 %v4141_v43, %v4138_v37 }
0x1178   :  { %v4453_v2 = vld [vmem:[#allocation14 + $0x158] sm:$0xff]  ;;  %v4456_v3 = vld [vmem:[#allocation14 + $0x170] sm:$0xff]  ;;  %v10454_v9 = vpack.c.bf16 %v4148_v23, %v4145_v33 }
0x1179   :  { %10429 = vmatpush1.bf16.msra.mxu0 %v10428_v52  ;;  %4346 = vmatmul.mubr.f32.vlgmr.msra.gmra.mrb[48].mxu1 %v12791_v18  ;;  %v4133_v52 = vld [vmem:[#allocation12 + $0x578] sm:$0xff] }
0x117a   :  { %4350 = vmatprep.mubr.f32.mxu1 %v13468_v50  ;;  %10493 = vmatpush1.bf16.msra.mxu1 %v13518_v19  ;;  %v10446_v55 = vpack.c.bf16 %v4136_v31, %v4133_v52  ;;  %v13574_v31 = vpack.c.bf16 %v4455_v32, %v4452_v21  ;;  %v4457_v37 = vld [vmem:[#allocation14 + $0x178] sm:$0xff] }
0x117b   :  { %10431 = vmatprep.subr.bf16.mxu0 %v10430_v35  ;;  %10495 = vmatprep.subr.bf16.mxu1 %v13521_v49  ;;  %v4444_v35 = vld [vmem:[#allocation14 + $0x110] sm:$0xff] }
0x117c   :  { %v13553_v46 = vpack.c.bf16 %v4444_v35, %v4441_v36  ;;  %v4412_v36 = vld [vmem:[#allocation14 + $0x10] sm:$0xff]  ;;  %v4415_v35 = vld [vmem:[#allocation14 + $0x28] sm:$0xff] }
0x117d   :  { %10433 = vmatpush1.bf16.msra.mxu0 %v10432_v34  ;;  %4351 = vmatmul.mubr.f32.gmra.mrb[50].mxu1 %v12835_v39  ;;  %v4440_v34 = vld [vmem:[#allocation14 + $0xf0] sm:$0xff]  ;;  %v13585_v51 = vpack.c.bf16 %v4415_v35, %v4412_v36 }
0x117e   :  { %4355 = vmatprep.mubr.f32.mxu1 %v13426_v58  ;;  %10497 = vmatpush1.bf16.msra.mxu1 %v13526_v15  ;;  %v13558_v16 = vpack.c.bf16 %v4443_v5, %v4440_v34  ;;  %v4424_v5 = vld [vmem:[#allocation14 + $0x70] sm:$0xff] }
0x117f   :  { %10435 = vmatprep.subr.bf16.mxu0 %v10434_v0  ;;  %10499 = vmatprep.subr.bf16.mxu1 %v13529_v28  ;;  %v4142_v0 = vld [vmem:[#allocation12 + $0x5c0] sm:$0xff] }
0x1181   :  { %10437 = vmatpush1.bf16.msra.mxu0 %v10436_v47  ;;  %4356 = vmatmul.mubr.f32.gmra.mrb[52].mxu1 %v12879_v1  ;;  %v10450_v47 = vpack.c.bf16 %v4142_v0, %v4139_v11  ;;  %v4427_v11 = vld [vmem:[#allocation14 + $0x88] sm:$0xff]  ;;  %v4433_v0 = vld [vmem:[#allocation14 + $0xb8] sm:$0xff] }
0x1182   :  { %4360 = vmatprep.mubr.f32.mxu1 %v13382_v17  ;;  %10501 = vmatpush1.bf16.msra.mxu1 %v13534_v40 }
0x1183   :  { %10439 = vmatprep.subr.bf16.mxu0 %v10438_v14  ;;  %10503 = vmatprep.subr.bf16.mxu1 %v13537_v12  ;;  %v4449_v14 = vld [vmem:[#allocation14 + $0x138] sm:$0xff] }
0x1184   :  { %v13566_v26 = vpack.c.bf16 %v4449_v14, %v4446_v13 }
0x1185   :  { %10441 = vmatpush1.bf16.msra.mxu0 %v10440_v56  ;;  %4361 = vmatmul.mubr.f32.gmra.mrb[54].mxu1 %v12923_v6  ;;  %v4144_v56 = vld [vmem:[#allocation12 + $0x5d0] sm:$0xff] }
0x1186   :  { %4365 = vmatprep.mubr.f32.mxu1 %v13338_v44  ;;  %10505 = vmatpush1.bf16.msra.mxu1 %v13542_v59  ;;  %v10456_v52 = vpack.c.bf16 %v4147_v25, %v4144_v56 }
0x1187   :  { %10443 = vmatprep.subr.bf16.mxu0 %v10442_v53  ;;  %10507 = vmatprep.subr.bf16.mxu1 %v13545_v57  ;;  %v13569_v53 = vpack.c.bf16 %v4456_v3, %v4453_v2 }
0x1189   :  { %10445 = vmatpush1.bf16.msra.mxu0 %v10444_v10  ;;  %4366 = vmatmul.mubr.f32.gmra.mrb[56].mxu1 %v12967_v24  ;;  %v13583_v10 = vld [vmem:[%s14485_s10 + $0x10] sm:$0xff] }
0x118a   :  { %4370 = vmatprep.mubr.f32.mxu1 %v13294_v41  ;;  %10509 = vmatpush1.bf16.msra.mxu1 %v13550_v30 }
0x118b   :  { %10447 = vmatprep.subr.bf16.mxu0 %v10446_v55  ;;  %10511 = vmatprep.subr.bf16.mxu1 %v13553_v46  ;;  %v4421_v55 = vld [vmem:[#allocation14 + $0x58] sm:$0xff] }
0x118c   :  { %v13593_v34 = vpack.c.bf16 %v4421_v55, %v4418_v63 }
0x118d   :  { %10449 = vmatpush1.bf16.msra.mxu0 %v10448_v7  ;;  %4371 = vmatmul.mubr.f32.gmra.mrb[58].mxu1 %v14502_v38  ;;  %v4451_v7 = vld [vmem:[#allocation14 + $0x148] sm:$0xff] }
0x118e   :  { %4375 = vmatprep.mubr.f32.mxu1 %v13250_v61  ;;  %10513 = vmatpush1.bf16.msra.mxu1 %v13558_v16 }
0x118f   :  { %10451 = vmatprep.subr.bf16.mxu0 %v10450_v47  ;;  %10515 = vmatprep.subr.bf16.mxu1 %v13561_v54 }
0x1191   :  { %10453 = vmatpush1.bf16.msra.mxu0 %v10452_v22  ;;  %4376 = vmatmul.mubr.f32.gmra.mrb[60].mxu1 %v13061_v29 }
0x1192   :  { %4380 = vmatprep.mubr.f32.mxu1 %v13206_v42  ;;  %10517 = vmatpush1.bf16.msra.mxu1 %v13566_v26 }
0x1193   :  { %10455 = vmatprep.subr.bf16.mxu0 %v10454_v9  ;;  %10519 = vmatprep.subr.bf16.mxu1 %v13569_v53 }
0x1195   :  { %10457 = vmatpush1.bf16.msra.mxu0 %v10456_v52  ;;  %4381 = vmatmul.mubr.f32.gmra.mrb[62].mxu1 %v13512_v60 }
0x1196   :  { %10521 = vmatpush1.bf16.msra.mxu1 %v13574_v31  ;;  %4544 = vmatprep.mubr.f32.mxu1 %v14499_v20 }
0x1197   :  { %10522 = vmatprep.subr.bf16.mxu0 %v14498_v4  ;;  %10547 = vmatprep.subr.bf16.mxu1 %v13510_v8 }
0x1198   :  { %4233 = vmatmul.mubr.f32.vlgmr.msra.gmra.mrb[72].mxu0 %v12791_v18  ;;  %v13602_v18 = vpack.c.bf16 %v4427_v11, %v4424_v5 }
0x1199   :  { %4238 = vmatprep.mubr.f32.mxu0 %v13468_v50  ;;  %4545 = vmatmul.mubr.f32.vlgmr.msra.gmra.mrb[32].mxu1 %v13583_v10  ;;  %v4430_v50 = vld [vmem:[#allocation14 + $0xa0] sm:$0xff] }
0x119a   :  { %10524 = vmatpush3.bf16.msra.mxu0 %v13585_v51  ;;  %10549 = vmatpush1.bf16.msra.mxu1 %v13518_v19 }
0x119b   :  { %10525 = vmatprep.subr.bf16.mxu0 %v14498_v4  ;;  %10551 = vmatprep.subr.bf16.mxu1 %v13521_v49 }
0x119c   :  { %4239 = vmatmul.mubr.f32.gmra.mrb[74].mxu0 %v12835_v39  ;;  %4710 = vmatprep.mubr.f32.mxu1 %v14499_v20  ;;  %v13610_v39 = vpack.c.bf16 %v4433_v0, %v4430_v50 }
0x119d   :  { %4244 = vmatprep.mubr.f32.mxu0 %v13426_v58  ;;  %v4436_v58 = vld [vmem:[#allocation14 + $0xd0] sm:$0xff] }
0x119e   :  { %10527 = vmatpush3.bf16.msra.mxu0 %v13593_v34  ;;  %10553 = vmatpush1.bf16.msra.mxu1 %v13526_v15 }
0x119f   :  { %10528 = vmatprep.subr.bf16.mxu0 %v14498_v4  ;;  %10555 = vmatprep.subr.bf16.mxu1 %v13529_v28 }
0x11a0   :  { %4245 = vmatmul.mubr.f32.gmra.mrb[76].mxu0 %v12879_v1  ;;  %v13618_v1 = vpack.c.bf16 %v4439_v48, %v4436_v58 }
0x11a1   :  { %4250 = vmatprep.mubr.f32.mxu0 %v13382_v17  ;;  %v4442_v17 = vld [vmem:[#allocation14 + $0x100] sm:$0xff] }
0x11a2   :  { %10530 = vmatpush3.bf16.msra.mxu0 %v13602_v18  ;;  %10557 = vmatpush1.bf16.msra.mxu1 %v13534_v40 }
0x11a3   :  { %10531 = vmatprep.subr.bf16.mxu0 %v14498_v4  ;;  %10559 = vmatprep.subr.bf16.mxu1 %v13537_v12 }
0x11a4   :  { %4251 = vmatmul.mubr.f32.gmra.mrb[78].mxu0 %v12923_v6  ;;  %v13626_v6 = vpack.c.bf16 %v4445_v45, %v4442_v17 }
0x11a5   :  { %4256 = vmatprep.mubr.f32.mxu0 %v13338_v44  ;;  %v4448_v44 = vld [vmem:[#allocation14 + $0x130] sm:$0xff] }
0x11a6   :  { %10533 = vmatpush3.bf16.msra.mxu0 %v13610_v39  ;;  %10561 = vmatpush1.bf16.msra.mxu1 %v13542_v59 }
0x11a7   :  { %10534 = vmatprep.subr.bf16.mxu0 %v14498_v4  ;;  %10563 = vmatprep.subr.bf16.mxu1 %v13545_v57 }
0x11a8   :  { %4257 = vmatmul.mubr.f32.gmra.mrb[80].mxu0 %v12967_v24  ;;  %v13634_v24 = vpack.c.bf16 %v4451_v7, %v4448_v44  ;;  %v7339_v7 = vld [vmem:[%s14483_s8 + $0x3] sm:$0x7] }
0x11a9   :  { %4262 = vmatprep.mubr.f32.mxu0 %v13294_v41  ;;  %v4454_v41 = vld [vmem:[#allocation14 + $0x160] sm:$0xff] }
0x11aa   :  { %10536 = vmatpush3.bf16.msra.mxu0 %v13618_v1  ;;  %10565 = vmatpush1.bf16.msra.mxu1 %v13550_v30 }
0x11ab   :  { %10537 = vmatprep.subr.bf16.mxu0 %v14498_v4  ;;  %10567 = vmatprep.subr.bf16.mxu1 %v13553_v46 }
0x11ac   :  { %4263 = vmatmul.mubr.f32.gmra.mrb[82].mxu0 %v14502_v38  ;;  %v13642_v38 = vpack.c.bf16 %v4457_v37, %v4454_v41 }
0x11ad   :  { %4268 = vmatprep.mubr.f32.mxu0 %v13250_v61 }
0x11ae   :  { %10539 = vmatpush3.bf16.msra.mxu0 %v13626_v6  ;;  %10569 = vmatpush1.bf16.msra.mxu1 %v13558_v16 }
0x11af   :  { %10540 = vmatprep.subr.bf16.mxu0 %v14498_v4  ;;  %10571 = vmatprep.subr.bf16.mxu1 %v13561_v54 }
0x11b0   :  { %4269 = vmatmul.mubr.f32.gmra.mrb[84].mxu0 %v13061_v29 }
0x11b1   :  { %4274 = vmatprep.mubr.f32.mxu0 %v13206_v42 }
0x11b2   :  { %10542 = vmatpush3.bf16.msra.mxu0 %v13634_v24  ;;  %10573 = vmatpush1.bf16.msra.mxu1 %v13566_v26 }
0x11b3   :  { %10543 = vmatprep.subr.bf16.mxu0 %v14498_v4  ;;  %10575 = vmatprep.subr.bf16.mxu1 %v13569_v53 }
0x11b4   :  { %4275 = vmatmul.mubr.f32.gmra.mrb[86].mxu0 %v13512_v60  ;;  %v13678_v60 = vld [vmem:[%s14483_s8] sm:$0x7] }
0x11b5   :  { %8778 = vmatprep.mubr.msk.f32.mxu0 %vm12126_vm9, %v14499_v20  ;;  %v13682_v13 = vrot.slane %v13678_v60, %v12729_v62 }
0x11b6   :  { %10545 = vmatpush3.bf16.msra.mxu0 %v13642_v38  ;;  %10577 = vmatpush1.bf16.msra.mxu1 %v13574_v31 }
0x11b7   :  { %10578 = vmatprep.subr.bf16.mxu0 %v14498_v4  ;;  %10603 = vmatprep.subr.bf16.mxu1 %v13510_v8 }
0x11b9   :  { %8779 = vmatmul.mubr.f32.vlgmr.msra.gmra.mrb[88].mxu0 %v13583_v10 }
0x11ba   :  { %10580 = vmatpush3.bf16.msra.mxu0 %v13585_v51  ;;  %8813 = vmatprep.mubr.msk.f32.mxu0 %vm12126_vm9, %v14499_v20 }
0x11bb   :  { %10581 = vmatprep.subr.bf16.mxu0 %v14498_v4 }
0x11be   :  { %10583 = vmatpush3.bf16.msra.mxu0 %v13593_v34 }
0x11bf   :  { %10584 = vmatprep.subr.bf16.mxu0 %v14498_v4 }
0x11c2   :  { %10586 = vmatpush3.bf16.msra.mxu0 %v13602_v18 }
0x11c3   :  { %10587 = vmatprep.subr.bf16.mxu0 %v14498_v4 }
0x11c6   :  { %10589 = vmatpush3.bf16.msra.mxu0 %v13610_v39 }
0x11c7   :  { %10590 = vmatprep.subr.bf16.mxu0 %v14498_v4 }
0x11ca   :  { %10592 = vmatpush3.bf16.msra.mxu0 %v13618_v1 }
0x11cb   :  { %10593 = vmatprep.subr.bf16.mxu0 %v14498_v4 }
0x11ce   :  { %10595 = vmatpush3.bf16.msra.mxu0 %v13626_v6 }
0x11cf   :  { %10596 = vmatprep.subr.bf16.mxu0 %v14498_v4 }
0x11d2   :  { %10598 = vmatpush3.bf16.msra.mxu0 %v13634_v24 }
0x11d3   :  { %10599 = vmatprep.subr.bf16.mxu0 %v14498_v4 }
0x11d6   :  { %10601 = vmatpush3.bf16.msra.mxu0 %v13642_v38 }
0x11d7   :  { %10634 = vmatprep.subr.bf16.mxu0 %v14498_v4 }
0x122b   :  { %v7734_v29 = vpop.f32.mrb[56].mxu0 }
0x122c   :  { %v7735_v42 = vpop.f32.mrb[57].mxu0 }
0x122d   :  { %v13673_v61 = vadd.f32 %v7735_v42, %v7734_v29  ;;  %v13709_v29 = vrot.slane %v7339_v7, %v12729_v62  ;;  %v4458_v7 = vld [vmem:[#allocation15] sm:$0x7] }
0x122f   :  { %v7737_v43 = vpop.f32.mrb[58].mxu0 }
0x1230   :  { %v7738_v47 = vpop.f32.mrb[59].mxu0 }
0x1231   :  { %v7739_v14 = vadd.f32 %v7738_v47, %v7737_v43 }
0x1233   :  { %v13685_v33 = vadd.f32 %v7739_v14, %v13682_v13  ;;  %v7740_v23 = vpop.f32.mrb[60].mxu0 }
0x1234   :  { %v7741_v2 = vpop.f32.mrb[61].mxu0 }
0x1235   :  { %v7742_v3 = vadd.f32 %v7741_v2, %v7740_v23 }
0x1237   :  { %v13688_v22 = vadd.f32 %v7742_v3, %v13682_v13  ;;  %v7743_v56 = vpop.f32.mrb[62].mxu0 }
0x1238   :  { %v7744_v25 = vpop.f32.mrb[63].mxu0 }
0x1239   :  { %v7745_v9 = vadd.f32 %v7744_v25, %v7743_v56 }
0x123b   :  { %v13691_v21 = vadd.f32 %v7745_v9, %v13682_v13  ;;  %v7746_v32 = vpop.f32.mrb[64].mxu0 }
0x123c   :  { %v7747_v52 = vpop.f32.mrb[65].mxu0 }
0x123d   :  { %v7748_v36 = vadd.f32 %v7747_v52, %v7746_v32 }
0x123f   :  { %v13694_v35 = vadd.f32 %v7748_v36, %v13682_v13  ;;  %v7749_v63 = vpop.f32.mrb[66].mxu0 }
0x1240   :  { %v7750_v55 = vpop.f32.mrb[67].mxu0 }
0x1241   :  { %v7751_v5 = vadd.f32 %v7750_v55, %v7749_v63 }
0x1243   :  { %v13697_v11 = vadd.f32 %v7751_v5, %v13682_v13  ;;  %v7752_v50 = vpop.f32.mrb[68].mxu0 }
0x1244   :  { %v7753_v0 = vpop.f32.mrb[69].mxu0 }
0x1245   :  { %v7754_v58 = vadd.f32 %v7753_v0, %v7752_v50 }
0x1247   :  { %v13700_v48 = vadd.f32 %v7754_v58, %v13682_v13  ;;  %v7755_v17 = vpop.f32.mrb[70].mxu0 }
0x1248   :  { %v7756_v45 = vpop.f32.mrb[71].mxu0 }
0x1249   :  { %v7757_v44 = vadd.f32 %v7756_v45, %v7755_v17 }
0x124b   :  { %v13706_v41 = vadd.f32 %v7757_v44, %v13682_v13 }
0x124c   :  { %v7790_v37 = vpop.f32.mrb[48].mxu1 }
0x124d   :  { %v7791_v42 = vpop.f32.mrb[49].mxu1 }
0x124e   :  { %v7792_v43 = vadd.f32 %v7791_v42, %v7790_v37 }
0x1250   :  { %v13712_v47 = vadd.f32 %v7792_v43, %v13709_v29  ;;  %v7793_v14 = vpop.f32.mrb[50].mxu1 }
0x1251   :  { %v7794_v23 = vpop.f32.mrb[51].mxu1 }
0x1252   :  { %14503 = vst [vmem:[#allocation26_spill] sm:$0xff] %v13712_v47  ;;  %v7795_v2 = vadd.f32 %v7794_v23, %v7793_v14  ;;  %v3799_v14 = vrot.slane %v13678_v60, %v12772_v27  ;;  %v4468_v23 = vrot.slane %v4458_v7, %v12772_v27 }
0x1254   :  { %v13715_v3 = vadd.f32 %v7795_v2, %v13709_v29  ;;  %v7796_v56 = vpop.f32.mrb[52].mxu1 }
0x1255   :  { %v7797_v25 = vpop.f32.mrb[53].mxu1 }
0x1256   :  { %14504 = vst [vmem:[#allocation28_spill] sm:$0xff] %v13715_v3  ;;  %v7798_v9 = vadd.f32 %v7797_v25, %v7796_v56 }
0x1258   :  { %v13718_v32 = vadd.f32 %v7798_v9, %v13709_v29  ;;  %v7799_v52 = vpop.f32.mrb[54].mxu1 }
0x1259   :  { %v7800_v36 = vpop.f32.mrb[55].mxu1 }
0x125a   :  { %v7801_v63 = vadd.f32 %v7800_v36, %v7799_v52  ;;  %v13735_v52 = vadd.f32 %v4468_v23, %v3799_v14 }
0x125c   :  { %v13721_v55 = vadd.f32 %v7801_v63, %v13709_v29  ;;  %v7802_v5 = vpop.f32.mrb[56].mxu1 }
0x125d   :  { %v7803_v50 = vpop.f32.mrb[57].mxu1 }
0x125e   :  { %v7804_v0 = vadd.f32 %v7803_v50, %v7802_v5 }
0x1260   :  { %v13724_v58 = vadd.f32 %v7804_v0, %v13709_v29  ;;  %v7805_v17 = vpop.f32.mrb[58].mxu1  ;;  %v14505_v0 = vld [vmem:[#allocation27_spill] sm:$0xff] }
0x1261   :  { %v7806_v45 = vpop.f32.mrb[59].mxu1 }
0x1262   :  { %v7807_v44 = vadd.f32 %v7806_v45, %v7805_v17  ;;  %v3803_v17 = vrot.slane %v13678_v60, %v14505_v0  ;;  %v4472_v45 = vrot.slane %v4458_v7, %v14505_v0 }
0x1264   :  { %v13727_v37 = vadd.f32 %v7807_v44, %v13709_v29  ;;  %v7808_v42 = vpop.f32.mrb[60].mxu1 }
0x1265   :  { %v7809_v43 = vpop.f32.mrb[61].mxu1 }
0x1266   :  { %v7810_v2 = vadd.f32 %v7809_v43, %v7808_v42  ;;  %v13743_v42 = vadd.f32 %v4472_v45, %v3803_v17  ;;  %v3991_v17 = vadd.f32 %v13673_v61, %v13682_v13 }
0x1268   :  { %v13733_v56 = vadd.f32 %v7810_v2, %v13709_v29  ;;  %v7811_v25 = vpop.f32.mrb[62].mxu1 }
0x1269   :  { %v7812_v9 = vpop.f32.mrb[63].mxu1 }
0x126a   :  { %v13737_v36 = vadd.f32 %v7812_v9, %v7811_v25  ;;  %v13747_v9 = vrot.slane %v4458_v7, %v12729_v62 }
0x126c   :  { %v4546_v63 = vpop.f32.mrb[32].mxu1 }
0x126d   :  { %v11451_v5 = vadd.f32 %v13735_v52, %v4546_v63  ;;  %v4548_v50 = vpop.f32.mrb[33].mxu1 }
0x126e   :  { %v11453_v43 = vadd.f32 %v13743_v42, %v4548_v50 }
0x126f   :  { %v7341_v44 = vmul.f32 -1.442695, %v11451_v5 }
0x1270   :  { %v7342_v2 = vmul.f32 -1.442695, %v11453_v43 }
0x1271   :  { %11761 = vpow2.f32 %v7341_v44 }
0x1272   :  { %11763 = vpow2.f32 %v7342_v2 }
0x127b   :  { %v11762_v14 = vpop.eup %11761 }
0x127c   :  { %v4625_v23 = vadd.f32 1.0, %v11762_v14  ;;  %v11764_v25 = vpop.eup %11763 }
0x127d   :  { %v4632_v63 = vadd.f32 1.0, %v11764_v25 }
0x127e   :  { %11765 = vrcp.f32 %v4625_v23 }
0x127f   :  { %11767 = vrcp.f32 %v4632_v63 }
0x1288   :  { %v11766_v5 = vpop.eup %11765 }
0x1289   :  { %v11768_v44 = vpop.eup %11767 }
0x128a   :  { %v4638_v43 = vsub.f32 1.0, %v11768_v44  ;;  %v4640_v7 = vmul.f32 %v11768_v44, %v13583_v10 }
0x128c   :  { %v4617_v47 = vpop.f32.mrb[88].mxu0 }
0x128d   :  { %v4618_v60 = vadd.f32 %v4617_v47, %v13747_v9  ;;  %v8780_v3 = vpop.f32.mrb[89].mxu0 }
0x128f   :  { %v4635_v50 = vmul.f32 %v11766_v5, %v4618_v60 }
0x1291   :  { %v4636_v45 = vadd.f32 %v4635_v50, %v3991_v17 }
0x1293   :  { %11769 = vtanh.f32 %v4636_v45 }
0x129d   :  { %v11770_v2 = vpop.eup %11769 }
0x129e   :  { %v4639_v14 = vmul.f32 %v11770_v2, %v4638_v43 }
0x12a0   :  { %v13753_v23 = vadd.f32 %v4640_v7, %v4639_v14 }
0x12a2   :  { %4642 = vst [vmem:[#allocation17] sm:$0xff] %v13753_v23  ;;  %4711 = vmatmul.mubr.f32.vlgmr.msra.gmra.mrb[34].mxu1 %v13753_v23  ;;  %8814 = vmatmul.mubr.f32.vlgmr.msra.gmra.mrb[90].mxu0 %v13753_v23 }
0x12a3   :  { %10605 = vmatpush1.bf16.msra.mxu1 %v13518_v19  ;;  %10636 = vmatpush3.bf16.msra.mxu0 %v13585_v51 }
0x12a4   :  { %10607 = vmatprep.subr.bf16.mxu1 %v13521_v49  ;;  %10637 = vmatprep.subr.bf16.mxu0 %v14498_v4 }
0x12a5   :  { %4876 = vmatprep.mubr.f32.mxu1 %v14499_v20  ;;  %8848 = vmatprep.mubr.msk.f32.mxu0 %vm12126_vm9, %v14499_v20 }
0x12a7   :  { %10609 = vmatpush1.bf16.msra.mxu1 %v13526_v15  ;;  %10639 = vmatpush3.bf16.msra.mxu0 %v13593_v34 }
0x12a8   :  { %10611 = vmatprep.subr.bf16.mxu1 %v13529_v28  ;;  %10640 = vmatprep.subr.bf16.mxu0 %v14498_v4 }
0x12ab   :  { %10613 = vmatpush1.bf16.msra.mxu1 %v13534_v40  ;;  %10642 = vmatpush3.bf16.msra.mxu0 %v13602_v18 }
0x12ac   :  { %10615 = vmatprep.subr.bf16.mxu1 %v13537_v12  ;;  %10643 = vmatprep.subr.bf16.mxu0 %v14498_v4 }
0x12af   :  { %10617 = vmatpush1.bf16.msra.mxu1 %v13542_v59  ;;  %10645 = vmatpush3.bf16.msra.mxu0 %v13610_v39 }
0x12b0   :  { %10619 = vmatprep.subr.bf16.mxu1 %v13545_v57  ;;  %10646 = vmatprep.subr.bf16.mxu0 %v14498_v4 }
0x12b3   :  { %10621 = vmatpush1.bf16.msra.mxu1 %v13550_v30  ;;  %10648 = vmatpush3.bf16.msra.mxu0 %v13618_v1 }
0x12b4   :  { %10623 = vmatprep.subr.bf16.mxu1 %v13553_v46  ;;  %10649 = vmatprep.subr.bf16.mxu0 %v14498_v4 }
0x12b7   :  { %10625 = vmatpush1.bf16.msra.mxu1 %v13558_v16  ;;  %10651 = vmatpush3.bf16.msra.mxu0 %v13626_v6 }
0x12b8   :  { %10627 = vmatprep.subr.bf16.mxu1 %v13561_v54  ;;  %10652 = vmatprep.subr.bf16.mxu0 %v14498_v4 }
0x12bb   :  { %10629 = vmatpush1.bf16.msra.mxu1 %v13566_v26  ;;  %10654 = vmatpush3.bf16.msra.mxu0 %v13634_v24 }
0x12bc   :  { %10631 = vmatprep.subr.bf16.mxu1 %v13569_v53  ;;  %10655 = vmatprep.subr.bf16.mxu0 %v14498_v4 }
0x12bf   :  { %10633 = vmatpush1.bf16.msra.mxu1 %v13574_v31  ;;  %10657 = vmatpush3.bf16.msra.mxu0 %v13642_v38 }
0x12c0   :  { %10659 = vmatprep.subr.bf16.mxu1 %v13510_v8  ;;  %10690 = vmatprep.subr.bf16.mxu0 %v14498_v4 }
0x1375   :  { %v4712_v10 = vpop.f32.mrb[34].mxu1  ;;  %v4783_v61 = vpop.f32.mrb[90].mxu0 }
0x1376   :  { %v11455_v13 = vadd.f32 %v13735_v52, %v4712_v10  ;;  %v4714_v47 = vpop.f32.mrb[35].mxu1  ;;  %v8815_v3 = vpop.f32.mrb[91].mxu0  ;;  %v4784_v44 = vadd.f32 %v4783_v61, %v13747_v9 }
0x1377   :  { %v11457_v63 = vadd.f32 %v13743_v42, %v4714_v47 }
0x1378   :  { %v7343_v25 = vmul.f32 -1.442695, %v11455_v13 }
0x1379   :  { %v7344_v60 = vmul.f32 -1.442695, %v11457_v63 }
0x137a   :  { %11771 = vpow2.f32 %v7343_v25 }
0x137b   :  { %11773 = vpow2.f32 %v7344_v60 }
0x1384   :  { %v11772_v5 = vpop.eup %11771 }
0x1385   :  { %v4791_v17 = vadd.f32 1.0, %v11772_v5  ;;  %v11774_v50 = vpop.eup %11773 }
0x1386   :  { %v4798_v45 = vadd.f32 1.0, %v11774_v50 }
0x1387   :  { %11775 = vrcp.f32 %v4791_v17 }
0x1388   :  { %11777 = vrcp.f32 %v4798_v45 }
0x1391   :  { %v11776_v43 = vpop.eup %11775 }
0x1392   :  { %v4801_v2 = vmul.f32 %v11776_v43, %v4784_v44  ;;  %v11778_v7 = vpop.eup %11777 }
0x1393   :  { %v4804_v10 = vsub.f32 1.0, %v11778_v7  ;;  %v4806_v3 = vmul.f32 %v11778_v7, %v13753_v23 }
0x1394   :  { %v4802_v14 = vadd.f32 %v4801_v2, %v13685_v33 }
0x1396   :  { %11779 = vtanh.f32 %v4802_v14 }
0x13a0   :  { %v11780_v13 = vpop.eup %11779 }
0x13a1   :  { %v4805_v47 = vmul.f32 %v11780_v13, %v4804_v10 }
0x13a3   :  { %v13798_v25 = vadd.f32 %v4806_v3, %v4805_v47 }
0x13a5   :  { %4808 = vst [vmem:[#allocation17 + $0x10] sm:$0xff] %v13798_v25  ;;  %4877 = vmatmul.mubr.f32.vlgmr.msra.gmra.mrb[36].mxu1 %v13798_v25  ;;  %8849 = vmatmul.mubr.f32.vlgmr.msra.gmra.mrb[92].mxu0 %v13798_v25 }
0x13a6   :  { %10661 = vmatpush1.bf16.msra.mxu1 %v13518_v19  ;;  %10692 = vmatpush3.bf16.msra.mxu0 %v13585_v51 }
0x13a7   :  { %10663 = vmatprep.subr.bf16.mxu1 %v13521_v49  ;;  %10693 = vmatprep.subr.bf16.mxu0 %v14498_v4 }
0x13a8   :  { %5042 = vmatprep.mubr.f32.mxu1 %v14499_v20  ;;  %8883 = vmatprep.mubr.msk.f32.mxu0 %vm12126_vm9, %v14499_v20 }
0x13aa   :  { %10665 = vmatpush1.bf16.msra.mxu1 %v13526_v15  ;;  %10695 = vmatpush3.bf16.msra.mxu0 %v13593_v34 }
0x13ab   :  { %10667 = vmatprep.subr.bf16.mxu1 %v13529_v28  ;;  %10696 = vmatprep.subr.bf16.mxu0 %v14498_v4 }
0x13ae   :  { %10669 = vmatpush1.bf16.msra.mxu1 %v13534_v40  ;;  %10698 = vmatpush3.bf16.msra.mxu0 %v13602_v18 }
0x13af   :  { %10671 = vmatprep.subr.bf16.mxu1 %v13537_v12  ;;  %10699 = vmatprep.subr.bf16.mxu0 %v14498_v4 }
0x13b2   :  { %10673 = vmatpush1.bf16.msra.mxu1 %v13542_v59  ;;  %10701 = vmatpush3.bf16.msra.mxu0 %v13610_v39 }
0x13b3   :  { %10675 = vmatprep.subr.bf16.mxu1 %v13545_v57  ;;  %10702 = vmatprep.subr.bf16.mxu0 %v14498_v4 }
0x13b6   :  { %10677 = vmatpush1.bf16.msra.mxu1 %v13550_v30  ;;  %10704 = vmatpush3.bf16.msra.mxu0 %v13618_v1 }
0x13b7   :  { %10679 = vmatprep.subr.bf16.mxu1 %v13553_v46  ;;  %10705 = vmatprep.subr.bf16.mxu0 %v14498_v4 }
0x13ba   :  { %10681 = vmatpush1.bf16.msra.mxu1 %v13558_v16  ;;  %10707 = vmatpush3.bf16.msra.mxu0 %v13626_v6 }
0x13bb   :  { %10683 = vmatprep.subr.bf16.mxu1 %v13561_v54  ;;  %10708 = vmatprep.subr.bf16.mxu0 %v14498_v4 }
0x13be   :  { %10685 = vmatpush1.bf16.msra.mxu1 %v13566_v26  ;;  %10710 = vmatpush3.bf16.msra.mxu0 %v13634_v24 }
0x13bf   :  { %10687 = vmatprep.subr.bf16.mxu1 %v13569_v53  ;;  %10711 = vmatprep.subr.bf16.mxu0 %v14498_v4 }
0x13c2   :  { %10689 = vmatpush1.bf16.msra.mxu1 %v13574_v31  ;;  %10713 = vmatpush3.bf16.msra.mxu0 %v13642_v38 }
0x13c3   :  { %10715 = vmatprep.subr.bf16.mxu1 %v13510_v8  ;;  %10746 = vmatprep.subr.bf16.mxu0 %v14498_v4 }
0x1478   :  { %v4878_v33 = vpop.f32.mrb[36].mxu1  ;;  %v4949_v23 = vpop.f32.mrb[92].mxu0 }
0x1479   :  { %v11459_v61 = vadd.f32 %v13735_v52, %v4878_v33  ;;  %v4880_v63 = vpop.f32.mrb[37].mxu1  ;;  %v8850_v60 = vpop.f32.mrb[93].mxu0  ;;  %v4950_v14 = vadd.f32 %v4949_v23, %v13747_v9 }
0x147a   :  { %v11461_v17 = vadd.f32 %v13743_v42, %v4880_v63 }
0x147b   :  { %v7345_v5 = vmul.f32 -1.442695, %v11459_v61 }
0x147c   :  { %v7346_v50 = vmul.f32 -1.442695, %v11461_v17 }
0x147d   :  { %11781 = vpow2.f32 %v7345_v5 }
0x147e   :  { %11783 = vpow2.f32 %v7346_v50 }
0x1487   :  { %v11782_v45 = vpop.eup %11781 }
0x1488   :  { %v4957_v44 = vadd.f32 1.0, %v11782_v45  ;;  %v11784_v43 = vpop.eup %11783 }
0x1489   :  { %v4964_v2 = vadd.f32 1.0, %v11784_v43 }
0x148a   :  { %11785 = vrcp.f32 %v4957_v44 }
0x148b   :  { %11787 = vrcp.f32 %v4964_v2 }
0x1494   :  { %v11786_v7 = vpop.eup %11785 }
0x1495   :  { %v4967_v10 = vmul.f32 %v11786_v7, %v4950_v14  ;;  %v11788_v47 = vpop.eup %11787 }
0x1496   :  { %v4970_v3 = vsub.f32 1.0, %v11788_v47  ;;  %v4972_v63 = vmul.f32 %v11788_v47, %v13798_v25 }
0x1497   :  { %v4968_v13 = vadd.f32 %v4967_v10, %v13688_v22 }
0x1499   :  { %11789 = vtanh.f32 %v4968_v13 }
0x14a3   :  { %v11790_v33 = vpop.eup %11789 }
0x14a4   :  { %v4971_v61 = vmul.f32 %v11790_v33, %v4970_v3 }
0x14a6   :  { %v13843_v60 = vadd.f32 %v4972_v63, %v4971_v61 }
0x14a8   :  { %4974 = vst [vmem:[#allocation17 + $0x20] sm:$0xff] %v13843_v60  ;;  %5043 = vmatmul.mubr.f32.vlgmr.msra.gmra.mrb[38].mxu1 %v13843_v60  ;;  %8884 = vmatmul.mubr.f32.vlgmr.msra.gmra.mrb[94].mxu0 %v13843_v60 }
0x14a9   :  { %10717 = vmatpush1.bf16.msra.mxu1 %v13518_v19  ;;  %10748 = vmatpush3.bf16.msra.mxu0 %v13585_v51 }
0x14aa   :  { %10719 = vmatprep.subr.bf16.mxu1 %v13521_v49  ;;  %10749 = vmatprep.subr.bf16.mxu0 %v14498_v4 }
0x14ab   :  { %5208 = vmatprep.mubr.f32.mxu1 %v14499_v20  ;;  %8918 = vmatprep.mubr.msk.f32.mxu0 %vm12126_vm9, %v14499_v20 }
0x14ad   :  { %10721 = vmatpush1.bf16.msra.mxu1 %v13526_v15  ;;  %10751 = vmatpush3.bf16.msra.mxu0 %v13593_v34 }
0x14ae   :  { %10723 = vmatprep.subr.bf16.mxu1 %v13529_v28  ;;  %10752 = vmatprep.subr.bf16.mxu0 %v14498_v4 }
0x14b1   :  { %10725 = vmatpush1.bf16.msra.mxu1 %v13534_v40  ;;  %10754 = vmatpush3.bf16.msra.mxu0 %v13602_v18 }
0x14b2   :  { %10727 = vmatprep.subr.bf16.mxu1 %v13537_v12  ;;  %10755 = vmatprep.subr.bf16.mxu0 %v14498_v4 }
0x14b5   :  { %10729 = vmatpush1.bf16.msra.mxu1 %v13542_v59  ;;  %10757 = vmatpush3.bf16.msra.mxu0 %v13610_v39 }
0x14b6   :  { %10731 = vmatprep.subr.bf16.mxu1 %v13545_v57  ;;  %10758 = vmatprep.subr.bf16.mxu0 %v14498_v4 }
0x14b9   :  { %10733 = vmatpush1.bf16.msra.mxu1 %v13550_v30  ;;  %10760 = vmatpush3.bf16.msra.mxu0 %v13618_v1 }
0x14ba   :  { %10735 = vmatprep.subr.bf16.mxu1 %v13553_v46  ;;  %10761 = vmatprep.subr.bf16.mxu0 %v14498_v4 }
0x14bd   :  { %10737 = vmatpush1.bf16.msra.mxu1 %v13558_v16  ;;  %10763 = vmatpush3.bf16.msra.mxu0 %v13626_v6 }
0x14be   :  { %10739 = vmatprep.subr.bf16.mxu1 %v13561_v54  ;;  %10764 = vmatprep.subr.bf16.mxu0 %v14498_v4 }
0x14c1   :  { %10741 = vmatpush1.bf16.msra.mxu1 %v13566_v26  ;;  %10766 = vmatpush3.bf16.msra.mxu0 %v13634_v24 }
0x14c2   :  { %10743 = vmatprep.subr.bf16.mxu1 %v13569_v53  ;;  %10767 = vmatprep.subr.bf16.mxu0 %v14498_v4 }
0x14c5   :  { %10745 = vmatpush1.bf16.msra.mxu1 %v13574_v31  ;;  %10769 = vmatpush3.bf16.msra.mxu0 %v13642_v38 }
0x14c6   :  { %10771 = vmatprep.subr.bf16.mxu1 %v13510_v8  ;;  %10802 = vmatprep.subr.bf16.mxu0 %v14498_v4 }
0x157b   :  { %v5044_v22 = vpop.f32.mrb[38].mxu1  ;;  %v5115_v25 = vpop.f32.mrb[94].mxu0 }
0x157c   :  { %v11463_v23 = vadd.f32 %v13735_v52, %v5044_v22  ;;  %v5046_v5 = vpop.f32.mrb[39].mxu1  ;;  %v8885_v17 = vpop.f32.mrb[95].mxu0  ;;  %v5116_v10 = vadd.f32 %v5115_v25, %v13747_v9 }
0x157d   :  { %v11465_v45 = vadd.f32 %v13743_v42, %v5046_v5 }
0x157e   :  { %v7347_v50 = vmul.f32 -1.442695, %v11463_v23 }
0x157f   :  { %v7348_v44 = vmul.f32 -1.442695, %v11465_v45 }
0x1580   :  { %11791 = vpow2.f32 %v7347_v50 }
0x1581   :  { %11793 = vpow2.f32 %v7348_v44 }
0x158a   :  { %v11792_v43 = vpop.eup %11791 }
0x158b   :  { %v5123_v2 = vadd.f32 1.0, %v11792_v43  ;;  %v11794_v14 = vpop.eup %11793 }
0x158c   :  { %v5130_v7 = vadd.f32 1.0, %v11794_v14 }
0x158d   :  { %11795 = vrcp.f32 %v5123_v2 }
0x158e   :  { %11797 = vrcp.f32 %v5130_v7 }
0x1597   :  { %v11796_v13 = vpop.eup %11795 }
0x1598   :  { %v5133_v47 = vmul.f32 %v11796_v13, %v5116_v10  ;;  %v11798_v33 = vpop.eup %11797 }
0x1599   :  { %v5136_v61 = vsub.f32 1.0, %v11798_v33  ;;  %v5138_v23 = vmul.f32 %v11798_v33, %v13843_v60 }
0x159a   :  { %v5134_v3 = vadd.f32 %v5133_v47, %v13691_v21 }
0x159c   :  { %11799 = vtanh.f32 %v5134_v3 }
0x15a6   :  { %v11800_v63 = vpop.eup %11799 }
0x15a7   :  { %v5137_v22 = vmul.f32 %v11800_v63, %v5136_v61 }
0x15a9   :  { %v13888_v5 = vadd.f32 %v5138_v23, %v5137_v22 }
0x15ab   :  { %5140 = vst [vmem:[#allocation17 + $0x30] sm:$0xff] %v13888_v5  ;;  %5209 = vmatmul.mubr.f32.vlgmr.msra.gmra.mrb[40].mxu1 %v13888_v5  ;;  %8919 = vmatmul.mubr.f32.vlgmr.msra.gmra.mrb[96].mxu0 %v13888_v5 }
0x15ac   :  { %10773 = vmatpush1.bf16.msra.mxu1 %v13518_v19  ;;  %10804 = vmatpush3.bf16.msra.mxu0 %v13585_v51 }
0x15ad   :  { %10775 = vmatprep.subr.bf16.mxu1 %v13521_v49  ;;  %10805 = vmatprep.subr.bf16.mxu0 %v14498_v4 }
0x15ae   :  { %5374 = vmatprep.mubr.f32.mxu1 %v14499_v20  ;;  %8953 = vmatprep.mubr.msk.f32.mxu0 %vm12126_vm9, %v14499_v20 }
0x15b0   :  { %10777 = vmatpush1.bf16.msra.mxu1 %v13526_v15  ;;  %10807 = vmatpush3.bf16.msra.mxu0 %v13593_v34 }
0x15b1   :  { %10779 = vmatprep.subr.bf16.mxu1 %v13529_v28  ;;  %10808 = vmatprep.subr.bf16.mxu0 %v14498_v4 }
0x15b4   :  { %10781 = vmatpush1.bf16.msra.mxu1 %v13534_v40  ;;  %10810 = vmatpush3.bf16.msra.mxu0 %v13602_v18 }
0x15b5   :  { %10783 = vmatprep.subr.bf16.mxu1 %v13537_v12  ;;  %10811 = vmatprep.subr.bf16.mxu0 %v14498_v4 }
0x15b8   :  { %10785 = vmatpush1.bf16.msra.mxu1 %v13542_v59  ;;  %10813 = vmatpush3.bf16.msra.mxu0 %v13610_v39 }
0x15b9   :  { %10787 = vmatprep.subr.bf16.mxu1 %v13545_v57  ;;  %10814 = vmatprep.subr.bf16.mxu0 %v14498_v4 }
0x15bc   :  { %10789 = vmatpush1.bf16.msra.mxu1 %v13550_v30  ;;  %10816 = vmatpush3.bf16.msra.mxu0 %v13618_v1 }
0x15bd   :  { %10791 = vmatprep.subr.bf16.mxu1 %v13553_v46  ;;  %10817 = vmatprep.subr.bf16.mxu0 %v14498_v4 }
0x15c0   :  { %10793 = vmatpush1.bf16.msra.mxu1 %v13558_v16  ;;  %10819 = vmatpush3.bf16.msra.mxu0 %v13626_v6 }
0x15c1   :  { %10795 = vmatprep.subr.bf16.mxu1 %v13561_v54  ;;  %10820 = vmatprep.subr.bf16.mxu0 %v14498_v4 }
0x15c4   :  { %10797 = vmatpush1.bf16.msra.mxu1 %v13566_v26  ;;  %10822 = vmatpush3.bf16.msra.mxu0 %v13634_v24 }
0x15c5   :  { %10799 = vmatprep.subr.bf16.mxu1 %v13569_v53  ;;  %10823 = vmatprep.subr.bf16.mxu0 %v14498_v4 }
0x15c8   :  { %10801 = vmatpush1.bf16.msra.mxu1 %v13574_v31  ;;  %10825 = vmatpush3.bf16.msra.mxu0 %v13642_v38 }
0x15c9   :  { %10827 = vmatprep.subr.bf16.mxu1 %v13510_v8  ;;  %10858 = vmatprep.subr.bf16.mxu0 %v14498_v4 }
0x167e   :  { %v5210_v21 = vpop.f32.mrb[40].mxu1  ;;  %v5281_v60 = vpop.f32.mrb[96].mxu0 }
0x167f   :  { %v11467_v25 = vadd.f32 %v13735_v52, %v5210_v21  ;;  %v5212_v17 = vpop.f32.mrb[41].mxu1  ;;  %v8920_v50 = vpop.f32.mrb[97].mxu0  ;;  %v5282_v13 = vadd.f32 %v5281_v60, %v13747_v9 }
0x1680   :  { %v11469_v44 = vadd.f32 %v13743_v42, %v5212_v17 }
0x1681   :  { %v7349_v45 = vmul.f32 -1.442695, %v11467_v25 }
0x1682   :  { %v7350_v43 = vmul.f32 -1.442695, %v11469_v44 }
0x1683   :  { %11801 = vpow2.f32 %v7349_v45 }
0x1684   :  { %11803 = vpow2.f32 %v7350_v43 }
0x168d   :  { %v11802_v2 = vpop.eup %11801 }
0x168e   :  { %v5289_v14 = vadd.f32 1.0, %v11802_v2  ;;  %v11804_v7 = vpop.eup %11803 }
0x168f   :  { %v5296_v10 = vadd.f32 1.0, %v11804_v7 }
0x1690   :  { %11805 = vrcp.f32 %v5289_v14 }
0x1691   :  { %11807 = vrcp.f32 %v5296_v10 }
0x169a   :  { %v11806_v47 = vpop.eup %11805 }
0x169b   :  { %v5299_v3 = vmul.f32 %v11806_v47, %v5282_v13  ;;  %v11808_v61 = vpop.eup %11807 }
0x169c   :  { %v5302_v63 = vsub.f32 1.0, %v11808_v61  ;;  %v5304_v21 = vmul.f32 %v11808_v61, %v13888_v5 }
0x169d   :  { %v5300_v33 = vadd.f32 %v5299_v3, %v13694_v35 }
0x169f   :  { %11809 = vtanh.f32 %v5300_v33 }
0x16a9   :  { %v11810_v22 = vpop.eup %11809 }
0x16aa   :  { %v5303_v23 = vmul.f32 %v11810_v22, %v5302_v63 }
0x16ac   :  { %v13933_v25 = vadd.f32 %v5304_v21, %v5303_v23 }
0x16ae   :  { %5306 = vst [vmem:[#allocation17 + $0x40] sm:$0xff] %v13933_v25  ;;  %5375 = vmatmul.mubr.f32.vlgmr.msra.gmra.mrb[42].mxu1 %v13933_v25  ;;  %8954 = vmatmul.mubr.f32.vlgmr.msra.gmra.mrb[98].mxu0 %v13933_v25 }
0x16af   :  { %10829 = vmatpush1.bf16.msra.mxu1 %v13518_v19  ;;  %10860 = vmatpush3.bf16.msra.mxu0 %v13585_v51 }
0x16b0   :  { %10831 = vmatprep.subr.bf16.mxu1 %v13521_v49  ;;  %10861 = vmatprep.subr.bf16.mxu0 %v14498_v4 }
0x16b1   :  { %5540 = vmatprep.mubr.f32.mxu1 %v14499_v20  ;;  %8988 = vmatprep.mubr.msk.f32.mxu0 %vm12126_vm9, %v14499_v20 }
0x16b3   :  { %10833 = vmatpush1.bf16.msra.mxu1 %v13526_v15  ;;  %10863 = vmatpush3.bf16.msra.mxu0 %v13593_v34 }
0x16b4   :  { %10835 = vmatprep.subr.bf16.mxu1 %v13529_v28  ;;  %10864 = vmatprep.subr.bf16.mxu0 %v14498_v4 }
0x16b7   :  { %10837 = vmatpush1.bf16.msra.mxu1 %v13534_v40  ;;  %10866 = vmatpush3.bf16.msra.mxu0 %v13602_v18 }
0x16b8   :  { %10839 = vmatprep.subr.bf16.mxu1 %v13537_v12  ;;  %10867 = vmatprep.subr.bf16.mxu0 %v14498_v4 }
0x16bb   :  { %10841 = vmatpush1.bf16.msra.mxu1 %v13542_v59  ;;  %10869 = vmatpush3.bf16.msra.mxu0 %v13610_v39 }
0x16bc   :  { %10843 = vmatprep.subr.bf16.mxu1 %v13545_v57  ;;  %10870 = vmatprep.subr.bf16.mxu0 %v14498_v4 }
0x16bf   :  { %10845 = vmatpush1.bf16.msra.mxu1 %v13550_v30  ;;  %10872 = vmatpush3.bf16.msra.mxu0 %v13618_v1 }
0x16c0   :  { %10847 = vmatprep.subr.bf16.mxu1 %v13553_v46  ;;  %10873 = vmatprep.subr.bf16.mxu0 %v14498_v4 }
0x16c3   :  { %10849 = vmatpush1.bf16.msra.mxu1 %v13558_v16  ;;  %10875 = vmatpush3.bf16.msra.mxu0 %v13626_v6 }
0x16c4   :  { %10851 = vmatprep.subr.bf16.mxu1 %v13561_v54  ;;  %10876 = vmatprep.subr.bf16.mxu0 %v14498_v4 }
0x16c7   :  { %10853 = vmatpush1.bf16.msra.mxu1 %v13566_v26  ;;  %10878 = vmatpush3.bf16.msra.mxu0 %v13634_v24 }
0x16c8   :  { %10855 = vmatprep.subr.bf16.mxu1 %v13569_v53  ;;  %10879 = vmatprep.subr.bf16.mxu0 %v14498_v4 }
0x16cb   :  { %10857 = vmatpush1.bf16.msra.mxu1 %v13574_v31  ;;  %10881 = vmatpush3.bf16.msra.mxu0 %v13642_v38 }
0x16cc   :  { %10914 = vmatprep.subr.bf16.mxu0 %v14498_v4  ;;  %10883 = vmatprep.subr.bf16.mxu1 %v13510_v8 }
0x1781   :  { %v5376_v35 = vpop.f32.mrb[42].mxu1  ;;  %v5447_v5 = vpop.f32.mrb[98].mxu0 }
0x1782   :  { %v11471_v60 = vadd.f32 %v13735_v52, %v5376_v35  ;;  %v5378_v17 = vpop.f32.mrb[43].mxu1  ;;  %v8955_v50 = vpop.f32.mrb[99].mxu0  ;;  %v5448_v13 = vadd.f32 %v5447_v5, %v13747_v9  ;;  %v5815_v5 = vld [vmem:[#allocation14 + $0x1b8] sm:$0xff] }
0x1783   :  { %v11473_v44 = vadd.f32 %v13743_v42, %v5378_v17 }
0x1784   :  { %v7351_v45 = vmul.f32 -1.442695, %v11471_v60  ;;  %v5818_v60 = vld [vmem:[#allocation14 + $0x1d0] sm:$0xff] }
0x1785   :  { %v7352_v43 = vmul.f32 -1.442695, %v11473_v44  ;;  %v5814_v44 = vld [vmem:[#allocation14 + $0x1b0] sm:$0xff] }
0x1786   :  { %11811 = vpow2.f32 %v7351_v45 }
0x1787   :  { %11813 = vpow2.f32 %v7352_v43 }
0x1790   :  { %v11812_v2 = vpop.eup %11811 }
0x1791   :  { %v5455_v14 = vadd.f32 1.0, %v11812_v2  ;;  %v11814_v7 = vpop.eup %11813 }
0x1792   :  { %v5462_v10 = vadd.f32 1.0, %v11814_v7  ;;  %v5816_v7 = vld [vmem:[#allocation14 + $0x1c0] sm:$0xff] }
0x1793   :  { %11815 = vrcp.f32 %v5455_v14  ;;  %v5817_v14 = vld [vmem:[#allocation14 + $0x1c8] sm:$0xff] }
0x1794   :  { %11817 = vrcp.f32 %v5462_v10  ;;  %v5819_v10 = vld [vmem:[#allocation14 + $0x1d8] sm:$0xff] }
0x179d   :  { %v11816_v8 = vpop.eup %11815 }
0x179e   :  { %v5465_v47 = vmul.f32 %v11816_v8, %v5448_v13  ;;  %v11818_v33 = vpop.eup %11817  ;;  %v5821_v13 = vld [vmem:[#allocation14 + $0x1e8] sm:$0xff]  ;;  %v5824_v8 = vld [vmem:[#allocation14 + $0x200] sm:$0xff] }
0x179f   :  { %v5468_v61 = vsub.f32 1.0, %v11818_v33  ;;  %v5470_v23 = vmul.f32 %v11818_v33, %v13933_v25  ;;  %v5813_v25 = vld [vmem:[#allocation14 + $0x1a8] sm:$0xff]  ;;  %v14040_v33 = vpack.c.bf16 %v5819_v10, %v5816_v7  ;;  %v5847_v10 = vld [vmem:[#allocation14 + $0x2b8] sm:$0xff] }
0x17a0   :  { %v5466_v3 = vadd.f32 %v5465_v47, %v13697_v11  ;;  %v5810_v11 = vld [vmem:[#allocation14 + $0x190] sm:$0xff]  ;;  %v14037_v47 = vpack.c.bf16 %v5817_v14, %v5814_v44  ;;  %v5844_v44 = vld [vmem:[#allocation14 + $0x2a0] sm:$0xff] }
0x17a1   :  { %v14027_v43 = vpack.c.bf16 %v5813_v25, %v5810_v11  ;;  %v5841_v25 = vld [vmem:[#allocation14 + $0x288] sm:$0xff] }
0x17a2   :  { %11819 = vtanh.f32 %v5466_v3  ;;  %v5820_v3 = vld [vmem:[#allocation14 + $0x1e0] sm:$0xff] }
0x17ac   :  { %v11820_v63 = vpop.eup %11819 }
0x17ad   :  { %v5469_v22 = vmul.f32 %v11820_v63, %v5468_v61  ;;  %v14043_v61 = vpack.c.bf16 %v5824_v8, %v5821_v13  ;;  %v5823_v63 = vld [vmem:[#allocation14 + $0x1f8] sm:$0xff]  ;;  %v5846_v13 = vld [vmem:[#allocation14 + $0x2b0] sm:$0xff]  ;;  %v5849_v8 = vld [vmem:[#allocation14 + $0x2c8] sm:$0xff] }
0x17af   :  { %v13978_v21 = vadd.f32 %v5470_v23, %v5469_v22  ;;  %v5822_v22 = vld [vmem:[#allocation14 + $0x1f0] sm:$0xff]  ;;  %v5825_v23 = vld [vmem:[#allocation14 + $0x208] sm:$0xff] }
0x17b1   :  { %5472 = vst [vmem:[#allocation17 + $0x50] sm:$0xff] %v13978_v21  ;;  %5541 = vmatmul.mubr.f32.vlgmr.msra.gmra.mrb[44].mxu1 %v13978_v21  ;;  %8989 = vmatmul.mubr.f32.vlgmr.msra.gmra.mrb[100].mxu0 %v13978_v21 }
0x17b2   :  { %10916 = vmatpush3.bf16.msra.mxu0 %v13585_v51  ;;  %10885 = vmatpush1.bf16.msra.mxu1 %v13518_v19  ;;  %v5809_v19 = vld [vmem:[#allocation14 + $0x188] sm:$0xff] }
0x17b3   :  { %10917 = vmatprep.subr.bf16.mxu0 %v14498_v4  ;;  %10887 = vmatprep.subr.bf16.mxu1 %v13521_v49  ;;  %v5812_v49 = vld [vmem:[#allocation14 + $0x1a0] sm:$0xff] }
0x17b4   :  { %5706 = vmatprep.mubr.f32.mxu1 %v14499_v20  ;;  %9023 = vmatprep.mubr.msk.f32.mxu0 %vm12126_vm9, %v14499_v20 }
0x17b6   :  { %10919 = vmatpush3.bf16.msra.mxu0 %v13593_v34  ;;  %10889 = vmatpush1.bf16.msra.mxu1 %v13526_v15  ;;  %v14017_v15 = vpack.c.bf16 %v5812_v49, %v5809_v19  ;;  %v5830_v19 = vld [vmem:[#allocation14 + $0x230] sm:$0xff]  ;;  %v14050_v49 = vpack.c.bf16 %v5823_v63, %v5820_v3  ;;  %v5851_v3 = vld [vmem:[#allocation14 + $0x2d8] sm:$0xff] }
0x17b7   :  { %10920 = vmatprep.subr.bf16.mxu0 %v14498_v4  ;;  %10891 = vmatprep.subr.bf16.mxu1 %v13529_v28  ;;  %v5854_v63 = vld [vmem:[#allocation14 + $0x2f0] sm:$0xff] }
0x17ba   :  { %10922 = vmatpush3.bf16.msra.mxu0 %v13602_v18  ;;  %10893 = vmatpush1.bf16.msra.mxu1 %v13534_v40 }
0x17bb   :  { %10923 = vmatprep.subr.bf16.mxu0 %v14498_v4  ;;  %10895 = vmatprep.subr.bf16.mxu1 %v13537_v12 }
0x17be   :  { %10925 = vmatpush3.bf16.msra.mxu0 %v13610_v39  ;;  %10897 = vmatpush1.bf16.msra.mxu1 %v13542_v59 }
0x17bf   :  { %10926 = vmatprep.subr.bf16.mxu0 %v14498_v4  ;;  %10899 = vmatprep.subr.bf16.mxu1 %v13545_v57 }
0x17c2   :  { %10928 = vmatpush3.bf16.msra.mxu0 %v13618_v1  ;;  %10901 = vmatpush1.bf16.msra.mxu1 %v13550_v30 }
0x17c3   :  { %10929 = vmatprep.subr.bf16.mxu0 %v14498_v4  ;;  %10903 = vmatprep.subr.bf16.mxu1 %v13553_v46 }
0x17c6   :  { %10931 = vmatpush3.bf16.msra.mxu0 %v13626_v6  ;;  %10905 = vmatpush1.bf16.msra.mxu1 %v13558_v16  ;;  %v5808_v6 = vld [vmem:[#allocation14 + $0x180] sm:$0xff] }
0x17c7   :  { %10932 = vmatprep.subr.bf16.mxu0 %v14498_v4  ;;  %10907 = vmatprep.subr.bf16.mxu1 %v13561_v54 }
0x17ca   :  { %10934 = vmatpush3.bf16.msra.mxu0 %v13634_v24  ;;  %10909 = vmatpush1.bf16.msra.mxu1 %v13566_v26 }
0x17cb   :  { %10935 = vmatprep.subr.bf16.mxu0 %v14498_v4  ;;  %10911 = vmatprep.subr.bf16.mxu1 %v13569_v53 }
0x17ce   :  { %10937 = vmatpush3.bf16.msra.mxu0 %v13642_v38  ;;  %10913 = vmatpush1.bf16.msra.mxu1 %v13574_v31  ;;  %v5811_v38 = vld [vmem:[#allocation14 + $0x198] sm:$0xff] }
0x17cf   :  { %10970 = vmatprep.subr.bf16.mxu1 %v14498_v4  ;;  %10939 = vmatprep.subr.bf16.mxu0 %v14017_v15  ;;  %v14025_v45 = vpack.c.bf16 %v5811_v38, %v5808_v6 }
0x1884   :  { %v5542_v28 = vpop.f32.mrb[44].mxu1  ;;  %v5613_v40 = vpop.f32.mrb[100].mxu0 }
0x1885   :  { %v11475_v12 = vadd.f32 %v13735_v52, %v5542_v28  ;;  %v5544_v59 = vpop.f32.mrb[45].mxu1  ;;  %v8990_v57 = vpop.f32.mrb[101].mxu0  ;;  %v5614_v51 = vadd.f32 %v5613_v40, %v13747_v9  ;;  %v5826_v28 = vld [vmem:[#allocation14 + $0x210] sm:$0xff]  ;;  %v14053_v40 = vpack.c.bf16 %v5825_v23, %v5822_v22  ;;  %v14090_v22 = vpack.c.bf16 %v5847_v10, %v5844_v44 }
0x1886   :  { %v11477_v46 = vadd.f32 %v13743_v42, %v5544_v59  ;;  %v5829_v59 = vld [vmem:[#allocation14 + $0x228] sm:$0xff]  ;;  %v5828_v57 = vld [vmem:[#allocation14 + $0x220] sm:$0xff]  ;;  %v5850_v23 = vld [vmem:[#allocation14 + $0x2d0] sm:$0xff] }
0x1887   :  { %v7353_v30 = vmul.f32 -1.442695, %v11475_v12  ;;  %v11923_v10 = vld [vmem:[%s14483_s8 + $0x3] sm:$0x7]  ;;  %s12127_s8 = smov [#allocation17]  }
0x1888   :  { %v7354_v16 = vmul.f32 -1.442695, %v11477_v46  ;;  %v5833_v46 = vld [vmem:[#allocation14 + $0x248] sm:$0xff]  ;;  %s7211_s9 = sshll.u32 %s12127_s8, 4  ;;  %s7212_s9 = int_to_ptr.vmem [resolvable:$true] %s7211_s9 }
0x1889   :  { %11821 = vpow2.f32 %v7353_v30  ;;  %v5831_v30 = vld [vmem:[#allocation14 + $0x238] sm:$0xff]  ;;  %s12056_s15 = scalar_lea.vmem %s7212_s9, 2048  ;;  %p12061_p7 = scmp.lt.s32.totalorder %s7212_s9, %s7212_s9 }
0x188a   :  { %11823 = vpow2.f32 %v7354_v16  ;;  %v5836_v16 = vld [vmem:[#allocation14 + $0x260] sm:$0xff]  ;;  %p12057_p6 = scmp.ne.s32.totalorder %s7212_s9, %s12056_s15  ;;  %p12062_p8 = scmp.lt.s32.totalorder %s12056_s15, %s12056_s15 }
0x188c   :  { %p12063_p9 = por %p12062_p8, %p12061_p7 }
0x188e   :  { %p12064_p10 = pnand %p12063_p9, %p12057_p6 }
0x1893   :  { %v11822_v54 = vpop.eup %11821 }
0x1894   :  { %v5621_v26 = vadd.f32 1.0, %v11822_v54  ;;  %v11824_v53 = vpop.eup %11823  ;;  %v14060_v54 = vpack.c.bf16 %v5829_v59, %v5826_v28  ;;  %v5853_v28 = vld [vmem:[#allocation14 + $0x2e8] sm:$0xff]  ;;  %v5852_v59 = vld [vmem:[#allocation14 + $0x2e0] sm:$0xff] }
0x1895   :  { %v5628_v31 = vadd.f32 1.0, %v11824_v53  ;;  %v14063_v53 = vpack.c.bf16 %v5831_v30, %v5828_v57  ;;  %v5855_v57 = vld [vmem:[#allocation14 + $0x2f8] sm:$0xff]  ;;  %v14100_v30 = vpack.c.bf16 %v5853_v28, %v5850_v23 }
0x1896   :  { %11825 = vrcp.f32 %v5621_v26  ;;  %v5832_v26 = vld [vmem:[#allocation14 + $0x240] sm:$0xff] }
0x1897   :  { %11827 = vrcp.f32 %v5628_v31  ;;  %v14066_v31 = vpack.c.bf16 %v5836_v16, %v5833_v46  ;;  %v14103_v46 = vpack.c.bf16 %v5855_v57, %v5852_v59  ;;  %v14111_v16 = vld [vmem:[%s14485_s10 + $0x18] sm:$0xff] }
0x18a0   :  { %v11826_v34 = vpop.eup %11825 }
0x18a1   :  { %v5631_v18 = vmul.f32 %v11826_v34, %v5614_v51  ;;  %v11828_v1 = vpop.eup %11827  ;;  %v5835_v51 = vld [vmem:[#allocation14 + $0x258] sm:$0xff]  ;;  %v5834_v34 = vld [vmem:[#allocation14 + $0x250] sm:$0xff] }
0x18a2   :  { %v5634_v24 = vsub.f32 1.0, %v11828_v1  ;;  %v5636_v50 = vmul.f32 %v11828_v1, %v13978_v21  ;;  %v5827_v21 = vld [vmem:[#allocation14 + $0x218] sm:$0xff]  ;;  %v5842_v1 = vld [vmem:[#allocation14 + $0x290] sm:$0xff]  ;;  %v14070_v6 = vpack.c.bf16 %v5835_v51, %v5832_v26 }
0x18a3   :  { %v5632_v39 = vadd.f32 %v5631_v18, %v13700_v48  ;;  %v14031_v48 = vpack.c.bf16 %v5818_v60, %v5815_v5  ;;  %v14056_v12 = vpack.c.bf16 %v5830_v19, %v5827_v21  ;;  %v5837_v18 = vld [vmem:[#allocation14 + $0x268] sm:$0xff]  ;;  %v5843_v5 = vld [vmem:[#allocation14 + $0x298] sm:$0xff]  ;;  %v14093_v21 = vpack.c.bf16 %v5849_v8, %v5846_v13 }
0x18a4   :  { %v14073_v38 = vpack.c.bf16 %v5837_v18, %v5834_v34  ;;  %v5845_v60 = vld [vmem:[#allocation14 + $0x2a8] sm:$0xff]  ;;  %v14096_v19 = vpack.c.bf16 %v5854_v63, %v5851_v3  ;;  %v4160_v3 = vrot.slane %v11923_v10, %v14505_v0 }
0x18a5   :  { %11829 = vtanh.f32 %v5632_v39  ;;  %v5839_v39 = vld [vmem:[#allocation14 + $0x278] sm:$0xff] }
0x18a6   :  { %v14076_v11 = vpack.c.bf16 %v5842_v1, %v5839_v39 }
0x18af   :  { %v11830_v35 = vpop.eup %11829 }
0x18b0   :  { %v5635_v17 = vmul.f32 %v11830_v35, %v5634_v24  ;;  %v5838_v24 = vld [vmem:[#allocation14 + $0x270] sm:$0xff]  ;;  %v5840_v35 = vld [vmem:[#allocation14 + $0x280] sm:$0xff] }
0x18b1   :  { %v14083_v14 = vpack.c.bf16 %v5843_v5, %v5840_v35 }
0x18b2   :  { %v14029_v2 = vadd.f32 %v5636_v50, %v5635_v17  ;;  %v5848_v17 = vld [vmem:[#allocation14 + $0x2c0] sm:$0xff]  ;;  %v14080_v50 = vpack.c.bf16 %v5841_v25, %v5838_v24 }
0x18b3   :  { %v14086_v7 = vpack.c.bf16 %v5848_v17, %v5845_v60  ;;  %v5857_v17 = vld [vmem:[#allocation15 + $0x3] sm:$0x7] }
0x18b4   :  { %5638 = vst [vmem:[#allocation17 + $0x60] sm:$0xff] %v14029_v2  ;;  %5707 = vmatmul.mubr.f32.vlgmr.msra.gmra.mrb[46].mxu1 %v14029_v2  ;;  %9024 = vmatmul.mubr.f32.vlgmr.msra.gmra.mrb[102].mxu0 %v14029_v2  ;;  %v5867_v13 = vrot.slane %v5857_v17, %v12772_v27  ;;  %v5871_v63 = vrot.slane %v5857_v17, %v14505_v0 }
0x18b5   :  { %10941 = vmatpush1.bf16.msra.mxu0 %v14025_v45  ;;  %10972 = vmatpush3.bf16.msra.mxu1 %v14027_v43 }
0x18b6   :  { %10943 = vmatprep.subr.bf16.mxu0 %v14031_v48  ;;  %10973 = vmatprep.subr.bf16.mxu1 %v14498_v4 }
0x18b7   :  { %5943 = vmatprep.mubr.f32.mxu0 %v14499_v20  ;;  %9058 = vmatprep.mubr.msk.f32.mxu1 %vm12126_vm9, %v14499_v20 }
0x18b9   :  { %10945 = vmatpush1.bf16.msra.mxu0 %v14037_v47  ;;  %10975 = vmatpush3.bf16.msra.mxu1 %v14040_v33 }
0x18ba   :  { %10947 = vmatprep.subr.bf16.mxu0 %v14043_v61  ;;  %10976 = vmatprep.subr.bf16.mxu1 %v14498_v4 }
0x18bd   :  { %10949 = vmatpush1.bf16.msra.mxu0 %v14050_v49  ;;  %10978 = vmatpush3.bf16.msra.mxu1 %v14053_v40 }
0x18be   :  { %10951 = vmatprep.subr.bf16.mxu0 %v14056_v12  ;;  %10979 = vmatprep.subr.bf16.mxu1 %v14498_v4 }
0x18c1   :  { %10953 = vmatpush1.bf16.msra.mxu0 %v14060_v54  ;;  %10981 = vmatpush3.bf16.msra.mxu1 %v14063_v53 }
0x18c2   :  { %10955 = vmatprep.subr.bf16.mxu0 %v14066_v31  ;;  %10982 = vmatprep.subr.bf16.mxu1 %v14498_v4 }
0x18c5   :  { %10957 = vmatpush1.bf16.msra.mxu0 %v14070_v6  ;;  %10984 = vmatpush3.bf16.msra.mxu1 %v14073_v38 }
0x18c6   :  { %10959 = vmatprep.subr.bf16.mxu0 %v14076_v11  ;;  %10985 = vmatprep.subr.bf16.mxu1 %v14498_v4 }
0x18c9   :  { %10961 = vmatpush1.bf16.msra.mxu0 %v14080_v50  ;;  %10987 = vmatpush3.bf16.msra.mxu1 %v14083_v14 }
0x18ca   :  { %10963 = vmatprep.subr.bf16.mxu0 %v14086_v7  ;;  %10988 = vmatprep.subr.bf16.mxu1 %v14498_v4 }
0x18cd   :  { %10965 = vmatpush1.bf16.msra.mxu0 %v14090_v22  ;;  %10990 = vmatpush3.bf16.msra.mxu1 %v14093_v21 }
0x18ce   :  { %10967 = vmatprep.subr.bf16.mxu0 %v14096_v19  ;;  %10991 = vmatprep.subr.bf16.mxu1 %v14498_v4 }
0x18d1   :  { %10969 = vmatpush1.bf16.msra.mxu0 %v14100_v30  ;;  %10993 = vmatpush3.bf16.msra.mxu1 %v14103_v46 }
0x18d2   :  { %10995 = vmatprep.subr.bf16.mxu0 %v14017_v15  ;;  %11026 = vmatprep.subr.bf16.mxu1 %v14498_v4 }
0x18d4   :  { %5944 = vmatmul.mubr.f32.vlgmr.msra.gmra.mrb[86].mxu0 %v14111_v16  ;;  %9059 = vmatmul.mubr.f32.vlgmr.msra.gmra.mrb[64].mxu1 %v14111_v16 }
0x18d5   :  { %10997 = vmatpush1.bf16.msra.mxu0 %v14025_v45  ;;  %11028 = vmatpush3.bf16.msra.mxu1 %v14027_v43 }
0x18d6   :  { %10999 = vmatprep.subr.bf16.mxu0 %v14031_v48  ;;  %11029 = vmatprep.subr.bf16.mxu1 %v14498_v4 }
0x18d7   :  { %6109 = vmatprep.mubr.f32.mxu0 %v14499_v20  ;;  %9093 = vmatprep.mubr.msk.f32.mxu1 %vm12126_vm9, %v14499_v20 }
0x18d9   :  { %11001 = vmatpush1.bf16.msra.mxu0 %v14037_v47  ;;  %11031 = vmatpush3.bf16.msra.mxu1 %v14040_v33 }
0x18da   :  { %11003 = vmatprep.subr.bf16.mxu0 %v14043_v61  ;;  %11032 = vmatprep.subr.bf16.mxu1 %v14498_v4 }
0x18dd   :  { %11005 = vmatpush1.bf16.msra.mxu0 %v14050_v49  ;;  %11034 = vmatpush3.bf16.msra.mxu1 %v14053_v40 }
0x18de   :  { %11007 = vmatprep.subr.bf16.mxu0 %v14056_v12  ;;  %11035 = vmatprep.subr.bf16.mxu1 %v14498_v4 }
0x18e1   :  { %11009 = vmatpush1.bf16.msra.mxu0 %v14060_v54  ;;  %11037 = vmatpush3.bf16.msra.mxu1 %v14063_v53 }
0x18e2   :  { %11011 = vmatprep.subr.bf16.mxu0 %v14066_v31  ;;  %11038 = vmatprep.subr.bf16.mxu1 %v14498_v4 }
0x18e5   :  { %11013 = vmatpush1.bf16.msra.mxu0 %v14070_v6  ;;  %11040 = vmatpush3.bf16.msra.mxu1 %v14073_v38 }
0x18e6   :  { %11015 = vmatprep.subr.bf16.mxu0 %v14076_v11  ;;  %11041 = vmatprep.subr.bf16.mxu1 %v14498_v4 }
0x18e9   :  { %11017 = vmatpush1.bf16.msra.mxu0 %v14080_v50  ;;  %11043 = vmatpush3.bf16.msra.mxu1 %v14083_v14 }
0x18ea   :  { %11019 = vmatprep.subr.bf16.mxu0 %v14086_v7  ;;  %11044 = vmatprep.subr.bf16.mxu1 %v14498_v4 }
0x18ed   :  { %11021 = vmatpush1.bf16.msra.mxu0 %v14090_v22  ;;  %11046 = vmatpush3.bf16.msra.mxu1 %v14093_v21 }
0x18ee   :  { %11023 = vmatprep.subr.bf16.mxu0 %v14096_v19  ;;  %11047 = vmatprep.subr.bf16.mxu1 %v14498_v4 }
0x18f1   :  { %11025 = vmatpush1.bf16.msra.mxu0 %v14100_v30  ;;  %11049 = vmatpush3.bf16.msra.mxu1 %v14103_v46 }
0x18f2   :  { %11051 = vmatprep.subr.bf16.mxu0 %v14017_v15  ;;  %11082 = vmatprep.subr.bf16.mxu1 %v14498_v4 }
0x1987   :  { %v5708_v26 = vpop.f32.mrb[46].mxu1  ;;  %v5779_v51 = vpop.f32.mrb[102].mxu0 }
0x1988   :  { %v11479_v34 = vadd.f32 %v13735_v52, %v5708_v26  ;;  %v5710_v18 = vpop.f32.mrb[47].mxu1  ;;  %v9025_v39 = vpop.f32.mrb[103].mxu0  ;;  %v4156_v52 = vrot.slane %v11923_v10, %v12772_v27  ;;  %v5780_v8 = vadd.f32 %v5779_v51, %v13747_v9  ;;  %v14166_v26 = vadd.f32 %v5871_v63, %v4160_v3 }
0x1989   :  { %v11481_v24 = vadd.f32 %v13743_v42, %v5710_v18  ;;  %v14172_v10 = vrot.slane %v5857_v17, %v12729_v62  ;;  %v4383_v3 = vadd.f32 %v13737_v36, %v13709_v29 }
0x198a   :  { %v7355_v1 = vmul.f32 -1.442695, %v11479_v34  ;;  %v14163_v28 = vadd.f32 %v5867_v13, %v4156_v52 }
0x198b   :  { %v7356_v25 = vmul.f32 -1.442695, %v11481_v24 }
0x198c   :  { %11831 = vpow2.f32 %v7355_v1 }
0x198d   :  { %11833 = vpow2.f32 %v7356_v25 }
0x1996   :  { %v11832_v35 = vpop.eup %11831 }
0x1997   :  { %v5787_v5 = vadd.f32 1.0, %v11832_v35  ;;  %v11834_v60 = vpop.eup %11833 }
0x1998   :  { %v5794_v44 = vadd.f32 1.0, %v11834_v60 }
0x1999   :  { %11835 = vrcp.f32 %v5787_v5 }
0x199a   :  { %11837 = vrcp.f32 %v5794_v44 }
0x19a3   :  { %v11836_v42 = vpop.eup %11835 }
0x19a4   :  { %v5797_v23 = vmul.f32 %v11836_v42, %v5780_v8  ;;  %v11838_v0 = vpop.eup %11837 }
0x19a5   :  { %v5800_v24 = vsub.f32 1.0, %v11838_v0 }
0x19a6   :  { %v5798_v59 = vadd.f32 %v5797_v23, %v13706_v41  ;;  %v5802_v41 = vmul.f32 %v11838_v0, %v14029_v2 }
0x19a7   :  { %v5945_v57 = vpop.f32.mrb[86].mxu0  ;;  %v6016_v34 = vpop.f32.mrb[64].mxu1 }
0x19a8   :  { %11839 = vtanh.f32 %v5798_v59  ;;  %v11511_v27 = vadd.f32 %v14163_v28, %v5945_v57  ;;  %v5947_v18 = vpop.f32.mrb[87].mxu0  ;;  %v9060_v9 = vpop.f32.mrb[65].mxu1  ;;  %v6017_v8 = vadd.f32 %v6016_v34, %v14172_v10 }
0x19a9   :  { %v11513_v39 = vadd.f32 %v14166_v26, %v5947_v18 }
0x19aa   :  { %v7358_v51 = vmul.f32 -1.442695, %v11511_v27 }
0x19ab   :  { %v7359_v1 = vmul.f32 -1.442695, %v11513_v39 }
0x19ac   :  { %11841 = vpow2.f32 %v7358_v51 }
0x19ad   :  { %11843 = vpow2.f32 %v7359_v1 }
0x19b2   :  { %v11840_v25 = vpop.eup %11839 }
0x19b3   :  { %v5801_v35 = vmul.f32 %v11840_v25, %v5800_v24 }
0x19b5   :  { %v5803_v5 = vadd.f32 %v5802_v41, %v5801_v35 }
0x19b6   :  { %v11842_v60 = vpop.eup %11841 }
0x19b7   :  { %5804 = vst [vmem:[#allocation17 + $0x70] sm:$0xff] %v5803_v5  ;;  %5806 = vst [vmem:[#allocation18 + $0x10] sm:$0xff] %v5803_v5  ;;  %v6024_v44 = vadd.f32 1.0, %v11842_v60  ;;  %v11844_v52 = vpop.eup %11843 }
0x19b8   :  { %v6031_v13 = vadd.f32 1.0, %v11844_v52 }
0x19b9   :  { %11845 = vrcp.f32 %v6024_v44 }
0x19ba   :  { %11847 = vrcp.f32 %v6031_v13 }
0x19c3   :  { %v11846_v42 = vpop.eup %11845 }
0x19c4   :  { %v6034_v2 = vmul.f32 %v11846_v42, %v6017_v8  ;;  %v11848_v23 = vpop.eup %11847 }
0x19c5   :  { %v6037_v59 = vsub.f32 1.0, %v11848_v23  ;;  %v6039_v18 = vmul.f32 %v11848_v23, %v14111_v16 }
0x19c6   :  { %v6035_v63 = vadd.f32 %v6034_v2, %v4383_v3 }
0x19c8   :  { %11849 = vtanh.f32 %v6035_v63 }
0x19d2   :  { %v11850_v57 = vpop.eup %11849 }
0x19d3   :  { %v6038_v27 = vmul.f32 %v11850_v57, %v6037_v59 }
0x19d5   :  { %v14178_v62 = vadd.f32 %v6039_v18, %v6038_v27 }
0x19d7   :  { %6041 = vst [vmem:[#allocation17 + $0x78] sm:$0xff] %v14178_v62  ;;  %6110 = vmatmul.mubr.f32.vlgmr.msra.gmra.mrb[84].mxu0 %v14178_v62  ;;  %9094 = vmatmul.mubr.f32.vlgmr.msra.gmra.mrb[66].mxu1 %v14178_v62 }
0x19d8   :  { %11053 = vmatpush1.bf16.msra.mxu0 %v14025_v45  ;;  %11084 = vmatpush3.bf16.msra.mxu1 %v14027_v43 }
0x19d9   :  { %11055 = vmatprep.subr.bf16.mxu0 %v14031_v48  ;;  %11085 = vmatprep.subr.bf16.mxu1 %v14498_v4 }
0x19da   :  { %6275 = vmatprep.mubr.f32.mxu0 %v14499_v20  ;;  %9128 = vmatprep.mubr.msk.f32.mxu1 %vm12126_vm9, %v14499_v20 }
0x19dc   :  { %11057 = vmatpush1.bf16.msra.mxu0 %v14037_v47  ;;  %11087 = vmatpush3.bf16.msra.mxu1 %v14040_v33 }
0x19dd   :  { %11059 = vmatprep.subr.bf16.mxu0 %v14043_v61  ;;  %11088 = vmatprep.subr.bf16.mxu1 %v14498_v4 }
0x19e0   :  { %11061 = vmatpush1.bf16.msra.mxu0 %v14050_v49  ;;  %11090 = vmatpush3.bf16.msra.mxu1 %v14053_v40 }
0x19e1   :  { %11063 = vmatprep.subr.bf16.mxu0 %v14056_v12  ;;  %11091 = vmatprep.subr.bf16.mxu1 %v14498_v4 }
0x19e4   :  { %11065 = vmatpush1.bf16.msra.mxu0 %v14060_v54  ;;  %11093 = vmatpush3.bf16.msra.mxu1 %v14063_v53 }
0x19e5   :  { %11067 = vmatprep.subr.bf16.mxu0 %v14066_v31  ;;  %11094 = vmatprep.subr.bf16.mxu1 %v14498_v4 }
0x19e8   :  { %11069 = vmatpush1.bf16.msra.mxu0 %v14070_v6  ;;  %11096 = vmatpush3.bf16.msra.mxu1 %v14073_v38 }
0x19e9   :  { %11071 = vmatprep.subr.bf16.mxu0 %v14076_v11  ;;  %11097 = vmatprep.subr.bf16.mxu1 %v14498_v4 }
0x19ec   :  { %11073 = vmatpush1.bf16.msra.mxu0 %v14080_v50  ;;  %11099 = vmatpush3.bf16.msra.mxu1 %v14083_v14 }
0x19ed   :  { %11075 = vmatprep.subr.bf16.mxu0 %v14086_v7  ;;  %11100 = vmatprep.subr.bf16.mxu1 %v14498_v4 }
0x19f0   :  { %11077 = vmatpush1.bf16.msra.mxu0 %v14090_v22  ;;  %11102 = vmatpush3.bf16.msra.mxu1 %v14093_v21 }
0x19f1   :  { %11079 = vmatprep.subr.bf16.mxu0 %v14096_v19  ;;  %11103 = vmatprep.subr.bf16.mxu1 %v14498_v4 }
0x19f4   :  { %11081 = vmatpush1.bf16.msra.mxu0 %v14100_v30  ;;  %11105 = vmatpush3.bf16.msra.mxu1 %v14103_v46 }
0x19f5   :  { %11107 = vmatprep.subr.bf16.mxu0 %v14017_v15  ;;  %11138 = vmatprep.subr.bf16.mxu1 %v14498_v4 }
0x1aaa   :  { %v6111_v29 = vpop.f32.mrb[84].mxu0  ;;  %v6182_v36 = vpop.f32.mrb[66].mxu1 }
0x1aab   :  { %v11507_v16 = vadd.f32 %v14163_v28, %v6111_v29  ;;  %v6113_v17 = vpop.f32.mrb[85].mxu0  ;;  %v9095_v34 = vpop.f32.mrb[67].mxu1  ;;  %v6183_v35 = vadd.f32 %v6182_v36, %v14172_v10 }
0x1aac   :  { %v11509_v51 = vadd.f32 %v14166_v26, %v6113_v17 }
0x1aad   :  { %v7360_v9 = vmul.f32 -1.442695, %v11507_v16 }
0x1aae   :  { %v7361_v39 = vmul.f32 -1.442695, %v11509_v51 }
0x1aaf   :  { %11851 = vpow2.f32 %v7360_v9 }
0x1ab0   :  { %11853 = vpow2.f32 %v7361_v39 }
0x1ab9   :  { %v11852_v0 = vpop.eup %11851 }
0x1aba   :  { %v6190_v1 = vadd.f32 1.0, %v11852_v0  ;;  %v11854_v24 = vpop.eup %11853 }
0x1abb   :  { %v6197_v25 = vadd.f32 1.0, %v11854_v24 }
0x1abc   :  { %11855 = vrcp.f32 %v6190_v1 }
0x1abd   :  { %11857 = vrcp.f32 %v6197_v25 }
0x1ac6   :  { %v11856_v41 = vpop.eup %11855 }
0x1ac7   :  { %v6200_v5 = vmul.f32 %v11856_v41, %v6183_v35  ;;  %v11858_v44 = vpop.eup %11857 }
0x1ac8   :  { %v6203_v52 = vsub.f32 1.0, %v11858_v44  ;;  %v6205_v42 = vmul.f32 %v11858_v44, %v14178_v62 }
0x1ac9   :  { %v6201_v60 = vadd.f32 %v6200_v5, %v13733_v56 }
0x1acb   :  { %11859 = vtanh.f32 %v6201_v60 }
0x1ad5   :  { %v11860_v13 = vpop.eup %11859 }
0x1ad6   :  { %v6204_v8 = vmul.f32 %v11860_v13, %v6203_v52 }
0x1ad8   :  { %v14223_v3 = vadd.f32 %v6205_v42, %v6204_v8 }
0x1ada   :  { %6207 = vst [vmem:[#allocation17 + $0x68] sm:$0xff] %v14223_v3  ;;  %6276 = vmatmul.mubr.f32.vlgmr.msra.gmra.mrb[82].mxu0 %v14223_v3  ;;  %9129 = vmatmul.mubr.f32.vlgmr.msra.gmra.mrb[68].mxu1 %v14223_v3 }
0x1adb   :  { %11109 = vmatpush1.bf16.msra.mxu0 %v14025_v45  ;;  %11140 = vmatpush3.bf16.msra.mxu1 %v14027_v43 }
0x1adc   :  { %11111 = vmatprep.subr.bf16.mxu0 %v14031_v48  ;;  %11141 = vmatprep.subr.bf16.mxu1 %v14498_v4 }
0x1add   :  { %6441 = vmatprep.mubr.f32.mxu0 %v14499_v20  ;;  %9163 = vmatprep.mubr.msk.f32.mxu1 %vm12126_vm9, %v14499_v20 }
0x1adf   :  { %11113 = vmatpush1.bf16.msra.mxu0 %v14037_v47  ;;  %11143 = vmatpush3.bf16.msra.mxu1 %v14040_v33 }
0x1ae0   :  { %11115 = vmatprep.subr.bf16.mxu0 %v14043_v61  ;;  %11144 = vmatprep.subr.bf16.mxu1 %v14498_v4 }
0x1ae3   :  { %11117 = vmatpush1.bf16.msra.mxu0 %v14050_v49  ;;  %11146 = vmatpush3.bf16.msra.mxu1 %v14053_v40 }
0x1ae4   :  { %11119 = vmatprep.subr.bf16.mxu0 %v14056_v12  ;;  %11147 = vmatprep.subr.bf16.mxu1 %v14498_v4 }
0x1ae7   :  { %11121 = vmatpush1.bf16.msra.mxu0 %v14060_v54  ;;  %11149 = vmatpush3.bf16.msra.mxu1 %v14063_v53 }
0x1ae8   :  { %11123 = vmatprep.subr.bf16.mxu0 %v14066_v31  ;;  %11150 = vmatprep.subr.bf16.mxu1 %v14498_v4 }
0x1aeb   :  { %11125 = vmatpush1.bf16.msra.mxu0 %v14070_v6  ;;  %11152 = vmatpush3.bf16.msra.mxu1 %v14073_v38 }
0x1aec   :  { %11127 = vmatprep.subr.bf16.mxu0 %v14076_v11  ;;  %11153 = vmatprep.subr.bf16.mxu1 %v14498_v4 }
0x1aef   :  { %11129 = vmatpush1.bf16.msra.mxu0 %v14080_v50  ;;  %11155 = vmatpush3.bf16.msra.mxu1 %v14083_v14 }
0x1af0   :  { %11131 = vmatprep.subr.bf16.mxu0 %v14086_v7  ;;  %11156 = vmatprep.subr.bf16.mxu1 %v14498_v4 }
0x1af3   :  { %11133 = vmatpush1.bf16.msra.mxu0 %v14090_v22  ;;  %11158 = vmatpush3.bf16.msra.mxu1 %v14093_v21 }
0x1af4   :  { %11135 = vmatprep.subr.bf16.mxu0 %v14096_v19  ;;  %11159 = vmatprep.subr.bf16.mxu1 %v14498_v4 }
0x1af7   :  { %11137 = vmatpush1.bf16.msra.mxu0 %v14100_v30  ;;  %11161 = vmatpush3.bf16.msra.mxu1 %v14103_v46 }
0x1af8   :  { %11163 = vmatprep.subr.bf16.mxu0 %v14017_v15  ;;  %11194 = vmatprep.subr.bf16.mxu1 %v14498_v4 }
0x1bad   :  { %v6277_v56 = vpop.f32.mrb[82].mxu0  ;;  %v6348_v2 = vpop.f32.mrb[68].mxu1 }
0x1bae   :  { %v11503_v63 = vadd.f32 %v14163_v28, %v6277_v56  ;;  %v6279_v23 = vpop.f32.mrb[83].mxu0  ;;  %v9130_v59 = vpop.f32.mrb[69].mxu1  ;;  %v6349_v17 = vadd.f32 %v6348_v2, %v14172_v10 }
0x1baf   :  { %v11505_v27 = vadd.f32 %v14166_v26, %v6279_v23 }
0x1bb0   :  { %v7362_v57 = vmul.f32 -1.442695, %v11503_v63 }
0x1bb1   :  { %v7363_v18 = vmul.f32 -1.442695, %v11505_v27 }
0x1bb2   :  { %11861 = vpow2.f32 %v7362_v57 }
0x1bb3   :  { %11863 = vpow2.f32 %v7363_v18 }
0x1bbc   :  { %v11862_v62 = vpop.eup %11861 }
0x1bbd   :  { %v6356_v29 = vadd.f32 1.0, %v11862_v62  ;;  %v11864_v36 = vpop.eup %11863 }
0x1bbe   :  { %v6363_v16 = vadd.f32 1.0, %v11864_v36 }
0x1bbf   :  { %11865 = vrcp.f32 %v6356_v29 }
0x1bc0   :  { %11867 = vrcp.f32 %v6363_v16 }
0x1bc9   :  { %v11866_v34 = vpop.eup %11865 }
0x1bca   :  { %v6366_v9 = vmul.f32 %v11866_v34, %v6349_v17  ;;  %v11868_v39 = vpop.eup %11867 }
0x1bcb   :  { %v6369_v0 = vsub.f32 1.0, %v11868_v39  ;;  %v6371_v25 = vmul.f32 %v11868_v39, %v14223_v3 }
0x1bcc   :  { %v6367_v51 = vadd.f32 %v6366_v9, %v13727_v37 }
0x1bce   :  { %11869 = vtanh.f32 %v6367_v51 }
0x1bd8   :  { %v11870_v1 = vpop.eup %11869 }
0x1bd9   :  { %v6370_v24 = vmul.f32 %v11870_v1, %v6369_v0 }
0x1bdb   :  { %v14268_v35 = vadd.f32 %v6371_v25, %v6370_v24 }
0x1bdd   :  { %6373 = vst [vmem:[#allocation17 + $0x58] sm:$0xff] %v14268_v35  ;;  %6442 = vmatmul.mubr.f32.vlgmr.msra.gmra.mrb[80].mxu0 %v14268_v35  ;;  %9164 = vmatmul.mubr.f32.vlgmr.msra.gmra.mrb[70].mxu1 %v14268_v35 }
0x1bde   :  { %11165 = vmatpush1.bf16.msra.mxu0 %v14025_v45  ;;  %11196 = vmatpush3.bf16.msra.mxu1 %v14027_v43 }
0x1bdf   :  { %11167 = vmatprep.subr.bf16.mxu0 %v14031_v48  ;;  %11197 = vmatprep.subr.bf16.mxu1 %v14498_v4 }
0x1be0   :  { %6607 = vmatprep.mubr.f32.mxu0 %v14499_v20  ;;  %9198 = vmatprep.mubr.msk.f32.mxu1 %vm12126_vm9, %v14499_v20 }
0x1be2   :  { %11169 = vmatpush1.bf16.msra.mxu0 %v14037_v47  ;;  %11199 = vmatpush3.bf16.msra.mxu1 %v14040_v33 }
0x1be3   :  { %11171 = vmatprep.subr.bf16.mxu0 %v14043_v61  ;;  %11200 = vmatprep.subr.bf16.mxu1 %v14498_v4 }
0x1be6   :  { %11173 = vmatpush1.bf16.msra.mxu0 %v14050_v49  ;;  %11202 = vmatpush3.bf16.msra.mxu1 %v14053_v40 }
0x1be7   :  { %11175 = vmatprep.subr.bf16.mxu0 %v14056_v12  ;;  %11203 = vmatprep.subr.bf16.mxu1 %v14498_v4 }
0x1bea   :  { %11177 = vmatpush1.bf16.msra.mxu0 %v14060_v54  ;;  %11205 = vmatpush3.bf16.msra.mxu1 %v14063_v53 }
0x1beb   :  { %11179 = vmatprep.subr.bf16.mxu0 %v14066_v31  ;;  %11206 = vmatprep.subr.bf16.mxu1 %v14498_v4 }
0x1bee   :  { %11181 = vmatpush1.bf16.msra.mxu0 %v14070_v6  ;;  %11208 = vmatpush3.bf16.msra.mxu1 %v14073_v38 }
0x1bef   :  { %11183 = vmatprep.subr.bf16.mxu0 %v14076_v11  ;;  %11209 = vmatprep.subr.bf16.mxu1 %v14498_v4 }
0x1bf2   :  { %11185 = vmatpush1.bf16.msra.mxu0 %v14080_v50  ;;  %11211 = vmatpush3.bf16.msra.mxu1 %v14083_v14 }
0x1bf3   :  { %11187 = vmatprep.subr.bf16.mxu0 %v14086_v7  ;;  %11212 = vmatprep.subr.bf16.mxu1 %v14498_v4 }
0x1bf6   :  { %11189 = vmatpush1.bf16.msra.mxu0 %v14090_v22  ;;  %11214 = vmatpush3.bf16.msra.mxu1 %v14093_v21 }
0x1bf7   :  { %11191 = vmatprep.subr.bf16.mxu0 %v14096_v19  ;;  %11215 = vmatprep.subr.bf16.mxu1 %v14498_v4 }
0x1bfa   :  { %11193 = vmatpush1.bf16.msra.mxu0 %v14100_v30  ;;  %11217 = vmatpush3.bf16.msra.mxu1 %v14103_v46 }
0x1bfb   :  { %11219 = vmatprep.subr.bf16.mxu0 %v14017_v15  ;;  %11250 = vmatprep.subr.bf16.mxu1 %v14498_v4 }
0x1cb0   :  { %v6443_v37 = vpop.f32.mrb[80].mxu0  ;;  %v6514_v41 = vpop.f32.mrb[70].mxu1 }
0x1cb1   :  { %v11499_v5 = vadd.f32 %v14163_v28, %v6443_v37  ;;  %v6445_v60 = vpop.f32.mrb[81].mxu0  ;;  %v9165_v44 = vpop.f32.mrb[71].mxu1  ;;  %v6515_v63 = vadd.f32 %v6514_v41, %v14172_v10 }
0x1cb2   :  { %v11501_v13 = vadd.f32 %v14166_v26, %v6445_v60 }
0x1cb3   :  { %v7364_v52 = vmul.f32 -1.442695, %v11499_v5 }
0x1cb4   :  { %v7365_v8 = vmul.f32 -1.442695, %v11501_v13 }
0x1cb5   :  { %11871 = vpow2.f32 %v7364_v52 }
0x1cb6   :  { %11873 = vpow2.f32 %v7365_v8 }
0x1cbf   :  { %v11872_v42 = vpop.eup %11871 }
0x1cc0   :  { %v6522_v3 = vadd.f32 1.0, %v11872_v42  ;;  %v11874_v56 = vpop.eup %11873 }
0x1cc1   :  { %v6529_v2 = vadd.f32 1.0, %v11874_v56 }
0x1cc2   :  { %11875 = vrcp.f32 %v6522_v3 }
0x1cc3   :  { %11877 = vrcp.f32 %v6529_v2 }
0x1ccc   :  { %v11876_v23 = vpop.eup %11875 }
0x1ccd   :  { %v6532_v59 = vmul.f32 %v11876_v23, %v6515_v63  ;;  %v11878_v27 = vpop.eup %11877 }
0x1cce   :  { %v6535_v18 = vsub.f32 1.0, %v11878_v27  ;;  %v6537_v36 = vmul.f32 %v11878_v27, %v14268_v35 }
0x1ccf   :  { %v6533_v57 = vadd.f32 %v6532_v59, %v13724_v58 }
0x1cd1   :  { %11879 = vtanh.f32 %v6533_v57 }
0x1cdb   :  { %v11880_v62 = vpop.eup %11879 }
0x1cdc   :  { %v6536_v29 = vmul.f32 %v11880_v62, %v6535_v18 }
0x1cde   :  { %v14313_v16 = vadd.f32 %v6537_v36, %v6536_v29 }
0x1ce0   :  { %6539 = vst [vmem:[#allocation17 + $0x48] sm:$0xff] %v14313_v16  ;;  %6608 = vmatmul.mubr.f32.vlgmr.msra.gmra.mrb[78].mxu0 %v14313_v16  ;;  %9199 = vmatmul.mubr.f32.vlgmr.msra.gmra.mrb[72].mxu1 %v14313_v16 }
0x1ce1   :  { %11221 = vmatpush1.bf16.msra.mxu0 %v14025_v45  ;;  %11252 = vmatpush3.bf16.msra.mxu1 %v14027_v43 }
0x1ce2   :  { %11223 = vmatprep.subr.bf16.mxu0 %v14031_v48  ;;  %11253 = vmatprep.subr.bf16.mxu1 %v14498_v4 }
0x1ce3   :  { %6773 = vmatprep.mubr.f32.mxu0 %v14499_v20  ;;  %9233 = vmatprep.mubr.msk.f32.mxu1 %vm12126_vm9, %v14499_v20 }
0x1ce5   :  { %11225 = vmatpush1.bf16.msra.mxu0 %v14037_v47  ;;  %11255 = vmatpush3.bf16.msra.mxu1 %v14040_v33 }
0x1ce6   :  { %11227 = vmatprep.subr.bf16.mxu0 %v14043_v61  ;;  %11256 = vmatprep.subr.bf16.mxu1 %v14498_v4 }
0x1ce9   :  { %11229 = vmatpush1.bf16.msra.mxu0 %v14050_v49  ;;  %11258 = vmatpush3.bf16.msra.mxu1 %v14053_v40 }
0x1cea   :  { %11231 = vmatprep.subr.bf16.mxu0 %v14056_v12  ;;  %11259 = vmatprep.subr.bf16.mxu1 %v14498_v4 }
0x1ced   :  { %11233 = vmatpush1.bf16.msra.mxu0 %v14060_v54  ;;  %11261 = vmatpush3.bf16.msra.mxu1 %v14063_v53 }
0x1cee   :  { %11235 = vmatprep.subr.bf16.mxu0 %v14066_v31  ;;  %11262 = vmatprep.subr.bf16.mxu1 %v14498_v4 }
0x1cf1   :  { %11237 = vmatpush1.bf16.msra.mxu0 %v14070_v6  ;;  %11264 = vmatpush3.bf16.msra.mxu1 %v14073_v38 }
0x1cf2   :  { %11239 = vmatprep.subr.bf16.mxu0 %v14076_v11  ;;  %11265 = vmatprep.subr.bf16.mxu1 %v14498_v4 }
0x1cf5   :  { %11241 = vmatpush1.bf16.msra.mxu0 %v14080_v50  ;;  %11267 = vmatpush3.bf16.msra.mxu1 %v14083_v14 }
0x1cf6   :  { %11243 = vmatprep.subr.bf16.mxu0 %v14086_v7  ;;  %11268 = vmatprep.subr.bf16.mxu1 %v14498_v4 }
0x1cf9   :  { %11245 = vmatpush1.bf16.msra.mxu0 %v14090_v22  ;;  %11270 = vmatpush3.bf16.msra.mxu1 %v14093_v21 }
0x1cfa   :  { %11247 = vmatprep.subr.bf16.mxu0 %v14096_v19  ;;  %11271 = vmatprep.subr.bf16.mxu1 %v14498_v4 }
0x1cfd   :  { %11249 = vmatpush1.bf16.msra.mxu0 %v14100_v30  ;;  %11273 = vmatpush3.bf16.msra.mxu1 %v14103_v46 }
0x1cfe   :  { %11275 = vmatprep.subr.bf16.mxu0 %v14017_v15  ;;  %11306 = vmatprep.subr.bf16.mxu1 %v14498_v4 }
0x1db3   :  { %v6609_v58 = vpop.f32.mrb[78].mxu0  ;;  %v6680_v17 = vpop.f32.mrb[72].mxu1 }
0x1db4   :  { %v11495_v34 = vadd.f32 %v14163_v28, %v6609_v58  ;;  %v6611_v9 = vpop.f32.mrb[79].mxu0  ;;  %v9200_v51 = vpop.f32.mrb[73].mxu1  ;;  %v6681_v41 = vadd.f32 %v6680_v17, %v14172_v10 }
0x1db5   :  { %v11497_v0 = vadd.f32 %v14166_v26, %v6611_v9 }
0x1db6   :  { %v7366_v39 = vmul.f32 -1.442695, %v11495_v34 }
0x1db7   :  { %v7367_v1 = vmul.f32 -1.442695, %v11497_v0 }
0x1db8   :  { %11881 = vpow2.f32 %v7366_v39 }
0x1db9   :  { %11883 = vpow2.f32 %v7367_v1 }
0x1dc2   :  { %v11882_v24 = vpop.eup %11881 }
0x1dc3   :  { %v6688_v25 = vadd.f32 1.0, %v11882_v24  ;;  %v11884_v35 = vpop.eup %11883 }
0x1dc4   :  { %v6695_v37 = vadd.f32 1.0, %v11884_v35 }
0x1dc5   :  { %11885 = vrcp.f32 %v6688_v25 }
0x1dc6   :  { %11887 = vrcp.f32 %v6695_v37 }
0x1dcf   :  { %v11886_v5 = vpop.eup %11885 }
0x1dd0   :  { %v6698_v60 = vmul.f32 %v11886_v5, %v6681_v41  ;;  %v11888_v52 = vpop.eup %11887 }
0x1dd1   :  { %v6701_v13 = vsub.f32 1.0, %v11888_v52  ;;  %v6703_v3 = vmul.f32 %v11888_v52, %v14313_v16 }
0x1dd2   :  { %v6699_v44 = vadd.f32 %v6698_v60, %v13721_v55 }
0x1dd4   :  { %11889 = vtanh.f32 %v6699_v44 }
0x1dde   :  { %v11890_v8 = vpop.eup %11889 }
0x1ddf   :  { %v6702_v42 = vmul.f32 %v11890_v8, %v6701_v13 }
0x1de1   :  { %v14358_v56 = vadd.f32 %v6703_v3, %v6702_v42 }
0x1de3   :  { %6705 = vst [vmem:[#allocation17 + $0x38] sm:$0xff] %v14358_v56  ;;  %6774 = vmatmul.mubr.f32.vlgmr.msra.gmra.mrb[76].mxu0 %v14358_v56  ;;  %9234 = vmatmul.mubr.f32.vlgmr.msra.gmra.mrb[74].mxu1 %v14358_v56 }
0x1de4   :  { %11277 = vmatpush1.bf16.msra.mxu0 %v14025_v45  ;;  %11308 = vmatpush3.bf16.msra.mxu1 %v14027_v43 }
0x1de5   :  { %11279 = vmatprep.subr.bf16.mxu0 %v14031_v48  ;;  %11309 = vmatprep.subr.bf16.mxu1 %v14498_v4 }
0x1de6   :  { %6939 = vmatprep.mubr.f32.mxu0 %v14499_v20  ;;  %9268 = vmatprep.mubr.msk.f32.mxu1 %vm12126_vm9, %v14499_v20 }
0x1de8   :  { %11281 = vmatpush1.bf16.msra.mxu0 %v14037_v47  ;;  %11311 = vmatpush3.bf16.msra.mxu1 %v14040_v33 }
0x1de9   :  { %11283 = vmatprep.subr.bf16.mxu0 %v14043_v61  ;;  %11312 = vmatprep.subr.bf16.mxu1 %v14498_v4 }
0x1dec   :  { %11285 = vmatpush1.bf16.msra.mxu0 %v14050_v49  ;;  %11314 = vmatpush3.bf16.msra.mxu1 %v14053_v40 }
0x1ded   :  { %11287 = vmatprep.subr.bf16.mxu0 %v14056_v12  ;;  %11315 = vmatprep.subr.bf16.mxu1 %v14498_v4 }
0x1df0   :  { %11289 = vmatpush1.bf16.msra.mxu0 %v14060_v54  ;;  %11317 = vmatpush3.bf16.msra.mxu1 %v14063_v53 }
0x1df1   :  { %11291 = vmatprep.subr.bf16.mxu0 %v14066_v31  ;;  %11318 = vmatprep.subr.bf16.mxu1 %v14498_v4 }
0x1df4   :  { %11293 = vmatpush1.bf16.msra.mxu0 %v14070_v6  ;;  %11320 = vmatpush3.bf16.msra.mxu1 %v14073_v38 }
0x1df5   :  { %11295 = vmatprep.subr.bf16.mxu0 %v14076_v11  ;;  %11321 = vmatprep.subr.bf16.mxu1 %v14498_v4 }
0x1df8   :  { %11297 = vmatpush1.bf16.msra.mxu0 %v14080_v50  ;;  %11323 = vmatpush3.bf16.msra.mxu1 %v14083_v14 }
0x1df9   :  { %11299 = vmatprep.subr.bf16.mxu0 %v14086_v7  ;;  %11324 = vmatprep.subr.bf16.mxu1 %v14498_v4 }
0x1dfc   :  { %11301 = vmatpush1.bf16.msra.mxu0 %v14090_v22  ;;  %11326 = vmatpush3.bf16.msra.mxu1 %v14093_v21 }
0x1dfd   :  { %11303 = vmatprep.subr.bf16.mxu0 %v14096_v19  ;;  %11327 = vmatprep.subr.bf16.mxu1 %v14498_v4 }
0x1e00   :  { %11305 = vmatpush1.bf16.msra.mxu0 %v14100_v30  ;;  %11329 = vmatpush3.bf16.msra.mxu1 %v14103_v46 }
0x1e01   :  { %11331 = vmatprep.subr.bf16.mxu0 %v14017_v15  ;;  %11362 = vmatprep.subr.bf16.mxu1 %v14498_v4 }
0x1eb6   :  { %v6775_v55 = vpop.f32.mrb[76].mxu0  ;;  %v6846_v2 = vpop.f32.mrb[74].mxu1 }
0x1eb7   :  { %v11491_v63 = vadd.f32 %v14163_v28, %v6775_v55  ;;  %v6777_v23 = vpop.f32.mrb[77].mxu0  ;;  %v9235_v59 = vpop.f32.mrb[75].mxu1  ;;  %v6847_v15 = vadd.f32 %v6846_v2, %v14172_v10 }
0x1eb8   :  { %v11493_v27 = vadd.f32 %v14166_v26, %v6777_v23 }
0x1eb9   :  { %v7368_v57 = vmul.f32 -1.442695, %v11491_v63 }
0x1eba   :  { %v7369_v18 = vmul.f32 -1.442695, %v11493_v27 }
0x1ebb   :  { %11891 = vpow2.f32 %v7368_v57 }
0x1ebc   :  { %11893 = vpow2.f32 %v7369_v18 }
0x1ec5   :  { %v11892_v62 = vpop.eup %11891 }
0x1ec6   :  { %v6854_v29 = vadd.f32 1.0, %v11892_v62  ;;  %v11894_v36 = vpop.eup %11893 }
0x1ec7   :  { %v6861_v16 = vadd.f32 1.0, %v11894_v36 }
0x1ec8   :  { %11895 = vrcp.f32 %v6854_v29 }
0x1ec9   :  { %11897 = vrcp.f32 %v6861_v16 }
0x1ed2   :  { %v11896_v58 = vpop.eup %11895 }
0x1ed3   :  { %v6864_v17 = vmul.f32 %v11896_v58, %v6847_v15  ;;  %v11898_v9 = vpop.eup %11897 }
0x1ed4   :  { %v6867_v51 = vsub.f32 1.0, %v11898_v9  ;;  %v6869_v1 = vmul.f32 %v11898_v9, %v14358_v56  ;;  %v14507_v56 = vld [vmem:[#allocation26_spill] sm:$0xff] }
0x1ed5   :  { %v6865_v34 = vadd.f32 %v6864_v17, %v13718_v32 }
0x1ed7   :  { %11899 = vtanh.f32 %v6865_v34 }
0x1ee1   :  { %v11900_v39 = vpop.eup %11899 }
0x1ee2   :  { %v6868_v0 = vmul.f32 %v11900_v39, %v6867_v51 }
0x1ee4   :  { %v6870_v24 = vadd.f32 %v6869_v1, %v6868_v0 }
0x1ee6   :  { %6871 = vst [vmem:[#allocation17 + $0x28] sm:$0xff] %v6870_v24  ;;  %6940 = vmatmul.mubr.f32.vlgmr.msra.gmra.mrb[74].mxu0 %v6870_v24  ;;  %9269 = vmatmul.mubr.f32.vlgmr.msra.gmra.mrb[76].mxu1 %v6870_v24 }
0x1ee7   :  { %11333 = vmatpush1.bf16.msra.mxu0 %v14025_v45  ;;  %11364 = vmatpush3.bf16.msra.mxu1 %v14027_v43 }
0x1ee8   :  { %11335 = vmatprep.subr.bf16.mxu0 %v14031_v48  ;;  %11365 = vmatprep.subr.bf16.mxu1 %v14498_v4 }
0x1ee9   :  { %7105 = vmatprep.mubr.f32.mxu0 %v14499_v20  ;;  %9303 = vmatprep.mubr.msk.f32.mxu1 %vm12126_vm9, %v14499_v20 }
0x1eeb   :  { %11337 = vmatpush1.bf16.msra.mxu0 %v14037_v47  ;;  %11367 = vmatpush3.bf16.msra.mxu1 %v14040_v33 }
0x1eec   :  { %11339 = vmatprep.subr.bf16.mxu0 %v14043_v61  ;;  %11368 = vmatprep.subr.bf16.mxu1 %v14498_v4 }
0x1eef   :  { %11341 = vmatpush1.bf16.msra.mxu0 %v14050_v49  ;;  %11370 = vmatpush3.bf16.msra.mxu1 %v14053_v40 }
0x1ef0   :  { %11343 = vmatprep.subr.bf16.mxu0 %v14056_v12  ;;  %11371 = vmatprep.subr.bf16.mxu1 %v14498_v4 }
0x1ef3   :  { %11345 = vmatpush1.bf16.msra.mxu0 %v14060_v54  ;;  %11373 = vmatpush3.bf16.msra.mxu1 %v14063_v53 }
0x1ef4   :  { %11347 = vmatprep.subr.bf16.mxu0 %v14066_v31  ;;  %11374 = vmatprep.subr.bf16.mxu1 %v14498_v4 }
0x1ef7   :  { %11349 = vmatpush1.bf16.msra.mxu0 %v14070_v6  ;;  %11376 = vmatpush3.bf16.msra.mxu1 %v14073_v38  ;;  %v14506_v6 = vld [vmem:[#allocation28_spill] sm:$0xff] }
0x1ef8   :  { %11351 = vmatprep.subr.bf16.mxu0 %v14076_v11  ;;  %11377 = vmatprep.subr.bf16.mxu1 %v14498_v4 }
0x1efb   :  { %11353 = vmatpush1.bf16.msra.mxu0 %v14080_v50  ;;  %11379 = vmatpush3.bf16.msra.mxu1 %v14083_v14 }
0x1efc   :  { %11355 = vmatprep.subr.bf16.mxu0 %v14086_v7  ;;  %11380 = vmatprep.subr.bf16.mxu1 %v14498_v4 }
0x1eff   :  { %11357 = vmatpush1.bf16.msra.mxu0 %v14090_v22  ;;  %11382 = vmatpush3.bf16.msra.mxu1 %v14093_v21 }
0x1f00   :  { %11359 = vmatprep.subr.bf16.mxu0 %v14096_v19  ;;  %11383 = vmatprep.subr.bf16.mxu1 %v14498_v4 }
0x1f03   :  { %11361 = vmatpush1.bf16.msra.mxu0 %v14100_v30  ;;  %11385 = vmatpush3.bf16.msra.mxu1 %v14103_v46 }
0x1fb9   :  { %v6941_v20 = vpop.f32.mrb[74].mxu0  ;;  %v7012_v32 = vpop.f32.mrb[76].mxu1 }
0x1fba   :  { %v11487_v45 = vadd.f32 %v14163_v28, %v6941_v20  ;;  %v6943_v43 = vpop.f32.mrb[75].mxu0  ;;  %v9270_v48 = vpop.f32.mrb[77].mxu1  ;;  %v7013_v54 = vadd.f32 %v7012_v32, %v14172_v10 }
0x1fbb   :  { %v11489_v33 = vadd.f32 %v14166_v26, %v6943_v43 }
0x1fbc   :  { %v7370_v47 = vmul.f32 -1.442695, %v11487_v45 }
0x1fbd   :  { %v7371_v61 = vmul.f32 -1.442695, %v11489_v33 }
0x1fbe   :  { %11901 = vpow2.f32 %v7370_v47 }
0x1fbf   :  { %11903 = vpow2.f32 %v7371_v61 }
0x1fc8   :  { %v11902_v49 = vpop.eup %11901 }
0x1fc9   :  { %v7020_v40 = vadd.f32 1.0, %v11902_v49  ;;  %v11904_v4 = vpop.eup %11903 }
0x1fca   :  { %v7027_v12 = vadd.f32 1.0, %v11904_v4 }
0x1fcb   :  { %11905 = vrcp.f32 %v7020_v40 }
0x1fcc   :  { %11907 = vrcp.f32 %v7027_v12 }
0x1fd5   :  { %v11906_v53 = vpop.eup %11905 }
0x1fd6   :  { %v7030_v31 = vmul.f32 %v11906_v53, %v7013_v54  ;;  %v11908_v11 = vpop.eup %11907 }
0x1fd7   :  { %v7033_v50 = vsub.f32 1.0, %v11908_v11  ;;  %v7035_v22 = vmul.f32 %v11908_v11, %v6870_v24 }
0x1fd8   :  { %v7031_v38 = vadd.f32 %v7030_v31, %v14506_v6 }
0x1fda   :  { %11909 = vtanh.f32 %v7031_v38 }
0x1fe4   :  { %v11910_v14 = vpop.eup %11909 }
0x1fe5   :  { %v7034_v7 = vmul.f32 %v11910_v14, %v7033_v50 }
0x1fe7   :  { %v7036_v21 = vadd.f32 %v7035_v22, %v7034_v7 }
0x1fe9   :  { %7037 = vst [vmem:[#allocation17 + $0x18] sm:$0xff] %v7036_v21  ;;  %7106 = vmatmul.mubr.f32.vlgmr.msra.gmra.mrb[72].mxu0 %v7036_v21  ;;  %9304 = vmatmul.mubr.f32.vlgmr.msra.gmra.mrb[78].mxu1 %v7036_v21 }
0x20bc   :  { %v7107_v19 = vpop.f32.mrb[72].mxu0  ;;  %v7178_v30 = vpop.f32.mrb[78].mxu1 }
0x20bd   :  { %v11483_v46 = vadd.f32 %v14163_v28, %v7107_v19  ;;  %v7109_v25 = vpop.f32.mrb[73].mxu0  ;;  %v9305_v35 = vpop.f32.mrb[79].mxu1  ;;  %v7179_v8 = vadd.f32 %v7178_v30, %v14172_v10 }
0x20be   :  { %v11485_v41 = vadd.f32 %v14166_v26, %v7109_v25 }
0x20bf   :  { %v7372_v37 = vmul.f32 -1.442695, %v11483_v46 }
0x20c0   :  { %v7373_v5 = vmul.f32 -1.442695, %v11485_v41 }
0x20c1   :  { %11911 = vpow2.f32 %v7372_v37 }
0x20c2   :  { %11913 = vpow2.f32 %v7373_v5 }
0x20cb   :  { %v11912_v60 = vpop.eup %11911 }
0x20cc   :  { %v7186_v44 = vadd.f32 1.0, %v11912_v60  ;;  %v11914_v52 = vpop.eup %11913 }
0x20cd   :  { %v7193_v13 = vadd.f32 1.0, %v11914_v52 }
0x20ce   :  { %11915 = vrcp.f32 %v7186_v44 }
0x20cf   :  { %11917 = vrcp.f32 %v7193_v13 }
0x20d8   :  { %v11916_v42 = vpop.eup %11915 }
0x20d9   :  { %v7196_v3 = vmul.f32 %v11916_v42, %v7179_v8  ;;  %v11918_v55 = vpop.eup %11917 }
0x20da   :  { %v7199_v2 = vsub.f32 1.0, %v11918_v55  ;;  %v7201_v23 = vmul.f32 %v11918_v55, %v7036_v21 }
0x20db   :  { %v7197_v28 = vadd.f32 %v7196_v3, %v14507_v56 }
0x20dd   :  { %11919 = vtanh.f32 %v7197_v28 }
0x20e7   :  { %v11920_v26 = vpop.eup %11919 }
0x20e8   :  { %v7200_v63 = vmul.f32 %v11920_v26, %v7199_v2 }
0x20ea   :  { %v7202_v59 = vadd.f32 %v7201_v23, %v7200_v63 }
0x20ec   :  { %7203 = vst [vmem:[#allocation17 + $0x8] sm:$0xff] %v7202_v59  ;;  %7205 = vst [vmem:[#allocation18 + $0x18] sm:$0xff] %v7202_v59 }
0x20ed   :  { %12067 = shalt.err (!%p12064_p10)
}
0x20ee   :  { %s12068_s17 = scalar_lea.hbm %s14486_s11, 2048 }
0x20ef   :  { %p12069_p11 = scmp.ne.s32.totalorder %s14486_s11, %s12068_s17  ;;  %p12072_p12 = scmp.lt.u32.totalorder %s12068_s17, %s14486_s11 }
0x20f1   :  { %p12074_p13 = pnand %p12072_p12, %p12069_p11 }
0x20f3   :  { %12077 = shalt.err (!%p12074_p13)
}
0x20f4   :  { %s12129_s0 = smov 256   ;;  %s12130_s23 = smov 16  }
0x20f5   :  { %7217 = dma.vmem_to_hbm [thread:$0]  %s7212_s9, 2048, %s14486_s11, [#allocation8], %s12129_s0, %s12129_s0, %s12130_s23  }
0x20f6   :  { %s12078_s3 = scalar_lea.vmem %s14444_s14, 512  ;;  %p12083_p1 = scmp.lt.s32.totalorder %s14444_s14, %s14444_s14 }
0x20f7   :  { %p12079_p0 = scmp.ne.s32.totalorder %s14444_s14, %s12078_s3  ;;  %p12084_p2 = scmp.lt.s32.totalorder %s12078_s3, %s12078_s3 }
0x20f9   :  { %p12085_p3 = por %p12084_p2, %p12083_p1 }
0x20fb   :  { %p12086_p4 = pnand %p12085_p3, %p12079_p0 }
0x20fd   :  { %12089 = shalt.err (!%p12086_p4)
}
0x20fe   :  { %s12090_s26 = scalar_lea.hbm %s14487_s12, 512 }
0x20ff   :  { %p12091_p5 = scmp.ne.s32.totalorder %s14487_s12, %s12090_s26  ;;  %p12094_p6 = scmp.lt.u32.totalorder %s12090_s26, %s14487_s12 }
0x2101   :  { %p12096_p7 = pnand %p12094_p6, %p12091_p5 }
0x2103   :  { %12099 = shalt.err (!%p12096_p7)
}
0x2104   :  { %s12131_s11 = smov 128   ;;  %s12132_s29 = smov 8  }
0x2105   :  { %7229 = dma.vmem_to_hbm [thread:$0]  %s14444_s14, 512, %s14487_s12, [#allocation19], %s12131_s11, %s12131_s11, %s12132_s29  }
0x2106   :  { %12108 = dma.done.wait [#allocation8], 2048  }
0x2107   :  { %12109 = vsyncadd [#allocation8], 4294965248 }
0x2108   :  { %12110 = dma.done.wait [#allocation19], 512  }
0x2109   :  { %12111 = vsyncadd [#allocation19], 4294966784 }
0x210a   :  { %7236 = vsyncpa [#allocation7], 1 }
0x210b   :  { %7237 = vsyncpa [#allocation10], 1 }
0x210c   :  { %7238 = vsyncpa [#allocation13], 1 }
0x210d   :  { %7239 = vsyncpa [#allocation16], 1 }
0x210e   :  { %7240 = vsyncpa [#allocation8], 1 }
0x210f   :  { %7241 = vsyncpa [#allocation19], 1 }

</bundles_post_ra>
